<compile_context>
chip_gen: v7x
topology: tpu7x:2x2x1
jax: 0.10.0
libtpu: 0.0.40
codegen_flags: <defaults>
</compile_context>

<pallas_src>
import functools

import jax
import jax.numpy as jnp
from jax.experimental import pallas as pl
from jax.experimental.pallas import tpu as pltpu

IMAGE_SIZE = 32  # small demo size (PyTorch config.IMAGE_SIZE)


# ----------------------------------------------------------------------------
# Kernel 1: one discriminator block for ONE image (one grid step = one image):
#   y = patches @ W + b ; [InstanceNorm over the P spatial rows] ; [LeakyReLU]
# ----------------------------------------------------------------------------
def _conv_block_kernel(x_ref, w_ref, b_ref, o_ref, *, normalize, leaky,
                       eps=1e-5, slope=0.2):
    x = x_ref[...]                                           # [P, KKC]  bf16
    y = jnp.dot(x, w_ref[...], preferred_element_type=jnp.float32)
    y = y + b_ref[...]                                       # [P, Cout] f32

    if normalize:
        # InstanceNorm2d(affine=False): per-image per-channel stats over the
        # P spatial rows of this block (biased variance, eps=1e-5).
        mean = jnp.mean(y, axis=0, keepdims=True)
        d = y - mean
        var = jnp.mean(d * d, axis=0, keepdims=True)
        y = d * jax.lax.rsqrt(var + eps)

    if leaky:
        y = jnp.where(y > 0, y, slope * y)

    o_ref[...] = y.astype(o_ref.dtype)


def conv_block(patches, w_mat, bias, *, normalize, leaky, out_dtype):
    """patches: [N, P, KKC] bf16 ; w_mat: [KKC, Cout] bf16 ; bias: [1, Cout] f32
    -> [N, P, Cout] out_dtype.  grid=(N,), one image per grid step."""
    N, P, KKC = patches.shape
    Cout = w_mat.shape[1]
    kernel = functools.partial(_conv_block_kernel, normalize=normalize,
                               leaky=leaky)
    return pl.pallas_call(
        kernel,
        out_shape=jax.ShapeDtypeStruct((N, P, Cout), out_dtype),
        grid_spec=pltpu.PrefetchScalarGridSpec(
            num_scalar_prefetch=0,
            grid=(N,),
            in_specs=[
                pl.BlockSpec((None, P, KKC), lambda n: (n, 0, 0)),
                pl.BlockSpec((KKC, Cout), lambda n: (0, 0)),   # weight: resident
                pl.BlockSpec((1, Cout), lambda n: (0, 0)),     # bias: resident
            ],
            out_specs=pl.BlockSpec((None, P, Cout), lambda n: (n, 0, 0)),
        ),
        compiler_params=pltpu.CompilerParams(
            # Image axis is independent -> shard across v7x's two TensorCores.
            dimension_semantics=("parallel",),
            # Working set per step is < 6 MiB; 32 MiB is safe on every
            # generation (v7x physical VMEM is 64 MiB).
            vmem_limit_bytes=32 * 1024 * 1024,
        ),
    )(patches, w_mat, bias)


# ----------------------------------------------------------------------------
# Kernel 2: fused tail = conv3 (+IN+LeakyReLU) + ZeroPad2d((1,0,1,0)) + conv_out
# for ONE image.  conv3's patches are [4, 4096]; its 2x2x512 output feeds the
# final conv directly in-register.  Because every final output position sees
# the FULL 2x2 window, conv_out is exactly:
#     out[q] = b + sum_p act[p, :] @ wo[p, :, q]
# with wo re-indexed once at init (q = final spatial position, padded 1->128).
# ----------------------------------------------------------------------------
def _tail_kernel(x_ref, w3_ref, b3_ref, wo_ref, bo_ref, o_ref, *,
                 eps=1e-5, slope=0.2):
    x = x_ref[...]                                           # [4, 4096] bf16
    y = jnp.dot(x, w3_ref[...], preferred_element_type=jnp.float32)
    y = y + b3_ref[...]                                      # [4, 512] f32
    mean = jnp.mean(y, axis=0, keepdims=True)
    d = y - mean
    var = jnp.mean(d * d, axis=0, keepdims=True)
    y = d * jax.lax.rsqrt(var + eps)
    y = jnp.where(y > 0, y, slope * y)                       # IN + LeakyReLU
    yb = y.astype(jnp.bfloat16)

    acc = bo_ref[...]                                        # [1, 128] f32
    for p in range(4):                                       # static unroll
        acc = acc + jnp.dot(yb[p:p + 1, :], wo_ref[p],
                            preferred_element_type=jnp.float32)
    o_ref[...] = acc                                         # [1, 128] f32


def tail_block(patches, w3, b3, wo, bo):
    """patches: [N, 4, 4096] bf16 -> [N, 1, 128] f32 (lanes 0..3 are the 2x2 map)."""
    N, P, KKC = patches.shape
    return pl.pallas_call(
        _tail_kernel,
        out_shape=jax.ShapeDtypeStruct((N, 1, 128), jnp.float32),
        grid_spec=pltpu.PrefetchScalarGridSpec(
            num_scalar_prefetch=0,
            grid=(N,),
            in_specs=[
                pl.BlockSpec((None, P, KKC), lambda n: (n, 0, 0)),
                pl.BlockSpec(w3.shape, lambda n: (0, 0)),      # [4096, 512]
                pl.BlockSpec(b3.shape, lambda n: (0, 0)),      # [1, 512]
                pl.BlockSpec(wo.shape, lambda n: (0, 0, 0)),   # [4, 512, 128]
                pl.BlockSpec(bo.shape, lambda n: (0, 0)),      # [1, 128]
            ],
            out_specs=pl.BlockSpec((None, 1, 128), lambda n: (n, 0, 0)),
        ),
        compiler_params=pltpu.CompilerParams(
            dimension_semantics=("parallel",),
            vmem_limit_bytes=32 * 1024 * 1024,
        ),
    )(patches, w3, b3, wo, bo)


# ----------------------------------------------------------------------------
# JAX glue: im2col patch extraction in NHWC (pure slices/reshapes, fused by XLA)
# ----------------------------------------------------------------------------
def im2col_nhwc(x, k, stride, pad):
    """x: [N,H,W,C], pad = (top, bottom, left, right).
    Returns ([N, OH*OW, k*k*C], OH, OW); column order is (kh, kw, c)."""
    N, H, W, C = x.shape
    xp = jnp.pad(x, ((0, 0), (pad[0], pad[1]), (pad[2], pad[3]), (0, 0)))
    OH = (H + pad[0] + pad[1] - k) // stride + 1
    OW = (W + pad[2] + pad[3] - k) // stride + 1
    cols = []
    for kh in range(k):
        for kw in range(k):
            cols.append(xp[:, kh:kh + stride * OH:stride,
                            kw:kw + stride * OW:stride, :])
    p = jnp.stack(cols, axis=3)                              # [N, OH, OW, k*k, C]
    return p.reshape(N, OH * OW, k * k * C), OH, OW


# ----------------------------------------------------------------------------
# Parameter init (mimics weights_init_normal: W ~ N(0, 0.02), bias = 0).
# Weights are pre-flattened/transposed ONCE to match the im2col (kh, kw, c)
# column order and stored in bf16 for the MXU.
# ----------------------------------------------------------------------------
def _flatten_conv_w(w):
    # (Cout, Cin, kh, kw) -> (kh, kw, Cin, Cout) -> (k*k*Cin, Cout)
    cout, cin, kh, kw = w.shape
    return w.transpose(2, 3, 1, 0).reshape(kh * kw * cin, cout)


def init_params(key):
    params = {}
    for name, cin, cout in (("conv0", 3, 64), ("conv1", 64, 128),
                            ("conv2", 128, 256), ("conv3", 256, 512)):
        key, wk = jax.random.split(key)
        w = 0.02 * jax.random.normal(wk, (cout, cin, 4, 4), dtype=jnp.float32)
        b = jnp.zeros((cout,), dtype=jnp.float32)
        w_flat = _flatten_conv_w(w)
        b_flat = b.reshape(1, cout)
        if name == "conv0":
            # Lane-dense output: pad Cout 64 -> 128 with zero channels; the
            # pad is sliced off in glue so conv1's K is NOT doubled.
            w_flat = jnp.pad(w_flat, ((0, 0), (0, 64)))
            b_flat = jnp.pad(b_flat, ((0, 0), (0, 64)))
        params[name] = (w_flat.astype(jnp.bfloat16), b_flat.astype(jnp.float32))

    # Final conv: ZeroPad2d((1,0,1,0)) + Conv2d(512,1,4,padding=1) on a 2x2x512
    # map.  Output (oi,oj) uses input (r,c) at kernel offset (r+2-oi, c+2-oj),
    # and every output sees the full 2x2 window, so re-index the weight once
    # into wo[p=(r*2+c), cin, q=(oi*2+oj)] and pad q 1*4 -> 128 lanes.
    key, wk = jax.random.split(key)
    w_out = 0.02 * jax.random.normal(wk, (1, 512, 4, 4), dtype=jnp.float32)
    b_out = jnp.zeros((1,), dtype=jnp.float32)
    wo = jnp.zeros((4, 512, 4), dtype=jnp.float32)
    for r in range(2):
        for c in range(2):
            for oi in range(2):
                for oj in range(2):
                    wo = wo.at[r * 2 + c, :, oi * 2 + oj].set(
                        w_out[0, :, r + 2 - oi, c + 2 - oj])
    wo = jnp.pad(wo, ((0, 0), (0, 0), (0, 124)))
    bo = jnp.pad(jnp.broadcast_to(b_out.reshape(1, 1), (1, 4)),
                 ((0, 0), (0, 124)))
    params["conv_out"] = (wo.astype(jnp.bfloat16), bo.astype(jnp.float32))
    return params


# ----------------------------------------------------------------------------
# Forward pass (matches the nn.Sequential in the PyTorch module)
# ----------------------------------------------------------------------------
def discriminator_forward(img_nchw, params):
    N = img_nchw.shape[0]
    # Single NCHW -> NHWC layout change at the module boundary; everything
    # stays channel-last (lane-dense) from here on.
    x = img_nchw.transpose(0, 2, 3, 1).astype(jnp.bfloat16)

    # conv0 (no InstanceNorm); output channels padded to 128, real ones [:64].
    w, b = params["conv0"]
    patches, OH, OW = im2col_nhwc(x, k=4, stride=2, pad=(1, 1, 1, 1))
    y = conv_block(patches, w, b, normalize=False, leaky=True,
                   out_dtype=jnp.bfloat16)
    x = y[..., :64].reshape(N, OH, OW, 64)

    for name in ("conv1", "conv2"):
        w, b = params[name]
        patches, OH, OW = im2col_nhwc(x, k=4, stride=2, pad=(1, 1, 1, 1))
        y = conv_block(patches, w, b, normalize=True, leaky=True,
                       out_dtype=jnp.bfloat16)
        x = y.reshape(N, OH, OW, w.shape[1])

    # Fused conv3 + (ZeroPad2d((1,0,1,0)) + Conv2d(512,1,4,padding=1)).
    w3, b3 = params["conv3"]
    wo, bo = params["conv_out"]
    patches, _, _ = im2col_nhwc(x, k=4, stride=2, pad=(1, 1, 1, 1))  # [N,4,4096]
    out = tail_block(patches, w3, b3, wo, bo)                        # [N,1,128]
    # q = oi*2 + oj (row-major 2x2) -> NCHW [N, 1, 2, 2]
    return out[:, 0, :4].reshape(N, 1, 2, 2)


if __name__ == "__main__":
    key = jax.random.PRNGKey(0)
    pkey, xkey = jax.random.split(key)
    params = init_params(pkey)

    batch = 2
    img = jax.random.normal(xkey, (batch, 3, IMAGE_SIZE, IMAGE_SIZE),
                            dtype=jnp.float32)

    fwd = jax.jit(discriminator_forward)
    out = jax.block_until_ready(fwd(img, params))

    # Expected: 32 -> 16 -> 8 -> 4 -> 2 -> (zero-pad to 3x3/5x5) -> 2x2 map
    assert out.shape == (batch, 1, 2, 2), out.shape
    assert bool(jnp.all(jnp.isfinite(out)))
    print("KERNEL_OK")
</pallas_src>

<mosaic_0001>
module attributes {stable_mosaic.version = 11 : i64} {
  func.func @_conv_block_kernel(%arg0: i32, %arg1: memref<1x256x48xbf16, #tpu.memory_space<vmem>>, %arg2: memref<48x128xbf16, #tpu.memory_space<vmem>>, %arg3: memref<1x128xf32, #tpu.memory_space<vmem>>, %arg4: memref<1x256x128xbf16, #tpu.memory_space<vmem>>) attributes {dimension_semantics = [#tpu.dimension_semantics<parallel>], iteration_bounds = array<i64: 2>, scalar_prefetch = 0 : i64, scratch_operands = 0 : i64, tpu.core_type = #tpu.core_type<tc>, window_params = [{transform_indices = @transform_0, window_bounds = array<i64: 1, 256, 48>}, {pipeline_mode = #tpu.pipeline_mode<synchronous>, transform_indices = @transform_1, window_bounds = array<i64: 48, 128>}, {pipeline_mode = #tpu.pipeline_mode<synchronous>, transform_indices = @transform_2, window_bounds = array<i64: 1, 128>}, {transform_indices = @transform_3, window_bounds = array<i64: 1, 256, 128>}]} {
    %c0 = arith.constant 0 : index
    %c0_0 = arith.constant 0 : index
    %c0_1 = arith.constant 0 : index
    %0 = vector.load %arg1[%c0, %c0_0, %c0_1] : memref<1x256x48xbf16, #tpu.memory_space<vmem>>, vector<1x256x48xbf16>
    %1 = vector.shape_cast %0 : vector<1x256x48xbf16> to vector<256x48xbf16>
    %c0_2 = arith.constant 0 : index
    %c0_3 = arith.constant 0 : index
    %2 = vector.load %arg2[%c0_2, %c0_3] : memref<48x128xbf16, #tpu.memory_space<vmem>>, vector<48x128xbf16>
    %cst = arith.constant dense<0.000000e+00> : vector<256x128xf32>
    %3 = tpu.matmul %1, %2, %cst {dimension_numbers = #tpu.dot_dimension_numbers<[1], [0], [0], [1], [0, 0, 1, 1], [], []>} : vector<256x48xbf16>, vector<48x128xbf16>, vector<256x128xf32> -> vector<256x128xf32>
    %c0_4 = arith.constant 0 : index
    %c0_5 = arith.constant 0 : index
    %4 = vector.load %arg3[%c0_4, %c0_5] : memref<1x128xf32, #tpu.memory_space<vmem>>, vector<1x128xf32>
    %5 = vector.broadcast %4 : vector<1x128xf32> to vector<256x128xf32>
    %6 = arith.addf %3, %5 : vector<256x128xf32>
    %cst_6 = arith.constant 0.000000e+00 : f32
    %7 = vector.broadcast %cst_6 : f32 to vector<256x128xf32>
    %8 = arith.cmpf ogt, %6, %7 : vector<256x128xf32>
    %cst_7 = arith.constant 2.000000e-01 : f32
    %9 = vector.broadcast %cst_7 : f32 to vector<256x128xf32>
    %10 = arith.mulf %9, %6 : vector<256x128xf32>
    %11 = arith.select %8, %6, %10 : vector<256x128xi1>, vector<256x128xf32>
    %12 = arith.truncf %11 : vector<256x128xf32> to vector<256x128xbf16>
    %c0_8 = arith.constant 0 : index
    %c0_9 = arith.constant 0 : index
    %c0_10 = arith.constant 0 : index
    %13 = vector.load %arg4[%c0_8, %c0_9, %c0_10] : memref<1x256x128xbf16, #tpu.memory_space<vmem>>, vector<1x256x128xbf16>
    %14 = vector.shape_cast %13 : vector<1x256x128xbf16> to vector<256x128xbf16>
    %15 = vector.shape_cast %12 : vector<256x128xbf16> to vector<1x256x128xbf16>
    tpu.vector_store %arg4[%c0_8, %c0_9, %c0_10], %15 {strides = array<i32>} : memref<1x256x128xbf16, #tpu.memory_space<vmem>>, vector<1x256x128xbf16>,
    return
  }
  func.func @transform_0(%arg0: i32) -> (i32, i32, i32) {
    %c0_i32 = arith.constant 0 : i32
    %c0_i32_0 = arith.constant 0 : i32
    %c0_i32_1 = arith.constant 0 : i32
    return %arg0, %c0_i32, %c0_i32_0 : i32, i32, i32
  }
  func.func @transform_1(%arg0: i32) -> (i32, i32) {
    %c0_i32 = arith.constant 0 : i32
    %c0_i32_0 = arith.constant 0 : i32
    %c0_i32_1 = arith.constant 0 : i32
    return %c0_i32, %c0_i32_0 : i32, i32
  }
  func.func @transform_2(%arg0: i32) -> (i32, i32) {
    %c0_i32 = arith.constant 0 : i32
    %c0_i32_0 = arith.constant 0 : i32
    %c0_i32_1 = arith.constant 0 : i32
    return %c0_i32, %c0_i32_0 : i32, i32
  }
  func.func @transform_3(%arg0: i32) -> (i32, i32, i32) {
    %c0_i32 = arith.constant 0 : i32
    %c0_i32_0 = arith.constant 0 : i32
    %c0_i32_1 = arith.constant 0 : i32
    return %arg0, %c0_i32, %c0_i32_0 : i32, i32, i32
  }
}

module attributes {stable_mosaic.version = 11 : i64} {
  func.func @_conv_block_kernel(%arg0: i32, %arg1: memref<1x64x1024xbf16, #tpu.memory_space<vmem>>, %arg2: memref<1024x128xbf16, #tpu.memory_space<vmem>>, %arg3: memref<1x128xf32, #tpu.memory_space<vmem>>, %arg4: memref<1x64x128xbf16, #tpu.memory_space<vmem>>) attributes {dimension_semantics = [#tpu.dimension_semantics<parallel>], iteration_bounds = array<i64: 2>, scalar_prefetch = 0 : i64, scratch_operands = 0 : i64, tpu.core_type = #tpu.core_type<tc>, window_params = [{transform_indices = @transform_0, window_bounds = array<i64: 1, 64, 1024>}, {pipeline_mode = #tpu.pipeline_mode<synchronous>, transform_indices = @transform_1, window_bounds = array<i64: 1024, 128>}, {pipeline_mode = #tpu.pipeline_mode<synchronous>, transform_indices = @transform_2, window_bounds = array<i64: 1, 128>}, {transform_indices = @transform_3, window_bounds = array<i64: 1, 64, 128>}]} {
    %c0 = arith.constant 0 : index
    %c0_0 = arith.constant 0 : index
    %c0_1 = arith.constant 0 : index
    %0 = vector.load %arg1[%c0, %c0_0, %c0_1] : memref<1x64x1024xbf16, #tpu.memory_space<vmem>>, vector<1x64x1024xbf16>
    %1 = vector.shape_cast %0 : vector<1x64x1024xbf16> to vector<64x1024xbf16>
    %c0_2 = arith.constant 0 : index
    %c0_3 = arith.constant 0 : index
    %2 = vector.load %arg2[%c0_2, %c0_3] : memref<1024x128xbf16, #tpu.memory_space<vmem>>, vector<1024x128xbf16>
    %cst = arith.constant dense<0.000000e+00> : vector<64x128xf32>
    %3 = tpu.matmul %1, %2, %cst {dimension_numbers = #tpu.dot_dimension_numbers<[1], [0], [0], [1], [0, 0, 1, 1], [], []>} : vector<64x1024xbf16>, vector<1024x128xbf16>, vector<64x128xf32> -> vector<64x128xf32>
    %c0_4 = arith.constant 0 : index
    %c0_5 = arith.constant 0 : index
    %4 = vector.load %arg3[%c0_4, %c0_5] : memref<1x128xf32, #tpu.memory_space<vmem>>, vector<1x128xf32>
    %5 = vector.broadcast %4 : vector<1x128xf32> to vector<64x128xf32>
    %6 = arith.addf %3, %5 : vector<64x128xf32>
    %cst_6 = arith.constant dense<0.000000e+00> : vector<128xf32>
    %7 = vector.multi_reduction <add>, %6, %cst_6 [0] : vector<64x128xf32> to vector<128xf32>
    %8 = vector.shape_cast %7 : vector<128xf32> to vector<1x128xf32>
    %cst_7 = arith.constant 6.400000e+01 : f32
    %9 = vector.broadcast %cst_7 : f32 to vector<1x128xf32>
    %10 = arith.divf %8, %9 : vector<1x128xf32>
    %11 = vector.broadcast %10 : vector<1x128xf32> to vector<64x128xf32>
    %12 = arith.subf %6, %11 : vector<64x128xf32>
    %13 = arith.mulf %12, %12 : vector<64x128xf32>
    %cst_8 = arith.constant dense<0.000000e+00> : vector<128xf32>
    %14 = vector.multi_reduction <add>, %13, %cst_8 [0] : vector<64x128xf32> to vector<128xf32>
    %15 = vector.shape_cast %14 : vector<128xf32> to vector<1x128xf32>
    %cst_9 = arith.constant 6.400000e+01 : f32
    %16 = vector.broadcast %cst_9 : f32 to vector<1x128xf32>
    %17 = arith.divf %15, %16 : vector<1x128xf32>
    %cst_10 = arith.constant 9.99999974E-6 : f32
    %18 = vector.broadcast %cst_10 : f32 to vector<1x128xf32>
    %19 = arith.addf %17, %18 : vector<1x128xf32>
    %20 = math.rsqrt %19 : vector<1x128xf32>
    %21 = vector.broadcast %20 : vector<1x128xf32> to vector<64x128xf32>
    %22 = arith.mulf %12, %21 : vector<64x128xf32>
    %cst_11 = arith.constant 0.000000e+00 : f32
    %23 = vector.broadcast %cst_11 : f32 to vector<64x128xf32>
    %24 = arith.cmpf ogt, %22, %23 : vector<64x128xf32>
    %cst_12 = arith.constant 2.000000e-01 : f32
    %25 = vector.broadcast %cst_12 : f32 to vector<64x128xf32>
    %26 = arith.mulf %25, %22 : vector<64x128xf32>
    %27 = arith.select %24, %22, %26 : vector<64x128xi1>, vector<64x128xf32>
    %28 = arith.truncf %27 : vector<64x128xf32> to vector<64x128xbf16>
    %c0_13 = arith.constant 0 : index
    %c0_14 = arith.constant 0 : index
    %c0_15 = arith.constant 0 : index
    %29 = vector.load %arg4[%c0_13, %c0_14, %c0_15] : memref<1x64x128xbf16, #tpu.memory_space<vmem>>, vector<1x64x128xbf16>
    %30 = vector.shape_cast %29 : vector<1x64x128xbf16> to vector<64x128xbf16>
    %31 = vector.shape_cast %28 : vector<64x128xbf16> to vector<1x64x128xbf16>
    tpu.vector_store %arg4[%c0_13, %c0_14, %c0_15], %31 {strides = array<i32>} : memref<1x64x128xbf16, #tpu.memory_space<vmem>>, vector<1x64x128xbf16>,
    return
  }
  func.func @transform_0(%arg0: i32) -> (i32, i32, i32) {
    %c0_i32 = arith.constant 0 : i32
    %c0_i32_0 = arith.constant 0 : i32
    %c0_i32_1 = arith.constant 0 : i32
    return %arg0, %c0_i32, %c0_i32_0 : i32, i32, i32
  }
  func.func @transform_1(%arg0: i32) -> (i32, i32) {
    %c0_i32 = arith.constant 0 : i32
    %c0_i32_0 = arith.constant 0 : i32
    %c0_i32_1 = arith.constant 0 : i32
    return %c0_i32, %c0_i32_0 : i32, i32
  }
  func.func @transform_2(%arg0: i32) -> (i32, i32) {
    %c0_i32 = arith.constant 0 : i32
    %c0_i32_0 = arith.constant 0 : i32
    %c0_i32_1 = arith.constant 0 : i32
    return %c0_i32, %c0_i32_0 : i32, i32
  }
  func.func @transform_3(%arg0: i32) -> (i32, i32, i32) {
    %c0_i32 = arith.constant 0 : i32
    %c0_i32_0 = arith.constant 0 : i32
    %c0_i32_1 = arith.constant 0 : i32
    return %arg0, %c0_i32, %c0_i32_0 : i32, i32, i32
  }
}

module attributes {stable_mosaic.version = 11 : i64} {
  func.func @_conv_block_kernel(%arg0: i32, %arg1: memref<1x16x2048xbf16, #tpu.memory_space<vmem>>, %arg2: memref<2048x256xbf16, #tpu.memory_space<vmem>>, %arg3: memref<1x256xf32, #tpu.memory_space<vmem>>, %arg4: memref<1x16x256xbf16, #tpu.memory_space<vmem>>) attributes {dimension_semantics = [#tpu.dimension_semantics<parallel>], iteration_bounds = array<i64: 2>, scalar_prefetch = 0 : i64, scratch_operands = 0 : i64, tpu.core_type = #tpu.core_type<tc>, window_params = [{transform_indices = @transform_0, window_bounds = array<i64: 1, 16, 2048>}, {pipeline_mode = #tpu.pipeline_mode<synchronous>, transform_indices = @transform_1, window_bounds = array<i64: 2048, 256>}, {pipeline_mode = #tpu.pipeline_mode<synchronous>, transform_indices = @transform_2, window_bounds = array<i64: 1, 256>}, {transform_indices = @transform_3, window_bounds = array<i64: 1, 16, 256>}]} {
    %c0 = arith.constant 0 : index
    %c0_0 = arith.constant 0 : index
    %c0_1 = arith.constant 0 : index
    %0 = vector.load %arg1[%c0, %c0_0, %c0_1] : memref<1x16x2048xbf16, #tpu.memory_space<vmem>>, vector<1x16x2048xbf16>
    %1 = vector.shape_cast %0 : vector<1x16x2048xbf16> to vector<16x2048xbf16>
    %c0_2 = arith.constant 0 : index
    %c0_3 = arith.constant 0 : index
    %2 = vector.load %arg2[%c0_2, %c0_3] : memref<2048x256xbf16, #tpu.memory_space<vmem>>, vector<2048x256xbf16>
    %cst = arith.constant dense<0.000000e+00> : vector<16x256xf32>
    %3 = tpu.matmul %1, %2, %cst {dimension_numbers = #tpu.dot_dimension_numbers<[1], [0], [0], [1], [0, 0, 1, 1], [], []>} : vector<16x2048xbf16>, vector<2048x256xbf16>, vector<16x256xf32> -> vector<16x256xf32>
    %c0_4 = arith.constant 0 : index
    %c0_5 = arith.constant 0 : index
    %4 = vector.load %arg3[%c0_4, %c0_5] : memref<1x256xf32, #tpu.memory_space<vmem>>, vector<1x256xf32>
    %5 = vector.broadcast %4 : vector<1x256xf32> to vector<16x256xf32>
    %6 = arith.addf %3, %5 : vector<16x256xf32>
    %cst_6 = arith.constant dense<0.000000e+00> : vector<256xf32>
    %7 = vector.multi_reduction <add>, %6, %cst_6 [0] : vector<16x256xf32> to vector<256xf32>
    %8 = vector.shape_cast %7 : vector<256xf32> to vector<1x256xf32>
    %cst_7 = arith.constant 1.600000e+01 : f32
    %9 = vector.broadcast %cst_7 : f32 to vector<1x256xf32>
    %10 = arith.divf %8, %9 : vector<1x256xf32>
    %11 = vector.broadcast %10 : vector<1x256xf32> to vector<16x256xf32>
    %12 = arith.subf %6, %11 : vector<16x256xf32>
    %13 = arith.mulf %12, %12 : vector<16x256xf32>
    %cst_8 = arith.constant dense<0.000000e+00> : vector<256xf32>
    %14 = vector.multi_reduction <add>, %13, %cst_8 [0] : vector<16x256xf32> to vector<256xf32>
    %15 = vector.shape_cast %14 : vector<256xf32> to vector<1x256xf32>
    %cst_9 = arith.constant 1.600000e+01 : f32
    %16 = vector.broadcast %cst_9 : f32 to vector<1x256xf32>
    %17 = arith.divf %15, %16 : vector<1x256xf32>
    %cst_10 = arith.constant 9.99999974E-6 : f32
    %18 = vector.broadcast %cst_10 : f32 to vector<1x256xf32>
    %19 = arith.addf %17, %18 : vector<1x256xf32>
    %20 = math.rsqrt %19 : vector<1x256xf32>
    %21 = vector.broadcast %20 : vector<1x256xf32> to vector<16x256xf32>
    %22 = arith.mulf %12, %21 : vector<16x256xf32>
    %cst_11 = arith.constant 0.000000e+00 : f32
    %23 = vector.broadcast %cst_11 : f32 to vector<16x256xf32>
    %24 = arith.cmpf ogt, %22, %23 : vector<16x256xf32>
    %cst_12 = arith.constant 2.000000e-01 : f32
    %25 = vector.broadcast %cst_12 : f32 to vector<16x256xf32>
    %26 = arith.mulf %25, %22 : vector<16x256xf32>
    %27 = arith.select %24, %22, %26 : vector<16x256xi1>, vector<16x256xf32>
    %28 = arith.truncf %27 : vector<16x256xf32> to vector<16x256xbf16>
    %c0_13 = arith.constant 0 : index
    %c0_14 = arith.constant 0 : index
    %c0_15 = arith.constant 0 : index
    %29 = vector.load %arg4[%c0_13, %c0_14, %c0_15] : memref<1x16x256xbf16, #tpu.memory_space<vmem>>, vector<1x16x256xbf16>
    %30 = vector.shape_cast %29 : vector<1x16x256xbf16> to vector<16x256xbf16>
    %31 = vector.shape_cast %28 : vector<16x256xbf16> to vector<1x16x256xbf16>
    tpu.vector_store %arg4[%c0_13, %c0_14, %c0_15], %31 {strides = array<i32>} : memref<1x16x256xbf16, #tpu.memory_space<vmem>>, vector<1x16x256xbf16>,
    return
  }
  func.func @transform_0(%arg0: i32) -> (i32, i32, i32) {
    %c0_i32 = arith.constant 0 : i32
    %c0_i32_0 = arith.constant 0 : i32
    %c0_i32_1 = arith.constant 0 : i32
    return %arg0, %c0_i32, %c0_i32_0 : i32, i32, i32
  }
  func.func @transform_1(%arg0: i32) -> (i32, i32) {
    %c0_i32 = arith.constant 0 : i32
    %c0_i32_0 = arith.constant 0 : i32
    %c0_i32_1 = arith.constant 0 : i32
    return %c0_i32, %c0_i32_0 : i32, i32
  }
  func.func @transform_2(%arg0: i32) -> (i32, i32) {
    %c0_i32 = arith.constant 0 : i32
    %c0_i32_0 = arith.constant 0 : i32
    %c0_i32_1 = arith.constant 0 : i32
    return %c0_i32, %c0_i32_0 : i32, i32
  }
  func.func @transform_3(%arg0: i32) -> (i32, i32, i32) {
    %c0_i32 = arith.constant 0 : i32
    %c0_i32_0 = arith.constant 0 : i32
    %c0_i32_1 = arith.constant 0 : i32
    return %arg0, %c0_i32, %c0_i32_0 : i32, i32, i32
  }
}

module attributes {stable_mosaic.version = 11 : i64} {
  func.func @_tail_kernel(%arg0: i32, %arg1: memref<1x4x4096xbf16, #tpu.memory_space<vmem>>, %arg2: memref<4096x512xbf16, #tpu.memory_space<vmem>>, %arg3: memref<1x512xf32, #tpu.memory_space<vmem>>, %arg4: memref<4x512x128xbf16, #tpu.memory_space<vmem>>, %arg5: memref<1x128xf32, #tpu.memory_space<vmem>>, %arg6: memref<1x1x128xf32, #tpu.memory_space<vmem>>) attributes {dimension_semantics = [#tpu.dimension_semantics<parallel>], iteration_bounds = array<i64: 2>, scalar_prefetch = 0 : i64, scratch_operands = 0 : i64, tpu.core_type = #tpu.core_type<tc>, window_params = [{transform_indices = @transform_0, window_bounds = array<i64: 1, 4, 4096>}, {pipeline_mode = #tpu.pipeline_mode<synchronous>, transform_indices = @transform_1, window_bounds = array<i64: 4096, 512>}, {pipeline_mode = #tpu.pipeline_mode<synchronous>, transform_indices = @transform_2, window_bounds = array<i64: 1, 512>}, {pipeline_mode = #tpu.pipeline_mode<synchronous>, transform_indices = @transform_3, window_bounds = array<i64: 4, 512, 128>}, {pipeline_mode = #tpu.pipeline_mode<synchronous>, transform_indices = @transform_4, window_bounds = array<i64: 1, 128>}, {transform_indices = @transform_5, window_bounds = array<i64: 1, 1, 128>}]} {
    %c0 = arith.constant 0 : index
    %c0_0 = arith.constant 0 : index
    %c0_1 = arith.constant 0 : index
    %0 = vector.load %arg1[%c0, %c0_0, %c0_1] : memref<1x4x4096xbf16, #tpu.memory_space<vmem>>, vector<1x4x4096xbf16>
    %1 = vector.shape_cast %0 : vector<1x4x4096xbf16> to vector<4x4096xbf16>
    %c0_2 = arith.constant 0 : index
    %c0_3 = arith.constant 0 : index
    %2 = vector.load %arg2[%c0_2, %c0_3] : memref<4096x512xbf16, #tpu.memory_space<vmem>>, vector<4096x512xbf16>
    %cst = arith.constant dense<0.000000e+00> : vector<4x512xf32>
    %3 = tpu.matmul %1, %2, %cst {dimension_numbers = #tpu.dot_dimension_numbers<[1], [0], [0], [1], [0, 0, 1, 1], [], []>} : vector<4x4096xbf16>, vector<4096x512xbf16>, vector<4x512xf32> -> vector<4x512xf32>
    %c0_4 = arith.constant 0 : index
    %c0_5 = arith.constant 0 : index
    %4 = vector.load %arg3[%c0_4, %c0_5] : memref<1x512xf32, #tpu.memory_space<vmem>>, vector<1x512xf32>
    %5 = vector.broadcast %4 : vector<1x512xf32> to vector<4x512xf32>
    %6 = arith.addf %3, %5 : vector<4x512xf32>
    %cst_6 = arith.constant dense<0.000000e+00> : vector<512xf32>
    %7 = vector.multi_reduction <add>, %6, %cst_6 [0] : vector<4x512xf32> to vector<512xf32>
    %8 = vector.shape_cast %7 : vector<512xf32> to vector<1x512xf32>
    %cst_7 = arith.constant 4.000000e+00 : f32
    %9 = vector.broadcast %cst_7 : f32 to vector<1x512xf32>
    %10 = arith.divf %8, %9 : vector<1x512xf32>
    %11 = vector.broadcast %10 : vector<1x512xf32> to vector<4x512xf32>
    %12 = arith.subf %6, %11 : vector<4x512xf32>
    %13 = arith.mulf %12, %12 : vector<4x512xf32>
    %cst_8 = arith.constant dense<0.000000e+00> : vector<512xf32>
    %14 = vector.multi_reduction <add>, %13, %cst_8 [0] : vector<4x512xf32> to vector<512xf32>
    %15 = vector.shape_cast %14 : vector<512xf32> to vector<1x512xf32>
    %cst_9 = arith.constant 4.000000e+00 : f32
    %16 = vector.broadcast %cst_9 : f32 to vector<1x512xf32>
    %17 = arith.divf %15, %16 : vector<1x512xf32>
    %cst_10 = arith.constant 9.99999974E-6 : f32
    %18 = vector.broadcast %cst_10 : f32 to vector<1x512xf32>
    %19 = arith.addf %17, %18 : vector<1x512xf32>
    %20 = math.rsqrt %19 : vector<1x512xf32>
    %21 = vector.broadcast %20 : vector<1x512xf32> to vector<4x512xf32>
    %22 = arith.mulf %12, %21 : vector<4x512xf32>
    %cst_11 = arith.constant 0.000000e+00 : f32
    %23 = vector.broadcast %cst_11 : f32 to vector<4x512xf32>
    %24 = arith.cmpf ogt, %22, %23 : vector<4x512xf32>
    %cst_12 = arith.constant 2.000000e-01 : f32
    %25 = vector.broadcast %cst_12 : f32 to vector<4x512xf32>
    %26 = arith.mulf %25, %22 : vector<4x512xf32>
    %27 = arith.select %24, %22, %26 : vector<4x512xi1>, vector<4x512xf32>
    %28 = arith.truncf %27 : vector<4x512xf32> to vector<4x512xbf16>
    %c0_13 = arith.constant 0 : index
    %c0_14 = arith.constant 0 : index
    %29 = vector.load %arg5[%c0_13, %c0_14] : memref<1x128xf32, #tpu.memory_space<vmem>>, vector<1x128xf32>
    %30 = vector.extract_strided_slice %28 {offsets = [0, 0], sizes = [1, 512], strides = [1, 1]} : vector<4x512xbf16> to vector<1x512xbf16>
    %c0_15 = arith.constant 0 : index
    %c0_16 = arith.constant 0 : index
    %c0_17 = arith.constant 0 : index
    %31 = vector.load %arg4[%c0_15, %c0_16, %c0_17] : memref<4x512x128xbf16, #tpu.memory_space<vmem>>, vector<1x512x128xbf16>
    %32 = vector.shape_cast %31 : vector<1x512x128xbf16> to vector<512x128xbf16>
    %cst_18 = arith.constant dense<0.000000e+00> : vector<1x128xf32>
    %33 = tpu.matmul %30, %32, %cst_18 {dimension_numbers = #tpu.dot_dimension_numbers<[1], [0], [0], [1], [0, 0, 1, 1], [], []>} : vector<1x512xbf16>, vector<512x128xbf16>, vector<1x128xf32> -> vector<1x128xf32>
    %34 = arith.addf %29, %33 : vector<1x128xf32>
    %35 = vector.extract_strided_slice %28 {offsets = [1, 0], sizes = [1, 512], strides = [1, 1]} : vector<4x512xbf16> to vector<1x512xbf16>
    %c1 = arith.constant 1 : index
    %c0_19 = arith.constant 0 : index
    %c0_20 = arith.constant 0 : index
    %36 = vector.load %arg4[%c1, %c0_19, %c0_20] : memref<4x512x128xbf16, #tpu.memory_space<vmem>>, vector<1x512x128xbf16>
    %37 = vector.shape_cast %36 : vector<1x512x128xbf16> to vector<512x128xbf16>
    %cst_21 = arith.constant dense<0.000000e+00> : vector<1x128xf32>
    %38 = tpu.matmul %35, %37, %cst_21 {dimension_numbers = #tpu.dot_dimension_numbers<[1], [0], [0], [1], [0, 0, 1, 1], [], []>} : vector<1x512xbf16>, vector<512x128xbf16>, vector<1x128xf32> -> vector<1x128xf32>
    %39 = arith.addf %34, %38 : vector<1x128xf32>
    %40 = vector.extract_strided_slice %28 {offsets = [2, 0], sizes = [1, 512], strides = [1, 1]} : vector<4x512xbf16> to vector<1x512xbf16>
    %c2 = arith.constant 2 : index
    %c0_22 = arith.constant 0 : index
    %c0_23 = arith.constant 0 : index
    %41 = vector.load %arg4[%c2, %c0_22, %c0_23] : memref<4x512x128xbf16, #tpu.memory_space<vmem>>, vector<1x512x128xbf16>
    %42 = vector.shape_cast %41 : vector<1x512x128xbf16> to vector<512x128xbf16>
    %cst_24 = arith.constant dense<0.000000e+00> : vector<1x128xf32>
    %43 = tpu.matmul %40, %42, %cst_24 {dimension_numbers = #tpu.dot_dimension_numbers<[1], [0], [0], [1], [0, 0, 1, 1], [], []>} : vector<1x512xbf16>, vector<512x128xbf16>, vector<1x128xf32> -> vector<1x128xf32>
    %44 = arith.addf %39, %43 : vector<1x128xf32>
    %45 = vector.extract_strided_slice %28 {offsets = [3, 0], sizes = [1, 512], strides = [1, 1]} : vector<4x512xbf16> to vector<1x512xbf16>
    %c3 = arith.constant 3 : index
    %c0_25 = arith.constant 0 : index
    %c0_26 = arith.constant 0 : index
    %46 = vector.load %arg4[%c3, %c0_25, %c0_26] : memref<4x512x128xbf16, #tpu.memory_space<vmem>>, vector<1x512x128xbf16>
    %47 = vector.shape_cast %46 : vector<1x512x128xbf16> to vector<512x128xbf16>
    %cst_27 = arith.constant dense<0.000000e+00> : vector<1x128xf32>
    %48 = tpu.matmul %45, %47, %cst_27 {dimension_numbers = #tpu.dot_dimension_numbers<[1], [0], [0], [1], [0, 0, 1, 1], [], []>} : vector<1x512xbf16>, vector<512x128xbf16>, vector<1x128xf32> -> vector<1x128xf32>
    %49 = arith.addf %44, %48 : vector<1x128xf32>
    %c0_28 = arith.constant 0 : index
    %c0_29 = arith.constant 0 : index
    %c0_30 = arith.constant 0 : index
    %50 = vector.load %arg6[%c0_28, %c0_29, %c0_30] : memref<1x1x128xf32, #tpu.memory_space<vmem>>, vector<1x1x128xf32>
    %51 = vector.shape_cast %50 : vector<1x1x128xf32> to vector<1x128xf32>
    %52 = vector.shape_cast %49 : vector<1x128xf32> to vector<1x1x128xf32>
    tpu.vector_store %arg6[%c0_28, %c0_29, %c0_30], %52 {strides = array<i32>} : memref<1x1x128xf32, #tpu.memory_space<vmem>>, vector<1x1x128xf32>,
    return
  }
  func.func @transform_0(%arg0: i32) -> (i32, i32, i32) {
    %c0_i32 = arith.constant 0 : i32
    %c0_i32_0 = arith.constant 0 : i32
    %c0_i32_1 = arith.constant 0 : i32
    return %arg0, %c0_i32, %c0_i32_0 : i32, i32, i32
  }
  func.func @transform_1(%arg0: i32) -> (i32, i32) {
    %c0_i32 = arith.constant 0 : i32
    %c0_i32_0 = arith.constant 0 : i32
    %c0_i32_1 = arith.constant 0 : i32
    return %c0_i32, %c0_i32_0 : i32, i32
  }
  func.func @transform_2(%arg0: i32) -> (i32, i32) {
    %c0_i32 = arith.constant 0 : i32
    %c0_i32_0 = arith.constant 0 : i32
    %c0_i32_1 = arith.constant 0 : i32
    return %c0_i32, %c0_i32_0 : i32, i32
  }
  func.func @transform_3(%arg0: i32) -> (i32, i32, i32) {
    %c0_i32 = arith.constant 0 : i32
    %c0_i32_0 = arith.constant 0 : i32
    %c0_i32_1 = arith.constant 0 : i32
    %c0_i32_2 = arith.constant 0 : i32
    return %c0_i32, %c0_i32_0, %c0_i32_1 : i32, i32, i32
  }
  func.func @transform_4(%arg0: i32) -> (i32, i32) {
    %c0_i32 = arith.constant 0 : i32
    %c0_i32_0 = arith.constant 0 : i32
    %c0_i32_1 = arith.constant 0 : i32
    return %c0_i32, %c0_i32_0 : i32, i32
  }
  func.func @transform_5(%arg0: i32) -> (i32, i32, i32) {
    %c0_i32 = arith.constant 0 : i32
    %c0_i32_0 = arith.constant 0 : i32
    %c0_i32_1 = arith.constant 0 : i32
    return %arg0, %c0_i32, %c0_i32_0 : i32, i32, i32
  }
}

</mosaic_0001>

<bundles_post_ra>
// kernel: discriminator_forward.4
= control target key start
LH: loop header
LB: loop body
LE: loop exit
PB: predicated region body
PF: predicated region fallthrough
CT: control target
= control target key end

     0   :  { %8 = vsyncpa [#allocation3], 0  ;;  %s1500_s0 = inlined_call_operand.vmem [shape: bf16[2,256,48], index: 0, kind: input, shape index: {}]   ;;  %s1501_s1 = inlined_call_operand.hbm [shape: bf16[48,128], index: 1, kind: input, shape index: {}]   ;;  %s1502_s2 = inlined_call_operand.hbm [shape: f32[1,128], index: 2, kind: input, shape index: {}]   ;;  %s1503_s3 = inlined_call_operand.vmem [shape: bf16[2,256,128], index: 3, kind: output, shape index: {}]  }
   0x1   :  { %9 = vsyncpa [#allocation5], 0  ;;  %s1307_s12 = smov 0  }
   0x2 LB: > { %s1313_s13 = sadd.s32 4294967295, %s1281_s12   ;;  %p888_p0 = scmp.ge.s32.totalorder %s1281_s12, 1  ;;  %s1281_s12 = sphi %s1307_s12, %s15_s12  }
   0x3   : > { %p114_p1 = scmp.lt.s32.totalorder %s1281_s12, 3  ;;  %s1283_s14 = smov [#allocation2]  }
   0x4   : > { %s126_s15 = sshll.u32 %s1283_s14, 4  ;;  %p1504_p3 = scmp.eq.s32.totalorder %s1313_s13, 0  ;;  %s127_s15 = int_to_ptr.vmem [resolvable:$true] %s126_s15 }
   0x5   : > { %p1317_p2 = pnand %p888_p0, %p114_p1  ;;  %s1284_s17 = smov [#allocation4]  }
   0x6   : > { %s140_s18 = sshll.u32 %s1284_s17, 4  ;;  %s1211_s22 = scalar_lea.hbm %s1501_s1, 384  ;;  %s1330_s18 = int_to_ptr.vmem [resolvable:$true] %s140_s18 }
   0x7   : > { %s1506_s16 = scalar_select %p1317_p2, 1, 0 }
   0x8   : > { %p1169_p4 = pneg %p1317_p2  ;;  %p1212_p6 = scmp.ne.s32.totalorder %s1501_s1, %s1211_s22 }
   0x9   : > { %p1218_p10 = scmp.lt.u32.totalorder %s1211_s22, %s1501_s1 }
   0xa   : > { %p1326_p5 = pnand %p1504_p3, %p1169_p4 }
   0xc   : > { %p1213_p7 = pneg %p1326_p5 }
   0xe   : > { %p1214_p8 = pnand %p1213_p7, %p1212_p6 }
  0x10   : > { %p1215_p9 = pneg %p1214_p8 }
  0x12   : > { %p1220_p11 = pnand %p1218_p10, %p1215_p9 }
  0x14   : > { %1223 = shalt.err (!%p1220_p11)
}
  0x15   : > { %s1224_s27 = scalar_lea.vmem %s127_s15, 384  ;;  %p1232_p1 = scmp.lt.s32.totalorder %s127_s15, %s127_s15 }
  0x16   : > { %p1225_p12 = scmp.ne.s32.totalorder %s127_s15, %s1224_s27  ;;  %p1233_p4 = scmp.lt.s32.totalorder %s1224_s27, %s1224_s27 }
  0x18   : > { %p1227_p13 = pnand %p1225_p12, %p1213_p7  ;;  %p1234_p3 = por %p1233_p4, %p1232_p1 }
  0x1a   : > { %p1228_p0 = pneg %p1227_p13 }
  0x1c   : > { %p1235_p2 = pnand %p1234_p3, %p1228_p0 }
  0x1e   : > { %1238 = shalt.err (!%p1235_p2)
}
  0x1f   : > { %s1285_s28 = smov 64   ;;  %s1286_s29 = smov 4  }
  0x20   : > { %1172 = dma.hbm_to_vmem [thread:$0]  (!%p1326_p5), %s1501_s1, 384, %s127_s15, [#allocation3], %s1285_s28, %s1285_s28, %s1286_s29  }
  0x21   : > { %s1239_s7 = scalar_lea.hbm %s1502_s2, 16 }
  0x22   : > { %p1240_p6 = scmp.ne.s32.totalorder %s1502_s2, %s1239_s7  ;;  %p1246_p8 = scmp.lt.u32.totalorder %s1239_s7, %s1502_s2 }
  0x24   : > { %p1242_p2 = pnand %p1240_p6, %p1213_p7 }
  0x26   : > { %p1243_p3 = pneg %p1242_p2 }
  0x28   : > { %p1248_p9 = pnand %p1246_p8, %p1243_p3 }
  0x2a   : > { %1251 = shalt.err (!%p1248_p9)
}
  0x2b   : > { %s1252_s14 = scalar_lea.vmem %s1330_s18, 16  ;;  %s1259_s15 = scalar_lea.vmem %s1330_s18, 32 }
  0x2c   : > { %p1253_p10 = scmp.ne.s32.totalorder %s1330_s18, %s1252_s14  ;;  %p1260_p13 = scmp.lt.s32.totalorder %s1330_s18, %s1330_s18 }
  0x2d   : > { %p1261_p0 = scmp.lt.s32.totalorder %s1259_s15, %s1252_s14 }
  0x2e   : > { %p1255_p11 = pnand %p1253_p10, %p1213_p7 }
  0x2f   : > { %p1262_p1 = por %p1261_p0, %p1260_p13 }
  0x30   : > { %p1256_p12 = pneg %p1255_p11 }
  0x32   : > { %p1263_p4 = pnand %p1262_p1, %p1256_p12 }
  0x34   : > { %1266 = shalt.err (!%p1263_p4)
}
  0x35   : > { %1175 = dma.hbm_to_vmem [thread:$0]  (!%p1326_p5), %s1502_s2, 16, %s1330_s18, [#allocation5]  }
  0x36   : > { %p1508_p6 = scmp.ne.s32.totalorder %s1506_s16, 0 }
  0x37   : > { %p1509_p7 = scmp.eq.s32.totalorder (!%p1508_p6), %s1313_s13, 0 }
  0x38   : > { %161 = sbr.rel (%p1508_p6) target bundleno = 336 (0x150), region = 32 }
  0x3f   : > { %1272 = dma.done.wait (%p1509_p7), [#allocation3], 384   ;;  %p1510_p2 = pmov %p1509_p7 }
  0x41   : > { %1274 = vsyncadd (%p1510_p2), [#allocation3], 4294966912  ;;  %p1511_p3 = pmov %p1510_p2 }
  0x42   : > { %p1512_p8 = pmov %p1510_p2 }
  0x43   : > { %1276 = dma.done.wait (%p1511_p3), [#allocation5], 16  }
  0x44   : > { %1278 = vsyncadd (%p1512_p8), [#allocation5], 4294967280  ;;  %p189_p9 = scmp.lt.s32.totalorder %s1313_s13, 1  ;;  %v1192_v0 = vld [vmem:[#allocation2] sm:$0xff]   ;;  %v1193_v1 = vld [vmem:[#allocation2 + $0x8] sm:$0xff]   ;;  %vm343_vm0 = vcmask 392192  }
  0x45   : > { %1117 = vmatprep.subr.bf16.mxu0 %v1192_v0  ;;  %1155 = vmatprep.subr.bf16.mxu1 %v1192_v0  ;;  %v1194_v2 = vld [vmem:[#allocation2 + $0x10] sm:$0xff]   ;;  %v1434_v19 = vld [vmem:[#allocation4] ss:$0 sm:$0xff] }
  0x46   : > { %s1514_s13 = smov (!%p189_p9, %s1313_s13), 1  ;;  %1118 = vmatpush3.bf16.msra.mxu0 %v1192_v0  ;;  %1158 = vmatpush3.bf16.msra.mxu1 %v1192_v0 }
  0x47   : > { %s969_s16 = sshll.u32 %s1514_s13, 7  ;;  %1119 = vmatprep.subr.bf16.mxu0 %v1193_v1  ;;  %1156 = vmatprep.subr.bf16.mxu1 %v1193_v1 }
  0x48   : > { %s1400_s21 = scalar_lea.vmem %s1500_s0, %s969_s16  ;;  %s1451_s24 = scalar_lea.vmem %s1503_s3, %s969_s16 }
  0x49   : > { %v1195_v3 = vld [vmem:[%s1400_s21] sm:$0xff]   ;;  %v1197_v5 = vld [vmem:[%s1400_s21 + $0x8] sm:$0xff]   ;;  %v1199_v7 = vld [vmem:[%s1400_s21 + $0x10] sm:$0xff]  }
  0x4a   : > { %v1196_v4 = vld [vmem:[%s1400_s21 + $0x40] sm:$0xff]   ;;  %1123 = vmatprep.mubr.msk.bf16.mxu0 %vm343_vm0, %v1195_v3  ;;  %1120 = vmatpush3.bf16.msra.mxu0 %v1193_v1  ;;  %v1198_v6 = vld [vmem:[%s1400_s21 + $0x48] sm:$0xff]   ;;  %v1200_v8 = vld [vmem:[%s1400_s21 + $0x50] sm:$0xff]  }
  0x4b   : > { %1139 = vmatprep.mubr.msk.bf16.mxu1 %vm343_vm0, %v1196_v4  ;;  %1159 = vmatpush3.bf16.msra.mxu1 %v1193_v1  ;;  %v1201_v9 = vld [vmem:[%s1400_s21 + $0x18] sm:$0xff]   ;;  %v1203_v11 = vld [vmem:[%s1400_s21 + $0x20] sm:$0xff]   ;;  %v1205_v13 = vld [vmem:[%s1400_s21 + $0x28] sm:$0xff]  }
  0x4c   : > { %1121 = vmatprep.subr.bf16.mxu0 %v1194_v2  ;;  %1157 = vmatprep.subr.bf16.mxu1 %v1194_v2  ;;  %v1202_v10 = vld [vmem:[%s1400_s21 + $0x58] sm:$0xff]   ;;  %v1204_v12 = vld [vmem:[%s1400_s21 + $0x60] sm:$0xff]   ;;  %v1206_v14 = vld [vmem:[%s1400_s21 + $0x68] sm:$0xff]  }
  0x4d   : > { %v1207_v15 = vld [vmem:[%s1400_s21 + $0x30] sm:$0xff]   ;;  %v1209_v17 = vld [vmem:[%s1400_s21 + $0x38] sm:$0xff]  }
  0x4e   : > { %1122 = vmatpush3.bf16.msra.mxu0 %v1194_v2  ;;  %v1208_v16 = vld [vmem:[%s1400_s21 + $0x70] sm:$0xff]   ;;  %v1210_v18 = vld [vmem:[%s1400_s21 + $0x78] sm:$0xff]  }
  0x4f   : > { %1160 = vmatpush3.bf16.msra.mxu1 %v1194_v2 }
  0x51   : > { %1124 = vmatmul.mubr.msk.bf16.vlgmr.msra.gmra.mrb[0].mxu0 %vm343_vm0, %v1197_v5 }
  0x52   : > { %1140 = vmatmul.mubr.msk.bf16.vlgmr.msra.gmra.mrb[0].mxu1 %vm343_vm0, %v1198_v6  ;;  %1127 = vmatprep.mubr.msk.bf16.mxu0 %vm343_vm0, %v1199_v7 }
  0x53   : > { %1143 = vmatprep.mubr.msk.bf16.mxu1 %vm343_vm0, %v1200_v8 }
  0x59   : > { %1128 = vmatmul.mubr.msk.bf16.gmra.mrb[4].mxu0 %vm343_vm0, %v1201_v9 }
  0x5a   : > { %1144 = vmatmul.mubr.msk.bf16.gmra.mrb[4].mxu1 %vm343_vm0, %v1202_v10  ;;  %1131 = vmatprep.mubr.msk.bf16.mxu0 %vm343_vm0, %v1203_v11 }
  0x5b   : > { %1147 = vmatprep.mubr.msk.bf16.mxu1 %vm343_vm0, %v1204_v12 }
  0x61   : > { %1132 = vmatmul.mubr.msk.bf16.gmra.mrb[8].mxu0 %vm343_vm0, %v1205_v13 }
  0x62   : > { %1148 = vmatmul.mubr.msk.bf16.gmra.mrb[8].mxu1 %vm343_vm0, %v1206_v14  ;;  %1135 = vmatprep.mubr.msk.bf16.mxu0 %vm343_vm0, %v1207_v15 }
  0x63   : > { %1151 = vmatprep.mubr.msk.bf16.mxu1 %vm343_vm0, %v1208_v16 }
  0x69   : > { %1136 = vmatmul.mubr.msk.bf16.gmra.mrb[12].mxu0 %vm343_vm0, %v1209_v17 }
  0x6a   : > { %1152 = vmatmul.mubr.msk.bf16.gmra.mrb[12].mxu1 %vm343_vm0, %v1210_v18 }
 0x124   : > { %v1125_v20 = vpop.f32.mrb[0].mxu0 }
 0x125   : > { %v1141_v21 = vpop.f32.mrb[0].mxu1  ;;  %v435_v22 = vadd.f32 %v1125_v20, %v1434_v19  ;;  %v426_v24 = vpop.f32.mrb[1].mxu0 }
 0x126   : > { %v499_v23 = vadd.f32 %v1141_v21, %v1434_v19  ;;  %v490_v25 = vpop.f32.mrb[1].mxu1  ;;  %v427_v26 = vadd.f32 %v1434_v19, %v426_v24  ;;  %v1126_v28 = vpop.f32.mrb[2].mxu0 }
 0x127   : > { %v491_v27 = vadd.f32 %v1434_v19, %v490_v25  ;;  %v1142_v29 = vpop.f32.mrb[2].mxu1  ;;  %vm555_vm1 = vcmp.gt.f32.partialorder %v435_v22, 0.0  ;;  %v587_v30 = vmul.f32 0.2, %v435_v22  ;;  %v438_v34 = vadd.f32 %v1126_v28, %v1434_v19  ;;  %v429_v36 = vpop.f32.mrb[3].mxu0 }
 0x128   : > { %vm571_vm2 = vcmp.gt.f32.partialorder %v499_v23, 0.0  ;;  %v603_v31 = vmul.f32 0.2, %v499_v23  ;;  %vm553_vm3 = vcmp.gt.f32.partialorder %v427_v26, 0.0  ;;  %v585_v32 = vmul.f32 0.2, %v427_v26 }
 0x129   : > { %vm569_vm4 = vcmp.gt.f32.partialorder %v491_v27, 0.0  ;;  %v601_v33 = vmul.f32 0.2, %v491_v27  ;;  %v502_v35 = vadd.f32 %v1142_v29, %v1434_v19  ;;  %v493_v37 = vpop.f32.mrb[3].mxu1  ;;  %v619_v38 = vsel %vm555_vm1, %v435_v22, %v587_v30 }
 0x12a   : > { %v635_v39 = vsel %vm571_vm2, %v499_v23, %v603_v31  ;;  %v430_v40 = vadd.f32 %v1434_v19, %v429_v36  ;;  %v494_v41 = vadd.f32 %v1434_v19, %v493_v37  ;;  %vm556_vm5 = vcmp.gt.f32.partialorder %v438_v34, 0.0 }
 0x12b   : > { %v588_v42 = vmul.f32 0.2, %v438_v34  ;;  %vm572_vm6 = vcmp.gt.f32.partialorder %v502_v35, 0.0  ;;  %v604_v43 = vmul.f32 0.2, %v502_v35  ;;  %v617_v46 = vsel %vm553_vm3, %v427_v26, %v585_v32 }
 0x12c   : > { %vm554_vm7 = vcmp.gt.f32.partialorder %v430_v40, 0.0  ;;  %v586_v44 = vmul.f32 0.2, %v430_v40  ;;  %vm570_vm8 = vcmp.gt.f32.partialorder %v494_v41, 0.0  ;;  %v602_v45 = vmul.f32 0.2, %v494_v41 }
 0x12d   : > { %v633_v47 = vsel %vm569_vm4, %v491_v27, %v601_v33  ;;  %v620_v48 = vsel %vm556_vm5, %v438_v34, %v588_v42  ;;  %v636_v49 = vsel %vm572_vm6, %v502_v35, %v604_v43  ;;  %v1129_v50 = vpop.f32.mrb[4].mxu0  ;;  %v1145_v51 = vpop.f32.mrb[4].mxu1 }
 0x12e   : > { %v1011_v52 = vpack.c.bf16 %v620_v48, %v619_v38  ;;  %v1051_v53 = vpack.c.bf16 %v636_v49, %v635_v39  ;;  %v618_v54 = vsel %vm554_vm7, %v430_v40, %v586_v44  ;;  %v634_v55 = vsel %vm570_vm8, %v494_v41, %v602_v45  ;;  %v442_v56 = vpop.f32.mrb[5].mxu0  ;;  %v506_v57 = vpop.f32.mrb[5].mxu1 }
 0x12f   : > { %v1006_v58 = vpack.c.bf16 %v618_v54, %v617_v46  ;;  %v1046_v59 = vpack.c.bf16 %v634_v55, %v633_v47  ;;  %v451_v60 = vadd.f32 %v1129_v50, %v1434_v19  ;;  %v515_v61 = vadd.f32 %v1145_v51, %v1434_v19  ;;  %v1130_v62 = vpop.f32.mrb[6].mxu0  ;;  %v1146_v63 = vpop.f32.mrb[6].mxu1 }
 0x130   : > { %1083 = vst [vmem:[%s1451_s24 + $0x8] sm:$0xff] %v1011_v52   ;;  %1091 = vst [vmem:[%s1451_s24 + $0x48] sm:$0xff] %v1051_v53   ;;  %v443_v0 = vadd.f32 %v1434_v19, %v442_v56  ;;  %v507_v1 = vadd.f32 %v1434_v19, %v506_v57  ;;  %v454_v2 = vadd.f32 %v1130_v62, %v1434_v19  ;;  %v445_v4 = vpop.f32.mrb[7].mxu0  ;;  %v509_v5 = vpop.f32.mrb[7].mxu1 }
 0x131   : > { %v518_v3 = vadd.f32 %v1146_v63, %v1434_v19  ;;  %1007 = vst [vmem:[%s1451_s24] sm:$0xff] %v1006_v58   ;;  %1090 = vst [vmem:[%s1451_s24 + $0x40] sm:$0xff] %v1046_v59   ;;  %vm559_vm9 = vcmp.gt.f32.partialorder %v451_v60, 0.0  ;;  %v591_v6 = vmul.f32 0.2, %v451_v60  ;;  %vm575_vm10 = vcmp.gt.f32.partialorder %v515_v61, 0.0 }
 0x132   : > { %v607_v7 = vmul.f32 0.2, %v515_v61  ;;  %vm557_vm11 = vcmp.gt.f32.partialorder %v443_v0, 0.0  ;;  %v589_v8 = vmul.f32 0.2, %v443_v0  ;;  %vm573_vm12 = vcmp.gt.f32.partialorder %v507_v1, 0.0 }
 0x133   : > { %v623_v9 = vsel %vm559_vm9, %v451_v60, %v591_v6  ;;  %v605_v10 = vmul.f32 0.2, %v507_v1  ;;  %vm560_vm13 = vcmp.gt.f32.partialorder %v454_v2, 0.0  ;;  %v592_v11 = vmul.f32 0.2, %v454_v2 }
 0x134   : > { %v639_v12 = vsel %vm575_vm10, %v515_v61, %v607_v7  ;;  %v621_v13 = vsel %vm557_vm11, %v443_v0, %v589_v8  ;;  %vm576_vm14 = vcmp.gt.f32.partialorder %v518_v3, 0.0  ;;  %v608_v14 = vmul.f32 0.2, %v518_v3  ;;  %v1133_v15 = vpop.f32.mrb[8].mxu0 }
 0x135   : > { %v1149_v16 = vpop.f32.mrb[8].mxu1  ;;  %v624_v17 = vsel %vm560_vm13, %v454_v2, %v592_v11  ;;  %v446_v18 = vadd.f32 %v1434_v19, %v445_v4  ;;  %v510_v20 = vadd.f32 %v1434_v19, %v509_v5  ;;  %v467_v21 = vadd.f32 %v1133_v15, %v1434_v19  ;;  %v458_v22 = vpop.f32.mrb[9].mxu0 }
 0x136   : > { %v522_v23 = vpop.f32.mrb[9].mxu1  ;;  %v1021_v24 = vpack.c.bf16 %v624_v17, %v623_v9  ;;  %v640_v25 = vsel %vm576_vm14, %v518_v3, %v608_v14  ;;  %v531_v26 = vadd.f32 %v1149_v16, %v1434_v19  ;;  %v459_v27 = vadd.f32 %v1434_v19, %v458_v22  ;;  %v1134_v28 = vpop.f32.mrb[10].mxu0 }
 0x137   : > { %v1150_v29 = vpop.f32.mrb[10].mxu1  ;;  %v1061_v30 = vpack.c.bf16 %v640_v25, %v639_v12  ;;  %vm558_vm15 = vcmp.gt.f32.partialorder %v446_v18, 0.0  ;;  %v590_v31 = vmul.f32 0.2, %v446_v18  ;;  %vm574_vm0 = vcmp.gt.f32.partialorder %v510_v20, 0.0  ;;  %v461_v32 = vpop.f32.mrb[11].mxu0 }
 0x138   : > { %v525_v33 = vpop.f32.mrb[11].mxu1  ;;  %1085 = vst [vmem:[%s1451_s24 + $0x18] sm:$0xff] %v1021_v24   ;;  %v606_v34 = vmul.f32 0.2, %v510_v20  ;;  %vm563_vm1 = vcmp.gt.f32.partialorder %v467_v21, 0.0  ;;  %vm579_vm2 = vcmp.gt.f32.partialorder %v531_v26, 0.0  ;;  %v637_v36 = vsel %vm573_vm12, %v507_v1, %v605_v10 }
 0x139   : > { %v595_v35 = vmul.f32 0.2, %v467_v21  ;;  %1093 = vst [vmem:[%s1451_s24 + $0x58] sm:$0xff] %v1061_v30   ;;  %v622_v37 = vsel %vm558_vm15, %v446_v18, %v590_v31  ;;  %v611_v38 = vmul.f32 0.2, %v531_v26  ;;  %vm561_vm3 = vcmp.gt.f32.partialorder %v459_v27, 0.0 }
 0x13a   : > { %v1016_v39 = vpack.c.bf16 %v622_v37, %v621_v13  ;;  %v638_v40 = vsel %vm574_vm0, %v510_v20, %v606_v34  ;;  %v593_v41 = vmul.f32 0.2, %v459_v27  ;;  %v523_v42 = vadd.f32 %v1434_v19, %v522_v23 }
 0x13b   : > { %v1056_v43 = vpack.c.bf16 %v638_v40, %v637_v36  ;;  %v627_v44 = vsel %vm563_vm1, %v467_v21, %v595_v35  ;;  %v643_v45 = vsel %vm579_vm2, %v531_v26, %v611_v38  ;;  %v470_v46 = vadd.f32 %v1134_v28, %v1434_v19 }
 0x13c   : > { %1084 = vst [vmem:[%s1451_s24 + $0x10] sm:$0xff] %v1016_v39   ;;  %vm577_vm4 = vcmp.gt.f32.partialorder %v523_v42, 0.0  ;;  %v609_v47 = vmul.f32 0.2, %v523_v42  ;;  %v534_v48 = vadd.f32 %v1150_v29, %v1434_v19  ;;  %v462_v49 = vadd.f32 %v1434_v19, %v461_v32  ;;  %v1137_v50 = vpop.f32.mrb[12].mxu0 }
 0x13d   : > { %v1153_v51 = vpop.f32.mrb[12].mxu1  ;;  %1092 = vst [vmem:[%s1451_s24 + $0x50] sm:$0xff] %v1056_v43   ;;  %vm564_vm5 = vcmp.gt.f32.partialorder %v470_v46, 0.0  ;;  %v596_v52 = vmul.f32 0.2, %v470_v46  ;;  %v526_v53 = vadd.f32 %v1434_v19, %v525_v33  ;;  %v483_v54 = vadd.f32 %v1137_v50, %v1434_v19  ;;  %v474_v55 = vpop.f32.mrb[13].mxu0 }
 0x13e   : > { %v538_v56 = vpop.f32.mrb[13].mxu1  ;;  %v625_v57 = vsel %vm561_vm3, %v459_v27, %v593_v41  ;;  %vm580_vm6 = vcmp.gt.f32.partialorder %v534_v48, 0.0  ;;  %v612_v58 = vmul.f32 0.2, %v534_v48  ;;  %vm562_vm7 = vcmp.gt.f32.partialorder %v462_v49, 0.0  ;;  %v1138_v59 = vpop.f32.mrb[14].mxu0 }
 0x13f   : > { %v1154_v60 = vpop.f32.mrb[14].mxu1  ;;  %v628_v61 = vsel %vm564_vm5, %v470_v46, %v596_v52  ;;  %v594_v62 = vmul.f32 0.2, %v462_v49  ;;  %vm578_vm8 = vcmp.gt.f32.partialorder %v526_v53, 0.0  ;;  %v610_v63 = vmul.f32 0.2, %v526_v53 }
 0x140   : > { %v477_v0 = vpop.f32.mrb[15].mxu0  ;;  %v641_v1 = vsel %vm577_vm4, %v523_v42, %v609_v47  ;;  %v1031_v2 = vpack.c.bf16 %v628_v61, %v627_v44  ;;  %v644_v3 = vsel %vm580_vm6, %v534_v48, %v612_v58  ;;  %v599_v4 = vmul.f32 0.2, %v483_v54  ;;  %v541_v5 = vpop.f32.mrb[15].mxu1 }
 0x141   : > { %v1071_v6 = vpack.c.bf16 %v644_v3, %v643_v45  ;;  %v626_v7 = vsel %vm562_vm7, %v462_v49, %v594_v62  ;;  %v642_v8 = vsel %vm578_vm8, %v526_v53, %v610_v63  ;;  %v547_v9 = vadd.f32 %v1153_v51, %v1434_v19 }
 0x142   : > { %1087 = vst [vmem:[%s1451_s24 + $0x28] sm:$0xff] %v1031_v2   ;;  %v1026_v10 = vpack.c.bf16 %v626_v7, %v625_v57  ;;  %v1066_v11 = vpack.c.bf16 %v642_v8, %v641_v1  ;;  %vm567_vm9 = vcmp.gt.f32.partialorder %v483_v54, 0.0  ;;  %v475_v12 = vadd.f32 %v1434_v19, %v474_v55 }
 0x143   : > { %1095 = vst [vmem:[%s1451_s24 + $0x68] sm:$0xff] %v1071_v6   ;;  %vm583_vm10 = vcmp.gt.f32.partialorder %v547_v9, 0.0  ;;  %v615_v13 = vmul.f32 0.2, %v547_v9  ;;  %v539_v14 = vadd.f32 %v1434_v19, %v538_v56  ;;  %v486_v15 = vadd.f32 %v1138_v59, %v1434_v19 }
 0x144   : > { %1086 = vst [vmem:[%s1451_s24 + $0x20] sm:$0xff] %v1026_v10   ;;  %1094 = vst [vmem:[%s1451_s24 + $0x60] sm:$0xff] %v1066_v11   ;;  %v597_v16 = vmul.f32 0.2, %v475_v12  ;;  %v550_v17 = vadd.f32 %v1154_v60, %v1434_v19  ;;  %v478_v18 = vadd.f32 %v1434_v19, %v477_v0  ;;  %v631_v20 = vsel %vm567_vm9, %v483_v54, %v599_v4 }
 0x145   : > { %vm565_vm11 = vcmp.gt.f32.partialorder %v475_v12, 0.0  ;;  %vm568_vm12 = vcmp.gt.f32.partialorder %v486_v15, 0.0  ;;  %v647_v21 = vsel %vm583_vm10, %v547_v9, %v615_v13  ;;  %v600_v22 = vmul.f32 0.2, %v486_v15 }
 0x146   : > { %vm584_vm13 = vcmp.gt.f32.partialorder %v550_v17, 0.0  ;;  %v616_v23 = vmul.f32 0.2, %v550_v17  ;;  %vm581_vm14 = vcmp.gt.f32.partialorder %v539_v14, 0.0  ;;  %vm566_vm15 = vcmp.gt.f32.partialorder %v478_v18, 0.0 }
 0x147   : > { %v598_v24 = vmul.f32 0.2, %v478_v18  ;;  %v542_v25 = vadd.f32 %v1434_v19, %v541_v5  ;;  %v629_v26 = vsel %vm565_vm11, %v475_v12, %v597_v16  ;;  %v613_v27 = vmul.f32 0.2, %v539_v14 }
 0x148   : > { %v632_v28 = vsel %vm568_vm12, %v486_v15, %v600_v22  ;;  %v648_v29 = vsel %vm584_vm13, %v550_v17, %v616_v23 }
 0x149   : > { %v1041_v30 = vpack.c.bf16 %v632_v28, %v631_v20  ;;  %v1081_v31 = vpack.c.bf16 %v648_v29, %v647_v21  ;;  %v630_v32 = vsel %vm566_vm15, %v478_v18, %v598_v24  ;;  %vm582_vm0 = vcmp.gt.f32.partialorder %v542_v25, 0.0 }
 0x14a   : > { %v1036_v33 = vpack.c.bf16 %v630_v32, %v629_v26  ;;  %v614_v34 = vmul.f32 0.2, %v542_v25  ;;  %v645_v35 = vsel %vm581_vm14, %v539_v14, %v613_v27 }
 0x14b   : > { %1089 = vst [vmem:[%s1451_s24 + $0x38] sm:$0xff] %v1041_v30   ;;  %1097 = vst [vmem:[%s1451_s24 + $0x78] sm:$0xff] %v1081_v31  }
 0x14c   : > { %1088 = vst [vmem:[%s1451_s24 + $0x30] sm:$0xff] %v1036_v33   ;;  %v646_v36 = vsel %vm582_vm0, %v542_v25, %v614_v34 }
 0x14d   : > { %v1076_v37 = vpack.c.bf16 %v646_v36, %v645_v35 }
 0x14f   : > { %1096 = vst [vmem:[%s1451_s24 + $0x70] sm:$0xff] %v1076_v37  }
 0x150 PF: > { %s15_s12 = sadd.s32 1, %s1281_s12  }
 0x151   : > { %p12_p5 = scmp.ge.s32.totalorder %s15_s12, 4  }
 0x153   :  { %14 = sbr.rel (!%p12_p5) target bundleno = 2 (0x2), region = 71 }
 0x15a   :  { %830 = vsyncpa [#allocation3], 1 }
 0x15b   :  { %832 = vsyncpa [#allocation3 + $0x1], 1 }
 0x15c   :  { %833 = vsyncpa [#allocation5], 1 }

// kernel: discriminator_forward.5
= control target key start
LH: loop header
LB: loop body
LE: loop exit
PB: predicated region body
PF: predicated region fallthrough
CT: control target
= control target key end

     0   :  { %s1728_s12 = smov 0   ;;  %s2016_s0 = inlined_call_operand.vmem [shape: bf16[2,64,1024], index: 0, kind: input, shape index: {}]   ;;  %s2017_s1 = inlined_call_operand.vmem [shape: bf16[1024,128], index: 1, kind: input, shape index: {}]   ;;  %s2018_s2 = inlined_call_operand.vmem [shape: f32[1,128], index: 2, kind: input, shape index: {}]   ;;  %s2019_s3 = inlined_call_operand.vmem [shape: bf16[2,64,128], index: 3, kind: output, shape index: {}]  }
   0x1 LB: > { %s1317_s13 = sadd.s32 4294967295, %s1706_s12   ;;  %p1321_p0 = scmp.ge.s32.totalorder %s1706_s12, 1  ;;  %s1706_s12 = sphi %s1728_s12, %s13_s12  }
   0x2   : > { %p137_p1 = scmp.lt.s32.totalorder %s1706_s12, 3 }
   0x4   : > { %p138_p2 = pnand %p1321_p0, %p137_p1 }
   0x5   : > { %v1634_v0 = vld [vmem:[%s2017_s1 + $0x40] sm:$0xff] (!%p138_p2)   ;;  %v1638_v4 = vld [vmem:[%s2017_s1 + $0x48] sm:$0xff] (!%p138_p2)   ;;  %v1642_v8 = vld [vmem:[%s2017_s1 + $0x50] sm:$0xff] (!%p138_p2)   ;;  %p161_p3 = scmp.lt.s32.totalorder (!%p138_p2), %s1317_s13, 1 }
   0x6   : > { %141 = sbr.rel (%p138_p2) target bundleno = 389 (0x185), region = 32  ;;  %v1635_v1 = vld [vmem:[%s2017_s1 + $0xc0] sm:$0xff] (!%p138_p2)   ;;  %1466 = vmatprep.subr.bf16.mxu0 (!%p138_p2), %v1634_v0  ;;  %v1639_v5 = vld [vmem:[%s2017_s1 + $0xc8] sm:$0xff] (!%p138_p2)   ;;  %v1643_v9 = vld [vmem:[%s2017_s1 + $0xd0] sm:$0xff] (!%p138_p2)  }
   0x7   : > { %v1636_v2 = vld [vmem:[%s2017_s1] sm:$0xff] (!%p138_p2)   ;;  %1506 = vmatprep.subr.bf16.mxu1 (!%p138_p2), %v1635_v1  ;;  %v1640_v6 = vld [vmem:[%s2017_s1 + $0x8] sm:$0xff] (!%p138_p2)   ;;  %v1644_v10 = vld [vmem:[%s2017_s1 + $0x10] sm:$0xff] (!%p138_p2)  }
   0x8   : > { %v1637_v3 = vld [vmem:[%s2017_s1 + $0x80] sm:$0xff] (!%p138_p2)   ;;  %1467 = vmatpush3.bf16.msra.mxu0 (!%p138_p2), %v1636_v2  ;;  %v1641_v7 = vld [vmem:[%s2017_s1 + $0x88] sm:$0xff] (!%p138_p2)   ;;  %v1645_v11 = vld [vmem:[%s2017_s1 + $0x90] sm:$0xff] (!%p138_p2)  }
   0x9   : > { %1507 = vmatpush3.bf16.msra.mxu1 (!%p138_p2), %v1637_v3  ;;  %1468 = vmatprep.subr.bf16.mxu0 (!%p138_p2), %v1638_v4  ;;  %v1646_v12 = vld [vmem:[%s2017_s1 + $0x58] sm:$0xff] (!%p138_p2)   ;;  %v1650_v16 = vld [vmem:[%s2017_s1 + $0x60] sm:$0xff] (!%p138_p2)   ;;  %v1654_v20 = vld [vmem:[%s2017_s1 + $0x68] sm:$0xff] (!%p138_p2)  }
   0xa   : > { %1508 = vmatprep.subr.bf16.mxu1 (!%p138_p2), %v1639_v5  ;;  %v1647_v13 = vld [vmem:[%s2017_s1 + $0xd8] sm:$0xff] (!%p138_p2)   ;;  %v1651_v17 = vld [vmem:[%s2017_s1 + $0xe0] sm:$0xff] (!%p138_p2)   ;;  %v1655_v21 = vld [vmem:[%s2017_s1 + $0xe8] sm:$0xff] (!%p138_p2)  }
   0xb   : > { %v1648_v14 = vld [vmem:[%s2017_s1 + $0x18] sm:$0xff] (!%p138_p2)   ;;  %v1652_v18 = vld [vmem:[%s2017_s1 + $0x20] sm:$0xff] (!%p138_p2)   ;;  %v1656_v22 = vld [vmem:[%s2017_s1 + $0x28] sm:$0xff] (!%p138_p2)  }
   0xc   : > { %1469 = vmatpush3.bf16.msra.mxu0 (!%p138_p2), %v1640_v6  ;;  %v1649_v15 = vld [vmem:[%s2017_s1 + $0x98] sm:$0xff] (!%p138_p2)   ;;  %v1653_v19 = vld [vmem:[%s2017_s1 + $0xa0] sm:$0xff] (!%p138_p2)   ;;  %v1657_v23 = vld [vmem:[%s2017_s1 + $0xa8] sm:$0xff] (!%p138_p2)  }
   0xd   : > { %1509 = vmatpush3.bf16.msra.mxu1 %v1641_v7  ;;  %1470 = vmatprep.subr.bf16.mxu0 %v1642_v8  ;;  %s2021_s13 = smov (!%p161_p3, %s1317_s13), 1  ;;  %v1658_v24 = vld [vmem:[%s2017_s1 + $0x70] sm:$0xff]   ;;  %v1662_v28 = vld [vmem:[%s2017_s1 + $0x78] sm:$0xff]   ;;  %v1666_v40 = vld [vmem:[%s2017_s1 + $0x140] sm:$0xff]  }
   0xe   : > { %1510 = vmatprep.subr.bf16.mxu1 %v1643_v9  ;;  %v1659_v25 = vld [vmem:[%s2017_s1 + $0xf0] sm:$0xff]   ;;  %s1433_s18 = sshll.u32 %s2021_s13, 8  ;;  %v1663_v29 = vld [vmem:[%s2017_s1 + $0xf8] sm:$0xff]   ;;  %v1667_v41 = vld [vmem:[%s2017_s1 + $0x1c0] sm:$0xff]  }
   0xf   : > { %v1660_v26 = vld [vmem:[%s2017_s1 + $0x30] sm:$0xff]   ;;  %s1836_s27 = scalar_lea.vmem %s2016_s0, %s1433_s18  ;;  %v1664_v30 = vld [vmem:[%s2017_s1 + $0x38] sm:$0xff]   ;;  %v1668_v42 = vld [vmem:[%s2017_s1 + $0x100] sm:$0xff]  }
  0x10   : > { %1471 = vmatpush3.bf16.msra.mxu0 %v1644_v10  ;;  %v1661_v27 = vld [vmem:[%s2017_s1 + $0xb0] sm:$0xff]   ;;  %v1665_v31 = vld [vmem:[%s2017_s1 + $0xb8] sm:$0xff]   ;;  %v172_v32 = vld [vmem:[%s1836_s27] sm:$0xff] }
  0x11   : > { %1511 = vmatpush3.bf16.msra.mxu1 %v1645_v11  ;;  %1472 = vmatprep.subr.bf16.mxu0 %v1646_v12  ;;  %v176_v33 = vld [vmem:[%s1836_s27 + $0x20] sm:$0xff]  ;;  %v173_v34 = vld [vmem:[%s1836_s27 + $0x8] sm:$0xff]  ;;  %v1674_v56 = vld [vmem:[%s2017_s1 + $0x150] sm:$0xff]  }
  0x12   : > { %1512 = vmatprep.subr.bf16.mxu1 %v1647_v13  ;;  %v1327_v35 = vcombine.low %v172_v32, %v176_v33  ;;  %v1328_v36 = vcombine.high %v172_v32, %v176_v33  ;;  %v177_v37 = vld [vmem:[%s1836_s27 + $0x28] sm:$0xff]  ;;  %v1669_v43 = vld [vmem:[%s2017_s1 + $0x180] sm:$0xff]   ;;  %v1675_v57 = vld [vmem:[%s2017_s1 + $0x1d0] sm:$0xff]  }
  0x13   : > { %v1329_v38 = vcombine.low %v173_v34, %v177_v37  ;;  %v1330_v39 = vcombine.high %v173_v34, %v177_v37  ;;  %v1670_v44 = vld [vmem:[%s2017_s1 + $0x148] sm:$0xff]   ;;  %v180_v48 = vld [vmem:[%s1836_s27 + $0x40] sm:$0xff]  ;;  %v1676_v58 = vld [vmem:[%s2017_s1 + $0x110] sm:$0xff]  }
  0x14   : > { %1473 = vmatpush3.bf16.msra.mxu0 %v1648_v14  ;;  %915 = vmatprep.mubr.bf16.mxu0 %v1328_v36  ;;  %v1671_v45 = vld [vmem:[%s2017_s1 + $0x1c8] sm:$0xff]   ;;  %v184_v49 = vld [vmem:[%s1836_s27 + $0x60] sm:$0xff]  ;;  %v1677_v59 = vld [vmem:[%s2017_s1 + $0x190] sm:$0xff]  }
  0x15   : > { %1513 = vmatpush3.bf16.msra.mxu1 %v1649_v15  ;;  %1474 = vmatprep.subr.bf16.mxu0 %v1650_v16  ;;  %v1672_v46 = vld [vmem:[%s2017_s1 + $0x108] sm:$0xff]   ;;  %v1336_v50 = vcombine.high %v180_v48, %v184_v49  ;;  %v1335_v53 = vcombine.low %v180_v48, %v184_v49  ;;  %v1678_v60 = vld [vmem:[%s2017_s1 + $0x158] sm:$0xff]   ;;  %v188_v0 = vld [vmem:[%s1836_s27 + $0x80] sm:$0xff] }
  0x16   : > { %1514 = vmatprep.subr.bf16.mxu1 %v1651_v17  ;;  %980 = vmatprep.mubr.bf16.mxu1 %v1330_v39  ;;  %v1673_v47 = vld [vmem:[%s2017_s1 + $0x188] sm:$0xff]   ;;  %v1679_v61 = vld [vmem:[%s2017_s1 + $0x1d8] sm:$0xff]   ;;  %v192_v1 = vld [vmem:[%s1836_s27 + $0xa0] sm:$0xff] }
  0x17   : > { %v181_v51 = vld [vmem:[%s1836_s27 + $0x48] sm:$0xff]  ;;  %v1680_v62 = vld [vmem:[%s2017_s1 + $0x118] sm:$0xff]   ;;  %v1344_v4 = vcombine.high %v188_v0, %v192_v1  ;;  %v1343_v6 = vcombine.low %v188_v0, %v192_v1  ;;  %v1682_v8 = vld [vmem:[%s2017_s1 + $0x160] sm:$0xff]  }
  0x18   : > { %1475 = vmatpush3.bf16.msra.mxu0 %v1652_v18  ;;  %v185_v52 = vld [vmem:[%s1836_s27 + $0x68] sm:$0xff]  ;;  %v1681_v63 = vld [vmem:[%s2017_s1 + $0x198] sm:$0xff]   ;;  %v1683_v9 = vld [vmem:[%s2017_s1 + $0x1e0] sm:$0xff]  }
  0x19   : > { %1515 = vmatpush3.bf16.msra.mxu1 %v1653_v19  ;;  %1476 = vmatprep.subr.bf16.mxu0 %v1654_v20  ;;  %v1338_v54 = vcombine.high %v181_v51, %v185_v52  ;;  %v1337_v55 = vcombine.low %v181_v51, %v185_v52  ;;  %v189_v2 = vld [vmem:[%s1836_s27 + $0x88] sm:$0xff]  ;;  %v1684_v10 = vld [vmem:[%s2017_s1 + $0x120] sm:$0xff]   ;;  %v174_v32 = vld [vmem:[%s1836_s27 + $0x10] sm:$0xff] }
  0x1a   : > { %1516 = vmatprep.subr.bf16.mxu1 %v1655_v21  ;;  %v193_v3 = vld [vmem:[%s1836_s27 + $0xa8] sm:$0xff]  ;;  %v1685_v11 = vld [vmem:[%s2017_s1 + $0x1a0] sm:$0xff]   ;;  %v178_v33 = vld [vmem:[%s1836_s27 + $0x30] sm:$0xff] }
  0x1b   : > { %v1346_v5 = vcombine.high %v189_v2, %v193_v3  ;;  %v1345_v7 = vcombine.low %v189_v2, %v193_v3  ;;  %v1686_v12 = vld [vmem:[%s2017_s1 + $0x168] sm:$0xff]   ;;  %v196_v16 = vld [vmem:[%s1836_s27 + $0xc0] sm:$0xff]  ;;  %v1331_v34 = vcombine.low %v174_v32, %v178_v33  ;;  %v175_v36 = vld [vmem:[%s1836_s27 + $0x18] sm:$0xff] }
  0x1c   : > { %1477 = vmatpush3.bf16.msra.mxu0 %v1656_v22  ;;  %v1687_v13 = vld [vmem:[%s2017_s1 + $0x1e8] sm:$0xff]   ;;  %v200_v17 = vld [vmem:[%s1836_s27 + $0xe0] sm:$0xff]  ;;  %v179_v37 = vld [vmem:[%s1836_s27 + $0x38] sm:$0xff] }
  0x1d   : > { %1517 = vmatpush3.bf16.msra.mxu1 %v1657_v23  ;;  %1478 = vmatprep.subr.bf16.mxu0 %v1658_v24  ;;  %v1688_v14 = vld [vmem:[%s2017_s1 + $0x128] sm:$0xff]   ;;  %v1352_v19 = vcombine.high %v196_v16, %v200_v17  ;;  %v1351_v21 = vcombine.low %v196_v16, %v200_v17  ;;  %v1690_v24 = vld [vmem:[%s2017_s1 + $0x170] sm:$0xff]   ;;  %v1333_v39 = vcombine.low %v175_v36, %v179_v37  ;;  %v191_v48 = vld [vmem:[%s1836_s27 + $0x98] sm:$0xff] }
  0x1e   : > { %1518 = vmatprep.subr.bf16.mxu1 %v1659_v25  ;;  %v1689_v15 = vld [vmem:[%s2017_s1 + $0x1a8] sm:$0xff]   ;;  %v1691_v25 = vld [vmem:[%s2017_s1 + $0x1f0] sm:$0xff]   ;;  %v195_v49 = vld [vmem:[%s1836_s27 + $0xb8] sm:$0xff] }
  0x1f   : > { %v197_v18 = vld [vmem:[%s1836_s27 + $0xc8] sm:$0xff]  ;;  %v1326_v2 = vld [vmem:[%s2018_s2] ss:$0 sm:$0xff] }
  0x20   : > { %1479 = vmatpush3.bf16.msra.mxu0 %v1660_v26  ;;  %v201_v20 = vld [vmem:[%s1836_s27 + $0xe8] sm:$0xff]  ;;  %v1692_v26 = vld [vmem:[%s2017_s1 + $0x130] sm:$0xff]  }
  0x21   : > { %1519 = vmatpush3.bf16.msra.mxu1 %v1661_v27  ;;  %1480 = vmatprep.subr.bf16.mxu0 %v1662_v28  ;;  %v1354_v22 = vcombine.high %v197_v18, %v201_v20  ;;  %v1353_v23 = vcombine.low %v197_v18, %v201_v20  ;;  %v1693_v27 = vld [vmem:[%s2017_s1 + $0x1b0] sm:$0xff]   ;;  %v1694_v28 = vld [vmem:[%s2017_s1 + $0x178] sm:$0xff]  }
  0x22   : > { %1520 = vmatprep.subr.bf16.mxu1 %v1663_v29  ;;  %v1695_v29 = vld [vmem:[%s2017_s1 + $0x1f8] sm:$0xff]  }
  0x24   : > { %1481 = vmatpush3.bf16.msra.mxu0 %v1664_v30  ;;  %v1696_v30 = vld [vmem:[%s2017_s1 + $0x138] sm:$0xff]  }
  0x25   : > { %1521 = vmatpush3.bf16.msra.mxu1 %v1665_v31  ;;  %1546 = vmatprep.subr.bf16.mxu0 %v1666_v40  ;;  %v1697_v31 = vld [vmem:[%s2017_s1 + $0x1b8] sm:$0xff]   ;;  %v1334_v40 = vcombine.high %v175_v36, %v179_v37 }
  0x26   : > { %1586 = vmatprep.subr.bf16.mxu1 %v1667_v41  ;;  %v186_v41 = vld [vmem:[%s1836_s27 + $0x70] sm:$0xff] }
  0x27   : > { %916 = vmatmul.mubr.bf16.vlgmr.msra.gmra.mrb[0].mxu0 %v1327_v35  ;;  %v1332_v35 = vcombine.high %v174_v32, %v178_v33 }
  0x28   : > { %981 = vmatmul.mubr.bf16.vlgmr.msra.gmra.mrb[0].mxu1 %v1329_v38  ;;  %1547 = vmatpush3.bf16.msra.mxu0 %v1668_v42  ;;  %v182_v38 = vld [vmem:[%s1836_s27 + $0x50] sm:$0xff]  ;;  %v183_v42 = vld [vmem:[%s1836_s27 + $0x58] sm:$0xff] }
  0x29   : > { %1587 = vmatpush3.bf16.msra.mxu1 %v1669_v43  ;;  %1548 = vmatprep.subr.bf16.mxu0 %v1670_v44  ;;  %v187_v43 = vld [vmem:[%s1836_s27 + $0x78] sm:$0xff]  ;;  %v1340_v44 = vcombine.high %v182_v38, %v186_v41 }
  0x2a   : > { %1588 = vmatprep.subr.bf16.mxu1 %v1671_v45  ;;  %923 = vmatprep.mubr.bf16.mxu0 %v1336_v50  ;;  %v1342_v45 = vcombine.high %v183_v42, %v187_v43  ;;  %v1339_v50 = vcombine.low %v182_v38, %v186_v41  ;;  %v1341_v51 = vcombine.low %v183_v42, %v187_v43 }
  0x2b   : > { %988 = vmatprep.mubr.bf16.mxu1 %v1338_v54  ;;  %v198_v54 = vld [vmem:[%s1836_s27 + $0xd0] sm:$0xff] }
  0x2c   : > { %1549 = vmatpush3.bf16.msra.mxu0 %v1672_v46  ;;  %v190_v46 = vld [vmem:[%s1836_s27 + $0x90] sm:$0xff] }
  0x2d   : > { %1589 = vmatpush3.bf16.msra.mxu1 %v1673_v47  ;;  %1550 = vmatprep.subr.bf16.mxu0 %v1674_v56  ;;  %v194_v47 = vld [vmem:[%s1836_s27 + $0xb0] sm:$0xff]  ;;  %v199_v56 = vld [vmem:[%s1836_s27 + $0xd8] sm:$0xff] }
  0x2e   : > { %1590 = vmatprep.subr.bf16.mxu1 %v1675_v57  ;;  %v1348_v52 = vcombine.high %v190_v46, %v194_v47  ;;  %v203_v57 = vld [vmem:[%s1836_s27 + $0xf8] sm:$0xff] }
  0x2f   : > { %924 = vmatmul.mubr.bf16.gmra.mrb[4].mxu0 %v1335_v53  ;;  %v1350_v53 = vcombine.high %v191_v48, %v195_v49 }
  0x30   : > { %989 = vmatmul.mubr.bf16.gmra.mrb[4].mxu1 %v1337_v55  ;;  %1551 = vmatpush3.bf16.msra.mxu0 %v1676_v58  ;;  %v202_v55 = vld [vmem:[%s1836_s27 + $0xf0] sm:$0xff]  ;;  %v1347_v58 = vcombine.low %v190_v46, %v194_v47  ;;  %s1434_s27 = sshll.u32 %s2021_s13, 5 }
  0x31   : > { %1591 = vmatpush3.bf16.msra.mxu1 %v1677_v59  ;;  %1552 = vmatprep.subr.bf16.mxu0 %v1678_v60  ;;  %v1349_v59 = vcombine.low %v191_v48, %v195_v49  ;;  %v1356_v60 = vcombine.high %v198_v54, %v202_v55  ;;  %s170_s13 = scalar_lea.vmem %s2019_s3, %s1434_s27 }
  0x32   : > { %1592 = vmatprep.subr.bf16.mxu1 %v1679_v61  ;;  %931 = vmatprep.mubr.bf16.mxu0 %v1344_v4  ;;  %v1358_v61 = vcombine.high %v199_v56, %v203_v57 }
  0x33   : > { %996 = vmatprep.mubr.bf16.mxu1 %v1346_v5 }
  0x34   : > { %1553 = vmatpush3.bf16.msra.mxu0 %v1680_v62  ;;  %v1355_v62 = vcombine.low %v198_v54, %v202_v55 }
  0x35   : > { %1593 = vmatpush3.bf16.msra.mxu1 %v1681_v63  ;;  %1554 = vmatprep.subr.bf16.mxu0 %v1682_v8  ;;  %v1357_v63 = vcombine.low %v199_v56, %v203_v57 }
  0x36   : > { %1594 = vmatprep.subr.bf16.mxu1 %v1683_v9 }
  0x37   : > { %932 = vmatmul.mubr.bf16.gmra.mrb[8].mxu0 %v1343_v6 }
  0x38   : > { %997 = vmatmul.mubr.bf16.gmra.mrb[8].mxu1 %v1345_v7  ;;  %1555 = vmatpush3.bf16.msra.mxu0 %v1684_v10 }
  0x39   : > { %1595 = vmatpush3.bf16.msra.mxu1 %v1685_v11  ;;  %1556 = vmatprep.subr.bf16.mxu0 %v1686_v12 }
  0x3a   : > { %1596 = vmatprep.subr.bf16.mxu1 %v1687_v13  ;;  %939 = vmatprep.mubr.bf16.mxu0 %v1352_v19 }
  0x3b   : > { %1004 = vmatprep.mubr.bf16.mxu1 %v1354_v22 }
  0x3c   : > { %1557 = vmatpush3.bf16.msra.mxu0 %v1688_v14 }
  0x3d   : > { %1597 = vmatpush3.bf16.msra.mxu1 %v1689_v15  ;;  %1558 = vmatprep.subr.bf16.mxu0 %v1690_v24 }
  0x3e   : > { %1598 = vmatprep.subr.bf16.mxu1 %v1691_v25 }
  0x3f   : > { %940 = vmatmul.mubr.bf16.gmra.mrb[12].mxu0 %v1351_v21 }
  0x40   : > { %1005 = vmatmul.mubr.bf16.gmra.mrb[12].mxu1 %v1353_v23  ;;  %1559 = vmatpush3.bf16.msra.mxu0 %v1692_v26 }
  0x41   : > { %1599 = vmatpush3.bf16.msra.mxu1 %v1693_v27  ;;  %1560 = vmatprep.subr.bf16.mxu0 %v1694_v28 }
  0x42   : > { %1600 = vmatprep.subr.bf16.mxu1 %v1695_v29  ;;  %1045 = vmatprep.mubr.bf16.mxu0 %v1332_v35 }
  0x43   : > { %1110 = vmatprep.mubr.bf16.mxu1 %v1334_v40 }
  0x44   : > { %1561 = vmatpush3.bf16.msra.mxu0 %v1696_v30 }
  0x45   : > { %1601 = vmatpush3.bf16.msra.mxu1 %v1697_v31 }
  0x47   : > { %1046 = vmatmul.mubr.bf16.vlgmr.msra.gmra.mrb[16].mxu0 %v1331_v34 }
  0x48   : > { %1111 = vmatmul.mubr.bf16.vlgmr.msra.gmra.mrb[16].mxu1 %v1333_v39  ;;  %1053 = vmatprep.mubr.bf16.mxu0 %v1340_v44 }
  0x49   : > { %1118 = vmatprep.mubr.bf16.mxu1 %v1342_v45 }
  0x4f   : > { %1054 = vmatmul.mubr.bf16.gmra.mrb[20].mxu0 %v1339_v50 }
  0x50   : > { %1119 = vmatmul.mubr.bf16.gmra.mrb[20].mxu1 %v1341_v51  ;;  %1061 = vmatprep.mubr.bf16.mxu0 %v1348_v52 }
  0x51   : > { %1126 = vmatprep.mubr.bf16.mxu1 %v1350_v53 }
  0x57   : > { %1062 = vmatmul.mubr.bf16.gmra.mrb[24].mxu0 %v1347_v58 }
  0x58   : > { %1127 = vmatmul.mubr.bf16.gmra.mrb[24].mxu1 %v1349_v59  ;;  %1069 = vmatprep.mubr.bf16.mxu0 %v1356_v60 }
  0x59   : > { %1134 = vmatprep.mubr.bf16.mxu1 %v1358_v61 }
  0x5f   : > { %1070 = vmatmul.mubr.bf16.gmra.mrb[28].mxu0 %v1355_v62 }
  0x60   : > { %1135 = vmatmul.mubr.bf16.gmra.mrb[28].mxu1 %v1357_v63 }
  0xfa   : > { %v1482_v0 = vpop.f32.mrb[0].mxu0 }
  0xfb   : > { %v1522_v1 = vpop.f32.mrb[0].mxu1  ;;  %v1483_v3 = vpop.f32.mrb[1].mxu0 }
  0xfc   : > { %v1484_v4 = vadd.f32 %v1483_v3, %v1482_v0  ;;  %v1523_v5 = vpop.f32.mrb[1].mxu1  ;;  %v1485_v6 = vpop.f32.mrb[2].mxu0 }
  0xfd   : > { %v1524_v7 = vadd.f32 %v1523_v5, %v1522_v1  ;;  %v1525_v8 = vpop.f32.mrb[2].mxu1  ;;  %v1486_v9 = vpop.f32.mrb[3].mxu0 }
  0xfe   : > { %v918_v10 = vadd.f32 %v1484_v4, %v1326_v2  ;;  %v1487_v11 = vadd.f32 %v1486_v9, %v1485_v6  ;;  %v1526_v12 = vpop.f32.mrb[3].mxu1 }
  0xff   : > { %v1527_v13 = vadd.f32 %v1526_v12, %v1525_v8 }
 0x100   : > { %v983_v14 = vadd.f32 %v1524_v7, %v918_v10  ;;  %v921_v15 = vadd.f32 %v1487_v11, %v1326_v2 }
 0x102   : > { %v1975_v16 = vadd.f32 %v1527_v13, %v921_v15  ;;  %v1488_v17 = vpop.f32.mrb[4].mxu0 }
 0x103   : > { %v1528_v18 = vpop.f32.mrb[4].mxu1  ;;  %v1489_v19 = vpop.f32.mrb[5].mxu0 }
 0x104   : > { %v1490_v20 = vadd.f32 %v1489_v19, %v1488_v17  ;;  %v1529_v21 = vpop.f32.mrb[5].mxu1  ;;  %v1491_v22 = vpop.f32.mrb[6].mxu0 }
 0x105   : > { %v1530_v23 = vadd.f32 %v1529_v21, %v1528_v18  ;;  %v1531_v24 = vpop.f32.mrb[6].mxu1  ;;  %v1492_v25 = vpop.f32.mrb[7].mxu0 }
 0x106   : > { %v926_v26 = vadd.f32 %v1490_v20, %v1326_v2  ;;  %v1493_v27 = vadd.f32 %v1492_v25, %v1491_v22  ;;  %v1532_v28 = vpop.f32.mrb[7].mxu1 }
 0x107   : > { %v1533_v29 = vadd.f32 %v1532_v28, %v1531_v24 }
 0x108   : > { %v991_v30 = vadd.f32 %v1530_v23, %v926_v26  ;;  %v929_v31 = vadd.f32 %v1493_v27, %v1326_v2 }
 0x10a   : > { %v1977_v32 = vadd.f32 %v1533_v29, %v929_v31  ;;  %v1494_v33 = vpop.f32.mrb[8].mxu0 }
 0x10b   : > { %v1534_v34 = vpop.f32.mrb[8].mxu1  ;;  %v1495_v35 = vpop.f32.mrb[9].mxu0 }
 0x10c   : > { %v1535_v36 = vpop.f32.mrb[9].mxu1  ;;  %v1496_v37 = vadd.f32 %v1495_v35, %v1494_v33  ;;  %v1497_v39 = vpop.f32.mrb[10].mxu0 }
 0x10d   : > { %v1536_v38 = vadd.f32 %v1535_v36, %v1534_v34  ;;  %v1537_v40 = vpop.f32.mrb[10].mxu1  ;;  %v1498_v41 = vpop.f32.mrb[11].mxu0 }
 0x10e   : > { %v1538_v42 = vpop.f32.mrb[11].mxu1  ;;  %v934_v43 = vadd.f32 %v1496_v37, %v1326_v2  ;;  %v1499_v44 = vadd.f32 %v1498_v41, %v1497_v39 }
 0x10f   : > { %v1539_v45 = vadd.f32 %v1538_v42, %v1537_v40 }
 0x110   : > { %v1979_v46 = vadd.f32 %v1536_v38, %v934_v43  ;;  %v937_v47 = vadd.f32 %v1499_v44, %v1326_v2 }
 0x112   : > { %v1981_v48 = vadd.f32 %v1539_v45, %v937_v47  ;;  %v1500_v49 = vpop.f32.mrb[12].mxu0 }
 0x113   : > { %v1540_v50 = vpop.f32.mrb[12].mxu1  ;;  %v1501_v51 = vpop.f32.mrb[13].mxu0 }
 0x114   : > { %v1502_v52 = vadd.f32 %v1501_v51, %v1500_v49  ;;  %v1541_v53 = vpop.f32.mrb[13].mxu1  ;;  %v1503_v54 = vpop.f32.mrb[14].mxu0 }
 0x115   : > { %v1542_v55 = vadd.f32 %v1541_v53, %v1540_v50  ;;  %v1543_v56 = vpop.f32.mrb[14].mxu1  ;;  %v1504_v57 = vpop.f32.mrb[15].mxu0 }
 0x116   : > { %v942_v58 = vadd.f32 %v1502_v52, %v1326_v2  ;;  %v1505_v59 = vadd.f32 %v1504_v57, %v1503_v54  ;;  %v1544_v60 = vpop.f32.mrb[15].mxu1 }
 0x117   : > { %v1545_v61 = vadd.f32 %v1544_v60, %v1543_v56 }
 0x118   : > { %v1983_v62 = vadd.f32 %v1542_v55, %v942_v58  ;;  %v945_v63 = vadd.f32 %v1505_v59, %v1326_v2 }
 0x11a   : > { %v1985_v0 = vadd.f32 %v1545_v61, %v945_v63  ;;  %v1562_v1 = vpop.f32.mrb[16].mxu0 }
 0x11b   : > { %v1602_v3 = vpop.f32.mrb[16].mxu1  ;;  %v1563_v4 = vpop.f32.mrb[17].mxu0 }
 0x11c   : > { %v1564_v5 = vadd.f32 %v1563_v4, %v1562_v1  ;;  %v1603_v6 = vpop.f32.mrb[17].mxu1  ;;  %v1565_v7 = vpop.f32.mrb[18].mxu0 }
 0x11d   : > { %v1604_v8 = vadd.f32 %v1603_v6, %v1602_v3  ;;  %v1605_v9 = vpop.f32.mrb[18].mxu1  ;;  %v1566_v10 = vpop.f32.mrb[19].mxu0 }
 0x11e   : > { %v1048_v11 = vadd.f32 %v1564_v5, %v983_v14  ;;  %v1567_v12 = vadd.f32 %v1566_v10, %v1565_v7  ;;  %v1606_v13 = vpop.f32.mrb[19].mxu1 }
 0x11f   : > { %v1607_v15 = vadd.f32 %v1606_v13, %v1605_v9 }
 0x120   : > { %v1987_v17 = vadd.f32 %v1604_v8, %v1048_v11  ;;  %v1051_v18 = vadd.f32 %v1567_v12, %v1975_v16 }
 0x122   : > { %v1990_v2 = vadd.f32 %v1607_v15, %v1051_v18  ;;  %v1568_v19 = vpop.f32.mrb[20].mxu0 }
 0x123   : > { %v1608_v20 = vpop.f32.mrb[20].mxu1  ;;  %v1569_v21 = vpop.f32.mrb[21].mxu0 }
 0x124   : > { %v1143_v22 = vadd.f32 %v1990_v2, %v1987_v17  ;;  %v1570_v23 = vadd.f32 %v1569_v21, %v1568_v19  ;;  %v1609_v24 = vpop.f32.mrb[21].mxu1  ;;  %v1571_v25 = vpop.f32.mrb[22].mxu0 }
 0x125   : > { %v1610_v26 = vadd.f32 %v1609_v24, %v1608_v20  ;;  %v1611_v14 = vpop.f32.mrb[22].mxu1  ;;  %v1572_v27 = vpop.f32.mrb[23].mxu0 }
 0x126   : > { %v1056_v28 = vadd.f32 %v1570_v23, %v991_v30  ;;  %v1573_v29 = vadd.f32 %v1572_v27, %v1571_v25  ;;  %v1612_v31 = vpop.f32.mrb[23].mxu1 }
 0x127   : > { %v1613_v33 = vadd.f32 %v1612_v31, %v1611_v14 }
 0x128   : > { %v1121_v34 = vadd.f32 %v1610_v26, %v1056_v28  ;;  %v1059_v16 = vadd.f32 %v1573_v29, %v1977_v32 }
 0x12a   : > { %v1144_v35 = vadd.f32 %v1143_v22, %v1121_v34  ;;  %v1124_v36 = vadd.f32 %v1613_v33, %v1059_v16  ;;  %v1574_v37 = vpop.f32.mrb[24].mxu0 }
 0x12b   : > { %v1614_v38 = vpop.f32.mrb[24].mxu1  ;;  %v1575_v39 = vpop.f32.mrb[25].mxu0 }
 0x12c   : > { %v1145_v40 = vadd.f32 %v1144_v35, %v1124_v36  ;;  %v1576_v41 = vadd.f32 %v1575_v39, %v1574_v37  ;;  %v1615_v42 = vpop.f32.mrb[25].mxu1  ;;  %v1577_v43 = vpop.f32.mrb[26].mxu0 }
 0x12d   : > { %v1616_v44 = vadd.f32 %v1615_v42, %v1614_v38  ;;  %v1617_v45 = vpop.f32.mrb[26].mxu1  ;;  %v1578_v47 = vpop.f32.mrb[27].mxu0 }
 0x12e   : > { %v1064_v30 = vadd.f32 %v1576_v41, %v1979_v46  ;;  %v1579_v49 = vadd.f32 %v1578_v47, %v1577_v43  ;;  %v1618_v50 = vpop.f32.mrb[27].mxu1 }
 0x12f   : > { %v1619_v51 = vadd.f32 %v1618_v50, %v1617_v45 }
 0x130   : > { %v1129_v52 = vadd.f32 %v1616_v44, %v1064_v30  ;;  %v1067_v32 = vadd.f32 %v1579_v49, %v1981_v48 }
 0x132   : > { %v1146_v53 = vadd.f32 %v1145_v40, %v1129_v52  ;;  %v1132_v54 = vadd.f32 %v1619_v51, %v1067_v32  ;;  %v1580_v55 = vpop.f32.mrb[28].mxu0 }
 0x133   : > { %v1620_v56 = vpop.f32.mrb[28].mxu1  ;;  %v1581_v57 = vpop.f32.mrb[29].mxu0 }
 0x134   : > { %v1147_v58 = vadd.f32 %v1146_v53, %v1132_v54  ;;  %v1582_v59 = vadd.f32 %v1581_v57, %v1580_v55  ;;  %v1621_v60 = vpop.f32.mrb[29].mxu1  ;;  %v1583_v61 = vpop.f32.mrb[30].mxu0 }
 0x135   : > { %v1622_v63 = vadd.f32 %v1621_v60, %v1620_v56  ;;  %v1623_v1 = vpop.f32.mrb[30].mxu1  ;;  %v1584_v3 = vpop.f32.mrb[31].mxu0 }
 0x136   : > { %v1072_v46 = vadd.f32 %v1582_v59, %v1983_v62  ;;  %v1585_v4 = vadd.f32 %v1584_v3, %v1583_v61  ;;  %v1624_v5 = vpop.f32.mrb[31].mxu1 }
 0x137   : > { %v1625_v6 = vadd.f32 %v1624_v5, %v1623_v1 }
 0x138   : > { %v1137_v7 = vadd.f32 %v1622_v63, %v1072_v46  ;;  %v1075_v48 = vadd.f32 %v1585_v4, %v1985_v0 }
 0x13a   : > { %v1148_v8 = vadd.f32 %v1147_v58, %v1137_v7  ;;  %v1140_v9 = vadd.f32 %v1625_v6, %v1075_v48 }
 0x13c   : > { %v1149_v10 = vadd.f32 %v1148_v8, %v1140_v9 }
 0x13e   : > { %v1150_v11 = vrot.slane %v1149_v10, 4 }
 0x140   : > { %v1151_v12 = vadd.f32 %v1150_v11, %v1149_v10 }
 0x142   : > { %v1152_v13 = vrot.slane %v1151_v12, 2 }
 0x144   : > { %v1153_v15 = vadd.f32 %v1152_v13, %v1151_v12 }
 0x146   : > { %v1154_v18 = vrot.slane %v1153_v15, 1 }
 0x148   : > { %v1155_v19 = vadd.f32 %v1154_v18, %v1153_v15 }
 0x14a   : > { %v1157_v20 = vmul.f32 0.015625, %v1155_v19 }
 0x14c   : > { %v1158_v21 = vsub.f32 %v1987_v17, %v1157_v20  ;;  %v1159_v62 = vsub.f32 %v1990_v2, %v1157_v20  ;;  %v1160_v22 = vsub.f32 %v1121_v34, %v1157_v20  ;;  %v1161_v23 = vsub.f32 %v1124_v36, %v1157_v20 }
 0x14d   : > { %v1162_v24 = vsub.f32 %v1129_v52, %v1157_v20  ;;  %v1163_v25 = vsub.f32 %v1132_v54, %v1157_v20  ;;  %v1164_v26 = vsub.f32 %v1137_v7, %v1157_v20  ;;  %v1165_v0 = vsub.f32 %v1140_v9, %v1157_v20 }
 0x14e   : > { %v1166_v14 = vmul.f32 %v1158_v21, %v1158_v21  ;;  %v1167_v27 = vmul.f32 %v1159_v62, %v1159_v62  ;;  %v1168_v28 = vmul.f32 %v1160_v22, %v1160_v22  ;;  %v1169_v31 = vmul.f32 %v1161_v23, %v1161_v23 }
 0x14f   : > { %v1170_v16 = vmul.f32 %v1162_v24, %v1162_v24  ;;  %v1171_v37 = vmul.f32 %v1163_v25, %v1163_v25  ;;  %v1172_v39 = vmul.f32 %v1164_v26, %v1164_v26  ;;  %v1173_v40 = vmul.f32 %v1165_v0, %v1165_v0 }
 0x150   : > { %v1174_v29 = vadd.f32 %v1167_v27, %v1166_v14 }
 0x152   : > { %v1175_v33 = vadd.f32 %v1174_v29, %v1168_v28 }
 0x154   : > { %v1176_v35 = vadd.f32 %v1175_v33, %v1169_v31 }
 0x156   : > { %v1177_v38 = vadd.f32 %v1176_v35, %v1170_v16 }
 0x158   : > { %v1178_v17 = vadd.f32 %v1177_v38, %v1171_v37 }
 0x15a   : > { %v1179_v2 = vadd.f32 %v1178_v17, %v1172_v39 }
 0x15c   : > { %v1180_v34 = vadd.f32 %v1179_v2, %v1173_v40 }
 0x15e   : > { %v1181_v36 = vrot.slane %v1180_v34, 4 }
 0x160   : > { %v1182_v41 = vadd.f32 %v1181_v36, %v1180_v34 }
 0x162   : > { %v1183_v42 = vrot.slane %v1182_v41, 2 }
 0x164   : > { %v1184_v43 = vadd.f32 %v1183_v42, %v1182_v41 }
 0x166   : > { %v1185_v44 = vrot.slane %v1184_v43, 1 }
 0x168   : > { %v1186_v45 = vadd.f32 %v1185_v44, %v1184_v43 }
 0x16a   : > { %v1187_v47 = vmul.f32 0.015625, %v1186_v45 }
 0x16c   : > { %v1188_v30 = vadd.f32 1e-05, %v1187_v47 }
 0x16e   : > { %1698 = vrsqrt.f32 %v1188_v30 }
 0x178   : > { %v1699_v49 = vpop.eup %1698 }
 0x179   : > { %v1190_v50 = vmul.f32 %v1699_v49, %v1158_v21  ;;  %v1191_v51 = vmul.f32 %v1699_v49, %v1159_v62  ;;  %v1192_v52 = vmul.f32 %v1699_v49, %v1160_v22  ;;  %v1193_v32 = vmul.f32 %v1699_v49, %v1161_v23 }
 0x17a   : > { %v1194_v53 = vmul.f32 %v1699_v49, %v1162_v24  ;;  %v1195_v54 = vmul.f32 %v1699_v49, %v1163_v25  ;;  %v1196_v55 = vmul.f32 %v1699_v49, %v1164_v26  ;;  %v1197_v56 = vmul.f32 %v1699_v49, %v1165_v0 }
 0x17b   : > { %vm1198_vm0 = vcmp.gt.f32.partialorder %v1190_v50, 0.0  ;;  %vm1199_vm1 = vcmp.gt.f32.partialorder %v1191_v51, 0.0  ;;  %vm1200_vm2 = vcmp.gt.f32.partialorder %v1192_v52, 0.0  ;;  %vm1201_vm3 = vcmp.gt.f32.partialorder %v1193_v32, 0.0 }
 0x17c   : > { %vm1202_vm4 = vcmp.gt.f32.partialorder %v1194_v53, 0.0  ;;  %vm1203_vm5 = vcmp.gt.f32.partialorder %v1195_v54, 0.0  ;;  %vm1204_vm6 = vcmp.gt.f32.partialorder %v1196_v55, 0.0  ;;  %vm1205_vm7 = vcmp.gt.f32.partialorder %v1197_v56, 0.0 }
 0x17d   : > { %v1206_v57 = vmul.f32 0.2, %v1190_v50  ;;  %v1207_v58 = vmul.f32 0.2, %v1191_v51  ;;  %v1208_v59 = vmul.f32 0.2, %v1192_v52 }
 0x17e   : > { %v1209_v60 = vmul.f32 0.2, %v1193_v32  ;;  %v1210_v61 = vmul.f32 0.2, %v1194_v53  ;;  %v1211_v63 = vmul.f32 0.2, %v1195_v54 }
 0x17f   : > { %v1212_v1 = vmul.f32 0.2, %v1196_v55  ;;  %v1213_v3 = vmul.f32 0.2, %v1197_v56  ;;  %v1214_v46 = vsel %vm1198_vm0, %v1190_v50, %v1206_v57  ;;  %v1215_v4 = vsel %vm1199_vm1, %v1191_v51, %v1207_v58 }
 0x180   : > { %v1216_v5 = vsel %vm1200_vm2, %v1192_v52, %v1208_v59  ;;  %v1217_v6 = vsel %vm1201_vm3, %v1193_v32, %v1209_v60  ;;  %v1218_v7 = vsel %vm1202_vm4, %v1194_v53, %v1210_v61  ;;  %v1219_v48 = vsel %vm1203_vm5, %v1195_v54, %v1211_v63 }
 0x181   : > { %v1220_v8 = vsel %vm1204_vm6, %v1196_v55, %v1212_v1  ;;  %v1221_v9 = vsel %vm1205_vm7, %v1197_v56, %v1213_v3  ;;  %v1446_v10 = vpack.c.bf16 %v1215_v4, %v1214_v46  ;;  %v1451_v11 = vpack.c.bf16 %v1217_v6, %v1216_v5 }
 0x182   : > { %v1456_v12 = vpack.c.bf16 %v1219_v48, %v1218_v7  ;;  %v1461_v13 = vpack.c.bf16 %v1221_v9, %v1220_v8 }
 0x183   : > { %1447 = vst [vmem:[%s170_s13] sm:$0xff] %v1446_v10   ;;  %1463 = vst [vmem:[%s170_s13 + $0x8] sm:$0xff] %v1451_v11  }
 0x184   : > { %1464 = vst [vmem:[%s170_s13 + $0x10] sm:$0xff] %v1456_v12   ;;  %1465 = vst [vmem:[%s170_s13 + $0x18] sm:$0xff] %v1461_v13  }
 0x185 PF: > { %s13_s12 = sadd.s32 1, %s1706_s12  }
 0x186   : > { %p10_p4 = scmp.ge.s32.totalorder %s13_s12, 4  }
 0x188   :  { %12 = sbr.rel (!%p10_p4) target bundleno = 1 (0x1), region = 62 }

// kernel: discriminator_forward.6
= control target key start
LH: loop header
LB: loop body
LE: loop exit
PB: predicated region body
PF: predicated region fallthrough
CT: control target
= control target key end

     0   :  { %s3034_s12 = smov 0   ;;  %s3896_s0 = inlined_call_operand.vmem [shape: bf16[2,16,2048], index: 0, kind: input, shape index: {}]   ;;  %s3897_s1 = inlined_call_operand.vmem [shape: bf16[2048,256], index: 1, kind: input, shape index: {}]   ;;  %s3898_s2 = inlined_call_operand.vmem [shape: f32[1,256], index: 2, kind: input, shape index: {}]   ;;  %s3899_s3 = inlined_call_operand.vmem [shape: bf16[2,16,256], index: 3, kind: output, shape index: {}]  }
   0x1 LB: > { %s2289_s13 = sadd.s32 4294967295, %s3012_s12   ;;  %p2293_p0 = scmp.ge.s32.totalorder %s3012_s12, 1  ;;  %s3012_s12 = sphi %s3034_s12, %s13_s12  }
   0x2   : > { %p137_p1 = scmp.lt.s32.totalorder %s3012_s12, 3 }
   0x4   : > { %p138_p2 = pnand %p2293_p0, %p137_p1 }
   0x5   : > { %v2618_v0 = vld [vmem:[%s3897_s1 + $0x4] ss:$8 sps:$4 sm:$0xff] (!%p138_p2)   ;;  %v2622_v2 = vld [vmem:[%s3897_s1] ss:$8 sps:$4 sm:$0xff] (!%p138_p2)   ;;  %v2624_v4 = vld [vmem:[%s3897_s1 + $0x14] ss:$8 sps:$4 sm:$0xff] (!%p138_p2)  }
   0x6   : > { %141 = sbr.rel (%p138_p2) target bundleno = 538 (0x21a), region = 32  ;;  %v2620_v1 = vld [vmem:[%s3897_s1 + $0x404] ss:$8 sps:$4 sm:$0xff] (!%p138_p2)   ;;  %1815 = vmatprep.subr.bf16.mxu1 (!%p138_p2), %v2618_v0  ;;  %v2623_v3 = vld [vmem:[%s3897_s1 + $0x400] ss:$8 sps:$4 sm:$0xff] (!%p138_p2)   ;;  %p161_p3 = scmp.lt.s32.totalorder (!%p138_p2), %s2289_s13, 1 }
   0x7   : > { %1987 = vmatprep.subr.bf16.mxu0 (!%p138_p2), %v2620_v1  ;;  %1816 = vmatpush1.bf16.msra.mxu1 (!%p138_p2), %v2622_v2  ;;  %v2626_v5 = vld [vmem:[%s3897_s1 + $0x414] ss:$8 sps:$4 sm:$0xff] (!%p138_p2)   ;;  %v2628_v6 = vld [vmem:[%s3897_s1 + $0x10] ss:$8 sps:$4 sm:$0xff] (!%p138_p2)   ;;  %v2630_v8 = vld [vmem:[%s3897_s1 + $0x24] ss:$8 sps:$4 sm:$0xff] (!%p138_p2)  }
   0x8   : > { %1988 = vmatpush1.bf16.msra.mxu0 (!%p138_p2), %v2623_v3  ;;  %1817 = vmatprep.subr.bf16.mxu1 (!%p138_p2), %v2624_v4  ;;  %v2629_v7 = vld [vmem:[%s3897_s1 + $0x410] ss:$8 sps:$4 sm:$0xff] (!%p138_p2)   ;;  %v2632_v9 = vld [vmem:[%s3897_s1 + $0x424] ss:$8 sps:$4 sm:$0xff] (!%p138_p2)   ;;  %v2634_v10 = vld [vmem:[%s3897_s1 + $0x20] ss:$8 sps:$4 sm:$0xff] (!%p138_p2)  }
   0x9   : > { %1989 = vmatprep.subr.bf16.mxu0 (!%p138_p2), %v2626_v5  ;;  %v2635_v11 = vld [vmem:[%s3897_s1 + $0x420] ss:$8 sps:$4 sm:$0xff] (!%p138_p2)   ;;  %v2636_v12 = vld [vmem:[%s3897_s1 + $0x34] ss:$8 sps:$4 sm:$0xff] (!%p138_p2)   ;;  %v2640_v14 = vld [vmem:[%s3897_s1 + $0x30] ss:$8 sps:$4 sm:$0xff] (!%p138_p2)  }
   0xa   : > { %v2638_v13 = vld [vmem:[%s3897_s1 + $0x434] ss:$8 sps:$4 sm:$0xff] (!%p138_p2)   ;;  %v2641_v15 = vld [vmem:[%s3897_s1 + $0x430] ss:$8 sps:$4 sm:$0xff] (!%p138_p2)   ;;  %v2642_v16 = vld [vmem:[%s3897_s1 + $0x44] ss:$8 sps:$4 sm:$0xff] (!%p138_p2)  }
   0xb   : > { %1818 = vmatpush1.bf16.msra.mxu1 (!%p138_p2), %v2628_v6  ;;  %v2644_v17 = vld [vmem:[%s3897_s1 + $0x444] ss:$8 sps:$4 sm:$0xff] (!%p138_p2)   ;;  %v2646_v18 = vld [vmem:[%s3897_s1 + $0x40] ss:$8 sps:$4 sm:$0xff] (!%p138_p2)   ;;  %v2648_v20 = vld [vmem:[%s3897_s1 + $0x54] ss:$8 sps:$4 sm:$0xff] (!%p138_p2)  }
   0xc   : > { %1990 = vmatpush1.bf16.msra.mxu0 (!%p138_p2), %v2629_v7  ;;  %1819 = vmatprep.subr.bf16.mxu1 (!%p138_p2), %v2630_v8  ;;  %v2647_v19 = vld [vmem:[%s3897_s1 + $0x440] ss:$8 sps:$4 sm:$0xff] (!%p138_p2)   ;;  %v2650_v21 = vld [vmem:[%s3897_s1 + $0x454] ss:$8 sps:$4 sm:$0xff] (!%p138_p2)   ;;  %v2652_v22 = vld [vmem:[%s3897_s1 + $0x50] ss:$8 sps:$4 sm:$0xff] (!%p138_p2)  }
   0xd   : > { %1991 = vmatprep.subr.bf16.mxu0 %v2632_v9  ;;  %v2653_v23 = vld [vmem:[%s3897_s1 + $0x450] ss:$8 sps:$4 sm:$0xff]   ;;  %v2654_v24 = vld [vmem:[%s3897_s1 + $0x64] ss:$8 sps:$4 sm:$0xff]   ;;  %v2658_v26 = vld [vmem:[%s3897_s1 + $0x60] ss:$8 sps:$4 sm:$0xff]  }
   0xe   : > { %v2656_v25 = vld [vmem:[%s3897_s1 + $0x464] ss:$8 sps:$4 sm:$0xff]   ;;  %v2659_v27 = vld [vmem:[%s3897_s1 + $0x460] ss:$8 sps:$4 sm:$0xff]   ;;  %v2660_v28 = vld [vmem:[%s3897_s1 + $0x74] ss:$8 sps:$4 sm:$0xff]  }
   0xf   : > { %1820 = vmatpush1.bf16.msra.mxu1 %v2634_v10  ;;  %v2662_v29 = vld [vmem:[%s3897_s1 + $0x474] ss:$8 sps:$4 sm:$0xff]   ;;  %v2664_v30 = vld [vmem:[%s3897_s1 + $0x70] ss:$8 sps:$4 sm:$0xff]   ;;  %v2666_v32 = vld [vmem:[%s3897_s1 + $0x84] ss:$8 sps:$4 sm:$0xff]  }
  0x10   : > { %1992 = vmatpush1.bf16.msra.mxu0 %v2635_v11  ;;  %1821 = vmatprep.subr.bf16.mxu1 %v2636_v12  ;;  %v2665_v31 = vld [vmem:[%s3897_s1 + $0x470] ss:$8 sps:$4 sm:$0xff]   ;;  %v2668_v33 = vld [vmem:[%s3897_s1 + $0x484] ss:$8 sps:$4 sm:$0xff]   ;;  %v2670_v34 = vld [vmem:[%s3897_s1 + $0x80] ss:$8 sps:$4 sm:$0xff]  }
  0x11   : > { %1993 = vmatprep.subr.bf16.mxu0 %v2638_v13  ;;  %v2671_v35 = vld [vmem:[%s3897_s1 + $0x480] ss:$8 sps:$4 sm:$0xff]   ;;  %v2672_v36 = vld [vmem:[%s3897_s1 + $0x94] ss:$8 sps:$4 sm:$0xff]   ;;  %s3901_s13 = smov (!%p161_p3, %s2289_s13), 1 }
  0x12   : > { %v2674_v37 = vld [vmem:[%s3897_s1 + $0x494] ss:$8 sps:$4 sm:$0xff]   ;;  %v2676_v38 = vld [vmem:[%s3897_s1 + $0x90] ss:$8 sps:$4 sm:$0xff]   ;;  %v2678_v40 = vld [vmem:[%s3897_s1 + $0xa4] ss:$8 sps:$4 sm:$0xff]  }
  0x13   : > { %1822 = vmatpush1.bf16.msra.mxu1 %v2640_v14  ;;  %v2677_v39 = vld [vmem:[%s3897_s1 + $0x490] ss:$8 sps:$4 sm:$0xff]   ;;  %s2574_s21 = sshll.u32 %s3901_s13, 7  ;;  %v2680_v41 = vld [vmem:[%s3897_s1 + $0x4a4] ss:$8 sps:$4 sm:$0xff]   ;;  %s2575_s19 = sshll.u32 %s3901_s13, 4 }
  0x14   : > { %1994 = vmatpush1.bf16.msra.mxu0 %v2641_v15  ;;  %1823 = vmatprep.subr.bf16.mxu1 %v2642_v16  ;;  %v2682_v42 = vld [vmem:[%s3897_s1 + $0xa0] ss:$8 sps:$4 sm:$0xff]   ;;  %s3184_s30 = scalar_lea.vmem %s3896_s0, %s2574_s21  ;;  %v2684_v44 = vld [vmem:[%s3897_s1 + $0xb4] ss:$8 sps:$4 sm:$0xff]   ;;  %v2688_v46 = vld [vmem:[%s3897_s1 + $0xb0] ss:$8 sps:$4 sm:$0xff]   ;;  %s170_s22 = scalar_lea.vmem %s3899_s3, %s2575_s19 }
  0x15   : > { %1995 = vmatprep.subr.bf16.mxu0 %v2644_v17  ;;  %v2683_v43 = vld [vmem:[%s3897_s1 + $0x4a0] ss:$8 sps:$4 sm:$0xff]   ;;  %v2686_v45 = vld [vmem:[%s3897_s1 + $0x4b4] ss:$8 sps:$4 sm:$0xff]   ;;  %v2689_v47 = vld [vmem:[%s3897_s1 + $0x4b0] ss:$8 sps:$4 sm:$0xff]  }
  0x16   : > { %v171_v48 = vld [vmem:[%s3184_s30] sm:$0xff]  ;;  %v2696_v58 = vld [vmem:[%s3897_s1 + $0xd4] ss:$8 sps:$4 sm:$0xff]   ;;  %v2700_v60 = vld [vmem:[%s3897_s1 + $0xd0] ss:$8 sps:$4 sm:$0xff]  }
  0x17   : > { %1824 = vmatpush1.bf16.msra.mxu1 %v2646_v18  ;;  %v179_v49 = vld [vmem:[%s3184_s30 + $0x40] sm:$0xff]  ;;  %v2698_v59 = vld [vmem:[%s3897_s1 + $0x4d4] ss:$8 sps:$4 sm:$0xff]   ;;  %v2701_v61 = vld [vmem:[%s3897_s1 + $0x4d0] ss:$8 sps:$4 sm:$0xff]  }
  0x18   : > { %1996 = vmatpush1.bf16.msra.mxu0 %v2647_v19  ;;  %1825 = vmatprep.subr.bf16.mxu1 %v2648_v20  ;;  %v2690_v50 = vld [vmem:[%s3897_s1 + $0xc4] ss:$8 sps:$4 sm:$0xff]   ;;  %v2299_v52 = vcombine.high %v171_v48, %v179_v49  ;;  %v2694_v56 = vld [vmem:[%s3897_s1 + $0xc0] ss:$8 sps:$4 sm:$0xff]   ;;  %v2708_v2 = vld [vmem:[%s3897_s1 + $0xf4] ss:$8 sps:$4 sm:$0xff]   ;;  %v2298_v8 = vcombine.low %v171_v48, %v179_v49 }
  0x19   : > { %1997 = vmatprep.subr.bf16.mxu0 %v2650_v21  ;;  %v2692_v51 = vld [vmem:[%s3897_s1 + $0x4c4] ss:$8 sps:$4 sm:$0xff]   ;;  %v2695_v57 = vld [vmem:[%s3897_s1 + $0x4c0] ss:$8 sps:$4 sm:$0xff]   ;;  %v2710_v3 = vld [vmem:[%s3897_s1 + $0x4f4] ss:$8 sps:$4 sm:$0xff]  }
  0x1a   : > { %v175_v53 = vld [vmem:[%s3184_s30 + $0x20] sm:$0xff]  ;;  %1847 = vmatprep.mubr.bf16.mxu1 %v2299_v52  ;;  %v2712_v4 = vld [vmem:[%s3897_s1 + $0xf0] ss:$8 sps:$4 sm:$0xff]   ;;  %v2722_v12 = vld [vmem:[%s3897_s1 + $0x114] ss:$8 sps:$4 sm:$0xff]  }
  0x1b   : > { %1826 = vmatpush1.bf16.msra.mxu1 %v2652_v22  ;;  %v183_v54 = vld [vmem:[%s3184_s30 + $0x60] sm:$0xff]  ;;  %v2713_v5 = vld [vmem:[%s3897_s1 + $0x4f0] ss:$8 sps:$4 sm:$0xff]   ;;  %v2725_v13 = vld [vmem:[%s3897_s1 + $0x514] ss:$8 sps:$4 sm:$0xff]  }
  0x1c   : > { %1998 = vmatpush1.bf16.msra.mxu0 %v2653_v23  ;;  %1827 = vmatprep.subr.bf16.mxu1 %v2654_v24  ;;  %v2307_v55 = vcombine.high %v175_v53, %v183_v54  ;;  %v2702_v62 = vld [vmem:[%s3897_s1 + $0xe4] ss:$8 sps:$4 sm:$0xff]   ;;  %v2706_v0 = vld [vmem:[%s3897_s1 + $0xe0] ss:$8 sps:$4 sm:$0xff]   ;;  %v2306_v10 = vcombine.low %v175_v53, %v183_v54  ;;  %v2720_v14 = vld [vmem:[%s3897_s1 + $0x110] ss:$8 sps:$4 sm:$0xff]  }
  0x1d   : > { %1999 = vmatprep.subr.bf16.mxu0 %v2656_v25  ;;  %v2704_v63 = vld [vmem:[%s3897_s1 + $0x4e4] ss:$8 sps:$4 sm:$0xff]   ;;  %v2707_v1 = vld [vmem:[%s3897_s1 + $0x4e0] ss:$8 sps:$4 sm:$0xff]   ;;  %v2723_v15 = vld [vmem:[%s3897_s1 + $0x510] ss:$8 sps:$4 sm:$0xff]  }
  0x1e   : > { %2019 = vmatprep.mubr.bf16.mxu0 %v2307_v55  ;;  %v2716_v6 = vld [vmem:[%s3897_s1 + $0x104] ss:$8 sps:$4 sm:$0xff]   ;;  %v2714_v9 = vld [vmem:[%s3897_s1 + $0x100] ss:$8 sps:$4 sm:$0xff]   ;;  %v2734_v20 = vld [vmem:[%s3897_s1 + $0x134] ss:$8 sps:$4 sm:$0xff]  }
  0x1f   : > { %1828 = vmatpush1.bf16.msra.mxu1 %v2658_v26  ;;  %v2719_v7 = vld [vmem:[%s3897_s1 + $0x504] ss:$8 sps:$4 sm:$0xff]   ;;  %v2717_v11 = vld [vmem:[%s3897_s1 + $0x500] ss:$8 sps:$4 sm:$0xff]   ;;  %v2737_v21 = vld [vmem:[%s3897_s1 + $0x534] ss:$8 sps:$4 sm:$0xff]  }
  0x20   : > { %2000 = vmatpush1.bf16.msra.mxu0 %v2659_v27  ;;  %1829 = vmatprep.subr.bf16.mxu1 %v2660_v28  ;;  %v2728_v16 = vld [vmem:[%s3897_s1 + $0x124] ss:$8 sps:$4 sm:$0xff]   ;;  %v2726_v18 = vld [vmem:[%s3897_s1 + $0x120] ss:$8 sps:$4 sm:$0xff]   ;;  %v2732_v22 = vld [vmem:[%s3897_s1 + $0x130] ss:$8 sps:$4 sm:$0xff]  }
  0x21   : > { %2001 = vmatprep.subr.bf16.mxu0 %v2662_v29  ;;  %v2731_v17 = vld [vmem:[%s3897_s1 + $0x524] ss:$8 sps:$4 sm:$0xff]   ;;  %v2729_v19 = vld [vmem:[%s3897_s1 + $0x520] ss:$8 sps:$4 sm:$0xff]   ;;  %v2735_v23 = vld [vmem:[%s3897_s1 + $0x530] ss:$8 sps:$4 sm:$0xff]  }
  0x22   : > { %v2740_v24 = vld [vmem:[%s3897_s1 + $0x144] ss:$8 sps:$4 sm:$0xff]   ;;  %v2738_v26 = vld [vmem:[%s3897_s1 + $0x140] ss:$8 sps:$4 sm:$0xff]   ;;  %v2746_v28 = vld [vmem:[%s3897_s1 + $0x154] ss:$8 sps:$4 sm:$0xff]  }
  0x23   : > { %1830 = vmatpush1.bf16.msra.mxu1 %v2664_v30  ;;  %v2743_v25 = vld [vmem:[%s3897_s1 + $0x544] ss:$8 sps:$4 sm:$0xff]   ;;  %v2741_v27 = vld [vmem:[%s3897_s1 + $0x540] ss:$8 sps:$4 sm:$0xff]   ;;  %v2749_v29 = vld [vmem:[%s3897_s1 + $0x554] ss:$8 sps:$4 sm:$0xff]  }
  0x24   : > { %2002 = vmatpush1.bf16.msra.mxu0 %v2665_v31  ;;  %1831 = vmatprep.subr.bf16.mxu1 %v2666_v32  ;;  %v2744_v30 = vld [vmem:[%s3897_s1 + $0x150] ss:$8 sps:$4 sm:$0xff]   ;;  %v2752_v32 = vld [vmem:[%s3897_s1 + $0x164] ss:$8 sps:$4 sm:$0xff]   ;;  %v2762_v48 = vld [vmem:[%s3897_s1 + $0x180] ss:$8 sps:$4 sm:$0xff]  }
  0x25   : > { %2003 = vmatprep.subr.bf16.mxu0 %v2668_v33  ;;  %v2747_v31 = vld [vmem:[%s3897_s1 + $0x550] ss:$8 sps:$4 sm:$0xff]   ;;  %v2755_v33 = vld [vmem:[%s3897_s1 + $0x564] ss:$8 sps:$4 sm:$0xff]   ;;  %v2765_v49 = vld [vmem:[%s3897_s1 + $0x580] ss:$8 sps:$4 sm:$0xff]  }
  0x26   : > { %v2768_v52 = vld [vmem:[%s3897_s1 + $0x190] ss:$8 sps:$4 sm:$0xff]   ;;  %v2776_v54 = vld [vmem:[%s3897_s1 + $0x1a4] ss:$8 sps:$4 sm:$0xff]  }
  0x27   : > { %1832 = vmatpush1.bf16.msra.mxu1 %v2670_v34  ;;  %v2750_v34 = vld [vmem:[%s3897_s1 + $0x160] ss:$8 sps:$4 sm:$0xff]   ;;  %v2771_v53 = vld [vmem:[%s3897_s1 + $0x590] ss:$8 sps:$4 sm:$0xff]   ;;  %v2779_v55 = vld [vmem:[%s3897_s1 + $0x5a4] ss:$8 sps:$4 sm:$0xff]  }
  0x28   : > { %2004 = vmatpush1.bf16.msra.mxu0 %v2671_v35  ;;  %1833 = vmatprep.subr.bf16.mxu1 %v2672_v36  ;;  %v2753_v35 = vld [vmem:[%s3897_s1 + $0x560] ss:$8 sps:$4 sm:$0xff]  }
  0x29   : > { %2005 = vmatprep.subr.bf16.mxu0 %v2674_v37  ;;  %v3335_v36 = vld [vmem:[%s3184_s30 + $0x8] sm:$0xff] }
  0x2a   : > { %v3338_v37 = vld [vmem:[%s3184_s30 + $0x48] sm:$0xff] }
  0x2b   : > { %1834 = vmatpush1.bf16.msra.mxu1 %v2676_v38  ;;  %v2758_v38 = vld [vmem:[%s3897_s1 + $0x174] ss:$8 sps:$4 sm:$0xff]  }
  0x2c   : > { %2006 = vmatpush1.bf16.msra.mxu0 %v2677_v39  ;;  %1835 = vmatprep.subr.bf16.mxu1 %v2678_v40  ;;  %v2761_v39 = vld [vmem:[%s3897_s1 + $0x574] ss:$8 sps:$4 sm:$0xff]   ;;  %v2301_v40 = vcombine.high %v3335_v36, %v3338_v37 }
  0x2d   : > { %2007 = vmatprep.subr.bf16.mxu0 %v2680_v41  ;;  %v3349_v41 = vld [vmem:[%s3184_s30 + $0x28] sm:$0xff] }
  0x2f   : > { %1836 = vmatpush1.bf16.msra.mxu1 %v2682_v42  ;;  %v3352_v42 = vld [vmem:[%s3184_s30 + $0x68] sm:$0xff] }
  0x30   : > { %2008 = vmatpush1.bf16.msra.mxu0 %v2683_v43  ;;  %1837 = vmatprep.subr.bf16.mxu1 %v2684_v44  ;;  %v2309_v43 = vcombine.high %v3349_v41, %v3352_v42  ;;  %v2756_v44 = vld [vmem:[%s3897_s1 + $0x170] ss:$8 sps:$4 sm:$0xff]  }
  0x31   : > { %2009 = vmatprep.subr.bf16.mxu0 %v2686_v45  ;;  %v2759_v45 = vld [vmem:[%s3897_s1 + $0x570] ss:$8 sps:$4 sm:$0xff]  }
  0x33   : > { %1838 = vmatpush1.bf16.msra.mxu1 %v2688_v46  ;;  %v2764_v46 = vld [vmem:[%s3897_s1 + $0x184] ss:$8 sps:$4 sm:$0xff]  }
  0x34   : > { %2010 = vmatpush1.bf16.msra.mxu0 %v2689_v47  ;;  %1839 = vmatprep.subr.bf16.mxu1 %v2690_v50  ;;  %v2767_v47 = vld [vmem:[%s3897_s1 + $0x584] ss:$8 sps:$4 sm:$0xff]   ;;  %v2770_v50 = vld [vmem:[%s3897_s1 + $0x194] ss:$8 sps:$4 sm:$0xff]  }
  0x35   : > { %2011 = vmatprep.subr.bf16.mxu0 %v2692_v51  ;;  %v2773_v51 = vld [vmem:[%s3897_s1 + $0x594] ss:$8 sps:$4 sm:$0xff]  }
  0x37   : > { %1840 = vmatpush1.bf16.msra.mxu1 %v2694_v56  ;;  %v2774_v56 = vld [vmem:[%s3897_s1 + $0x1a0] ss:$8 sps:$4 sm:$0xff]  }
  0x38   : > { %2012 = vmatpush1.bf16.msra.mxu0 %v2695_v57  ;;  %1841 = vmatprep.subr.bf16.mxu1 %v2696_v58  ;;  %v2777_v57 = vld [vmem:[%s3897_s1 + $0x5a0] ss:$8 sps:$4 sm:$0xff]   ;;  %v2782_v58 = vld [vmem:[%s3897_s1 + $0x1b4] ss:$8 sps:$4 sm:$0xff]  }
  0x39   : > { %2013 = vmatprep.subr.bf16.mxu0 %v2698_v59  ;;  %v2785_v59 = vld [vmem:[%s3897_s1 + $0x5b4] ss:$8 sps:$4 sm:$0xff]  }
  0x3b   : > { %1842 = vmatpush1.bf16.msra.mxu1 %v2700_v60  ;;  %v2780_v60 = vld [vmem:[%s3897_s1 + $0x1b0] ss:$8 sps:$4 sm:$0xff]  }
  0x3c   : > { %2014 = vmatpush1.bf16.msra.mxu0 %v2701_v61  ;;  %1843 = vmatprep.subr.bf16.mxu1 %v2702_v62  ;;  %v2783_v61 = vld [vmem:[%s3897_s1 + $0x5b0] ss:$8 sps:$4 sm:$0xff]   ;;  %v2788_v62 = vld [vmem:[%s3897_s1 + $0x1c4] ss:$8 sps:$4 sm:$0xff]  }
  0x3d   : > { %2015 = vmatprep.subr.bf16.mxu0 %v2704_v63  ;;  %v2791_v63 = vld [vmem:[%s3897_s1 + $0x5c4] ss:$8 sps:$4 sm:$0xff]  }
  0x3f   : > { %1844 = vmatpush1.bf16.msra.mxu1 %v2706_v0  ;;  %v2786_v0 = vld [vmem:[%s3897_s1 + $0x1c0] ss:$8 sps:$4 sm:$0xff]  }
  0x40   : > { %2016 = vmatpush1.bf16.msra.mxu0 %v2707_v1  ;;  %1845 = vmatprep.subr.bf16.mxu1 %v2708_v2  ;;  %v2789_v1 = vld [vmem:[%s3897_s1 + $0x5c0] ss:$8 sps:$4 sm:$0xff]   ;;  %v2794_v2 = vld [vmem:[%s3897_s1 + $0x1d4] ss:$8 sps:$4 sm:$0xff]  }
  0x41   : > { %2017 = vmatprep.subr.bf16.mxu0 %v2710_v3  ;;  %v2797_v3 = vld [vmem:[%s3897_s1 + $0x5d4] ss:$8 sps:$4 sm:$0xff]  }
  0x43   : > { %1846 = vmatpush1.bf16.msra.mxu1 %v2712_v4  ;;  %v2792_v4 = vld [vmem:[%s3897_s1 + $0x1d0] ss:$8 sps:$4 sm:$0xff]  }
  0x44   : > { %2018 = vmatpush1.bf16.msra.mxu0 %v2713_v5  ;;  %1858 = vmatprep.subr.bf16.mxu1 %v2716_v6  ;;  %v2795_v5 = vld [vmem:[%s3897_s1 + $0x5d0] ss:$8 sps:$4 sm:$0xff]   ;;  %v2800_v6 = vld [vmem:[%s3897_s1 + $0x1e4] ss:$8 sps:$4 sm:$0xff]  }
  0x45   : > { %2030 = vmatprep.subr.bf16.mxu0 %v2719_v7  ;;  %v2803_v7 = vld [vmem:[%s3897_s1 + $0x5e4] ss:$8 sps:$4 sm:$0xff]  }
  0x46   : > { %1848 = vmatmul.mubr.bf16.vlgmr.msra.gmra.mrb[0].mxu1 %v2298_v8  ;;  %v2798_v8 = vld [vmem:[%s3897_s1 + $0x1e0] ss:$8 sps:$4 sm:$0xff]  }
  0x47   : > { %2020 = vmatmul.mubr.bf16.vlgmr.msra.gmra.mrb[0].mxu0 %v2306_v10  ;;  %1859 = vmatpush1.bf16.msra.mxu1 %v2714_v9  ;;  %v2801_v9 = vld [vmem:[%s3897_s1 + $0x5e0] ss:$8 sps:$4 sm:$0xff]   ;;  %v2806_v10 = vld [vmem:[%s3897_s1 + $0x1f4] ss:$8 sps:$4 sm:$0xff]  }
  0x48   : > { %2031 = vmatpush1.bf16.msra.mxu0 %v2717_v11  ;;  %1860 = vmatprep.subr.bf16.mxu1 %v2722_v12  ;;  %v2809_v11 = vld [vmem:[%s3897_s1 + $0x5f4] ss:$8 sps:$4 sm:$0xff]   ;;  %v2804_v12 = vld [vmem:[%s3897_s1 + $0x1f0] ss:$8 sps:$4 sm:$0xff]  }
  0x49   : > { %2032 = vmatprep.subr.bf16.mxu0 %v2725_v13  ;;  %1890 = vmatprep.mubr.bf16.mxu1 %v2301_v40  ;;  %v2807_v13 = vld [vmem:[%s3897_s1 + $0x5f0] ss:$8 sps:$4 sm:$0xff]   ;;  %v2834_v40 = vld [vmem:[%s3897_s1 + $0x240] ss:$8 sps:$4 sm:$0xff]  }
  0x4a   : > { %2062 = vmatprep.mubr.bf16.mxu0 %v2309_v43  ;;  %v2845_v43 = vld [vmem:[%s3897_s1 + $0x654] ss:$8 sps:$4 sm:$0xff]  }
  0x4b   : > { %1861 = vmatpush1.bf16.msra.mxu1 %v2720_v14  ;;  %v2812_v14 = vld [vmem:[%s3897_s1 + $0x204] ss:$8 sps:$4 sm:$0xff]  }
  0x4c   : > { %2033 = vmatpush1.bf16.msra.mxu0 %v2723_v15  ;;  %1862 = vmatprep.subr.bf16.mxu1 %v2728_v16  ;;  %v2815_v15 = vld [vmem:[%s3897_s1 + $0x604] ss:$8 sps:$4 sm:$0xff]   ;;  %v2300_v16 = vcombine.low %v3335_v36, %v3338_v37  ;;  %v2828_v36 = vld [vmem:[%s3897_s1 + $0x230] ss:$8 sps:$4 sm:$0xff]  }
  0x4d   : > { %2034 = vmatprep.subr.bf16.mxu0 %v2731_v17  ;;  %v2810_v17 = vld [vmem:[%s3897_s1 + $0x200] ss:$8 sps:$4 sm:$0xff]   ;;  %v2831_v37 = vld [vmem:[%s3897_s1 + $0x630] ss:$8 sps:$4 sm:$0xff]  }
  0x4f   : > { %1863 = vmatpush1.bf16.msra.mxu1 %v2726_v18  ;;  %v2308_v18 = vcombine.low %v3349_v41, %v3352_v42  ;;  %v2837_v41 = vld [vmem:[%s3897_s1 + $0x640] ss:$8 sps:$4 sm:$0xff]   ;;  %v2842_v42 = vld [vmem:[%s3897_s1 + $0x254] ss:$8 sps:$4 sm:$0xff]  }
  0x50   : > { %2035 = vmatpush1.bf16.msra.mxu0 %v2729_v19  ;;  %1864 = vmatprep.subr.bf16.mxu1 %v2734_v20  ;;  %v2813_v19 = vld [vmem:[%s3897_s1 + $0x600] ss:$8 sps:$4 sm:$0xff]   ;;  %v2818_v20 = vld [vmem:[%s3897_s1 + $0x214] ss:$8 sps:$4 sm:$0xff]  }
  0x51   : > { %2036 = vmatprep.subr.bf16.mxu0 %v2737_v21  ;;  %v2821_v21 = vld [vmem:[%s3897_s1 + $0x614] ss:$8 sps:$4 sm:$0xff]  }
  0x53   : > { %1865 = vmatpush1.bf16.msra.mxu1 %v2732_v22  ;;  %v2816_v22 = vld [vmem:[%s3897_s1 + $0x210] ss:$8 sps:$4 sm:$0xff]  }
  0x54   : > { %2037 = vmatpush1.bf16.msra.mxu0 %v2735_v23  ;;  %1866 = vmatprep.subr.bf16.mxu1 %v2740_v24  ;;  %v2819_v23 = vld [vmem:[%s3897_s1 + $0x610] ss:$8 sps:$4 sm:$0xff]  }
  0x55   : > { %2038 = vmatprep.subr.bf16.mxu0 %v2743_v25  ;;  %v3487_v24 = vld [vmem:[%s3184_s30 + $0x10] sm:$0xff] }
  0x56   : > { %v3490_v25 = vld [vmem:[%s3184_s30 + $0x50] sm:$0xff] }
  0x57   : > { %1867 = vmatpush1.bf16.msra.mxu1 %v2738_v26  ;;  %v2824_v26 = vld [vmem:[%s3897_s1 + $0x224] ss:$8 sps:$4 sm:$0xff]  }
  0x58   : > { %2039 = vmatpush1.bf16.msra.mxu0 %v2741_v27  ;;  %1868 = vmatprep.subr.bf16.mxu1 %v2746_v28  ;;  %v2827_v27 = vld [vmem:[%s3897_s1 + $0x624] ss:$8 sps:$4 sm:$0xff]   ;;  %v2303_v28 = vcombine.high %v3487_v24, %v3490_v25 }
  0x59   : > { %2040 = vmatprep.subr.bf16.mxu0 %v2749_v29  ;;  %v3501_v29 = vld [vmem:[%s3184_s30 + $0x30] sm:$0xff] }
  0x5b   : > { %1869 = vmatpush1.bf16.msra.mxu1 %v2744_v30  ;;  %v3504_v30 = vld [vmem:[%s3184_s30 + $0x70] sm:$0xff] }
  0x5c   : > { %2041 = vmatpush1.bf16.msra.mxu0 %v2747_v31  ;;  %1870 = vmatprep.subr.bf16.mxu1 %v2752_v32  ;;  %v2311_v31 = vcombine.high %v3501_v29, %v3504_v30  ;;  %v2822_v32 = vld [vmem:[%s3897_s1 + $0x220] ss:$8 sps:$4 sm:$0xff]  }
  0x5d   : > { %2042 = vmatprep.subr.bf16.mxu0 %v2755_v33  ;;  %v2825_v33 = vld [vmem:[%s3897_s1 + $0x620] ss:$8 sps:$4 sm:$0xff]  }
  0x5f   : > { %1871 = vmatpush1.bf16.msra.mxu1 %v2750_v34  ;;  %v2830_v34 = vld [vmem:[%s3897_s1 + $0x234] ss:$8 sps:$4 sm:$0xff]  }
  0x60   : > { %2043 = vmatpush1.bf16.msra.mxu0 %v2753_v35  ;;  %1872 = vmatprep.subr.bf16.mxu1 %v2758_v38  ;;  %v2833_v35 = vld [vmem:[%s3897_s1 + $0x634] ss:$8 sps:$4 sm:$0xff]   ;;  %v2836_v38 = vld [vmem:[%s3897_s1 + $0x244] ss:$8 sps:$4 sm:$0xff]  }
  0x61   : > { %2044 = vmatprep.subr.bf16.mxu0 %v2761_v39  ;;  %v2839_v39 = vld [vmem:[%s3897_s1 + $0x644] ss:$8 sps:$4 sm:$0xff]  }
  0x63   : > { %1873 = vmatpush1.bf16.msra.mxu1 %v2756_v44  ;;  %v2840_v44 = vld [vmem:[%s3897_s1 + $0x250] ss:$8 sps:$4 sm:$0xff]  }
  0x64   : > { %2045 = vmatpush1.bf16.msra.mxu0 %v2759_v45  ;;  %1874 = vmatprep.subr.bf16.mxu1 %v2764_v46  ;;  %v2843_v45 = vld [vmem:[%s3897_s1 + $0x650] ss:$8 sps:$4 sm:$0xff]   ;;  %v2848_v46 = vld [vmem:[%s3897_s1 + $0x264] ss:$8 sps:$4 sm:$0xff]  }
  0x65   : > { %2046 = vmatprep.subr.bf16.mxu0 %v2767_v47  ;;  %v2851_v47 = vld [vmem:[%s3897_s1 + $0x664] ss:$8 sps:$4 sm:$0xff]  }
  0x67   : > { %1875 = vmatpush1.bf16.msra.mxu1 %v2762_v48  ;;  %v2846_v48 = vld [vmem:[%s3897_s1 + $0x260] ss:$8 sps:$4 sm:$0xff]  }
  0x68   : > { %2047 = vmatpush1.bf16.msra.mxu0 %v2765_v49  ;;  %1876 = vmatprep.subr.bf16.mxu1 %v2770_v50  ;;  %v2849_v49 = vld [vmem:[%s3897_s1 + $0x660] ss:$8 sps:$4 sm:$0xff]   ;;  %v2854_v50 = vld [vmem:[%s3897_s1 + $0x274] ss:$8 sps:$4 sm:$0xff]  }
  0x69   : > { %2048 = vmatprep.subr.bf16.mxu0 %v2773_v51  ;;  %v2857_v51 = vld [vmem:[%s3897_s1 + $0x674] ss:$8 sps:$4 sm:$0xff]  }
  0x6b   : > { %1877 = vmatpush1.bf16.msra.mxu1 %v2768_v52  ;;  %v2852_v52 = vld [vmem:[%s3897_s1 + $0x270] ss:$8 sps:$4 sm:$0xff]  }
  0x6c   : > { %2049 = vmatpush1.bf16.msra.mxu0 %v2771_v53  ;;  %1878 = vmatprep.subr.bf16.mxu1 %v2776_v54  ;;  %v2855_v53 = vld [vmem:[%s3897_s1 + $0x670] ss:$8 sps:$4 sm:$0xff]   ;;  %v2860_v54 = vld [vmem:[%s3897_s1 + $0x284] ss:$8 sps:$4 sm:$0xff]  }
  0x6d   : > { %2050 = vmatprep.subr.bf16.mxu0 %v2779_v55  ;;  %v2863_v55 = vld [vmem:[%s3897_s1 + $0x684] ss:$8 sps:$4 sm:$0xff]  }
  0x6f   : > { %1879 = vmatpush1.bf16.msra.mxu1 %v2774_v56  ;;  %v2858_v56 = vld [vmem:[%s3897_s1 + $0x280] ss:$8 sps:$4 sm:$0xff]  }
  0x70   : > { %2051 = vmatpush1.bf16.msra.mxu0 %v2777_v57  ;;  %1880 = vmatprep.subr.bf16.mxu1 %v2782_v58  ;;  %v2861_v57 = vld [vmem:[%s3897_s1 + $0x680] ss:$8 sps:$4 sm:$0xff]   ;;  %v2866_v58 = vld [vmem:[%s3897_s1 + $0x294] ss:$8 sps:$4 sm:$0xff]  }
  0x71   : > { %2052 = vmatprep.subr.bf16.mxu0 %v2785_v59  ;;  %v2869_v59 = vld [vmem:[%s3897_s1 + $0x694] ss:$8 sps:$4 sm:$0xff]  }
  0x73   : > { %1881 = vmatpush1.bf16.msra.mxu1 %v2780_v60  ;;  %v2864_v60 = vld [vmem:[%s3897_s1 + $0x290] ss:$8 sps:$4 sm:$0xff]  }
  0x74   : > { %2053 = vmatpush1.bf16.msra.mxu0 %v2783_v61  ;;  %1882 = vmatprep.subr.bf16.mxu1 %v2788_v62  ;;  %v2867_v61 = vld [vmem:[%s3897_s1 + $0x690] ss:$8 sps:$4 sm:$0xff]   ;;  %v2872_v62 = vld [vmem:[%s3897_s1 + $0x2a4] ss:$8 sps:$4 sm:$0xff]  }
  0x75   : > { %2054 = vmatprep.subr.bf16.mxu0 %v2791_v63  ;;  %v2875_v63 = vld [vmem:[%s3897_s1 + $0x6a4] ss:$8 sps:$4 sm:$0xff]  }
  0x77   : > { %1883 = vmatpush1.bf16.msra.mxu1 %v2786_v0  ;;  %v2870_v0 = vld [vmem:[%s3897_s1 + $0x2a0] ss:$8 sps:$4 sm:$0xff]  }
  0x78   : > { %2055 = vmatpush1.bf16.msra.mxu0 %v2789_v1  ;;  %1884 = vmatprep.subr.bf16.mxu1 %v2794_v2  ;;  %v2873_v1 = vld [vmem:[%s3897_s1 + $0x6a0] ss:$8 sps:$4 sm:$0xff]   ;;  %v2878_v2 = vld [vmem:[%s3897_s1 + $0x2b4] ss:$8 sps:$4 sm:$0xff]  }
  0x79   : > { %2056 = vmatprep.subr.bf16.mxu0 %v2797_v3  ;;  %v2881_v3 = vld [vmem:[%s3897_s1 + $0x6b4] ss:$8 sps:$4 sm:$0xff]  }
  0x7b   : > { %1885 = vmatpush1.bf16.msra.mxu1 %v2792_v4  ;;  %v2876_v4 = vld [vmem:[%s3897_s1 + $0x2b0] ss:$8 sps:$4 sm:$0xff]  }
  0x7c   : > { %2057 = vmatpush1.bf16.msra.mxu0 %v2795_v5  ;;  %1886 = vmatprep.subr.bf16.mxu1 %v2800_v6  ;;  %v2879_v5 = vld [vmem:[%s3897_s1 + $0x6b0] ss:$8 sps:$4 sm:$0xff]   ;;  %v2884_v6 = vld [vmem:[%s3897_s1 + $0x2c4] ss:$8 sps:$4 sm:$0xff]  }
  0x7d   : > { %2058 = vmatprep.subr.bf16.mxu0 %v2803_v7  ;;  %v2887_v7 = vld [vmem:[%s3897_s1 + $0x6c4] ss:$8 sps:$4 sm:$0xff]  }
  0x7f   : > { %1887 = vmatpush1.bf16.msra.mxu1 %v2798_v8  ;;  %v2882_v8 = vld [vmem:[%s3897_s1 + $0x2c0] ss:$8 sps:$4 sm:$0xff]  }
  0x80   : > { %2059 = vmatpush1.bf16.msra.mxu0 %v2801_v9  ;;  %1888 = vmatprep.subr.bf16.mxu1 %v2806_v10  ;;  %v2885_v9 = vld [vmem:[%s3897_s1 + $0x6c0] ss:$8 sps:$4 sm:$0xff]   ;;  %v2890_v10 = vld [vmem:[%s3897_s1 + $0x2d4] ss:$8 sps:$4 sm:$0xff]  }
  0x81   : > { %2060 = vmatprep.subr.bf16.mxu0 %v2809_v11  ;;  %v2893_v11 = vld [vmem:[%s3897_s1 + $0x6d4] ss:$8 sps:$4 sm:$0xff]  }
  0x83   : > { %1889 = vmatpush1.bf16.msra.mxu1 %v2804_v12  ;;  %v2888_v12 = vld [vmem:[%s3897_s1 + $0x2d0] ss:$8 sps:$4 sm:$0xff]  }
  0x84   : > { %2061 = vmatpush1.bf16.msra.mxu0 %v2807_v13  ;;  %1901 = vmatprep.subr.bf16.mxu1 %v2812_v14  ;;  %v2891_v13 = vld [vmem:[%s3897_s1 + $0x6d0] ss:$8 sps:$4 sm:$0xff]   ;;  %v2896_v14 = vld [vmem:[%s3897_s1 + $0x2e4] ss:$8 sps:$4 sm:$0xff]  }
  0x85   : > { %2073 = vmatprep.subr.bf16.mxu0 %v2815_v15  ;;  %v2899_v15 = vld [vmem:[%s3897_s1 + $0x6e4] ss:$8 sps:$4 sm:$0xff]  }
  0x86   : > { %1891 = vmatmul.mubr.bf16.vlgmr.msra.gmra.mrb[0].mxu1 %v2300_v16  ;;  %v2894_v16 = vld [vmem:[%s3897_s1 + $0x2e0] ss:$8 sps:$4 sm:$0xff]  }
  0x87   : > { %2063 = vmatmul.mubr.bf16.vlgmr.msra.gmra.mrb[0].mxu0 %v2308_v18  ;;  %1902 = vmatpush1.bf16.msra.mxu1 %v2810_v17  ;;  %v2897_v17 = vld [vmem:[%s3897_s1 + $0x6e0] ss:$8 sps:$4 sm:$0xff]   ;;  %v2902_v18 = vld [vmem:[%s3897_s1 + $0x2f4] ss:$8 sps:$4 sm:$0xff]  }
  0x88   : > { %2074 = vmatpush1.bf16.msra.mxu0 %v2813_v19  ;;  %1903 = vmatprep.subr.bf16.mxu1 %v2818_v20  ;;  %v2905_v19 = vld [vmem:[%s3897_s1 + $0x6f4] ss:$8 sps:$4 sm:$0xff]   ;;  %v2900_v20 = vld [vmem:[%s3897_s1 + $0x2f0] ss:$8 sps:$4 sm:$0xff]  }
  0x89   : > { %2075 = vmatprep.subr.bf16.mxu0 %v2821_v21  ;;  %1933 = vmatprep.mubr.bf16.mxu1 %v2303_v28  ;;  %v2903_v21 = vld [vmem:[%s3897_s1 + $0x6f0] ss:$8 sps:$4 sm:$0xff]   ;;  %v2310_v28 = vcombine.low %v3501_v29, %v3504_v30 }
  0x8a   : > { %2105 = vmatprep.mubr.bf16.mxu0 %v2311_v31  ;;  %v3684_v31 = vld [vmem:[%s3184_s30 + $0x58] sm:$0xff] }
  0x8b   : > { %1904 = vmatpush1.bf16.msra.mxu1 %v2816_v22  ;;  %v2908_v22 = vld [vmem:[%s3897_s1 + $0x304] ss:$8 sps:$4 sm:$0xff]  }
  0x8c   : > { %2076 = vmatpush1.bf16.msra.mxu0 %v2819_v23  ;;  %1905 = vmatprep.subr.bf16.mxu1 %v2824_v26  ;;  %v2911_v23 = vld [vmem:[%s3897_s1 + $0x704] ss:$8 sps:$4 sm:$0xff]   ;;  %v3677_v26 = vld [vmem:[%s3184_s30 + $0x18] sm:$0xff] }
  0x8d   : > { %2077 = vmatprep.subr.bf16.mxu0 %v2827_v27  ;;  %v2302_v27 = vcombine.low %v3487_v24, %v3490_v25  ;;  %v2914_v24 = vld [vmem:[%s3897_s1 + $0x314] ss:$8 sps:$4 sm:$0xff]   ;;  %v2305_v29 = vcombine.high %v3677_v26, %v3684_v31 }
  0x8e   : > { %v2917_v25 = vld [vmem:[%s3897_s1 + $0x714] ss:$8 sps:$4 sm:$0xff]  }
  0x8f   : > { %1906 = vmatpush1.bf16.msra.mxu1 %v2822_v32  ;;  %v3687_v32 = vld [vmem:[%s3184_s30 + $0x38] sm:$0xff] }
  0x90   : > { %2078 = vmatpush1.bf16.msra.mxu0 %v2825_v33  ;;  %1907 = vmatprep.subr.bf16.mxu1 %v2830_v34  ;;  %v3690_v33 = vld [vmem:[%s3184_s30 + $0x78] sm:$0xff]  ;;  %v2906_v34 = vld [vmem:[%s3897_s1 + $0x300] ss:$8 sps:$4 sm:$0xff]  }
  0x91   : > { %2079 = vmatprep.subr.bf16.mxu0 %v2833_v35  ;;  %v2909_v35 = vld [vmem:[%s3897_s1 + $0x700] ss:$8 sps:$4 sm:$0xff]   ;;  %v2313_v30 = vcombine.high %v3687_v32, %v3690_v33 }
  0x93   : > { %1908 = vmatpush1.bf16.msra.mxu1 %v2828_v36  ;;  %v2912_v36 = vld [vmem:[%s3897_s1 + $0x310] ss:$8 sps:$4 sm:$0xff]  }
  0x94   : > { %2080 = vmatpush1.bf16.msra.mxu0 %v2831_v37  ;;  %1909 = vmatprep.subr.bf16.mxu1 %v2836_v38  ;;  %v2915_v37 = vld [vmem:[%s3897_s1 + $0x710] ss:$8 sps:$4 sm:$0xff]   ;;  %v2920_v38 = vld [vmem:[%s3897_s1 + $0x324] ss:$8 sps:$4 sm:$0xff]  }
  0x95   : > { %2081 = vmatprep.subr.bf16.mxu0 %v2839_v39  ;;  %v2923_v39 = vld [vmem:[%s3897_s1 + $0x724] ss:$8 sps:$4 sm:$0xff]  }
  0x97   : > { %1910 = vmatpush1.bf16.msra.mxu1 %v2834_v40  ;;  %v2918_v40 = vld [vmem:[%s3897_s1 + $0x320] ss:$8 sps:$4 sm:$0xff]  }
  0x98   : > { %2082 = vmatpush1.bf16.msra.mxu0 %v2837_v41  ;;  %1911 = vmatprep.subr.bf16.mxu1 %v2842_v42  ;;  %v2921_v41 = vld [vmem:[%s3897_s1 + $0x720] ss:$8 sps:$4 sm:$0xff]   ;;  %v2926_v42 = vld [vmem:[%s3897_s1 + $0x334] ss:$8 sps:$4 sm:$0xff]  }
  0x99   : > { %2083 = vmatprep.subr.bf16.mxu0 %v2845_v43  ;;  %v2929_v43 = vld [vmem:[%s3897_s1 + $0x734] ss:$8 sps:$4 sm:$0xff]  }
  0x9b   : > { %1912 = vmatpush1.bf16.msra.mxu1 %v2840_v44  ;;  %v2924_v44 = vld [vmem:[%s3897_s1 + $0x330] ss:$8 sps:$4 sm:$0xff]  }
  0x9c   : > { %2084 = vmatpush1.bf16.msra.mxu0 %v2843_v45  ;;  %1913 = vmatprep.subr.bf16.mxu1 %v2848_v46  ;;  %v2927_v45 = vld [vmem:[%s3897_s1 + $0x730] ss:$8 sps:$4 sm:$0xff]   ;;  %v2932_v46 = vld [vmem:[%s3897_s1 + $0x344] ss:$8 sps:$4 sm:$0xff]  }
  0x9d   : > { %2085 = vmatprep.subr.bf16.mxu0 %v2851_v47  ;;  %v2935_v47 = vld [vmem:[%s3897_s1 + $0x744] ss:$8 sps:$4 sm:$0xff]  }
  0x9f   : > { %1914 = vmatpush1.bf16.msra.mxu1 %v2846_v48  ;;  %v2930_v48 = vld [vmem:[%s3897_s1 + $0x340] ss:$8 sps:$4 sm:$0xff]  }
  0xa0   : > { %2086 = vmatpush1.bf16.msra.mxu0 %v2849_v49  ;;  %1915 = vmatprep.subr.bf16.mxu1 %v2854_v50  ;;  %v2933_v49 = vld [vmem:[%s3897_s1 + $0x740] ss:$8 sps:$4 sm:$0xff]   ;;  %v2938_v50 = vld [vmem:[%s3897_s1 + $0x354] ss:$8 sps:$4 sm:$0xff]  }
  0xa1   : > { %2087 = vmatprep.subr.bf16.mxu0 %v2857_v51  ;;  %v2941_v51 = vld [vmem:[%s3897_s1 + $0x754] ss:$8 sps:$4 sm:$0xff]  }
  0xa3   : > { %1916 = vmatpush1.bf16.msra.mxu1 %v2852_v52  ;;  %v2936_v52 = vld [vmem:[%s3897_s1 + $0x350] ss:$8 sps:$4 sm:$0xff]  }
  0xa4   : > { %2088 = vmatpush1.bf16.msra.mxu0 %v2855_v53  ;;  %1917 = vmatprep.subr.bf16.mxu1 %v2860_v54  ;;  %v2939_v53 = vld [vmem:[%s3897_s1 + $0x750] ss:$8 sps:$4 sm:$0xff]   ;;  %v2944_v54 = vld [vmem:[%s3897_s1 + $0x364] ss:$8 sps:$4 sm:$0xff]  }
  0xa5   : > { %2089 = vmatprep.subr.bf16.mxu0 %v2863_v55  ;;  %v2947_v55 = vld [vmem:[%s3897_s1 + $0x764] ss:$8 sps:$4 sm:$0xff]  }
  0xa7   : > { %1918 = vmatpush1.bf16.msra.mxu1 %v2858_v56  ;;  %v2942_v56 = vld [vmem:[%s3897_s1 + $0x360] ss:$8 sps:$4 sm:$0xff]  }
  0xa8   : > { %2090 = vmatpush1.bf16.msra.mxu0 %v2861_v57  ;;  %1919 = vmatprep.subr.bf16.mxu1 %v2866_v58  ;;  %v2945_v57 = vld [vmem:[%s3897_s1 + $0x760] ss:$8 sps:$4 sm:$0xff]   ;;  %v2950_v58 = vld [vmem:[%s3897_s1 + $0x374] ss:$8 sps:$4 sm:$0xff]  }
  0xa9   : > { %2091 = vmatprep.subr.bf16.mxu0 %v2869_v59  ;;  %v2953_v59 = vld [vmem:[%s3897_s1 + $0x774] ss:$8 sps:$4 sm:$0xff]  }
  0xab   : > { %1920 = vmatpush1.bf16.msra.mxu1 %v2864_v60  ;;  %v2948_v60 = vld [vmem:[%s3897_s1 + $0x370] ss:$8 sps:$4 sm:$0xff]  }
  0xac   : > { %2092 = vmatpush1.bf16.msra.mxu0 %v2867_v61  ;;  %1921 = vmatprep.subr.bf16.mxu1 %v2872_v62  ;;  %v2951_v61 = vld [vmem:[%s3897_s1 + $0x770] ss:$8 sps:$4 sm:$0xff]   ;;  %v2956_v62 = vld [vmem:[%s3897_s1 + $0x384] ss:$8 sps:$4 sm:$0xff]  }
  0xad   : > { %2093 = vmatprep.subr.bf16.mxu0 %v2875_v63  ;;  %v2959_v63 = vld [vmem:[%s3897_s1 + $0x784] ss:$8 sps:$4 sm:$0xff]  }
  0xaf   : > { %1922 = vmatpush1.bf16.msra.mxu1 %v2870_v0  ;;  %v2954_v0 = vld [vmem:[%s3897_s1 + $0x380] ss:$8 sps:$4 sm:$0xff]  }
  0xb0   : > { %2094 = vmatpush1.bf16.msra.mxu0 %v2873_v1  ;;  %1923 = vmatprep.subr.bf16.mxu1 %v2878_v2  ;;  %v2957_v1 = vld [vmem:[%s3897_s1 + $0x780] ss:$8 sps:$4 sm:$0xff]   ;;  %v2962_v2 = vld [vmem:[%s3897_s1 + $0x394] ss:$8 sps:$4 sm:$0xff]  }
  0xb1   : > { %2095 = vmatprep.subr.bf16.mxu0 %v2881_v3  ;;  %v2965_v3 = vld [vmem:[%s3897_s1 + $0x794] ss:$8 sps:$4 sm:$0xff]  }
  0xb3   : > { %1924 = vmatpush1.bf16.msra.mxu1 %v2876_v4  ;;  %v2960_v4 = vld [vmem:[%s3897_s1 + $0x390] ss:$8 sps:$4 sm:$0xff]  }
  0xb4   : > { %2096 = vmatpush1.bf16.msra.mxu0 %v2879_v5  ;;  %1925 = vmatprep.subr.bf16.mxu1 %v2884_v6  ;;  %v2963_v5 = vld [vmem:[%s3897_s1 + $0x790] ss:$8 sps:$4 sm:$0xff]   ;;  %v2968_v6 = vld [vmem:[%s3897_s1 + $0x3a4] ss:$8 sps:$4 sm:$0xff]  }
  0xb5   : > { %2097 = vmatprep.subr.bf16.mxu0 %v2887_v7  ;;  %v2971_v7 = vld [vmem:[%s3897_s1 + $0x7a4] ss:$8 sps:$4 sm:$0xff]  }
  0xb7   : > { %1926 = vmatpush1.bf16.msra.mxu1 %v2882_v8  ;;  %v2966_v8 = vld [vmem:[%s3897_s1 + $0x3a0] ss:$8 sps:$4 sm:$0xff]  }
  0xb8   : > { %2098 = vmatpush1.bf16.msra.mxu0 %v2885_v9  ;;  %1927 = vmatprep.subr.bf16.mxu1 %v2890_v10  ;;  %v2969_v9 = vld [vmem:[%s3897_s1 + $0x7a0] ss:$8 sps:$4 sm:$0xff]   ;;  %v2974_v10 = vld [vmem:[%s3897_s1 + $0x3b4] ss:$8 sps:$4 sm:$0xff]  }
  0xb9   : > { %2099 = vmatprep.subr.bf16.mxu0 %v2893_v11  ;;  %v2977_v11 = vld [vmem:[%s3897_s1 + $0x7b4] ss:$8 sps:$4 sm:$0xff]  }
  0xbb   : > { %1928 = vmatpush1.bf16.msra.mxu1 %v2888_v12  ;;  %v2972_v12 = vld [vmem:[%s3897_s1 + $0x3b0] ss:$8 sps:$4 sm:$0xff]  }
  0xbc   : > { %2100 = vmatpush1.bf16.msra.mxu0 %v2891_v13  ;;  %1929 = vmatprep.subr.bf16.mxu1 %v2896_v14  ;;  %v2975_v13 = vld [vmem:[%s3897_s1 + $0x7b0] ss:$8 sps:$4 sm:$0xff]   ;;  %v2980_v14 = vld [vmem:[%s3897_s1 + $0x3c4] ss:$8 sps:$4 sm:$0xff]  }
  0xbd   : > { %2101 = vmatprep.subr.bf16.mxu0 %v2899_v15  ;;  %v2983_v15 = vld [vmem:[%s3897_s1 + $0x7c4] ss:$8 sps:$4 sm:$0xff]  }
  0xbf   : > { %1930 = vmatpush1.bf16.msra.mxu1 %v2894_v16  ;;  %v2978_v16 = vld [vmem:[%s3897_s1 + $0x3c0] ss:$8 sps:$4 sm:$0xff]  }
  0xc0   : > { %2102 = vmatpush1.bf16.msra.mxu0 %v2897_v17  ;;  %1931 = vmatprep.subr.bf16.mxu1 %v2902_v18  ;;  %v2981_v17 = vld [vmem:[%s3897_s1 + $0x7c0] ss:$8 sps:$4 sm:$0xff]   ;;  %v2986_v18 = vld [vmem:[%s3897_s1 + $0x3d4] ss:$8 sps:$4 sm:$0xff]  }
  0xc1   : > { %2103 = vmatprep.subr.bf16.mxu0 %v2905_v19  ;;  %v2989_v19 = vld [vmem:[%s3897_s1 + $0x7d4] ss:$8 sps:$4 sm:$0xff]  }
  0xc3   : > { %1932 = vmatpush1.bf16.msra.mxu1 %v2900_v20  ;;  %v2984_v20 = vld [vmem:[%s3897_s1 + $0x3d0] ss:$8 sps:$4 sm:$0xff]  }
  0xc4   : > { %2104 = vmatpush1.bf16.msra.mxu0 %v2903_v21  ;;  %1944 = vmatprep.subr.bf16.mxu1 %v2908_v22  ;;  %v2987_v21 = vld [vmem:[%s3897_s1 + $0x7d0] ss:$8 sps:$4 sm:$0xff]   ;;  %v2992_v22 = vld [vmem:[%s3897_s1 + $0x3e4] ss:$8 sps:$4 sm:$0xff]  }
  0xc5   : > { %2116 = vmatprep.subr.bf16.mxu0 %v2911_v23  ;;  %v2995_v23 = vld [vmem:[%s3897_s1 + $0x7e4] ss:$8 sps:$4 sm:$0xff]  }
  0xc6   : > { %1934 = vmatmul.mubr.bf16.vlgmr.msra.gmra.mrb[0].mxu1 %v2302_v27  ;;  %v2990_v27 = vld [vmem:[%s3897_s1 + $0x3e0] ss:$8 sps:$4 sm:$0xff]  }
  0xc7   : > { %2106 = vmatmul.mubr.bf16.vlgmr.msra.gmra.mrb[0].mxu0 %v2310_v28  ;;  %1945 = vmatpush1.bf16.msra.mxu1 %v2906_v34  ;;  %v2993_v28 = vld [vmem:[%s3897_s1 + $0x7e0] ss:$8 sps:$4 sm:$0xff]   ;;  %v2998_v34 = vld [vmem:[%s3897_s1 + $0x3f4] ss:$8 sps:$4 sm:$0xff]  }
  0xc8   : > { %2117 = vmatpush1.bf16.msra.mxu0 %v2909_v35  ;;  %1946 = vmatprep.subr.bf16.mxu1 %v2914_v24  ;;  %v3001_v35 = vld [vmem:[%s3897_s1 + $0x7f4] ss:$8 sps:$4 sm:$0xff]   ;;  %v2996_v24 = vld [vmem:[%s3897_s1 + $0x3f0] ss:$8 sps:$4 sm:$0xff]  }
  0xc9   : > { %2118 = vmatprep.subr.bf16.mxu0 %v2917_v25  ;;  %1976 = vmatprep.mubr.bf16.mxu1 %v2305_v29  ;;  %v2999_v25 = vld [vmem:[%s3897_s1 + $0x7f0] ss:$8 sps:$4 sm:$0xff]   ;;  %v2304_v29 = vcombine.low %v3677_v26, %v3684_v31 }
  0xca   : > { %2148 = vmatprep.mubr.bf16.mxu0 %v2313_v30  ;;  %v2312_v30 = vcombine.low %v3687_v32, %v3690_v33 }
  0xcb   : > { %1947 = vmatpush1.bf16.msra.mxu1 %v2912_v36  ;;  %v445_v36 = vlaneseq }
  0xcc   : > { %2119 = vmatpush1.bf16.msra.mxu0 %v2915_v37  ;;  %1948 = vmatprep.subr.bf16.mxu1 %v2920_v38 }
  0xcd   : > { %2120 = vmatprep.subr.bf16.mxu0 %v2923_v39  ;;  %v446_v37 = vshrl.u32 %v445_v36, 7  ;;  %v443_v39 = vld [vmem:[%s3898_s2] sm:$0x3] }
  0xcf   : > { %1949 = vmatpush1.bf16.msra.mxu1 %v2918_v40  ;;  %v447_v38 = vsub.s32 0, %v446_v37  ;;  %v451_v40 = vsub.s32 1, %v446_v37 }
  0xd0   : > { %2121 = vmatpush1.bf16.msra.mxu0 %v2921_v41  ;;  %1950 = vmatprep.subr.bf16.mxu1 %v2926_v42 }
  0xd1   : > { %2122 = vmatprep.subr.bf16.mxu0 %v2929_v43  ;;  %v448_v41 = vrot.slane %v443_v39, %v447_v38  ;;  %v452_v42 = vrot.slane %v443_v39, %v451_v40 }
  0xd3   : > { %1951 = vmatpush1.bf16.msra.mxu1 %v2924_v44 }
  0xd4   : > { %2123 = vmatpush1.bf16.msra.mxu0 %v2927_v45  ;;  %1952 = vmatprep.subr.bf16.mxu1 %v2932_v46 }
  0xd5   : > { %2124 = vmatprep.subr.bf16.mxu0 %v2935_v47 }
  0xd7   : > { %1953 = vmatpush1.bf16.msra.mxu1 %v2930_v48 }
  0xd8   : > { %2125 = vmatpush1.bf16.msra.mxu0 %v2933_v49  ;;  %1954 = vmatprep.subr.bf16.mxu1 %v2938_v50 }
  0xd9   : > { %2126 = vmatprep.subr.bf16.mxu0 %v2941_v51 }
  0xdb   : > { %1955 = vmatpush1.bf16.msra.mxu1 %v2936_v52 }
  0xdc   : > { %2127 = vmatpush1.bf16.msra.mxu0 %v2939_v53  ;;  %1956 = vmatprep.subr.bf16.mxu1 %v2944_v54 }
  0xdd   : > { %2128 = vmatprep.subr.bf16.mxu0 %v2947_v55 }
  0xdf   : > { %1957 = vmatpush1.bf16.msra.mxu1 %v2942_v56 }
  0xe0   : > { %2129 = vmatpush1.bf16.msra.mxu0 %v2945_v57  ;;  %1958 = vmatprep.subr.bf16.mxu1 %v2950_v58 }
  0xe1   : > { %2130 = vmatprep.subr.bf16.mxu0 %v2953_v59 }
  0xe3   : > { %1959 = vmatpush1.bf16.msra.mxu1 %v2948_v60 }
  0xe4   : > { %2131 = vmatpush1.bf16.msra.mxu0 %v2951_v61  ;;  %1960 = vmatprep.subr.bf16.mxu1 %v2956_v62 }
  0xe5   : > { %2132 = vmatprep.subr.bf16.mxu0 %v2959_v63 }
  0xe7   : > { %1961 = vmatpush1.bf16.msra.mxu1 %v2954_v0 }
  0xe8   : > { %2133 = vmatpush1.bf16.msra.mxu0 %v2957_v1  ;;  %1962 = vmatprep.subr.bf16.mxu1 %v2962_v2 }
  0xe9   : > { %2134 = vmatprep.subr.bf16.mxu0 %v2965_v3 }
  0xeb   : > { %1963 = vmatpush1.bf16.msra.mxu1 %v2960_v4 }
  0xec   : > { %2135 = vmatpush1.bf16.msra.mxu0 %v2963_v5  ;;  %1964 = vmatprep.subr.bf16.mxu1 %v2968_v6 }
  0xed   : > { %2136 = vmatprep.subr.bf16.mxu0 %v2971_v7 }
  0xef   : > { %1965 = vmatpush1.bf16.msra.mxu1 %v2966_v8 }
  0xf0   : > { %2137 = vmatpush1.bf16.msra.mxu0 %v2969_v9  ;;  %1966 = vmatprep.subr.bf16.mxu1 %v2974_v10 }
  0xf1   : > { %2138 = vmatprep.subr.bf16.mxu0 %v2977_v11 }
  0xf3   : > { %1967 = vmatpush1.bf16.msra.mxu1 %v2972_v12 }
  0xf4   : > { %2139 = vmatpush1.bf16.msra.mxu0 %v2975_v13  ;;  %1968 = vmatprep.subr.bf16.mxu1 %v2980_v14 }
  0xf5   : > { %2140 = vmatprep.subr.bf16.mxu0 %v2983_v15 }
  0xf7   : > { %1969 = vmatpush1.bf16.msra.mxu1 %v2978_v16 }
  0xf8   : > { %2141 = vmatpush1.bf16.msra.mxu0 %v2981_v17  ;;  %1970 = vmatprep.subr.bf16.mxu1 %v2986_v18 }
  0xf9   : > { %2142 = vmatprep.subr.bf16.mxu0 %v2989_v19 }
  0xfb   : > { %1971 = vmatpush1.bf16.msra.mxu1 %v2984_v20 }
  0xfc   : > { %2143 = vmatpush1.bf16.msra.mxu0 %v2987_v21  ;;  %1972 = vmatprep.subr.bf16.mxu1 %v2992_v22 }
  0xfd   : > { %2144 = vmatprep.subr.bf16.mxu0 %v2995_v23 }
  0xff   : > { %1973 = vmatpush1.bf16.msra.mxu1 %v2990_v27 }
 0x100   : > { %2145 = vmatpush1.bf16.msra.mxu0 %v2993_v28  ;;  %1974 = vmatprep.subr.bf16.mxu1 %v2998_v34 }
 0x101   : > { %2146 = vmatprep.subr.bf16.mxu0 %v3001_v35 }
 0x103   : > { %1975 = vmatpush1.bf16.msra.mxu1 %v2996_v24 }
 0x104   : > { %2147 = vmatpush1.bf16.msra.mxu0 %v2999_v25 }
 0x106   : > { %1977 = vmatmul.mubr.bf16.vlgmr.msra.gmra.mrb[0].mxu1 %v2304_v29 }
 0x107   : > { %2149 = vmatmul.mubr.bf16.vlgmr.msra.gmra.mrb[0].mxu0 %v2312_v30 }
 0x1d9   : > { %v1978_v43 = vpop.f32.mrb[0].mxu1 }
 0x1da   : > { %v2150_v44 = vpop.f32.mrb[0].mxu0  ;;  %v2578_v26 = vadd.f32 %v1978_v43, %v448_v41  ;;  %v1980_v31 = vpop.f32.mrb[1].mxu1 }
 0x1db   : > { %v2152_v45 = vpop.f32.mrb[1].mxu0  ;;  %v2580_v32 = vadd.f32 %v1980_v31, %v452_v42  ;;  %v1982_v33 = vpop.f32.mrb[2].mxu1 }
 0x1dc   : > { %v2154_v46 = vpop.f32.mrb[2].mxu0  ;;  %v2579_v47 = vadd.f32 %v2578_v26, %v2150_v44  ;;  %v2582_v48 = vadd.f32 %v1982_v33, %v448_v41  ;;  %v1984_v49 = vpop.f32.mrb[3].mxu1 }
 0x1dd   : > { %v2156_v50 = vpop.f32.mrb[3].mxu0  ;;  %v2581_v51 = vadd.f32 %v2580_v32, %v2152_v45  ;;  %v2584_v52 = vadd.f32 %v1984_v49, %v452_v42 }
 0x1de   : > { %v2583_v53 = vadd.f32 %v2582_v48, %v2154_v46 }
 0x1df   : > { %v2585_v54 = vadd.f32 %v2584_v52, %v2156_v50 }
 0x1e0   : > { %v2159_v55 = vadd.f32 %v2583_v53, %v2579_v47 }
 0x1e1   : > { %v2166_v56 = vadd.f32 %v2585_v54, %v2581_v51 }
 0x1e2   : > { %v2160_v57 = vrot.slane %v2159_v55, 4 }
 0x1e3   : > { %v2167_v58 = vrot.slane %v2166_v56, 4 }
 0x1e4   : > { %v2161_v59 = vadd.f32 %v2160_v57, %v2159_v55 }
 0x1e5   : > { %v2168_v60 = vadd.f32 %v2167_v58, %v2166_v56 }
 0x1e6   : > { %v2162_v61 = vrot.slane %v2161_v59, 2 }
 0x1e7   : > { %v2169_v62 = vrot.slane %v2168_v60, 2 }
 0x1e8   : > { %v2163_v63 = vadd.f32 %v2162_v61, %v2161_v59 }
 0x1e9   : > { %v2170_v0 = vadd.f32 %v2169_v62, %v2168_v60 }
 0x1ea   : > { %v2164_v1 = vrot.slane %v2163_v63, 1 }
 0x1eb   : > { %v2171_v2 = vrot.slane %v2170_v0, 1 }
 0x1ec   : > { %v2165_v3 = vadd.f32 %v2164_v1, %v2163_v63 }
 0x1ed   : > { %v2172_v4 = vadd.f32 %v2171_v2, %v2170_v0 }
 0x1ee   : > { %v2174_v5 = vmul.f32 0.0625, %v2165_v3 }
 0x1ef   : > { %v2175_v6 = vmul.f32 0.0625, %v2172_v4 }
 0x1f0   : > { %v2176_v7 = vsub.f32 %v2579_v47, %v2174_v5  ;;  %v2178_v8 = vsub.f32 %v2583_v53, %v2174_v5 }
 0x1f1   : > { %v2177_v9 = vsub.f32 %v2581_v51, %v2175_v6  ;;  %v2179_v10 = vsub.f32 %v2585_v54, %v2175_v6 }
 0x1f2   : > { %v2180_v11 = vmul.f32 %v2176_v7, %v2176_v7  ;;  %v2182_v12 = vmul.f32 %v2178_v8, %v2178_v8 }
 0x1f3   : > { %v2181_v13 = vmul.f32 %v2177_v9, %v2177_v9  ;;  %v2183_v14 = vmul.f32 %v2179_v10, %v2179_v10 }
 0x1f4   : > { %v2184_v15 = vadd.f32 %v2182_v12, %v2180_v11 }
 0x1f5   : > { %v2191_v16 = vadd.f32 %v2183_v14, %v2181_v13 }
 0x1f6   : > { %v2185_v17 = vrot.slane %v2184_v15, 4 }
 0x1f7   : > { %v2192_v18 = vrot.slane %v2191_v16, 4 }
 0x1f8   : > { %v2186_v19 = vadd.f32 %v2185_v17, %v2184_v15 }
 0x1f9   : > { %v2193_v20 = vadd.f32 %v2192_v18, %v2191_v16 }
 0x1fa   : > { %v2187_v21 = vrot.slane %v2186_v19, 2 }
 0x1fb   : > { %v2194_v22 = vrot.slane %v2193_v20, 2 }
 0x1fc   : > { %v2188_v23 = vadd.f32 %v2187_v21, %v2186_v19 }
 0x1fd   : > { %v2195_v27 = vadd.f32 %v2194_v22, %v2193_v20 }
 0x1fe   : > { %v2189_v28 = vrot.slane %v2188_v23, 1 }
 0x1ff   : > { %v2196_v34 = vrot.slane %v2195_v27, 1 }
 0x200   : > { %v2190_v35 = vadd.f32 %v2189_v28, %v2188_v23 }
 0x201   : > { %v2197_v24 = vadd.f32 %v2196_v34, %v2195_v27 }
 0x202   : > { %v2198_v25 = vmul.f32 0.0625, %v2190_v35 }
 0x203   : > { %v2199_v29 = vmul.f32 0.0625, %v2197_v24 }
 0x204   : > { %v2200_v30 = vadd.f32 1e-05, %v2198_v25 }
 0x205   : > { %v2201_v36 = vadd.f32 1e-05, %v2199_v29 }
 0x206   : > { %3002 = vrsqrt.f32 %v2200_v30 }
 0x207   : > { %3004 = vrsqrt.f32 %v2201_v36 }
 0x210   : > { %v3003_v37 = vpop.eup %3002 }
 0x211   : > { %v3005_v38 = vpop.eup %3004  ;;  %v2204_v39 = vmul.f32 %v3003_v37, %v2176_v7  ;;  %v2206_v40 = vmul.f32 %v3003_v37, %v2178_v8 }
 0x212   : > { %v2205_v41 = vmul.f32 %v3005_v38, %v2177_v9  ;;  %v2207_v42 = vmul.f32 %v3005_v38, %v2179_v10 }
 0x213   : > { %vm2208_vm0 = vcmp.gt.f32.partialorder %v2204_v39, 0.0  ;;  %vm2210_vm1 = vcmp.gt.f32.partialorder %v2206_v40, 0.0  ;;  %v2212_v43 = vmul.f32 0.2, %v2204_v39  ;;  %v2214_v44 = vmul.f32 0.2, %v2206_v40 }
 0x214   : > { %vm2209_vm2 = vcmp.gt.f32.partialorder %v2205_v41, 0.0  ;;  %vm2211_vm3 = vcmp.gt.f32.partialorder %v2207_v42, 0.0  ;;  %v2213_v26 = vmul.f32 0.2, %v2205_v41  ;;  %v2215_v31 = vmul.f32 0.2, %v2207_v42 }
 0x215   : > { %v2216_v45 = vsel %vm2208_vm0, %v2204_v39, %v2212_v43  ;;  %v2218_v32 = vsel %vm2210_vm1, %v2206_v40, %v2214_v44 }
 0x216   : > { %v2217_v33 = vsel %vm2209_vm2, %v2205_v41, %v2213_v26  ;;  %v2219_v46 = vsel %vm2211_vm3, %v2207_v42, %v2215_v31 }
 0x217   : > { %v2576_v47 = vpack.c.bf16 %v2217_v33, %v2216_v45  ;;  %v2577_v48 = vpack.c.bf16 %v2219_v46, %v2218_v32 }
 0x219   : > { %2232 = vst [vmem:[%s170_s22] sm:$0xff] %v2576_v47  ;;  %2233 = vst [vmem:[%s170_s22 + $0x8] sm:$0xff] %v2577_v48 }
 0x21a PF: > { %s13_s12 = sadd.s32 1, %s3012_s12  }
 0x21b   : > { %p10_p4 = scmp.ge.s32.totalorder %s13_s12, 4  }
 0x21d   :  { %12 = sbr.rel (!%p10_p4) target bundleno = 1 (0x1), region = 62 }

// kernel: squeeze.1
= control target key start
LH: loop header
LB: loop body
LE: loop exit
PB: predicated region body
PF: predicated region fallthrough
CT: control target
= control target key end

     0   :  { %s90_s0 = inlined_call_operand.vmem [shape: f32[2,4], index: 0, kind: input, shape index: {}]   ;;  %s91_s1 = inlined_call_operand.hbm [shape: f32[2,1,2,2], index: 1, kind: output, shape index: {}]  }
   0x1   :  { %v5_v0 = vld [vmem:[%s90_s0] sm:$0x3] }
   0x2   :  { %2 = vsyncpa [#allocation1], 0  ;;  %6 = vst [vmem:[#allocation3] sm:$0x3] %v5_v0  ;;  %vm8_vm0 = vcmask 15360   ;;  %s63_s0 = smov 126  }
   0x3   :  { %s64_s8 = smov [#allocation0]  }
   0x4   :  { %s31_s9 = sshll.u32 %s64_s8, 4  ;;  %s32_s9 = int_to_ptr.vmem [resolvable:$true] %s31_s9 }
   0x5   :  { %s39_s10 = scalar_lea.vmem %s32_s9, 64  ;;  %p44_p1 = scmp.lt.s32.totalorder %s32_s9, %s32_s9 }
   0x6   :  { %p40_p0 = scmp.ne.s32.totalorder %s32_s9, %s39_s10  ;;  %p45_p2 = scmp.lt.s32.totalorder %s39_s10, %s39_s10 }
   0x8   :  { %p46_p3 = por %p45_p2, %p44_p1 }
   0x9   :  { %v10_v1 = vld [vmem:[#allocation3] sm:$0x3]  }
   0xa   :  { %v7_v2 = vld [vmem:[#allocation3] sm:$0x3]   ;;  %11 = vrot.lane.b32.xlu0 %v10_v1, %s63_s0  ;;  %p47_p4 = pnand %p46_p3, %p40_p0 }
   0xb   :  { %9 = vst.msk [vmem:[#allocation2] ss:$8 sm:$0x3] %vm8_vm0, %v7_v2  }
  0x7c   :  { %v12_v3 = vpop.permute.xlu0 %11  }
  0x7d   :  { %15 = vst.msk [vmem:[#allocation2 + $0x1] ss:$8 sm:$0x3] %vm8_vm0, %v12_v3  }
  0x84   :  { %v19_v4 = vld [vmem:[#allocation2] sm:$0x3]  ;;  %v23_v5 = vld [vmem:[#allocation2 + $0x8] sm:$0x3] }
  0x85   :  { %21 = vst [vmem:[#allocation0] sm:$0x3] %v19_v4  ;;  %26 = vst [vmem:[#allocation0 + $0x2] sm:$0x3] %v23_v5 }
  0x86   :  { %50 = shalt.err (!%p47_p4)
}
  0x87   :  { %s51_s13 = scalar_lea.hbm %s91_s1, 64 }
  0x88   :  { %p52_p5 = scmp.ne.s32.totalorder %s91_s1, %s51_s13  ;;  %p55_p6 = scmp.lt.u32.totalorder %s51_s13, %s91_s1 }
  0x8a   :  { %p57_p7 = pnand %p55_p6, %p52_p5 }
  0x8c   :  { %60 = shalt.err (!%p57_p7)
}
  0x8d   :  { %34 = dma.vmem_to_hbm [thread:$0]  %s32_s9, 64, %s91_s1, [#allocation1]  }
  0x8e   :  { %61 = dma.done.wait [#allocation1], 64  }
  0x8f   :  { %62 = vsyncadd [#allocation1], 4294967232 }
  0x90   :  { %36 = vsyncpa [#allocation1], 1 }

// kernel: discriminator_forward.7
= control target key start
LH: loop header
LB: loop body
LE: loop exit
PB: predicated region body
PF: predicated region fallthrough
CT: control target
= control target key end

     0   :  { %s12804_s18 = smov 0   ;;  %s16495_s0 = inlined_call_operand.vmem [shape: bf16[2,4,4096], index: 0, kind: input, shape index: {}]   ;;  %s16496_s1 = inlined_call_operand.vmem [shape: bf16[4096,512], index: 1, kind: input, shape index: {}]   ;;  %s16497_s2 = inlined_call_operand.vmem [shape: f32[1,512], index: 2, kind: input, shape index: {}]   ;;  %s16498_s3 = inlined_call_operand.vmem [shape: bf16[4,512,128], index: 3, kind: input, shape index: {}]   ;;  %s16499_s4 = inlined_call_operand.vmem [shape: f32[1,128], index: 4, kind: input, shape index: {}]   ;;  %s16500_s5 = inlined_call_operand.vmem [shape: f32[2,1,128], index: 5, kind: output, shape index: {}]  }
   0x1 LB: > { %s9422_s19 = sadd.s32 4294967295, %s12771_s18   ;;  %p9426_p0 = scmp.ge.s32.totalorder %s12771_s18, 1  ;;  %s12771_s18 = sphi %s12804_s18, %s15_s18  }
   0x2   : > { %p187_p1 = scmp.lt.s32.totalorder %s12771_s18, 3 }
   0x4   : > { %p188_p2 = pnand %p9426_p0, %p187_p1 }
   0x5   : > { %v11085_v0 = vld [vmem:[%s16496_s1 + $0x4] ss:$16 sps:$4 sm:$0xff] (!%p188_p2)   ;;  %v11087_v1 = vld [vmem:[%s16496_s1 + $0xc] ss:$16 sps:$4 sm:$0xff] (!%p188_p2)   ;;  %v11089_v2 = vld [vmem:[%s16496_s1] ss:$16 sps:$4 sm:$0xff] (!%p188_p2)   ;;  %v1256_v36 = vlaneseq (!%p188_p2) }
   0x6   : > { %191 = sbr.rel (%p188_p2) target bundleno = 1618 (0x652), region = 40  ;;  %6572 = vmatprep.subr.bf16.mxu0 (!%p188_p2), %v11085_v0  ;;  %v11090_v3 = vld [vmem:[%s16496_s1 + $0x8] ss:$16 sps:$4 sm:$0xff] (!%p188_p2)   ;;  %7228 = vmatprep.subr.bf16.mxu1 (!%p188_p2), %v11087_v1  ;;  %v11091_v4 = vld [vmem:[%s16496_s1 + $0x24] ss:$16 sps:$4 sm:$0xff] (!%p188_p2)   ;;  %p213_p3 = scmp.lt.s32.totalorder (!%p188_p2), %s9422_s19, 1 }
   0x7   : > { %6573 = vmatpush1.bf16.msra.mxu0 (!%p188_p2), %v11089_v2  ;;  %7229 = vmatpush1.bf16.msra.mxu1 (!%p188_p2), %v11090_v3  ;;  %v11093_v5 = vld [vmem:[%s16496_s1 + $0x2c] ss:$16 sps:$4 sm:$0xff] (!%p188_p2)   ;;  %v11095_v6 = vld [vmem:[%s16496_s1 + $0x20] ss:$16 sps:$4 sm:$0xff] (!%p188_p2)   ;;  %v11096_v7 = vld [vmem:[%s16496_s1 + $0x28] ss:$16 sps:$4 sm:$0xff] (!%p188_p2)  }
   0x8   : > { %6574 = vmatprep.subr.bf16.mxu0 (!%p188_p2), %v11091_v4  ;;  %7230 = vmatprep.subr.bf16.mxu1 (!%p188_p2), %v11093_v5  ;;  %v11097_v8 = vld [vmem:[%s16496_s1 + $0x44] ss:$16 sps:$4 sm:$0xff] (!%p188_p2)   ;;  %v11099_v9 = vld [vmem:[%s16496_s1 + $0x4c] ss:$16 sps:$4 sm:$0xff] (!%p188_p2)   ;;  %v11101_v10 = vld [vmem:[%s16496_s1 + $0x40] ss:$16 sps:$4 sm:$0xff] (!%p188_p2)  }
   0x9   : > { %v11102_v11 = vld [vmem:[%s16496_s1 + $0x48] ss:$16 sps:$4 sm:$0xff] (!%p188_p2)   ;;  %v11103_v12 = vld [vmem:[%s16496_s1 + $0x64] ss:$16 sps:$4 sm:$0xff] (!%p188_p2)   ;;  %v11105_v13 = vld [vmem:[%s16496_s1 + $0x6c] ss:$16 sps:$4 sm:$0xff] (!%p188_p2)  }
   0xa   : > { %v11107_v14 = vld [vmem:[%s16496_s1 + $0x60] ss:$16 sps:$4 sm:$0xff] (!%p188_p2)   ;;  %v11108_v15 = vld [vmem:[%s16496_s1 + $0x68] ss:$16 sps:$4 sm:$0xff] (!%p188_p2)   ;;  %v11109_v16 = vld [vmem:[%s16496_s1 + $0x84] ss:$16 sps:$4 sm:$0xff] (!%p188_p2)  }
   0xb   : > { %6575 = vmatpush1.bf16.msra.mxu0 (!%p188_p2), %v11095_v6  ;;  %7231 = vmatpush1.bf16.msra.mxu1 (!%p188_p2), %v11096_v7  ;;  %v11111_v17 = vld [vmem:[%s16496_s1 + $0x8c] ss:$16 sps:$4 sm:$0xff] (!%p188_p2)   ;;  %v11113_v18 = vld [vmem:[%s16496_s1 + $0x80] ss:$16 sps:$4 sm:$0xff] (!%p188_p2)   ;;  %v11114_v19 = vld [vmem:[%s16496_s1 + $0x88] ss:$16 sps:$4 sm:$0xff] (!%p188_p2)  }
   0xc   : > { %6576 = vmatprep.subr.bf16.mxu0 (!%p188_p2), %v11097_v8  ;;  %7232 = vmatprep.subr.bf16.mxu1 (!%p188_p2), %v11099_v9  ;;  %v11115_v20 = vld [vmem:[%s16496_s1 + $0xa4] ss:$16 sps:$4 sm:$0xff] (!%p188_p2)   ;;  %v11117_v21 = vld [vmem:[%s16496_s1 + $0xac] ss:$16 sps:$4 sm:$0xff] (!%p188_p2)   ;;  %v11119_v22 = vld [vmem:[%s16496_s1 + $0xa0] ss:$16 sps:$4 sm:$0xff] (!%p188_p2)  }
   0xd   : > { %v11120_v23 = vld [vmem:[%s16496_s1 + $0xa8] ss:$16 sps:$4 sm:$0xff]   ;;  %v11121_v24 = vld [vmem:[%s16496_s1 + $0xc4] ss:$16 sps:$4 sm:$0xff]   ;;  %v11123_v25 = vld [vmem:[%s16496_s1 + $0xcc] ss:$16 sps:$4 sm:$0xff]  }
   0xe   : > { %v11125_v26 = vld [vmem:[%s16496_s1 + $0xc0] ss:$16 sps:$4 sm:$0xff]   ;;  %v11126_v27 = vld [vmem:[%s16496_s1 + $0xc8] ss:$16 sps:$4 sm:$0xff]   ;;  %v11127_v28 = vld [vmem:[%s16496_s1 + $0xe4] ss:$16 sps:$4 sm:$0xff]  }
   0xf   : > { %6577 = vmatpush1.bf16.msra.mxu0 %v11101_v10  ;;  %7233 = vmatpush1.bf16.msra.mxu1 %v11102_v11  ;;  %v11129_v29 = vld [vmem:[%s16496_s1 + $0xec] ss:$16 sps:$4 sm:$0xff]   ;;  %v11131_v30 = vld [vmem:[%s16496_s1 + $0xe0] ss:$16 sps:$4 sm:$0xff]   ;;  %v11132_v31 = vld [vmem:[%s16496_s1 + $0xe8] ss:$16 sps:$4 sm:$0xff]  }
  0x10   : > { %6578 = vmatprep.subr.bf16.mxu0 %v11103_v12  ;;  %7234 = vmatprep.subr.bf16.mxu1 %v11105_v13  ;;  %v11133_v32 = vld [vmem:[%s16496_s1 + $0x104] ss:$16 sps:$4 sm:$0xff]   ;;  %v11135_v33 = vld [vmem:[%s16496_s1 + $0x10c] ss:$16 sps:$4 sm:$0xff]   ;;  %v11137_v34 = vld [vmem:[%s16496_s1 + $0x100] ss:$16 sps:$4 sm:$0xff]  }
  0x11   : > { %v11138_v35 = vld [vmem:[%s16496_s1 + $0x108] ss:$16 sps:$4 sm:$0xff]   ;;  %v12773_v37 = vmov 1983009808   ;;  %v11139_v39 = vld [vmem:[%s16496_s1 + $0x124] ss:$16 sps:$4 sm:$0xff]  }
  0x12   : > { %v1286_v38 = vunpack.c.l.s4 %v12773_v37  ;;  %s16502_s19 = smov (!%p213_p3, %s9422_s19), 1  ;;  %v11141_v40 = vld [vmem:[%s16496_s1 + $0x12c] ss:$16 sps:$4 sm:$0xff]   ;;  %v11143_v41 = vld [vmem:[%s16496_s1 + $0x120] ss:$16 sps:$4 sm:$0xff]   ;;  %v12935_v42 = vshrl.u32 %v1256_v36, 7 }
  0x13   : > { %6579 = vmatpush1.bf16.msra.mxu0 %v11107_v14  ;;  %7235 = vmatpush1.bf16.msra.mxu1 %v11108_v15  ;;  %v11144_v44 = vld [vmem:[%s16496_s1 + $0x128] ss:$16 sps:$4 sm:$0xff]   ;;  %v11145_v45 = vld [vmem:[%s16496_s1 + $0x144] ss:$16 sps:$4 sm:$0xff]   ;;  %s10775_s8 = sshll.u32 %s16502_s19, 6  ;;  %vm7884_vm0 = vcmask 1043456   ;;  %s220_s16 = scalar_lea.vmem %s16500_s5, %s16502_s19 }
  0x14   : > { %6580 = vmatprep.subr.bf16.mxu0 %v11109_v16  ;;  %7236 = vmatprep.subr.bf16.mxu1 %v11111_v17  ;;  %v1287_v43 = vunpack.c.0.s8 %v1286_v38  ;;  %v11147_v46 = vld [vmem:[%s16496_s1 + $0x14c] ss:$16 sps:$4 sm:$0xff]   ;;  %v11149_v47 = vld [vmem:[%s16496_s1 + $0x140] ss:$16 sps:$4 sm:$0xff]   ;;  %v11150_v48 = vld [vmem:[%s16496_s1 + $0x148] ss:$16 sps:$4 sm:$0xff]   ;;  %s12956_s17 = scalar_lea.vmem %s16495_s0, %s10775_s8 }
  0x15   : > { %v11151_v50 = vld [vmem:[%s16496_s1 + $0x164] ss:$16 sps:$4 sm:$0xff]   ;;  %v11153_v51 = vld [vmem:[%s16496_s1 + $0x16c] ss:$16 sps:$4 sm:$0xff]   ;;  %v11155_v53 = vld [vmem:[%s16496_s1 + $0x160] ss:$16 sps:$4 sm:$0xff]  }
  0x16   : > { %v12959_v49 = vsub.s32 %v1287_v43, %v12935_v42  ;;  %v222_v52 = vld [vmem:[%s12956_s17] sm:$0xff]  ;;  %v11156_v55 = vld [vmem:[%s16496_s1 + $0x168] ss:$16 sps:$4 sm:$0xff]   ;;  %v11159_v57 = vld [vmem:[%s16496_s1 + $0x18c] ss:$16 sps:$4 sm:$0xff]  }
  0x17   : > { %6581 = vmatpush1.bf16.msra.mxu0 %v11113_v18  ;;  %7237 = vmatpush1.bf16.msra.mxu1 %v11114_v19  ;;  %v11157_v56 = vld [vmem:[%s16496_s1 + $0x184] ss:$16 sps:$4 sm:$0xff]   ;;  %v11161_v59 = vld [vmem:[%s16496_s1 + $0x180] ss:$16 sps:$4 sm:$0xff]   ;;  %v11162_v60 = vld [vmem:[%s16496_s1 + $0x188] ss:$16 sps:$4 sm:$0xff]   ;;  %v1284_v7 = vcombine.high %v222_v52, %v222_v52 }
  0x18   : > { %6582 = vmatprep.subr.bf16.mxu0 %v11115_v20  ;;  %7238 = vmatprep.subr.bf16.mxu1 %v11117_v21  ;;  %v1291_v54 = vrot.slane %v222_v52, %v12959_v49  ;;  %v11163_v61 = vld [vmem:[%s16496_s1 + $0x1a4] ss:$16 sps:$4 sm:$0xff]   ;;  %v11165_v62 = vld [vmem:[%s16496_s1 + $0x1ac] ss:$16 sps:$4 sm:$0xff]   ;;  %v11167_v63 = vld [vmem:[%s16496_s1 + $0x1a0] ss:$16 sps:$4 sm:$0xff]  }
  0x19   : > { %v11168_v0 = vld [vmem:[%s16496_s1 + $0x1a8] ss:$16 sps:$4 sm:$0xff]   ;;  %v11169_v1 = vld [vmem:[%s16496_s1 + $0x1c4] ss:$16 sps:$4 sm:$0xff]   ;;  %v11171_v2 = vld [vmem:[%s16496_s1 + $0x1cc] ss:$16 sps:$4 sm:$0xff]   ;;  %v13030_v12 = vrot.slane %v1284_v7, %v12959_v49 }
  0x1a   : > { %v1299_v58 = vcombine.high %v1291_v54, %v1291_v54  ;;  %v11173_v3 = vld [vmem:[%s16496_s1 + $0x1c0] ss:$16 sps:$4 sm:$0xff]   ;;  %v11174_v4 = vld [vmem:[%s16496_s1 + $0x1c8] ss:$16 sps:$4 sm:$0xff]   ;;  %v11175_v5 = vld [vmem:[%s16496_s1 + $0x1e4] ss:$16 sps:$4 sm:$0xff]  }
  0x1b   : > { %6583 = vmatpush1.bf16.msra.mxu0 %v11119_v22  ;;  %7239 = vmatpush1.bf16.msra.mxu1 %v11120_v23  ;;  %v11177_v6 = vld [vmem:[%s16496_s1 + $0x1ec] ss:$16 sps:$4 sm:$0xff]   ;;  %v11179_v8 = vld [vmem:[%s16496_s1 + $0x1e0] ss:$16 sps:$4 sm:$0xff]   ;;  %v11180_v9 = vld [vmem:[%s16496_s1 + $0x1e8] ss:$16 sps:$4 sm:$0xff]   ;;  %v1300_v17 = vcombine.high %v13030_v12, %v13030_v12 }
  0x1c   : > { %6584 = vmatprep.subr.bf16.mxu0 %v11121_v24  ;;  %7240 = vmatprep.subr.bf16.mxu1 %v11123_v25  ;;  %v11184_v10 = vld [vmem:[%s16496_s1 + $0x204] ss:$16 sps:$4 sm:$0xff]   ;;  %v11187_v11 = vld [vmem:[%s16496_s1 + $0x20c] ss:$16 sps:$4 sm:$0xff]   ;;  %v11182_v13 = vld [vmem:[%s16496_s1 + $0x200] ss:$16 sps:$4 sm:$0xff]  }
  0x1d   : > { %6604 = vmatprep.mubr.bf16.mxu0 %v1299_v58  ;;  %7260 = vmatprep.mubr.bf16.mxu1 %v1299_v58  ;;  %v11185_v14 = vld [vmem:[%s16496_s1 + $0x208] ss:$16 sps:$4 sm:$0xff]   ;;  %v11190_v15 = vld [vmem:[%s16496_s1 + $0x224] ss:$16 sps:$4 sm:$0xff]   ;;  %v11193_v16 = vld [vmem:[%s16496_s1 + $0x22c] ss:$16 sps:$4 sm:$0xff]  }
  0x1e   : > { %v11188_v18 = vld [vmem:[%s16496_s1 + $0x220] ss:$16 sps:$4 sm:$0xff]   ;;  %v11191_v19 = vld [vmem:[%s16496_s1 + $0x228] ss:$16 sps:$4 sm:$0xff]   ;;  %v11196_v20 = vld [vmem:[%s16496_s1 + $0x244] ss:$16 sps:$4 sm:$0xff]  }
  0x1f   : > { %6585 = vmatpush1.bf16.msra.mxu0 %v11125_v26  ;;  %7241 = vmatpush1.bf16.msra.mxu1 %v11126_v27  ;;  %v11199_v21 = vld [vmem:[%s16496_s1 + $0x24c] ss:$16 sps:$4 sm:$0xff]   ;;  %v11194_v22 = vld [vmem:[%s16496_s1 + $0x240] ss:$16 sps:$4 sm:$0xff]   ;;  %v11197_v23 = vld [vmem:[%s16496_s1 + $0x248] ss:$16 sps:$4 sm:$0xff]  }
  0x20   : > { %6586 = vmatprep.subr.bf16.mxu0 %v11127_v28  ;;  %7242 = vmatprep.subr.bf16.mxu1 %v11129_v29  ;;  %v11202_v24 = vld [vmem:[%s16496_s1 + $0x264] ss:$16 sps:$4 sm:$0xff]   ;;  %v11205_v25 = vld [vmem:[%s16496_s1 + $0x26c] ss:$16 sps:$4 sm:$0xff]   ;;  %v11200_v26 = vld [vmem:[%s16496_s1 + $0x260] ss:$16 sps:$4 sm:$0xff]  }
  0x21   : > { %v11203_v27 = vld [vmem:[%s16496_s1 + $0x268] ss:$16 sps:$4 sm:$0xff]   ;;  %v11208_v28 = vld [vmem:[%s16496_s1 + $0x284] ss:$16 sps:$4 sm:$0xff]   ;;  %v11211_v29 = vld [vmem:[%s16496_s1 + $0x28c] ss:$16 sps:$4 sm:$0xff]  }
  0x22   : > { %v11220_v36 = vld [vmem:[%s16496_s1 + $0x2c4] ss:$16 sps:$4 sm:$0xff]   ;;  %v11223_v37 = vld [vmem:[%s16496_s1 + $0x2cc] ss:$16 sps:$4 sm:$0xff]   ;;  %v11218_v38 = vld [vmem:[%s16496_s1 + $0x2c0] ss:$16 sps:$4 sm:$0xff]  }
  0x23   : > { %6587 = vmatpush1.bf16.msra.mxu0 %v11131_v30  ;;  %7243 = vmatpush1.bf16.msra.mxu1 %v11132_v31  ;;  %v11206_v30 = vld [vmem:[%s16496_s1 + $0x280] ss:$16 sps:$4 sm:$0xff]   ;;  %v11209_v31 = vld [vmem:[%s16496_s1 + $0x288] ss:$16 sps:$4 sm:$0xff]   ;;  %v11250_v58 = vld [vmem:[%s16496_s1 + $0x364] ss:$16 sps:$4 sm:$0xff]  }
  0x24   : > { %6588 = vmatprep.subr.bf16.mxu0 %v11133_v32  ;;  %7244 = vmatprep.subr.bf16.mxu1 %v11135_v33  ;;  %v11214_v32 = vld [vmem:[%s16496_s1 + $0x2a4] ss:$16 sps:$4 sm:$0xff]   ;;  %v11217_v33 = vld [vmem:[%s16496_s1 + $0x2ac] ss:$16 sps:$4 sm:$0xff]   ;;  %v11224_v43 = vld [vmem:[%s16496_s1 + $0x2e0] ss:$16 sps:$4 sm:$0xff]  }
  0x25   : > { %v11236_v52 = vld [vmem:[%s16496_s1 + $0x320] ss:$16 sps:$4 sm:$0xff]   ;;  %v11271_v7 = vld [vmem:[%s16496_s1 + $0x3cc] ss:$16 sps:$4 sm:$0xff]  }
  0x27   : > { %6589 = vmatpush1.bf16.msra.mxu0 %v11137_v34  ;;  %7245 = vmatpush1.bf16.msra.mxu1 %v11138_v35  ;;  %v11212_v34 = vld [vmem:[%s16496_s1 + $0x2a0] ss:$16 sps:$4 sm:$0xff]   ;;  %v11215_v35 = vld [vmem:[%s16496_s1 + $0x2a8] ss:$16 sps:$4 sm:$0xff]  }
  0x28   : > { %6590 = vmatprep.subr.bf16.mxu0 %v11139_v39  ;;  %7246 = vmatprep.subr.bf16.mxu1 %v11141_v40  ;;  %v11221_v39 = vld [vmem:[%s16496_s1 + $0x2c8] ss:$16 sps:$4 sm:$0xff]   ;;  %v11226_v40 = vld [vmem:[%s16496_s1 + $0x2e4] ss:$16 sps:$4 sm:$0xff]  }
  0x2b   : > { %6591 = vmatpush1.bf16.msra.mxu0 %v11143_v41  ;;  %7247 = vmatpush1.bf16.msra.mxu1 %v11144_v44  ;;  %v11229_v41 = vld [vmem:[%s16496_s1 + $0x2ec] ss:$16 sps:$4 sm:$0xff]   ;;  %v11227_v44 = vld [vmem:[%s16496_s1 + $0x2e8] ss:$16 sps:$4 sm:$0xff]  }
  0x2c   : > { %6592 = vmatprep.subr.bf16.mxu0 %v11145_v45  ;;  %7248 = vmatprep.subr.bf16.mxu1 %v11147_v46  ;;  %v11232_v45 = vld [vmem:[%s16496_s1 + $0x304] ss:$16 sps:$4 sm:$0xff]   ;;  %v11235_v46 = vld [vmem:[%s16496_s1 + $0x30c] ss:$16 sps:$4 sm:$0xff]  }
  0x2f   : > { %6593 = vmatpush1.bf16.msra.mxu0 %v11149_v47  ;;  %7249 = vmatpush1.bf16.msra.mxu1 %v11150_v48  ;;  %v11230_v47 = vld [vmem:[%s16496_s1 + $0x300] ss:$16 sps:$4 sm:$0xff]   ;;  %v11233_v48 = vld [vmem:[%s16496_s1 + $0x308] ss:$16 sps:$4 sm:$0xff]  }
  0x30   : > { %6594 = vmatprep.subr.bf16.mxu0 %v11151_v50  ;;  %7250 = vmatprep.subr.bf16.mxu1 %v11153_v51  ;;  %v11238_v50 = vld [vmem:[%s16496_s1 + $0x324] ss:$16 sps:$4 sm:$0xff]   ;;  %v11241_v51 = vld [vmem:[%s16496_s1 + $0x32c] ss:$16 sps:$4 sm:$0xff]  }
  0x33   : > { %6595 = vmatpush1.bf16.msra.mxu0 %v11155_v53  ;;  %7251 = vmatpush1.bf16.msra.mxu1 %v11156_v55  ;;  %v11239_v53 = vld [vmem:[%s16496_s1 + $0x328] ss:$16 sps:$4 sm:$0xff]   ;;  %v11247_v55 = vld [vmem:[%s16496_s1 + $0x34c] ss:$16 sps:$4 sm:$0xff]  }
  0x34   : > { %6596 = vmatprep.subr.bf16.mxu0 %v11157_v56  ;;  %7252 = vmatprep.subr.bf16.mxu1 %v11159_v57  ;;  %v11242_v56 = vld [vmem:[%s16496_s1 + $0x340] ss:$16 sps:$4 sm:$0xff]   ;;  %v11245_v57 = vld [vmem:[%s16496_s1 + $0x348] ss:$16 sps:$4 sm:$0xff]  }
  0x37   : > { %6597 = vmatpush1.bf16.msra.mxu0 %v11161_v59  ;;  %7253 = vmatpush1.bf16.msra.mxu1 %v11162_v60  ;;  %v11253_v59 = vld [vmem:[%s16496_s1 + $0x36c] ss:$16 sps:$4 sm:$0xff]   ;;  %v11248_v60 = vld [vmem:[%s16496_s1 + $0x360] ss:$16 sps:$4 sm:$0xff]  }
  0x38   : > { %6598 = vmatprep.subr.bf16.mxu0 %v11163_v61  ;;  %7254 = vmatprep.subr.bf16.mxu1 %v11165_v62  ;;  %v11251_v61 = vld [vmem:[%s16496_s1 + $0x368] ss:$16 sps:$4 sm:$0xff]   ;;  %v11256_v62 = vld [vmem:[%s16496_s1 + $0x384] ss:$16 sps:$4 sm:$0xff]  }
  0x3b   : > { %6599 = vmatpush1.bf16.msra.mxu0 %v11167_v63  ;;  %7255 = vmatpush1.bf16.msra.mxu1 %v11168_v0  ;;  %v11259_v63 = vld [vmem:[%s16496_s1 + $0x38c] ss:$16 sps:$4 sm:$0xff]   ;;  %v11254_v0 = vld [vmem:[%s16496_s1 + $0x380] ss:$16 sps:$4 sm:$0xff]  }
  0x3c   : > { %6600 = vmatprep.subr.bf16.mxu0 %v11169_v1  ;;  %7256 = vmatprep.subr.bf16.mxu1 %v11171_v2  ;;  %v11257_v1 = vld [vmem:[%s16496_s1 + $0x388] ss:$16 sps:$4 sm:$0xff]   ;;  %v11262_v2 = vld [vmem:[%s16496_s1 + $0x3a4] ss:$16 sps:$4 sm:$0xff]  }
  0x3f   : > { %6601 = vmatpush1.bf16.msra.mxu0 %v11173_v3  ;;  %7257 = vmatpush1.bf16.msra.mxu1 %v11174_v4  ;;  %v11265_v3 = vld [vmem:[%s16496_s1 + $0x3ac] ss:$16 sps:$4 sm:$0xff]   ;;  %v11260_v4 = vld [vmem:[%s16496_s1 + $0x3a0] ss:$16 sps:$4 sm:$0xff]  }
  0x40   : > { %6602 = vmatprep.subr.bf16.mxu0 %v11175_v5  ;;  %7258 = vmatprep.subr.bf16.mxu1 %v11177_v6  ;;  %v11263_v5 = vld [vmem:[%s16496_s1 + $0x3a8] ss:$16 sps:$4 sm:$0xff]   ;;  %v11268_v6 = vld [vmem:[%s16496_s1 + $0x3c4] ss:$16 sps:$4 sm:$0xff]  }
  0x43   : > { %6603 = vmatpush1.bf16.msra.mxu0 %v11179_v8  ;;  %7259 = vmatpush1.bf16.msra.mxu1 %v11180_v9  ;;  %v11266_v8 = vld [vmem:[%s16496_s1 + $0x3c0] ss:$16 sps:$4 sm:$0xff]   ;;  %v11269_v9 = vld [vmem:[%s16496_s1 + $0x3c8] ss:$16 sps:$4 sm:$0xff]  }
  0x44   : > { %6613 = vmatprep.subr.bf16.mxu0 %v11184_v10  ;;  %7269 = vmatprep.subr.bf16.mxu1 %v11187_v11  ;;  %v11274_v10 = vld [vmem:[%s16496_s1 + $0x3e4] ss:$16 sps:$4 sm:$0xff]   ;;  %v11277_v11 = vld [vmem:[%s16496_s1 + $0x3ec] ss:$16 sps:$4 sm:$0xff]  }
  0x46   : > { %6605 = vmatmul.mubr.bf16.vlgmr.msra.gmra.mrb[0].mxu0 %v1291_v54  ;;  %7261 = vmatmul.mubr.bf16.vlgmr.msra.gmra.mrb[0].mxu1 %v1291_v54  ;;  %v11244_v54 = vld [vmem:[%s16496_s1 + $0x344] ss:$16 sps:$4 sm:$0xff]  }
  0x47   : > { %6614 = vmatpush1.bf16.msra.mxu0 %v11182_v13  ;;  %7270 = vmatpush1.bf16.msra.mxu1 %v11185_v14  ;;  %v11272_v13 = vld [vmem:[%s16496_s1 + $0x3e0] ss:$16 sps:$4 sm:$0xff]   ;;  %v11275_v14 = vld [vmem:[%s16496_s1 + $0x3e8] ss:$16 sps:$4 sm:$0xff]  }
  0x48   : > { %6615 = vmatprep.subr.bf16.mxu0 %v11190_v15  ;;  %7271 = vmatprep.subr.bf16.mxu1 %v11193_v16  ;;  %v11280_v15 = vld [vmem:[%s16496_s1 + $0x404] ss:$16 sps:$4 sm:$0xff]   ;;  %v11283_v16 = vld [vmem:[%s16496_s1 + $0x40c] ss:$16 sps:$4 sm:$0xff]  }
  0x49   : > { %6645 = vmatprep.mubr.bf16.mxu0 %v1300_v17  ;;  %7301 = vmatprep.mubr.bf16.mxu1 %v1300_v17  ;;  %v11278_v17 = vld [vmem:[%s16496_s1 + $0x400] ss:$16 sps:$4 sm:$0xff]  }
  0x4b   : > { %6616 = vmatpush1.bf16.msra.mxu0 %v11188_v18  ;;  %7272 = vmatpush1.bf16.msra.mxu1 %v11191_v19  ;;  %v11281_v18 = vld [vmem:[%s16496_s1 + $0x408] ss:$16 sps:$4 sm:$0xff]  }
  0x4c   : > { %6617 = vmatprep.subr.bf16.mxu0 %v11196_v20  ;;  %7273 = vmatprep.subr.bf16.mxu1 %v11199_v21  ;;  %v13233_v19 = vld [vmem:[%s12956_s17 + $0x8] sm:$0xff]  ;;  %v11286_v20 = vld [vmem:[%s16496_s1 + $0x424] ss:$16 sps:$4 sm:$0xff]  }
  0x4d   : > { %v11289_v21 = vld [vmem:[%s16496_s1 + $0x42c] ss:$16 sps:$4 sm:$0xff]  }
  0x4f   : > { %6618 = vmatpush1.bf16.msra.mxu0 %v11194_v22  ;;  %7274 = vmatpush1.bf16.msra.mxu1 %v11197_v23  ;;  %v13243_v22 = vrot.slane %v13233_v19, %v12959_v49 }
  0x50   : > { %6619 = vmatprep.subr.bf16.mxu0 %v11202_v24  ;;  %7275 = vmatprep.subr.bf16.mxu1 %v11205_v25  ;;  %v11284_v24 = vld [vmem:[%s16496_s1 + $0x420] ss:$16 sps:$4 sm:$0xff]   ;;  %v11287_v25 = vld [vmem:[%s16496_s1 + $0x428] ss:$16 sps:$4 sm:$0xff]  }
  0x51   : > { %v1316_v23 = vcombine.high %v13243_v22, %v13243_v22 }
  0x53   : > { %6620 = vmatpush1.bf16.msra.mxu0 %v11200_v26  ;;  %7276 = vmatpush1.bf16.msra.mxu1 %v11203_v27  ;;  %v11292_v26 = vld [vmem:[%s16496_s1 + $0x444] ss:$16 sps:$4 sm:$0xff]   ;;  %v11290_v27 = vld [vmem:[%s16496_s1 + $0x440] ss:$16 sps:$4 sm:$0xff]  }
  0x54   : > { %6621 = vmatprep.subr.bf16.mxu0 %v11208_v28  ;;  %7277 = vmatprep.subr.bf16.mxu1 %v11211_v29  ;;  %v11293_v28 = vld [vmem:[%s16496_s1 + $0x448] ss:$16 sps:$4 sm:$0xff]   ;;  %v11298_v29 = vld [vmem:[%s16496_s1 + $0x464] ss:$16 sps:$4 sm:$0xff]  }
  0x57   : > { %6622 = vmatpush1.bf16.msra.mxu0 %v11206_v30  ;;  %7278 = vmatpush1.bf16.msra.mxu1 %v11209_v31  ;;  %v11301_v30 = vld [vmem:[%s16496_s1 + $0x46c] ss:$16 sps:$4 sm:$0xff]   ;;  %v11296_v31 = vld [vmem:[%s16496_s1 + $0x460] ss:$16 sps:$4 sm:$0xff]  }
  0x58   : > { %6623 = vmatprep.subr.bf16.mxu0 %v11214_v32  ;;  %7279 = vmatprep.subr.bf16.mxu1 %v11217_v33  ;;  %v11299_v32 = vld [vmem:[%s16496_s1 + $0x468] ss:$16 sps:$4 sm:$0xff]   ;;  %v11304_v33 = vld [vmem:[%s16496_s1 + $0x484] ss:$16 sps:$4 sm:$0xff]  }
  0x5b   : > { %6624 = vmatpush1.bf16.msra.mxu0 %v11212_v34  ;;  %7280 = vmatpush1.bf16.msra.mxu1 %v11215_v35  ;;  %v11307_v34 = vld [vmem:[%s16496_s1 + $0x48c] ss:$16 sps:$4 sm:$0xff]   ;;  %v11302_v35 = vld [vmem:[%s16496_s1 + $0x480] ss:$16 sps:$4 sm:$0xff]  }
  0x5c   : > { %6625 = vmatprep.subr.bf16.mxu0 %v11220_v36  ;;  %7281 = vmatprep.subr.bf16.mxu1 %v11223_v37  ;;  %v11305_v36 = vld [vmem:[%s16496_s1 + $0x488] ss:$16 sps:$4 sm:$0xff]   ;;  %v11310_v37 = vld [vmem:[%s16496_s1 + $0x4a4] ss:$16 sps:$4 sm:$0xff]  }
  0x5f   : > { %6626 = vmatpush1.bf16.msra.mxu0 %v11218_v38  ;;  %7282 = vmatpush1.bf16.msra.mxu1 %v11221_v39  ;;  %v11313_v38 = vld [vmem:[%s16496_s1 + $0x4ac] ss:$16 sps:$4 sm:$0xff]   ;;  %v11308_v39 = vld [vmem:[%s16496_s1 + $0x4a0] ss:$16 sps:$4 sm:$0xff]  }
  0x60   : > { %6627 = vmatprep.subr.bf16.mxu0 %v11226_v40  ;;  %7283 = vmatprep.subr.bf16.mxu1 %v11229_v41  ;;  %v11311_v40 = vld [vmem:[%s16496_s1 + $0x4a8] ss:$16 sps:$4 sm:$0xff]   ;;  %v11316_v41 = vld [vmem:[%s16496_s1 + $0x4c4] ss:$16 sps:$4 sm:$0xff]  }
  0x63   : > { %6628 = vmatpush1.bf16.msra.mxu0 %v11224_v43  ;;  %7284 = vmatpush1.bf16.msra.mxu1 %v11227_v44  ;;  %v11319_v43 = vld [vmem:[%s16496_s1 + $0x4cc] ss:$16 sps:$4 sm:$0xff]   ;;  %v11314_v44 = vld [vmem:[%s16496_s1 + $0x4c0] ss:$16 sps:$4 sm:$0xff]  }
  0x64   : > { %6629 = vmatprep.subr.bf16.mxu0 %v11232_v45  ;;  %7285 = vmatprep.subr.bf16.mxu1 %v11235_v46  ;;  %v11317_v45 = vld [vmem:[%s16496_s1 + $0x4c8] ss:$16 sps:$4 sm:$0xff]   ;;  %v11322_v46 = vld [vmem:[%s16496_s1 + $0x4e4] ss:$16 sps:$4 sm:$0xff]  }
  0x67   : > { %6630 = vmatpush1.bf16.msra.mxu0 %v11230_v47  ;;  %7286 = vmatpush1.bf16.msra.mxu1 %v11233_v48  ;;  %v11325_v47 = vld [vmem:[%s16496_s1 + $0x4ec] ss:$16 sps:$4 sm:$0xff]   ;;  %v11320_v48 = vld [vmem:[%s16496_s1 + $0x4e0] ss:$16 sps:$4 sm:$0xff]  }
  0x68   : > { %6631 = vmatprep.subr.bf16.mxu0 %v11238_v50  ;;  %7287 = vmatprep.subr.bf16.mxu1 %v11241_v51  ;;  %v11323_v50 = vld [vmem:[%s16496_s1 + $0x4e8] ss:$16 sps:$4 sm:$0xff]   ;;  %v11328_v51 = vld [vmem:[%s16496_s1 + $0x504] ss:$16 sps:$4 sm:$0xff]  }
  0x6b   : > { %6632 = vmatpush1.bf16.msra.mxu0 %v11236_v52  ;;  %7288 = vmatpush1.bf16.msra.mxu1 %v11239_v53  ;;  %v11331_v52 = vld [vmem:[%s16496_s1 + $0x50c] ss:$16 sps:$4 sm:$0xff]   ;;  %v11326_v53 = vld [vmem:[%s16496_s1 + $0x500] ss:$16 sps:$4 sm:$0xff]  }
  0x6c   : > { %6633 = vmatprep.subr.bf16.mxu0 %v11244_v54  ;;  %7289 = vmatprep.subr.bf16.mxu1 %v11247_v55  ;;  %v11329_v54 = vld [vmem:[%s16496_s1 + $0x508] ss:$16 sps:$4 sm:$0xff]   ;;  %v11334_v55 = vld [vmem:[%s16496_s1 + $0x524] ss:$16 sps:$4 sm:$0xff]  }
  0x6f   : > { %6634 = vmatpush1.bf16.msra.mxu0 %v11242_v56  ;;  %7290 = vmatpush1.bf16.msra.mxu1 %v11245_v57  ;;  %v11337_v56 = vld [vmem:[%s16496_s1 + $0x52c] ss:$16 sps:$4 sm:$0xff]   ;;  %v11332_v57 = vld [vmem:[%s16496_s1 + $0x520] ss:$16 sps:$4 sm:$0xff]  }
  0x70   : > { %6635 = vmatprep.subr.bf16.mxu0 %v11250_v58  ;;  %7291 = vmatprep.subr.bf16.mxu1 %v11253_v59  ;;  %v11335_v58 = vld [vmem:[%s16496_s1 + $0x528] ss:$16 sps:$4 sm:$0xff]   ;;  %v11340_v59 = vld [vmem:[%s16496_s1 + $0x544] ss:$16 sps:$4 sm:$0xff]  }
  0x73   : > { %6636 = vmatpush1.bf16.msra.mxu0 %v11248_v60  ;;  %7292 = vmatpush1.bf16.msra.mxu1 %v11251_v61  ;;  %v11343_v60 = vld [vmem:[%s16496_s1 + $0x54c] ss:$16 sps:$4 sm:$0xff]   ;;  %v11338_v61 = vld [vmem:[%s16496_s1 + $0x540] ss:$16 sps:$4 sm:$0xff]  }
  0x74   : > { %6637 = vmatprep.subr.bf16.mxu0 %v11256_v62  ;;  %7293 = vmatprep.subr.bf16.mxu1 %v11259_v63  ;;  %v11341_v62 = vld [vmem:[%s16496_s1 + $0x548] ss:$16 sps:$4 sm:$0xff]   ;;  %v11346_v63 = vld [vmem:[%s16496_s1 + $0x564] ss:$16 sps:$4 sm:$0xff]  }
  0x77   : > { %6638 = vmatpush1.bf16.msra.mxu0 %v11254_v0  ;;  %7294 = vmatpush1.bf16.msra.mxu1 %v11257_v1  ;;  %v11349_v0 = vld [vmem:[%s16496_s1 + $0x56c] ss:$16 sps:$4 sm:$0xff]   ;;  %v11344_v1 = vld [vmem:[%s16496_s1 + $0x560] ss:$16 sps:$4 sm:$0xff]  }
  0x78   : > { %6639 = vmatprep.subr.bf16.mxu0 %v11262_v2  ;;  %7295 = vmatprep.subr.bf16.mxu1 %v11265_v3  ;;  %v11347_v2 = vld [vmem:[%s16496_s1 + $0x568] ss:$16 sps:$4 sm:$0xff]   ;;  %v11352_v3 = vld [vmem:[%s16496_s1 + $0x584] ss:$16 sps:$4 sm:$0xff]  }
  0x7b   : > { %6640 = vmatpush1.bf16.msra.mxu0 %v11260_v4  ;;  %7296 = vmatpush1.bf16.msra.mxu1 %v11263_v5  ;;  %v11355_v4 = vld [vmem:[%s16496_s1 + $0x58c] ss:$16 sps:$4 sm:$0xff]   ;;  %v11350_v5 = vld [vmem:[%s16496_s1 + $0x580] ss:$16 sps:$4 sm:$0xff]  }
  0x7c   : > { %6641 = vmatprep.subr.bf16.mxu0 %v11268_v6  ;;  %7297 = vmatprep.subr.bf16.mxu1 %v11271_v7  ;;  %v11353_v6 = vld [vmem:[%s16496_s1 + $0x588] ss:$16 sps:$4 sm:$0xff]   ;;  %v11358_v7 = vld [vmem:[%s16496_s1 + $0x5a4] ss:$16 sps:$4 sm:$0xff]  }
  0x7f   : > { %6642 = vmatpush1.bf16.msra.mxu0 %v11266_v8  ;;  %7298 = vmatpush1.bf16.msra.mxu1 %v11269_v9  ;;  %v11361_v8 = vld [vmem:[%s16496_s1 + $0x5ac] ss:$16 sps:$4 sm:$0xff]   ;;  %v11356_v9 = vld [vmem:[%s16496_s1 + $0x5a0] ss:$16 sps:$4 sm:$0xff]  }
  0x80   : > { %6643 = vmatprep.subr.bf16.mxu0 %v11274_v10  ;;  %7299 = vmatprep.subr.bf16.mxu1 %v11277_v11  ;;  %v11359_v10 = vld [vmem:[%s16496_s1 + $0x5a8] ss:$16 sps:$4 sm:$0xff]   ;;  %v11364_v11 = vld [vmem:[%s16496_s1 + $0x5c4] ss:$16 sps:$4 sm:$0xff]  }
  0x83   : > { %6644 = vmatpush1.bf16.msra.mxu0 %v11272_v13  ;;  %7300 = vmatpush1.bf16.msra.mxu1 %v11275_v14  ;;  %v11367_v13 = vld [vmem:[%s16496_s1 + $0x5cc] ss:$16 sps:$4 sm:$0xff]   ;;  %v11362_v14 = vld [vmem:[%s16496_s1 + $0x5c0] ss:$16 sps:$4 sm:$0xff]  }
  0x84   : > { %6654 = vmatprep.subr.bf16.mxu0 %v11280_v15  ;;  %7310 = vmatprep.subr.bf16.mxu1 %v11283_v16  ;;  %v11365_v15 = vld [vmem:[%s16496_s1 + $0x5c8] ss:$16 sps:$4 sm:$0xff]   ;;  %v11370_v16 = vld [vmem:[%s16496_s1 + $0x5e4] ss:$16 sps:$4 sm:$0xff]  }
  0x86   : > { %6646 = vmatmul.mubr.bf16.vlgmr.msra.gmra.mrb[0].mxu0 %v13030_v12  ;;  %7302 = vmatmul.mubr.bf16.vlgmr.msra.gmra.mrb[0].mxu1 %v13030_v12  ;;  %v11295_v12 = vld [vmem:[%s16496_s1 + $0x44c] ss:$16 sps:$4 sm:$0xff]  }
  0x87   : > { %6655 = vmatpush1.bf16.msra.mxu0 %v11278_v17  ;;  %7311 = vmatpush1.bf16.msra.mxu1 %v11281_v18  ;;  %v11373_v17 = vld [vmem:[%s16496_s1 + $0x5ec] ss:$16 sps:$4 sm:$0xff]   ;;  %v1301_v18 = vcombine.high %v13233_v19, %v13233_v19 }
  0x88   : > { %6656 = vmatprep.subr.bf16.mxu0 %v11286_v20  ;;  %7312 = vmatprep.subr.bf16.mxu1 %v11289_v21  ;;  %v11368_v20 = vld [vmem:[%s16496_s1 + $0x5e0] ss:$16 sps:$4 sm:$0xff]   ;;  %v11371_v21 = vld [vmem:[%s16496_s1 + $0x5e8] ss:$16 sps:$4 sm:$0xff]   ;;  %v11379_v19 = vld [vmem:[%s16496_s1 + $0x60c] ss:$16 sps:$4 sm:$0xff]  }
  0x89   : > { %6686 = vmatprep.mubr.bf16.mxu0 %v1316_v23  ;;  %7342 = vmatprep.mubr.bf16.mxu1 %v1316_v23  ;;  %v11376_v23 = vld [vmem:[%s16496_s1 + $0x604] ss:$16 sps:$4 sm:$0xff]  }
  0x8b   : > { %6657 = vmatpush1.bf16.msra.mxu0 %v11284_v24  ;;  %7313 = vmatpush1.bf16.msra.mxu1 %v11287_v25  ;;  %v13432_v24 = vrot.slane %v1301_v18, %v12959_v49  ;;  %v11374_v25 = vld [vmem:[%s16496_s1 + $0x600] ss:$16 sps:$4 sm:$0xff]   ;;  %v11463_v18 = vld [vmem:[%s16496_s1 + $0x7cc] ss:$16 sps:$4 sm:$0xff]  }
  0x8c   : > { %6658 = vmatprep.subr.bf16.mxu0 %v11292_v26  ;;  %7314 = vmatprep.subr.bf16.mxu1 %v11295_v12  ;;  %v11377_v26 = vld [vmem:[%s16496_s1 + $0x608] ss:$16 sps:$4 sm:$0xff]   ;;  %v11382_v12 = vld [vmem:[%s16496_s1 + $0x624] ss:$16 sps:$4 sm:$0xff]  }
  0x8f   : > { %6659 = vmatpush1.bf16.msra.mxu0 %v11290_v27  ;;  %7315 = vmatpush1.bf16.msra.mxu1 %v11293_v28  ;;  %v11385_v27 = vld [vmem:[%s16496_s1 + $0x62c] ss:$16 sps:$4 sm:$0xff]   ;;  %v1317_v28 = vcombine.high %v13432_v24, %v13432_v24 }
  0x90   : > { %6660 = vmatprep.subr.bf16.mxu0 %v11298_v29  ;;  %7316 = vmatprep.subr.bf16.mxu1 %v11301_v30  ;;  %v11380_v29 = vld [vmem:[%s16496_s1 + $0x620] ss:$16 sps:$4 sm:$0xff]   ;;  %v11383_v30 = vld [vmem:[%s16496_s1 + $0x628] ss:$16 sps:$4 sm:$0xff]  }
  0x93   : > { %6661 = vmatpush1.bf16.msra.mxu0 %v11296_v31  ;;  %7317 = vmatpush1.bf16.msra.mxu1 %v11299_v32  ;;  %v11388_v31 = vld [vmem:[%s16496_s1 + $0x644] ss:$16 sps:$4 sm:$0xff]   ;;  %v11386_v32 = vld [vmem:[%s16496_s1 + $0x640] ss:$16 sps:$4 sm:$0xff]  }
  0x94   : > { %6662 = vmatprep.subr.bf16.mxu0 %v11304_v33  ;;  %7318 = vmatprep.subr.bf16.mxu1 %v11307_v34  ;;  %v11389_v33 = vld [vmem:[%s16496_s1 + $0x648] ss:$16 sps:$4 sm:$0xff]   ;;  %v11394_v34 = vld [vmem:[%s16496_s1 + $0x664] ss:$16 sps:$4 sm:$0xff]  }
  0x97   : > { %6663 = vmatpush1.bf16.msra.mxu0 %v11302_v35  ;;  %7319 = vmatpush1.bf16.msra.mxu1 %v11305_v36  ;;  %v11397_v35 = vld [vmem:[%s16496_s1 + $0x66c] ss:$16 sps:$4 sm:$0xff]   ;;  %v11392_v36 = vld [vmem:[%s16496_s1 + $0x660] ss:$16 sps:$4 sm:$0xff]  }
  0x98   : > { %6664 = vmatprep.subr.bf16.mxu0 %v11310_v37  ;;  %7320 = vmatprep.subr.bf16.mxu1 %v11313_v38  ;;  %v11395_v37 = vld [vmem:[%s16496_s1 + $0x668] ss:$16 sps:$4 sm:$0xff]   ;;  %v11400_v38 = vld [vmem:[%s16496_s1 + $0x684] ss:$16 sps:$4 sm:$0xff]  }
  0x9b   : > { %6665 = vmatpush1.bf16.msra.mxu0 %v11308_v39  ;;  %7321 = vmatpush1.bf16.msra.mxu1 %v11311_v40  ;;  %v11403_v39 = vld [vmem:[%s16496_s1 + $0x68c] ss:$16 sps:$4 sm:$0xff]   ;;  %v11398_v40 = vld [vmem:[%s16496_s1 + $0x680] ss:$16 sps:$4 sm:$0xff]  }
  0x9c   : > { %6666 = vmatprep.subr.bf16.mxu0 %v11316_v41  ;;  %7322 = vmatprep.subr.bf16.mxu1 %v11319_v43  ;;  %v11401_v41 = vld [vmem:[%s16496_s1 + $0x688] ss:$16 sps:$4 sm:$0xff]   ;;  %v11406_v43 = vld [vmem:[%s16496_s1 + $0x6a4] ss:$16 sps:$4 sm:$0xff]  }
  0x9f   : > { %6667 = vmatpush1.bf16.msra.mxu0 %v11314_v44  ;;  %7323 = vmatpush1.bf16.msra.mxu1 %v11317_v45  ;;  %v11409_v44 = vld [vmem:[%s16496_s1 + $0x6ac] ss:$16 sps:$4 sm:$0xff]   ;;  %v11404_v45 = vld [vmem:[%s16496_s1 + $0x6a0] ss:$16 sps:$4 sm:$0xff]  }
  0xa0   : > { %6668 = vmatprep.subr.bf16.mxu0 %v11322_v46  ;;  %7324 = vmatprep.subr.bf16.mxu1 %v11325_v47  ;;  %v11407_v46 = vld [vmem:[%s16496_s1 + $0x6a8] ss:$16 sps:$4 sm:$0xff]   ;;  %v11412_v47 = vld [vmem:[%s16496_s1 + $0x6c4] ss:$16 sps:$4 sm:$0xff]  }
  0xa3   : > { %6669 = vmatpush1.bf16.msra.mxu0 %v11320_v48  ;;  %7325 = vmatpush1.bf16.msra.mxu1 %v11323_v50  ;;  %v11415_v48 = vld [vmem:[%s16496_s1 + $0x6cc] ss:$16 sps:$4 sm:$0xff]   ;;  %v11410_v50 = vld [vmem:[%s16496_s1 + $0x6c0] ss:$16 sps:$4 sm:$0xff]  }
  0xa4   : > { %6670 = vmatprep.subr.bf16.mxu0 %v11328_v51  ;;  %7326 = vmatprep.subr.bf16.mxu1 %v11331_v52  ;;  %v11413_v51 = vld [vmem:[%s16496_s1 + $0x6c8] ss:$16 sps:$4 sm:$0xff]   ;;  %v11418_v52 = vld [vmem:[%s16496_s1 + $0x6e4] ss:$16 sps:$4 sm:$0xff]  }
  0xa7   : > { %6671 = vmatpush1.bf16.msra.mxu0 %v11326_v53  ;;  %7327 = vmatpush1.bf16.msra.mxu1 %v11329_v54  ;;  %v11421_v53 = vld [vmem:[%s16496_s1 + $0x6ec] ss:$16 sps:$4 sm:$0xff]   ;;  %v11416_v54 = vld [vmem:[%s16496_s1 + $0x6e0] ss:$16 sps:$4 sm:$0xff]  }
  0xa8   : > { %6672 = vmatprep.subr.bf16.mxu0 %v11334_v55  ;;  %7328 = vmatprep.subr.bf16.mxu1 %v11337_v56  ;;  %v11419_v55 = vld [vmem:[%s16496_s1 + $0x6e8] ss:$16 sps:$4 sm:$0xff]   ;;  %v11424_v56 = vld [vmem:[%s16496_s1 + $0x704] ss:$16 sps:$4 sm:$0xff]  }
  0xab   : > { %6673 = vmatpush1.bf16.msra.mxu0 %v11332_v57  ;;  %7329 = vmatpush1.bf16.msra.mxu1 %v11335_v58  ;;  %v11427_v57 = vld [vmem:[%s16496_s1 + $0x70c] ss:$16 sps:$4 sm:$0xff]   ;;  %v11422_v58 = vld [vmem:[%s16496_s1 + $0x700] ss:$16 sps:$4 sm:$0xff]  }
  0xac   : > { %6674 = vmatprep.subr.bf16.mxu0 %v11340_v59  ;;  %7330 = vmatprep.subr.bf16.mxu1 %v11343_v60  ;;  %v11425_v59 = vld [vmem:[%s16496_s1 + $0x708] ss:$16 sps:$4 sm:$0xff]   ;;  %v11430_v60 = vld [vmem:[%s16496_s1 + $0x724] ss:$16 sps:$4 sm:$0xff]  }
  0xaf   : > { %6675 = vmatpush1.bf16.msra.mxu0 %v11338_v61  ;;  %7331 = vmatpush1.bf16.msra.mxu1 %v11341_v62  ;;  %v11433_v61 = vld [vmem:[%s16496_s1 + $0x72c] ss:$16 sps:$4 sm:$0xff]   ;;  %v11428_v62 = vld [vmem:[%s16496_s1 + $0x720] ss:$16 sps:$4 sm:$0xff]  }
  0xb0   : > { %6676 = vmatprep.subr.bf16.mxu0 %v11346_v63  ;;  %7332 = vmatprep.subr.bf16.mxu1 %v11349_v0  ;;  %v11431_v63 = vld [vmem:[%s16496_s1 + $0x728] ss:$16 sps:$4 sm:$0xff]   ;;  %v11436_v0 = vld [vmem:[%s16496_s1 + $0x744] ss:$16 sps:$4 sm:$0xff]  }
  0xb3   : > { %6677 = vmatpush1.bf16.msra.mxu0 %v11344_v1  ;;  %7333 = vmatpush1.bf16.msra.mxu1 %v11347_v2  ;;  %v11439_v1 = vld [vmem:[%s16496_s1 + $0x74c] ss:$16 sps:$4 sm:$0xff]   ;;  %v11434_v2 = vld [vmem:[%s16496_s1 + $0x740] ss:$16 sps:$4 sm:$0xff]  }
  0xb4   : > { %6678 = vmatprep.subr.bf16.mxu0 %v11352_v3  ;;  %7334 = vmatprep.subr.bf16.mxu1 %v11355_v4  ;;  %v11437_v3 = vld [vmem:[%s16496_s1 + $0x748] ss:$16 sps:$4 sm:$0xff]   ;;  %v11442_v4 = vld [vmem:[%s16496_s1 + $0x764] ss:$16 sps:$4 sm:$0xff]  }
  0xb7   : > { %6679 = vmatpush1.bf16.msra.mxu0 %v11350_v5  ;;  %7335 = vmatpush1.bf16.msra.mxu1 %v11353_v6  ;;  %v11445_v5 = vld [vmem:[%s16496_s1 + $0x76c] ss:$16 sps:$4 sm:$0xff]   ;;  %v11440_v6 = vld [vmem:[%s16496_s1 + $0x760] ss:$16 sps:$4 sm:$0xff]  }
  0xb8   : > { %6680 = vmatprep.subr.bf16.mxu0 %v11358_v7  ;;  %7336 = vmatprep.subr.bf16.mxu1 %v11361_v8  ;;  %v11443_v7 = vld [vmem:[%s16496_s1 + $0x768] ss:$16 sps:$4 sm:$0xff]   ;;  %v11448_v8 = vld [vmem:[%s16496_s1 + $0x784] ss:$16 sps:$4 sm:$0xff]  }
  0xbb   : > { %6681 = vmatpush1.bf16.msra.mxu0 %v11356_v9  ;;  %7337 = vmatpush1.bf16.msra.mxu1 %v11359_v10  ;;  %v11451_v9 = vld [vmem:[%s16496_s1 + $0x78c] ss:$16 sps:$4 sm:$0xff]   ;;  %v11446_v10 = vld [vmem:[%s16496_s1 + $0x780] ss:$16 sps:$4 sm:$0xff]  }
  0xbc   : > { %6682 = vmatprep.subr.bf16.mxu0 %v11364_v11  ;;  %7338 = vmatprep.subr.bf16.mxu1 %v11367_v13  ;;  %v11449_v11 = vld [vmem:[%s16496_s1 + $0x788] ss:$16 sps:$4 sm:$0xff]   ;;  %v11454_v13 = vld [vmem:[%s16496_s1 + $0x7a4] ss:$16 sps:$4 sm:$0xff]  }
  0xbf   : > { %6683 = vmatpush1.bf16.msra.mxu0 %v11362_v14  ;;  %7339 = vmatpush1.bf16.msra.mxu1 %v11365_v15  ;;  %v11457_v14 = vld [vmem:[%s16496_s1 + $0x7ac] ss:$16 sps:$4 sm:$0xff]   ;;  %v11452_v15 = vld [vmem:[%s16496_s1 + $0x7a0] ss:$16 sps:$4 sm:$0xff]  }
  0xc0   : > { %6684 = vmatprep.subr.bf16.mxu0 %v11370_v16  ;;  %7340 = vmatprep.subr.bf16.mxu1 %v11373_v17  ;;  %v11455_v16 = vld [vmem:[%s16496_s1 + $0x7a8] ss:$16 sps:$4 sm:$0xff]   ;;  %v11460_v17 = vld [vmem:[%s16496_s1 + $0x7c4] ss:$16 sps:$4 sm:$0xff]  }
  0xc3   : > { %6685 = vmatpush1.bf16.msra.mxu0 %v11368_v20  ;;  %7341 = vmatpush1.bf16.msra.mxu1 %v11371_v21  ;;  %v11458_v20 = vld [vmem:[%s16496_s1 + $0x7c0] ss:$16 sps:$4 sm:$0xff]   ;;  %v11461_v21 = vld [vmem:[%s16496_s1 + $0x7c8] ss:$16 sps:$4 sm:$0xff]  }
  0xc4   : > { %6695 = vmatprep.subr.bf16.mxu0 %v11376_v23  ;;  %7351 = vmatprep.subr.bf16.mxu1 %v11379_v19  ;;  %v11466_v23 = vld [vmem:[%s16496_s1 + $0x7e4] ss:$16 sps:$4 sm:$0xff]   ;;  %v11469_v19 = vld [vmem:[%s16496_s1 + $0x7ec] ss:$16 sps:$4 sm:$0xff]  }
  0xc6   : > { %6687 = vmatmul.mubr.bf16.vlgmr.msra.gmra.mrb[0].mxu0 %v13243_v22  ;;  %7343 = vmatmul.mubr.bf16.vlgmr.msra.gmra.mrb[0].mxu1 %v13243_v22  ;;  %v11391_v22 = vld [vmem:[%s16496_s1 + $0x64c] ss:$16 sps:$4 sm:$0xff]  }
  0xc7   : > { %6696 = vmatpush1.bf16.msra.mxu0 %v11374_v25  ;;  %7352 = vmatpush1.bf16.msra.mxu1 %v11377_v26  ;;  %v11464_v25 = vld [vmem:[%s16496_s1 + $0x7e0] ss:$16 sps:$4 sm:$0xff]  }
  0xc8   : > { %6697 = vmatprep.subr.bf16.mxu0 %v11382_v12  ;;  %7353 = vmatprep.subr.bf16.mxu1 %v11385_v27  ;;  %v13622_v26 = vld [vmem:[%s12956_s17 + $0x10] sm:$0xff]  ;;  %v11467_v12 = vld [vmem:[%s16496_s1 + $0x7e8] ss:$16 sps:$4 sm:$0xff]  }
  0xc9   : > { %6727 = vmatprep.mubr.bf16.mxu0 %v1317_v28  ;;  %7383 = vmatprep.mubr.bf16.mxu1 %v1317_v28  ;;  %v11473_v27 = vld [vmem:[%s16496_s1 + $0x804] ss:$16 sps:$4 sm:$0xff]   ;;  %v11476_v28 = vld [vmem:[%s16496_s1 + $0x80c] ss:$16 sps:$4 sm:$0xff]  }
  0xcb   : > { %6698 = vmatpush1.bf16.msra.mxu0 %v11380_v29  ;;  %7354 = vmatpush1.bf16.msra.mxu1 %v11383_v30  ;;  %v13635_v29 = vrot.slane %v13622_v26, %v12959_v49  ;;  %v11471_v30 = vld [vmem:[%s16496_s1 + $0x800] ss:$16 sps:$4 sm:$0xff]  }
  0xcc   : > { %6699 = vmatprep.subr.bf16.mxu0 %v11388_v31  ;;  %7355 = vmatprep.subr.bf16.mxu1 %v11391_v22  ;;  %v11474_v31 = vld [vmem:[%s16496_s1 + $0x808] ss:$16 sps:$4 sm:$0xff]   ;;  %v11479_v22 = vld [vmem:[%s16496_s1 + $0x824] ss:$16 sps:$4 sm:$0xff]  }
  0xcf   : > { %6700 = vmatpush1.bf16.msra.mxu0 %v11386_v32  ;;  %7356 = vmatpush1.bf16.msra.mxu1 %v11389_v33  ;;  %v11482_v32 = vld [vmem:[%s16496_s1 + $0x82c] ss:$16 sps:$4 sm:$0xff]   ;;  %v1333_v33 = vcombine.high %v13635_v29, %v13635_v29 }
  0xd0   : > { %6701 = vmatprep.subr.bf16.mxu0 %v11394_v34  ;;  %7357 = vmatprep.subr.bf16.mxu1 %v11397_v35  ;;  %v11477_v34 = vld [vmem:[%s16496_s1 + $0x820] ss:$16 sps:$4 sm:$0xff]   ;;  %v11480_v35 = vld [vmem:[%s16496_s1 + $0x828] ss:$16 sps:$4 sm:$0xff]  }
  0xd3   : > { %6702 = vmatpush1.bf16.msra.mxu0 %v11392_v36  ;;  %7358 = vmatpush1.bf16.msra.mxu1 %v11395_v37  ;;  %v11485_v36 = vld [vmem:[%s16496_s1 + $0x844] ss:$16 sps:$4 sm:$0xff]   ;;  %v11483_v37 = vld [vmem:[%s16496_s1 + $0x840] ss:$16 sps:$4 sm:$0xff]  }
  0xd4   : > { %6703 = vmatprep.subr.bf16.mxu0 %v11400_v38  ;;  %7359 = vmatprep.subr.bf16.mxu1 %v11403_v39  ;;  %v11486_v38 = vld [vmem:[%s16496_s1 + $0x848] ss:$16 sps:$4 sm:$0xff]   ;;  %v11491_v39 = vld [vmem:[%s16496_s1 + $0x864] ss:$16 sps:$4 sm:$0xff]  }
  0xd7   : > { %6704 = vmatpush1.bf16.msra.mxu0 %v11398_v40  ;;  %7360 = vmatpush1.bf16.msra.mxu1 %v11401_v41  ;;  %v11494_v40 = vld [vmem:[%s16496_s1 + $0x86c] ss:$16 sps:$4 sm:$0xff]   ;;  %v11489_v41 = vld [vmem:[%s16496_s1 + $0x860] ss:$16 sps:$4 sm:$0xff]  }
  0xd8   : > { %6705 = vmatprep.subr.bf16.mxu0 %v11406_v43  ;;  %7361 = vmatprep.subr.bf16.mxu1 %v11409_v44  ;;  %v11492_v43 = vld [vmem:[%s16496_s1 + $0x868] ss:$16 sps:$4 sm:$0xff]   ;;  %v11497_v44 = vld [vmem:[%s16496_s1 + $0x884] ss:$16 sps:$4 sm:$0xff]  }
  0xdb   : > { %6706 = vmatpush1.bf16.msra.mxu0 %v11404_v45  ;;  %7362 = vmatpush1.bf16.msra.mxu1 %v11407_v46  ;;  %v11500_v45 = vld [vmem:[%s16496_s1 + $0x88c] ss:$16 sps:$4 sm:$0xff]   ;;  %v11495_v46 = vld [vmem:[%s16496_s1 + $0x880] ss:$16 sps:$4 sm:$0xff]  }
  0xdc   : > { %6707 = vmatprep.subr.bf16.mxu0 %v11412_v47  ;;  %7363 = vmatprep.subr.bf16.mxu1 %v11415_v48  ;;  %v11498_v47 = vld [vmem:[%s16496_s1 + $0x888] ss:$16 sps:$4 sm:$0xff]   ;;  %v11503_v48 = vld [vmem:[%s16496_s1 + $0x8a4] ss:$16 sps:$4 sm:$0xff]  }
  0xdf   : > { %6708 = vmatpush1.bf16.msra.mxu0 %v11410_v50  ;;  %7364 = vmatpush1.bf16.msra.mxu1 %v11413_v51  ;;  %v11506_v50 = vld [vmem:[%s16496_s1 + $0x8ac] ss:$16 sps:$4 sm:$0xff]   ;;  %v11501_v51 = vld [vmem:[%s16496_s1 + $0x8a0] ss:$16 sps:$4 sm:$0xff]  }
  0xe0   : > { %6709 = vmatprep.subr.bf16.mxu0 %v11418_v52  ;;  %7365 = vmatprep.subr.bf16.mxu1 %v11421_v53  ;;  %v11504_v52 = vld [vmem:[%s16496_s1 + $0x8a8] ss:$16 sps:$4 sm:$0xff]   ;;  %v11509_v53 = vld [vmem:[%s16496_s1 + $0x8c4] ss:$16 sps:$4 sm:$0xff]  }
  0xe3   : > { %6710 = vmatpush1.bf16.msra.mxu0 %v11416_v54  ;;  %7366 = vmatpush1.bf16.msra.mxu1 %v11419_v55  ;;  %v11512_v54 = vld [vmem:[%s16496_s1 + $0x8cc] ss:$16 sps:$4 sm:$0xff]   ;;  %v11507_v55 = vld [vmem:[%s16496_s1 + $0x8c0] ss:$16 sps:$4 sm:$0xff]  }
  0xe4   : > { %6711 = vmatprep.subr.bf16.mxu0 %v11424_v56  ;;  %7367 = vmatprep.subr.bf16.mxu1 %v11427_v57  ;;  %v11510_v56 = vld [vmem:[%s16496_s1 + $0x8c8] ss:$16 sps:$4 sm:$0xff]   ;;  %v11515_v57 = vld [vmem:[%s16496_s1 + $0x8e4] ss:$16 sps:$4 sm:$0xff]  }
  0xe7   : > { %6712 = vmatpush1.bf16.msra.mxu0 %v11422_v58  ;;  %7368 = vmatpush1.bf16.msra.mxu1 %v11425_v59  ;;  %v11518_v58 = vld [vmem:[%s16496_s1 + $0x8ec] ss:$16 sps:$4 sm:$0xff]   ;;  %v11513_v59 = vld [vmem:[%s16496_s1 + $0x8e0] ss:$16 sps:$4 sm:$0xff]  }
  0xe8   : > { %6713 = vmatprep.subr.bf16.mxu0 %v11430_v60  ;;  %7369 = vmatprep.subr.bf16.mxu1 %v11433_v61  ;;  %v11516_v60 = vld [vmem:[%s16496_s1 + $0x8e8] ss:$16 sps:$4 sm:$0xff]   ;;  %v11521_v61 = vld [vmem:[%s16496_s1 + $0x904] ss:$16 sps:$4 sm:$0xff]  }
  0xeb   : > { %6714 = vmatpush1.bf16.msra.mxu0 %v11428_v62  ;;  %7370 = vmatpush1.bf16.msra.mxu1 %v11431_v63  ;;  %v11524_v62 = vld [vmem:[%s16496_s1 + $0x90c] ss:$16 sps:$4 sm:$0xff]   ;;  %v11519_v63 = vld [vmem:[%s16496_s1 + $0x900] ss:$16 sps:$4 sm:$0xff]  }
  0xec   : > { %6715 = vmatprep.subr.bf16.mxu0 %v11436_v0  ;;  %7371 = vmatprep.subr.bf16.mxu1 %v11439_v1  ;;  %v11522_v0 = vld [vmem:[%s16496_s1 + $0x908] ss:$16 sps:$4 sm:$0xff]   ;;  %v11527_v1 = vld [vmem:[%s16496_s1 + $0x924] ss:$16 sps:$4 sm:$0xff]  }
  0xef   : > { %6716 = vmatpush1.bf16.msra.mxu0 %v11434_v2  ;;  %7372 = vmatpush1.bf16.msra.mxu1 %v11437_v3  ;;  %v11530_v2 = vld [vmem:[%s16496_s1 + $0x92c] ss:$16 sps:$4 sm:$0xff]   ;;  %v11525_v3 = vld [vmem:[%s16496_s1 + $0x920] ss:$16 sps:$4 sm:$0xff]  }
  0xf0   : > { %6717 = vmatprep.subr.bf16.mxu0 %v11442_v4  ;;  %7373 = vmatprep.subr.bf16.mxu1 %v11445_v5  ;;  %v11528_v4 = vld [vmem:[%s16496_s1 + $0x928] ss:$16 sps:$4 sm:$0xff]   ;;  %v11533_v5 = vld [vmem:[%s16496_s1 + $0x944] ss:$16 sps:$4 sm:$0xff]  }
  0xf3   : > { %6718 = vmatpush1.bf16.msra.mxu0 %v11440_v6  ;;  %7374 = vmatpush1.bf16.msra.mxu1 %v11443_v7  ;;  %v11536_v6 = vld [vmem:[%s16496_s1 + $0x94c] ss:$16 sps:$4 sm:$0xff]   ;;  %v11531_v7 = vld [vmem:[%s16496_s1 + $0x940] ss:$16 sps:$4 sm:$0xff]  }
  0xf4   : > { %6719 = vmatprep.subr.bf16.mxu0 %v11448_v8  ;;  %7375 = vmatprep.subr.bf16.mxu1 %v11451_v9  ;;  %v11534_v8 = vld [vmem:[%s16496_s1 + $0x948] ss:$16 sps:$4 sm:$0xff]   ;;  %v11539_v9 = vld [vmem:[%s16496_s1 + $0x964] ss:$16 sps:$4 sm:$0xff]  }
  0xf7   : > { %6720 = vmatpush1.bf16.msra.mxu0 %v11446_v10  ;;  %7376 = vmatpush1.bf16.msra.mxu1 %v11449_v11  ;;  %v11542_v10 = vld [vmem:[%s16496_s1 + $0x96c] ss:$16 sps:$4 sm:$0xff]   ;;  %v11537_v11 = vld [vmem:[%s16496_s1 + $0x960] ss:$16 sps:$4 sm:$0xff]  }
  0xf8   : > { %6721 = vmatprep.subr.bf16.mxu0 %v11454_v13  ;;  %7377 = vmatprep.subr.bf16.mxu1 %v11457_v14  ;;  %v11540_v13 = vld [vmem:[%s16496_s1 + $0x968] ss:$16 sps:$4 sm:$0xff]   ;;  %v11545_v14 = vld [vmem:[%s16496_s1 + $0x984] ss:$16 sps:$4 sm:$0xff]  }
  0xfb   : > { %6722 = vmatpush1.bf16.msra.mxu0 %v11452_v15  ;;  %7378 = vmatpush1.bf16.msra.mxu1 %v11455_v16  ;;  %v11548_v15 = vld [vmem:[%s16496_s1 + $0x98c] ss:$16 sps:$4 sm:$0xff]   ;;  %v11543_v16 = vld [vmem:[%s16496_s1 + $0x980] ss:$16 sps:$4 sm:$0xff]  }
  0xfc   : > { %6723 = vmatprep.subr.bf16.mxu0 %v11460_v17  ;;  %7379 = vmatprep.subr.bf16.mxu1 %v11463_v18  ;;  %v11546_v17 = vld [vmem:[%s16496_s1 + $0x988] ss:$16 sps:$4 sm:$0xff]   ;;  %v11551_v18 = vld [vmem:[%s16496_s1 + $0x9a4] ss:$16 sps:$4 sm:$0xff]  }
  0xff   : > { %6724 = vmatpush1.bf16.msra.mxu0 %v11458_v20  ;;  %7380 = vmatpush1.bf16.msra.mxu1 %v11461_v21  ;;  %v11554_v20 = vld [vmem:[%s16496_s1 + $0x9ac] ss:$16 sps:$4 sm:$0xff]   ;;  %v11549_v21 = vld [vmem:[%s16496_s1 + $0x9a0] ss:$16 sps:$4 sm:$0xff]  }
 0x100   : > { %6725 = vmatprep.subr.bf16.mxu0 %v11466_v23  ;;  %7381 = vmatprep.subr.bf16.mxu1 %v11469_v19  ;;  %v11552_v23 = vld [vmem:[%s16496_s1 + $0x9a8] ss:$16 sps:$4 sm:$0xff]   ;;  %v11557_v19 = vld [vmem:[%s16496_s1 + $0x9c4] ss:$16 sps:$4 sm:$0xff]  }
 0x103   : > { %6726 = vmatpush1.bf16.msra.mxu0 %v11464_v25  ;;  %7382 = vmatpush1.bf16.msra.mxu1 %v11467_v12  ;;  %v11560_v25 = vld [vmem:[%s16496_s1 + $0x9cc] ss:$16 sps:$4 sm:$0xff]   ;;  %v11555_v12 = vld [vmem:[%s16496_s1 + $0x9c0] ss:$16 sps:$4 sm:$0xff]  }
 0x104   : > { %6736 = vmatprep.subr.bf16.mxu0 %v11473_v27  ;;  %7392 = vmatprep.subr.bf16.mxu1 %v11476_v28  ;;  %v11558_v27 = vld [vmem:[%s16496_s1 + $0x9c8] ss:$16 sps:$4 sm:$0xff]   ;;  %v11563_v28 = vld [vmem:[%s16496_s1 + $0x9e4] ss:$16 sps:$4 sm:$0xff]  }
 0x106   : > { %6728 = vmatmul.mubr.bf16.vlgmr.msra.gmra.mrb[0].mxu0 %v13432_v24  ;;  %7384 = vmatmul.mubr.bf16.vlgmr.msra.gmra.mrb[0].mxu1 %v13432_v24  ;;  %v11488_v24 = vld [vmem:[%s16496_s1 + $0x84c] ss:$16 sps:$4 sm:$0xff]  }
 0x107   : > { %6737 = vmatpush1.bf16.msra.mxu0 %v11471_v30  ;;  %7393 = vmatpush1.bf16.msra.mxu1 %v11474_v31  ;;  %v11566_v30 = vld [vmem:[%s16496_s1 + $0x9ec] ss:$16 sps:$4 sm:$0xff]   ;;  %v1318_v31 = vcombine.high %v13622_v26, %v13622_v26 }
 0x108   : > { %6738 = vmatprep.subr.bf16.mxu0 %v11479_v22  ;;  %7394 = vmatprep.subr.bf16.mxu1 %v11482_v32  ;;  %v11561_v22 = vld [vmem:[%s16496_s1 + $0x9e0] ss:$16 sps:$4 sm:$0xff]   ;;  %v11564_v32 = vld [vmem:[%s16496_s1 + $0x9e8] ss:$16 sps:$4 sm:$0xff]   ;;  %v11572_v26 = vld [vmem:[%s16496_s1 + $0xa0c] ss:$16 sps:$4 sm:$0xff]  }
 0x109   : > { %6768 = vmatprep.mubr.bf16.mxu0 %v1333_v33  ;;  %7424 = vmatprep.mubr.bf16.mxu1 %v1333_v33  ;;  %v11569_v33 = vld [vmem:[%s16496_s1 + $0xa04] ss:$16 sps:$4 sm:$0xff]  }
 0x10b   : > { %6739 = vmatpush1.bf16.msra.mxu0 %v11477_v34  ;;  %7395 = vmatpush1.bf16.msra.mxu1 %v11480_v35  ;;  %v13836_v34 = vrot.slane %v1318_v31, %v12959_v49  ;;  %v11567_v35 = vld [vmem:[%s16496_s1 + $0xa00] ss:$16 sps:$4 sm:$0xff]   ;;  %v11656_v31 = vld [vmem:[%s16496_s1 + $0xbcc] ss:$16 sps:$4 sm:$0xff]  }
 0x10c   : > { %6740 = vmatprep.subr.bf16.mxu0 %v11485_v36  ;;  %7396 = vmatprep.subr.bf16.mxu1 %v11488_v24  ;;  %v11570_v36 = vld [vmem:[%s16496_s1 + $0xa08] ss:$16 sps:$4 sm:$0xff]   ;;  %v11575_v24 = vld [vmem:[%s16496_s1 + $0xa24] ss:$16 sps:$4 sm:$0xff]  }
 0x10f   : > { %6741 = vmatpush1.bf16.msra.mxu0 %v11483_v37  ;;  %7397 = vmatpush1.bf16.msra.mxu1 %v11486_v38  ;;  %v11578_v37 = vld [vmem:[%s16496_s1 + $0xa2c] ss:$16 sps:$4 sm:$0xff]   ;;  %v1334_v38 = vcombine.high %v13836_v34, %v13836_v34 }
 0x110   : > { %6742 = vmatprep.subr.bf16.mxu0 %v11491_v39  ;;  %7398 = vmatprep.subr.bf16.mxu1 %v11494_v40  ;;  %v11573_v39 = vld [vmem:[%s16496_s1 + $0xa20] ss:$16 sps:$4 sm:$0xff]   ;;  %v11576_v40 = vld [vmem:[%s16496_s1 + $0xa28] ss:$16 sps:$4 sm:$0xff]  }
 0x113   : > { %6743 = vmatpush1.bf16.msra.mxu0 %v11489_v41  ;;  %7399 = vmatpush1.bf16.msra.mxu1 %v11492_v43  ;;  %v11581_v41 = vld [vmem:[%s16496_s1 + $0xa44] ss:$16 sps:$4 sm:$0xff]   ;;  %v11579_v43 = vld [vmem:[%s16496_s1 + $0xa40] ss:$16 sps:$4 sm:$0xff]  }
 0x114   : > { %6744 = vmatprep.subr.bf16.mxu0 %v11497_v44  ;;  %7400 = vmatprep.subr.bf16.mxu1 %v11500_v45  ;;  %v11582_v44 = vld [vmem:[%s16496_s1 + $0xa48] ss:$16 sps:$4 sm:$0xff]   ;;  %v11587_v45 = vld [vmem:[%s16496_s1 + $0xa64] ss:$16 sps:$4 sm:$0xff]  }
 0x117   : > { %6745 = vmatpush1.bf16.msra.mxu0 %v11495_v46  ;;  %7401 = vmatpush1.bf16.msra.mxu1 %v11498_v47  ;;  %v11590_v46 = vld [vmem:[%s16496_s1 + $0xa6c] ss:$16 sps:$4 sm:$0xff]   ;;  %v11585_v47 = vld [vmem:[%s16496_s1 + $0xa60] ss:$16 sps:$4 sm:$0xff]  }
 0x118   : > { %6746 = vmatprep.subr.bf16.mxu0 %v11503_v48  ;;  %7402 = vmatprep.subr.bf16.mxu1 %v11506_v50  ;;  %v11588_v48 = vld [vmem:[%s16496_s1 + $0xa68] ss:$16 sps:$4 sm:$0xff]   ;;  %v11593_v50 = vld [vmem:[%s16496_s1 + $0xa84] ss:$16 sps:$4 sm:$0xff]  }
 0x11b   : > { %6747 = vmatpush1.bf16.msra.mxu0 %v11501_v51  ;;  %7403 = vmatpush1.bf16.msra.mxu1 %v11504_v52  ;;  %v11596_v51 = vld [vmem:[%s16496_s1 + $0xa8c] ss:$16 sps:$4 sm:$0xff]   ;;  %v11591_v52 = vld [vmem:[%s16496_s1 + $0xa80] ss:$16 sps:$4 sm:$0xff]  }
 0x11c   : > { %6748 = vmatprep.subr.bf16.mxu0 %v11509_v53  ;;  %7404 = vmatprep.subr.bf16.mxu1 %v11512_v54  ;;  %v11594_v53 = vld [vmem:[%s16496_s1 + $0xa88] ss:$16 sps:$4 sm:$0xff]   ;;  %v11599_v54 = vld [vmem:[%s16496_s1 + $0xaa4] ss:$16 sps:$4 sm:$0xff]  }
 0x11f   : > { %6749 = vmatpush1.bf16.msra.mxu0 %v11507_v55  ;;  %7405 = vmatpush1.bf16.msra.mxu1 %v11510_v56  ;;  %v11602_v55 = vld [vmem:[%s16496_s1 + $0xaac] ss:$16 sps:$4 sm:$0xff]   ;;  %v11597_v56 = vld [vmem:[%s16496_s1 + $0xaa0] ss:$16 sps:$4 sm:$0xff]  }
 0x120   : > { %6750 = vmatprep.subr.bf16.mxu0 %v11515_v57  ;;  %7406 = vmatprep.subr.bf16.mxu1 %v11518_v58  ;;  %v11600_v57 = vld [vmem:[%s16496_s1 + $0xaa8] ss:$16 sps:$4 sm:$0xff]   ;;  %v11605_v58 = vld [vmem:[%s16496_s1 + $0xac4] ss:$16 sps:$4 sm:$0xff]  }
 0x123   : > { %6751 = vmatpush1.bf16.msra.mxu0 %v11513_v59  ;;  %7407 = vmatpush1.bf16.msra.mxu1 %v11516_v60  ;;  %v11608_v59 = vld [vmem:[%s16496_s1 + $0xacc] ss:$16 sps:$4 sm:$0xff]   ;;  %v11603_v60 = vld [vmem:[%s16496_s1 + $0xac0] ss:$16 sps:$4 sm:$0xff]  }
 0x124   : > { %6752 = vmatprep.subr.bf16.mxu0 %v11521_v61  ;;  %7408 = vmatprep.subr.bf16.mxu1 %v11524_v62  ;;  %v11606_v61 = vld [vmem:[%s16496_s1 + $0xac8] ss:$16 sps:$4 sm:$0xff]   ;;  %v11611_v62 = vld [vmem:[%s16496_s1 + $0xae4] ss:$16 sps:$4 sm:$0xff]  }
 0x127   : > { %6753 = vmatpush1.bf16.msra.mxu0 %v11519_v63  ;;  %7409 = vmatpush1.bf16.msra.mxu1 %v11522_v0  ;;  %v11614_v63 = vld [vmem:[%s16496_s1 + $0xaec] ss:$16 sps:$4 sm:$0xff]   ;;  %v11609_v0 = vld [vmem:[%s16496_s1 + $0xae0] ss:$16 sps:$4 sm:$0xff]  }
 0x128   : > { %6754 = vmatprep.subr.bf16.mxu0 %v11527_v1  ;;  %7410 = vmatprep.subr.bf16.mxu1 %v11530_v2  ;;  %v11612_v1 = vld [vmem:[%s16496_s1 + $0xae8] ss:$16 sps:$4 sm:$0xff]   ;;  %v11617_v2 = vld [vmem:[%s16496_s1 + $0xb04] ss:$16 sps:$4 sm:$0xff]  }
 0x12b   : > { %6755 = vmatpush1.bf16.msra.mxu0 %v11525_v3  ;;  %7411 = vmatpush1.bf16.msra.mxu1 %v11528_v4  ;;  %v11620_v3 = vld [vmem:[%s16496_s1 + $0xb0c] ss:$16 sps:$4 sm:$0xff]   ;;  %v11615_v4 = vld [vmem:[%s16496_s1 + $0xb00] ss:$16 sps:$4 sm:$0xff]  }
 0x12c   : > { %6756 = vmatprep.subr.bf16.mxu0 %v11533_v5  ;;  %7412 = vmatprep.subr.bf16.mxu1 %v11536_v6  ;;  %v11618_v5 = vld [vmem:[%s16496_s1 + $0xb08] ss:$16 sps:$4 sm:$0xff]   ;;  %v11623_v6 = vld [vmem:[%s16496_s1 + $0xb24] ss:$16 sps:$4 sm:$0xff]  }
 0x12f   : > { %6757 = vmatpush1.bf16.msra.mxu0 %v11531_v7  ;;  %7413 = vmatpush1.bf16.msra.mxu1 %v11534_v8  ;;  %v11626_v7 = vld [vmem:[%s16496_s1 + $0xb2c] ss:$16 sps:$4 sm:$0xff]   ;;  %v11621_v8 = vld [vmem:[%s16496_s1 + $0xb20] ss:$16 sps:$4 sm:$0xff]  }
 0x130   : > { %6758 = vmatprep.subr.bf16.mxu0 %v11539_v9  ;;  %7414 = vmatprep.subr.bf16.mxu1 %v11542_v10  ;;  %v11624_v9 = vld [vmem:[%s16496_s1 + $0xb28] ss:$16 sps:$4 sm:$0xff]   ;;  %v11629_v10 = vld [vmem:[%s16496_s1 + $0xb44] ss:$16 sps:$4 sm:$0xff]  }
 0x133   : > { %6759 = vmatpush1.bf16.msra.mxu0 %v11537_v11  ;;  %7415 = vmatpush1.bf16.msra.mxu1 %v11540_v13  ;;  %v11632_v11 = vld [vmem:[%s16496_s1 + $0xb4c] ss:$16 sps:$4 sm:$0xff]   ;;  %v11627_v13 = vld [vmem:[%s16496_s1 + $0xb40] ss:$16 sps:$4 sm:$0xff]  }
 0x134   : > { %6760 = vmatprep.subr.bf16.mxu0 %v11545_v14  ;;  %7416 = vmatprep.subr.bf16.mxu1 %v11548_v15  ;;  %v11630_v14 = vld [vmem:[%s16496_s1 + $0xb48] ss:$16 sps:$4 sm:$0xff]   ;;  %v11635_v15 = vld [vmem:[%s16496_s1 + $0xb64] ss:$16 sps:$4 sm:$0xff]  }
 0x137   : > { %6761 = vmatpush1.bf16.msra.mxu0 %v11543_v16  ;;  %7417 = vmatpush1.bf16.msra.mxu1 %v11546_v17  ;;  %v11638_v16 = vld [vmem:[%s16496_s1 + $0xb6c] ss:$16 sps:$4 sm:$0xff]   ;;  %v11633_v17 = vld [vmem:[%s16496_s1 + $0xb60] ss:$16 sps:$4 sm:$0xff]  }
 0x138   : > { %6762 = vmatprep.subr.bf16.mxu0 %v11551_v18  ;;  %7418 = vmatprep.subr.bf16.mxu1 %v11554_v20  ;;  %v11636_v18 = vld [vmem:[%s16496_s1 + $0xb68] ss:$16 sps:$4 sm:$0xff]   ;;  %v11641_v20 = vld [vmem:[%s16496_s1 + $0xb84] ss:$16 sps:$4 sm:$0xff]  }
 0x13b   : > { %6763 = vmatpush1.bf16.msra.mxu0 %v11549_v21  ;;  %7419 = vmatpush1.bf16.msra.mxu1 %v11552_v23  ;;  %v11644_v21 = vld [vmem:[%s16496_s1 + $0xb8c] ss:$16 sps:$4 sm:$0xff]   ;;  %v11639_v23 = vld [vmem:[%s16496_s1 + $0xb80] ss:$16 sps:$4 sm:$0xff]  }
 0x13c   : > { %6764 = vmatprep.subr.bf16.mxu0 %v11557_v19  ;;  %7420 = vmatprep.subr.bf16.mxu1 %v11560_v25  ;;  %v11642_v19 = vld [vmem:[%s16496_s1 + $0xb88] ss:$16 sps:$4 sm:$0xff]   ;;  %v11647_v25 = vld [vmem:[%s16496_s1 + $0xba4] ss:$16 sps:$4 sm:$0xff]  }
 0x13f   : > { %6765 = vmatpush1.bf16.msra.mxu0 %v11555_v12  ;;  %7421 = vmatpush1.bf16.msra.mxu1 %v11558_v27  ;;  %v11650_v12 = vld [vmem:[%s16496_s1 + $0xbac] ss:$16 sps:$4 sm:$0xff]   ;;  %v11645_v27 = vld [vmem:[%s16496_s1 + $0xba0] ss:$16 sps:$4 sm:$0xff]  }
 0x140   : > { %6766 = vmatprep.subr.bf16.mxu0 %v11563_v28  ;;  %7422 = vmatprep.subr.bf16.mxu1 %v11566_v30  ;;  %v11648_v28 = vld [vmem:[%s16496_s1 + $0xba8] ss:$16 sps:$4 sm:$0xff]   ;;  %v11653_v30 = vld [vmem:[%s16496_s1 + $0xbc4] ss:$16 sps:$4 sm:$0xff]  }
 0x143   : > { %6767 = vmatpush1.bf16.msra.mxu0 %v11561_v22  ;;  %7423 = vmatpush1.bf16.msra.mxu1 %v11564_v32  ;;  %v11651_v22 = vld [vmem:[%s16496_s1 + $0xbc0] ss:$16 sps:$4 sm:$0xff]   ;;  %v11654_v32 = vld [vmem:[%s16496_s1 + $0xbc8] ss:$16 sps:$4 sm:$0xff]  }
 0x144   : > { %6777 = vmatprep.subr.bf16.mxu0 %v11569_v33  ;;  %7433 = vmatprep.subr.bf16.mxu1 %v11572_v26  ;;  %v11659_v33 = vld [vmem:[%s16496_s1 + $0xbe4] ss:$16 sps:$4 sm:$0xff]   ;;  %v11662_v26 = vld [vmem:[%s16496_s1 + $0xbec] ss:$16 sps:$4 sm:$0xff]  }
 0x146   : > { %6769 = vmatmul.mubr.bf16.vlgmr.msra.gmra.mrb[0].mxu0 %v13635_v29  ;;  %7425 = vmatmul.mubr.bf16.vlgmr.msra.gmra.mrb[0].mxu1 %v13635_v29  ;;  %v11584_v29 = vld [vmem:[%s16496_s1 + $0xa4c] ss:$16 sps:$4 sm:$0xff]  }
 0x147   : > { %6778 = vmatpush1.bf16.msra.mxu0 %v11567_v35  ;;  %7434 = vmatpush1.bf16.msra.mxu1 %v11570_v36  ;;  %v14023_v35 = vld [vmem:[%s12956_s17 + $0x18] sm:$0xff]  ;;  %v11657_v36 = vld [vmem:[%s16496_s1 + $0xbe0] ss:$16 sps:$4 sm:$0xff]  }
 0x148   : > { %6779 = vmatprep.subr.bf16.mxu0 %v11575_v24  ;;  %7435 = vmatprep.subr.bf16.mxu1 %v11578_v37  ;;  %v11660_v24 = vld [vmem:[%s16496_s1 + $0xbe8] ss:$16 sps:$4 sm:$0xff]   ;;  %v11666_v37 = vld [vmem:[%s16496_s1 + $0xc04] ss:$16 sps:$4 sm:$0xff]  }
 0x149   : > { %6809 = vmatprep.mubr.bf16.mxu0 %v1334_v38  ;;  %7465 = vmatprep.mubr.bf16.mxu1 %v1334_v38  ;;  %v11669_v38 = vld [vmem:[%s16496_s1 + $0xc0c] ss:$16 sps:$4 sm:$0xff]  }
 0x14b   : > { %6780 = vmatpush1.bf16.msra.mxu0 %v11573_v39  ;;  %7436 = vmatpush1.bf16.msra.mxu1 %v11576_v40  ;;  %v14039_v39 = vrot.slane %v14023_v35, %v12959_v49  ;;  %v11664_v40 = vld [vmem:[%s16496_s1 + $0xc00] ss:$16 sps:$4 sm:$0xff]  }
 0x14c   : > { %6781 = vmatprep.subr.bf16.mxu0 %v11581_v41  ;;  %7437 = vmatprep.subr.bf16.mxu1 %v11584_v29  ;;  %v11667_v41 = vld [vmem:[%s16496_s1 + $0xc08] ss:$16 sps:$4 sm:$0xff]   ;;  %v11672_v29 = vld [vmem:[%s16496_s1 + $0xc24] ss:$16 sps:$4 sm:$0xff]  }
 0x14f   : > { %6782 = vmatpush1.bf16.msra.mxu0 %v11579_v43  ;;  %7438 = vmatpush1.bf16.msra.mxu1 %v11582_v44  ;;  %v11675_v43 = vld [vmem:[%s16496_s1 + $0xc2c] ss:$16 sps:$4 sm:$0xff]   ;;  %v1350_v44 = vcombine.high %v14039_v39, %v14039_v39 }
 0x150   : > { %6783 = vmatprep.subr.bf16.mxu0 %v11587_v45  ;;  %7439 = vmatprep.subr.bf16.mxu1 %v11590_v46  ;;  %v11670_v45 = vld [vmem:[%s16496_s1 + $0xc20] ss:$16 sps:$4 sm:$0xff]   ;;  %v11673_v46 = vld [vmem:[%s16496_s1 + $0xc28] ss:$16 sps:$4 sm:$0xff]  }
 0x153   : > { %6784 = vmatpush1.bf16.msra.mxu0 %v11585_v47  ;;  %7440 = vmatpush1.bf16.msra.mxu1 %v11588_v48  ;;  %v11678_v47 = vld [vmem:[%s16496_s1 + $0xc44] ss:$16 sps:$4 sm:$0xff]   ;;  %v11676_v48 = vld [vmem:[%s16496_s1 + $0xc40] ss:$16 sps:$4 sm:$0xff]  }
 0x154   : > { %6785 = vmatprep.subr.bf16.mxu0 %v11593_v50  ;;  %7441 = vmatprep.subr.bf16.mxu1 %v11596_v51  ;;  %v11679_v50 = vld [vmem:[%s16496_s1 + $0xc48] ss:$16 sps:$4 sm:$0xff]   ;;  %v11684_v51 = vld [vmem:[%s16496_s1 + $0xc64] ss:$16 sps:$4 sm:$0xff]  }
 0x157   : > { %6786 = vmatpush1.bf16.msra.mxu0 %v11591_v52  ;;  %7442 = vmatpush1.bf16.msra.mxu1 %v11594_v53  ;;  %v11687_v52 = vld [vmem:[%s16496_s1 + $0xc6c] ss:$16 sps:$4 sm:$0xff]   ;;  %v11682_v53 = vld [vmem:[%s16496_s1 + $0xc60] ss:$16 sps:$4 sm:$0xff]  }
 0x158   : > { %6787 = vmatprep.subr.bf16.mxu0 %v11599_v54  ;;  %7443 = vmatprep.subr.bf16.mxu1 %v11602_v55  ;;  %v11685_v54 = vld [vmem:[%s16496_s1 + $0xc68] ss:$16 sps:$4 sm:$0xff]   ;;  %v11690_v55 = vld [vmem:[%s16496_s1 + $0xc84] ss:$16 sps:$4 sm:$0xff]  }
 0x15b   : > { %6788 = vmatpush1.bf16.msra.mxu0 %v11597_v56  ;;  %7444 = vmatpush1.bf16.msra.mxu1 %v11600_v57  ;;  %v11693_v56 = vld [vmem:[%s16496_s1 + $0xc8c] ss:$16 sps:$4 sm:$0xff]   ;;  %v11688_v57 = vld [vmem:[%s16496_s1 + $0xc80] ss:$16 sps:$4 sm:$0xff]  }
 0x15c   : > { %6789 = vmatprep.subr.bf16.mxu0 %v11605_v58  ;;  %7445 = vmatprep.subr.bf16.mxu1 %v11608_v59  ;;  %v11691_v58 = vld [vmem:[%s16496_s1 + $0xc88] ss:$16 sps:$4 sm:$0xff]   ;;  %v11696_v59 = vld [vmem:[%s16496_s1 + $0xca4] ss:$16 sps:$4 sm:$0xff]  }
 0x15f   : > { %6790 = vmatpush1.bf16.msra.mxu0 %v11603_v60  ;;  %7446 = vmatpush1.bf16.msra.mxu1 %v11606_v61  ;;  %v11699_v60 = vld [vmem:[%s16496_s1 + $0xcac] ss:$16 sps:$4 sm:$0xff]   ;;  %v11694_v61 = vld [vmem:[%s16496_s1 + $0xca0] ss:$16 sps:$4 sm:$0xff]  }
 0x160   : > { %6791 = vmatprep.subr.bf16.mxu0 %v11611_v62  ;;  %7447 = vmatprep.subr.bf16.mxu1 %v11614_v63  ;;  %v11697_v62 = vld [vmem:[%s16496_s1 + $0xca8] ss:$16 sps:$4 sm:$0xff]   ;;  %v11702_v63 = vld [vmem:[%s16496_s1 + $0xcc4] ss:$16 sps:$4 sm:$0xff]  }
 0x163   : > { %6792 = vmatpush1.bf16.msra.mxu0 %v11609_v0  ;;  %7448 = vmatpush1.bf16.msra.mxu1 %v11612_v1  ;;  %v11705_v0 = vld [vmem:[%s16496_s1 + $0xccc] ss:$16 sps:$4 sm:$0xff]   ;;  %v11700_v1 = vld [vmem:[%s16496_s1 + $0xcc0] ss:$16 sps:$4 sm:$0xff]  }
 0x164   : > { %6793 = vmatprep.subr.bf16.mxu0 %v11617_v2  ;;  %7449 = vmatprep.subr.bf16.mxu1 %v11620_v3  ;;  %v11703_v2 = vld [vmem:[%s16496_s1 + $0xcc8] ss:$16 sps:$4 sm:$0xff]   ;;  %v11708_v3 = vld [vmem:[%s16496_s1 + $0xce4] ss:$16 sps:$4 sm:$0xff]  }
 0x167   : > { %6794 = vmatpush1.bf16.msra.mxu0 %v11615_v4  ;;  %7450 = vmatpush1.bf16.msra.mxu1 %v11618_v5  ;;  %v11711_v4 = vld [vmem:[%s16496_s1 + $0xcec] ss:$16 sps:$4 sm:$0xff]   ;;  %v11706_v5 = vld [vmem:[%s16496_s1 + $0xce0] ss:$16 sps:$4 sm:$0xff]  }
 0x168   : > { %6795 = vmatprep.subr.bf16.mxu0 %v11623_v6  ;;  %7451 = vmatprep.subr.bf16.mxu1 %v11626_v7  ;;  %v11709_v6 = vld [vmem:[%s16496_s1 + $0xce8] ss:$16 sps:$4 sm:$0xff]   ;;  %v11714_v7 = vld [vmem:[%s16496_s1 + $0xd04] ss:$16 sps:$4 sm:$0xff]  }
 0x16b   : > { %6796 = vmatpush1.bf16.msra.mxu0 %v11621_v8  ;;  %7452 = vmatpush1.bf16.msra.mxu1 %v11624_v9  ;;  %v11717_v8 = vld [vmem:[%s16496_s1 + $0xd0c] ss:$16 sps:$4 sm:$0xff]   ;;  %v11712_v9 = vld [vmem:[%s16496_s1 + $0xd00] ss:$16 sps:$4 sm:$0xff]  }
 0x16c   : > { %6797 = vmatprep.subr.bf16.mxu0 %v11629_v10  ;;  %7453 = vmatprep.subr.bf16.mxu1 %v11632_v11  ;;  %v11715_v10 = vld [vmem:[%s16496_s1 + $0xd08] ss:$16 sps:$4 sm:$0xff]   ;;  %v11720_v11 = vld [vmem:[%s16496_s1 + $0xd24] ss:$16 sps:$4 sm:$0xff]  }
 0x16f   : > { %6798 = vmatpush1.bf16.msra.mxu0 %v11627_v13  ;;  %7454 = vmatpush1.bf16.msra.mxu1 %v11630_v14  ;;  %v11723_v13 = vld [vmem:[%s16496_s1 + $0xd2c] ss:$16 sps:$4 sm:$0xff]   ;;  %v11718_v14 = vld [vmem:[%s16496_s1 + $0xd20] ss:$16 sps:$4 sm:$0xff]  }
 0x170   : > { %6799 = vmatprep.subr.bf16.mxu0 %v11635_v15  ;;  %7455 = vmatprep.subr.bf16.mxu1 %v11638_v16  ;;  %v11721_v15 = vld [vmem:[%s16496_s1 + $0xd28] ss:$16 sps:$4 sm:$0xff]   ;;  %v11726_v16 = vld [vmem:[%s16496_s1 + $0xd44] ss:$16 sps:$4 sm:$0xff]  }
 0x173   : > { %6800 = vmatpush1.bf16.msra.mxu0 %v11633_v17  ;;  %7456 = vmatpush1.bf16.msra.mxu1 %v11636_v18  ;;  %v11729_v17 = vld [vmem:[%s16496_s1 + $0xd4c] ss:$16 sps:$4 sm:$0xff]   ;;  %v11724_v18 = vld [vmem:[%s16496_s1 + $0xd40] ss:$16 sps:$4 sm:$0xff]  }
 0x174   : > { %6801 = vmatprep.subr.bf16.mxu0 %v11641_v20  ;;  %7457 = vmatprep.subr.bf16.mxu1 %v11644_v21  ;;  %v11727_v20 = vld [vmem:[%s16496_s1 + $0xd48] ss:$16 sps:$4 sm:$0xff]   ;;  %v11732_v21 = vld [vmem:[%s16496_s1 + $0xd64] ss:$16 sps:$4 sm:$0xff]  }
 0x177   : > { %6802 = vmatpush1.bf16.msra.mxu0 %v11639_v23  ;;  %7458 = vmatpush1.bf16.msra.mxu1 %v11642_v19  ;;  %v11735_v23 = vld [vmem:[%s16496_s1 + $0xd6c] ss:$16 sps:$4 sm:$0xff]   ;;  %v11730_v19 = vld [vmem:[%s16496_s1 + $0xd60] ss:$16 sps:$4 sm:$0xff]  }
 0x178   : > { %6803 = vmatprep.subr.bf16.mxu0 %v11647_v25  ;;  %7459 = vmatprep.subr.bf16.mxu1 %v11650_v12  ;;  %v11733_v25 = vld [vmem:[%s16496_s1 + $0xd68] ss:$16 sps:$4 sm:$0xff]   ;;  %v11738_v12 = vld [vmem:[%s16496_s1 + $0xd84] ss:$16 sps:$4 sm:$0xff]  }
 0x17b   : > { %6804 = vmatpush1.bf16.msra.mxu0 %v11645_v27  ;;  %7460 = vmatpush1.bf16.msra.mxu1 %v11648_v28  ;;  %v11741_v27 = vld [vmem:[%s16496_s1 + $0xd8c] ss:$16 sps:$4 sm:$0xff]   ;;  %v11736_v28 = vld [vmem:[%s16496_s1 + $0xd80] ss:$16 sps:$4 sm:$0xff]  }
 0x17c   : > { %6805 = vmatprep.subr.bf16.mxu0 %v11653_v30  ;;  %7461 = vmatprep.subr.bf16.mxu1 %v11656_v31  ;;  %v11739_v30 = vld [vmem:[%s16496_s1 + $0xd88] ss:$16 sps:$4 sm:$0xff]   ;;  %v11744_v31 = vld [vmem:[%s16496_s1 + $0xda4] ss:$16 sps:$4 sm:$0xff]  }
 0x17f   : > { %6806 = vmatpush1.bf16.msra.mxu0 %v11651_v22  ;;  %7462 = vmatpush1.bf16.msra.mxu1 %v11654_v32  ;;  %v11747_v22 = vld [vmem:[%s16496_s1 + $0xdac] ss:$16 sps:$4 sm:$0xff]   ;;  %v11742_v32 = vld [vmem:[%s16496_s1 + $0xda0] ss:$16 sps:$4 sm:$0xff]  }
 0x180   : > { %6807 = vmatprep.subr.bf16.mxu0 %v11659_v33  ;;  %7463 = vmatprep.subr.bf16.mxu1 %v11662_v26  ;;  %v11745_v33 = vld [vmem:[%s16496_s1 + $0xda8] ss:$16 sps:$4 sm:$0xff]   ;;  %v11750_v26 = vld [vmem:[%s16496_s1 + $0xdc4] ss:$16 sps:$4 sm:$0xff]  }
 0x183   : > { %6808 = vmatpush1.bf16.msra.mxu0 %v11657_v36  ;;  %7464 = vmatpush1.bf16.msra.mxu1 %v11660_v24  ;;  %v11753_v36 = vld [vmem:[%s16496_s1 + $0xdcc] ss:$16 sps:$4 sm:$0xff]   ;;  %v11748_v24 = vld [vmem:[%s16496_s1 + $0xdc0] ss:$16 sps:$4 sm:$0xff]  }
 0x184   : > { %6818 = vmatprep.subr.bf16.mxu0 %v11666_v37  ;;  %7474 = vmatprep.subr.bf16.mxu1 %v11669_v38  ;;  %v11751_v37 = vld [vmem:[%s16496_s1 + $0xdc8] ss:$16 sps:$4 sm:$0xff]   ;;  %v11756_v38 = vld [vmem:[%s16496_s1 + $0xde4] ss:$16 sps:$4 sm:$0xff]  }
 0x186   : > { %6810 = vmatmul.mubr.bf16.vlgmr.msra.gmra.mrb[0].mxu0 %v13836_v34  ;;  %7466 = vmatmul.mubr.bf16.vlgmr.msra.gmra.mrb[0].mxu1 %v13836_v34  ;;  %v11681_v34 = vld [vmem:[%s16496_s1 + $0xc4c] ss:$16 sps:$4 sm:$0xff]  }
 0x187   : > { %6819 = vmatpush1.bf16.msra.mxu0 %v11664_v40  ;;  %7475 = vmatpush1.bf16.msra.mxu1 %v11667_v41  ;;  %v11759_v40 = vld [vmem:[%s16496_s1 + $0xdec] ss:$16 sps:$4 sm:$0xff]   ;;  %v1335_v41 = vcombine.high %v14023_v35, %v14023_v35 }
 0x188   : > { %6820 = vmatprep.subr.bf16.mxu0 %v11672_v29  ;;  %7476 = vmatprep.subr.bf16.mxu1 %v11675_v43  ;;  %v11754_v29 = vld [vmem:[%s16496_s1 + $0xde0] ss:$16 sps:$4 sm:$0xff]   ;;  %v11757_v43 = vld [vmem:[%s16496_s1 + $0xde8] ss:$16 sps:$4 sm:$0xff]   ;;  %v11765_v35 = vld [vmem:[%s16496_s1 + $0xe0c] ss:$16 sps:$4 sm:$0xff]  }
 0x189   : > { %6850 = vmatprep.mubr.bf16.mxu0 %v1350_v44  ;;  %7506 = vmatprep.mubr.bf16.mxu1 %v1350_v44  ;;  %v11762_v44 = vld [vmem:[%s16496_s1 + $0xe04] ss:$16 sps:$4 sm:$0xff]  }
 0x18b   : > { %6821 = vmatpush1.bf16.msra.mxu0 %v11670_v45  ;;  %7477 = vmatpush1.bf16.msra.mxu1 %v11673_v46  ;;  %v14240_v45 = vrot.slane %v1335_v41, %v12959_v49  ;;  %v11760_v46 = vld [vmem:[%s16496_s1 + $0xe00] ss:$16 sps:$4 sm:$0xff]   ;;  %v11849_v41 = vld [vmem:[%s16496_s1 + $0xfcc] ss:$16 sps:$4 sm:$0xff]  }
 0x18c   : > { %6822 = vmatprep.subr.bf16.mxu0 %v11678_v47  ;;  %7478 = vmatprep.subr.bf16.mxu1 %v11681_v34  ;;  %v11763_v47 = vld [vmem:[%s16496_s1 + $0xe08] ss:$16 sps:$4 sm:$0xff]   ;;  %v11768_v34 = vld [vmem:[%s16496_s1 + $0xe24] ss:$16 sps:$4 sm:$0xff]  }
 0x18f   : > { %6823 = vmatpush1.bf16.msra.mxu0 %v11676_v48  ;;  %7479 = vmatpush1.bf16.msra.mxu1 %v11679_v50  ;;  %v11771_v48 = vld [vmem:[%s16496_s1 + $0xe2c] ss:$16 sps:$4 sm:$0xff]   ;;  %v1351_v50 = vcombine.high %v14240_v45, %v14240_v45 }
 0x190   : > { %6824 = vmatprep.subr.bf16.mxu0 %v11684_v51  ;;  %7480 = vmatprep.subr.bf16.mxu1 %v11687_v52  ;;  %v11766_v51 = vld [vmem:[%s16496_s1 + $0xe20] ss:$16 sps:$4 sm:$0xff]   ;;  %v11769_v52 = vld [vmem:[%s16496_s1 + $0xe28] ss:$16 sps:$4 sm:$0xff]  }
 0x193   : > { %6825 = vmatpush1.bf16.msra.mxu0 %v11682_v53  ;;  %7481 = vmatpush1.bf16.msra.mxu1 %v11685_v54  ;;  %v11774_v53 = vld [vmem:[%s16496_s1 + $0xe44] ss:$16 sps:$4 sm:$0xff]   ;;  %v11772_v54 = vld [vmem:[%s16496_s1 + $0xe40] ss:$16 sps:$4 sm:$0xff]  }
 0x194   : > { %6826 = vmatprep.subr.bf16.mxu0 %v11690_v55  ;;  %7482 = vmatprep.subr.bf16.mxu1 %v11693_v56  ;;  %v11775_v55 = vld [vmem:[%s16496_s1 + $0xe48] ss:$16 sps:$4 sm:$0xff]   ;;  %v11780_v56 = vld [vmem:[%s16496_s1 + $0xe64] ss:$16 sps:$4 sm:$0xff]  }
 0x197   : > { %6827 = vmatpush1.bf16.msra.mxu0 %v11688_v57  ;;  %7483 = vmatpush1.bf16.msra.mxu1 %v11691_v58  ;;  %v11783_v57 = vld [vmem:[%s16496_s1 + $0xe6c] ss:$16 sps:$4 sm:$0xff]   ;;  %v11778_v58 = vld [vmem:[%s16496_s1 + $0xe60] ss:$16 sps:$4 sm:$0xff]  }
 0x198   : > { %6828 = vmatprep.subr.bf16.mxu0 %v11696_v59  ;;  %7484 = vmatprep.subr.bf16.mxu1 %v11699_v60  ;;  %v11781_v59 = vld [vmem:[%s16496_s1 + $0xe68] ss:$16 sps:$4 sm:$0xff]   ;;  %v11786_v60 = vld [vmem:[%s16496_s1 + $0xe84] ss:$16 sps:$4 sm:$0xff]  }
 0x19b   : > { %6829 = vmatpush1.bf16.msra.mxu0 %v11694_v61  ;;  %7485 = vmatpush1.bf16.msra.mxu1 %v11697_v62  ;;  %v11789_v61 = vld [vmem:[%s16496_s1 + $0xe8c] ss:$16 sps:$4 sm:$0xff]   ;;  %v11784_v62 = vld [vmem:[%s16496_s1 + $0xe80] ss:$16 sps:$4 sm:$0xff]  }
 0x19c   : > { %6830 = vmatprep.subr.bf16.mxu0 %v11702_v63  ;;  %7486 = vmatprep.subr.bf16.mxu1 %v11705_v0  ;;  %v11787_v63 = vld [vmem:[%s16496_s1 + $0xe88] ss:$16 sps:$4 sm:$0xff]   ;;  %v11792_v0 = vld [vmem:[%s16496_s1 + $0xea4] ss:$16 sps:$4 sm:$0xff]  }
 0x19f   : > { %6831 = vmatpush1.bf16.msra.mxu0 %v11700_v1  ;;  %7487 = vmatpush1.bf16.msra.mxu1 %v11703_v2  ;;  %v11795_v1 = vld [vmem:[%s16496_s1 + $0xeac] ss:$16 sps:$4 sm:$0xff]   ;;  %v11790_v2 = vld [vmem:[%s16496_s1 + $0xea0] ss:$16 sps:$4 sm:$0xff]  }
 0x1a0   : > { %6832 = vmatprep.subr.bf16.mxu0 %v11708_v3  ;;  %7488 = vmatprep.subr.bf16.mxu1 %v11711_v4  ;;  %v11793_v3 = vld [vmem:[%s16496_s1 + $0xea8] ss:$16 sps:$4 sm:$0xff]   ;;  %v11798_v4 = vld [vmem:[%s16496_s1 + $0xec4] ss:$16 sps:$4 sm:$0xff]  }
 0x1a3   : > { %6833 = vmatpush1.bf16.msra.mxu0 %v11706_v5  ;;  %7489 = vmatpush1.bf16.msra.mxu1 %v11709_v6  ;;  %v11801_v5 = vld [vmem:[%s16496_s1 + $0xecc] ss:$16 sps:$4 sm:$0xff]   ;;  %v11796_v6 = vld [vmem:[%s16496_s1 + $0xec0] ss:$16 sps:$4 sm:$0xff]  }
 0x1a4   : > { %6834 = vmatprep.subr.bf16.mxu0 %v11714_v7  ;;  %7490 = vmatprep.subr.bf16.mxu1 %v11717_v8  ;;  %v11799_v7 = vld [vmem:[%s16496_s1 + $0xec8] ss:$16 sps:$4 sm:$0xff]   ;;  %v11804_v8 = vld [vmem:[%s16496_s1 + $0xee4] ss:$16 sps:$4 sm:$0xff]  }
 0x1a7   : > { %6835 = vmatpush1.bf16.msra.mxu0 %v11712_v9  ;;  %7491 = vmatpush1.bf16.msra.mxu1 %v11715_v10  ;;  %v11807_v9 = vld [vmem:[%s16496_s1 + $0xeec] ss:$16 sps:$4 sm:$0xff]   ;;  %v11802_v10 = vld [vmem:[%s16496_s1 + $0xee0] ss:$16 sps:$4 sm:$0xff]  }
 0x1a8   : > { %6836 = vmatprep.subr.bf16.mxu0 %v11720_v11  ;;  %7492 = vmatprep.subr.bf16.mxu1 %v11723_v13  ;;  %v11805_v11 = vld [vmem:[%s16496_s1 + $0xee8] ss:$16 sps:$4 sm:$0xff]   ;;  %v11810_v13 = vld [vmem:[%s16496_s1 + $0xf04] ss:$16 sps:$4 sm:$0xff]  }
 0x1ab   : > { %6837 = vmatpush1.bf16.msra.mxu0 %v11718_v14  ;;  %7493 = vmatpush1.bf16.msra.mxu1 %v11721_v15  ;;  %v11813_v14 = vld [vmem:[%s16496_s1 + $0xf0c] ss:$16 sps:$4 sm:$0xff]   ;;  %v11808_v15 = vld [vmem:[%s16496_s1 + $0xf00] ss:$16 sps:$4 sm:$0xff]  }
 0x1ac   : > { %6838 = vmatprep.subr.bf16.mxu0 %v11726_v16  ;;  %7494 = vmatprep.subr.bf16.mxu1 %v11729_v17  ;;  %v11811_v16 = vld [vmem:[%s16496_s1 + $0xf08] ss:$16 sps:$4 sm:$0xff]   ;;  %v11816_v17 = vld [vmem:[%s16496_s1 + $0xf24] ss:$16 sps:$4 sm:$0xff]  }
 0x1af   : > { %6839 = vmatpush1.bf16.msra.mxu0 %v11724_v18  ;;  %7495 = vmatpush1.bf16.msra.mxu1 %v11727_v20  ;;  %v11819_v18 = vld [vmem:[%s16496_s1 + $0xf2c] ss:$16 sps:$4 sm:$0xff]   ;;  %v11814_v20 = vld [vmem:[%s16496_s1 + $0xf20] ss:$16 sps:$4 sm:$0xff]  }
 0x1b0   : > { %6840 = vmatprep.subr.bf16.mxu0 %v11732_v21  ;;  %7496 = vmatprep.subr.bf16.mxu1 %v11735_v23  ;;  %v11817_v21 = vld [vmem:[%s16496_s1 + $0xf28] ss:$16 sps:$4 sm:$0xff]   ;;  %v11822_v23 = vld [vmem:[%s16496_s1 + $0xf44] ss:$16 sps:$4 sm:$0xff]  }
 0x1b3   : > { %6841 = vmatpush1.bf16.msra.mxu0 %v11730_v19  ;;  %7497 = vmatpush1.bf16.msra.mxu1 %v11733_v25  ;;  %v11825_v19 = vld [vmem:[%s16496_s1 + $0xf4c] ss:$16 sps:$4 sm:$0xff]   ;;  %v11820_v25 = vld [vmem:[%s16496_s1 + $0xf40] ss:$16 sps:$4 sm:$0xff]  }
 0x1b4   : > { %6842 = vmatprep.subr.bf16.mxu0 %v11738_v12  ;;  %7498 = vmatprep.subr.bf16.mxu1 %v11741_v27  ;;  %v11823_v12 = vld [vmem:[%s16496_s1 + $0xf48] ss:$16 sps:$4 sm:$0xff]   ;;  %v11828_v27 = vld [vmem:[%s16496_s1 + $0xf64] ss:$16 sps:$4 sm:$0xff]  }
 0x1b7   : > { %6843 = vmatpush1.bf16.msra.mxu0 %v11736_v28  ;;  %7499 = vmatpush1.bf16.msra.mxu1 %v11739_v30  ;;  %v11831_v28 = vld [vmem:[%s16496_s1 + $0xf6c] ss:$16 sps:$4 sm:$0xff]   ;;  %v11826_v30 = vld [vmem:[%s16496_s1 + $0xf60] ss:$16 sps:$4 sm:$0xff]  }
 0x1b8   : > { %6844 = vmatprep.subr.bf16.mxu0 %v11744_v31  ;;  %7500 = vmatprep.subr.bf16.mxu1 %v11747_v22  ;;  %v11829_v31 = vld [vmem:[%s16496_s1 + $0xf68] ss:$16 sps:$4 sm:$0xff]   ;;  %v11834_v22 = vld [vmem:[%s16496_s1 + $0xf84] ss:$16 sps:$4 sm:$0xff]  }
 0x1bb   : > { %6845 = vmatpush1.bf16.msra.mxu0 %v11742_v32  ;;  %7501 = vmatpush1.bf16.msra.mxu1 %v11745_v33  ;;  %v11837_v32 = vld [vmem:[%s16496_s1 + $0xf8c] ss:$16 sps:$4 sm:$0xff]   ;;  %v11832_v33 = vld [vmem:[%s16496_s1 + $0xf80] ss:$16 sps:$4 sm:$0xff]  }
 0x1bc   : > { %6846 = vmatprep.subr.bf16.mxu0 %v11750_v26  ;;  %7502 = vmatprep.subr.bf16.mxu1 %v11753_v36  ;;  %v11835_v26 = vld [vmem:[%s16496_s1 + $0xf88] ss:$16 sps:$4 sm:$0xff]   ;;  %v11840_v36 = vld [vmem:[%s16496_s1 + $0xfa4] ss:$16 sps:$4 sm:$0xff]  }
 0x1bf   : > { %6847 = vmatpush1.bf16.msra.mxu0 %v11748_v24  ;;  %7503 = vmatpush1.bf16.msra.mxu1 %v11751_v37  ;;  %v11843_v24 = vld [vmem:[%s16496_s1 + $0xfac] ss:$16 sps:$4 sm:$0xff]   ;;  %v11838_v37 = vld [vmem:[%s16496_s1 + $0xfa0] ss:$16 sps:$4 sm:$0xff]  }
 0x1c0   : > { %6848 = vmatprep.subr.bf16.mxu0 %v11756_v38  ;;  %7504 = vmatprep.subr.bf16.mxu1 %v11759_v40  ;;  %v11841_v38 = vld [vmem:[%s16496_s1 + $0xfa8] ss:$16 sps:$4 sm:$0xff]   ;;  %v11846_v40 = vld [vmem:[%s16496_s1 + $0xfc4] ss:$16 sps:$4 sm:$0xff]  }
 0x1c3   : > { %6849 = vmatpush1.bf16.msra.mxu0 %v11754_v29  ;;  %7505 = vmatpush1.bf16.msra.mxu1 %v11757_v43  ;;  %v11844_v29 = vld [vmem:[%s16496_s1 + $0xfc0] ss:$16 sps:$4 sm:$0xff]   ;;  %v11847_v43 = vld [vmem:[%s16496_s1 + $0xfc8] ss:$16 sps:$4 sm:$0xff]  }
 0x1c4   : > { %6859 = vmatprep.subr.bf16.mxu0 %v11762_v44  ;;  %7515 = vmatprep.subr.bf16.mxu1 %v11765_v35  ;;  %v11852_v44 = vld [vmem:[%s16496_s1 + $0xfe4] ss:$16 sps:$4 sm:$0xff]   ;;  %v11855_v35 = vld [vmem:[%s16496_s1 + $0xfec] ss:$16 sps:$4 sm:$0xff]  }
 0x1c6   : > { %6851 = vmatmul.mubr.bf16.vlgmr.msra.gmra.mrb[0].mxu0 %v14039_v39  ;;  %7507 = vmatmul.mubr.bf16.vlgmr.msra.gmra.mrb[0].mxu1 %v14039_v39  ;;  %v11777_v39 = vld [vmem:[%s16496_s1 + $0xe4c] ss:$16 sps:$4 sm:$0xff]  }
 0x1c7   : > { %6860 = vmatpush1.bf16.msra.mxu0 %v11760_v46  ;;  %7516 = vmatpush1.bf16.msra.mxu1 %v11763_v47  ;;  %v14427_v46 = vld [vmem:[%s12956_s17 + $0x20] sm:$0xff] }
 0x1c8   : > { %6861 = vmatprep.subr.bf16.mxu0 %v11768_v34  ;;  %7517 = vmatprep.subr.bf16.mxu1 %v11771_v48  ;;  %v11850_v47 = vld [vmem:[%s16496_s1 + $0xfe0] ss:$16 sps:$4 sm:$0xff]   ;;  %v11853_v34 = vld [vmem:[%s16496_s1 + $0xfe8] ss:$16 sps:$4 sm:$0xff]   ;;  %v11859_v48 = vld [vmem:[%s16496_s1 + $0x1004] ss:$16 sps:$4 sm:$0xff]  }
 0x1c9   : > { %6891 = vmatprep.mubr.bf16.mxu0 %v1351_v50  ;;  %7547 = vmatprep.mubr.bf16.mxu1 %v1351_v50  ;;  %v11862_v50 = vld [vmem:[%s16496_s1 + $0x100c] ss:$16 sps:$4 sm:$0xff]  }
 0x1cb   : > { %6862 = vmatpush1.bf16.msra.mxu0 %v11766_v51  ;;  %7518 = vmatpush1.bf16.msra.mxu1 %v11769_v52  ;;  %v14443_v51 = vrot.slane %v14427_v46, %v12959_v49  ;;  %v11857_v52 = vld [vmem:[%s16496_s1 + $0x1000] ss:$16 sps:$4 sm:$0xff]  }
 0x1cc   : > { %6863 = vmatprep.subr.bf16.mxu0 %v11774_v53  ;;  %7519 = vmatprep.subr.bf16.mxu1 %v11777_v39  ;;  %v11860_v53 = vld [vmem:[%s16496_s1 + $0x1008] ss:$16 sps:$4 sm:$0xff]   ;;  %v11865_v39 = vld [vmem:[%s16496_s1 + $0x1024] ss:$16 sps:$4 sm:$0xff]  }
 0x1cf   : > { %6864 = vmatpush1.bf16.msra.mxu0 %v11772_v54  ;;  %7520 = vmatpush1.bf16.msra.mxu1 %v11775_v55  ;;  %v11868_v54 = vld [vmem:[%s16496_s1 + $0x102c] ss:$16 sps:$4 sm:$0xff]   ;;  %v1367_v55 = vcombine.high %v14443_v51, %v14443_v51 }
 0x1d0   : > { %6865 = vmatprep.subr.bf16.mxu0 %v11780_v56  ;;  %7521 = vmatprep.subr.bf16.mxu1 %v11783_v57  ;;  %v11863_v56 = vld [vmem:[%s16496_s1 + $0x1020] ss:$16 sps:$4 sm:$0xff]   ;;  %v11866_v57 = vld [vmem:[%s16496_s1 + $0x1028] ss:$16 sps:$4 sm:$0xff]  }
 0x1d3   : > { %6866 = vmatpush1.bf16.msra.mxu0 %v11778_v58  ;;  %7522 = vmatpush1.bf16.msra.mxu1 %v11781_v59  ;;  %v11871_v58 = vld [vmem:[%s16496_s1 + $0x1044] ss:$16 sps:$4 sm:$0xff]   ;;  %v11869_v59 = vld [vmem:[%s16496_s1 + $0x1040] ss:$16 sps:$4 sm:$0xff]  }
 0x1d4   : > { %6867 = vmatprep.subr.bf16.mxu0 %v11786_v60  ;;  %7523 = vmatprep.subr.bf16.mxu1 %v11789_v61  ;;  %v11872_v60 = vld [vmem:[%s16496_s1 + $0x1048] ss:$16 sps:$4 sm:$0xff]   ;;  %v11877_v61 = vld [vmem:[%s16496_s1 + $0x1064] ss:$16 sps:$4 sm:$0xff]  }
 0x1d7   : > { %6868 = vmatpush1.bf16.msra.mxu0 %v11784_v62  ;;  %7524 = vmatpush1.bf16.msra.mxu1 %v11787_v63  ;;  %v11880_v62 = vld [vmem:[%s16496_s1 + $0x106c] ss:$16 sps:$4 sm:$0xff]   ;;  %v11875_v63 = vld [vmem:[%s16496_s1 + $0x1060] ss:$16 sps:$4 sm:$0xff]  }
 0x1d8   : > { %6869 = vmatprep.subr.bf16.mxu0 %v11792_v0  ;;  %7525 = vmatprep.subr.bf16.mxu1 %v11795_v1  ;;  %v11878_v0 = vld [vmem:[%s16496_s1 + $0x1068] ss:$16 sps:$4 sm:$0xff]   ;;  %v11883_v1 = vld [vmem:[%s16496_s1 + $0x1084] ss:$16 sps:$4 sm:$0xff]  }
 0x1db   : > { %6870 = vmatpush1.bf16.msra.mxu0 %v11790_v2  ;;  %7526 = vmatpush1.bf16.msra.mxu1 %v11793_v3  ;;  %v11886_v2 = vld [vmem:[%s16496_s1 + $0x108c] ss:$16 sps:$4 sm:$0xff]   ;;  %v11881_v3 = vld [vmem:[%s16496_s1 + $0x1080] ss:$16 sps:$4 sm:$0xff]  }
 0x1dc   : > { %6871 = vmatprep.subr.bf16.mxu0 %v11798_v4  ;;  %7527 = vmatprep.subr.bf16.mxu1 %v11801_v5  ;;  %v11884_v4 = vld [vmem:[%s16496_s1 + $0x1088] ss:$16 sps:$4 sm:$0xff]   ;;  %v11889_v5 = vld [vmem:[%s16496_s1 + $0x10a4] ss:$16 sps:$4 sm:$0xff]  }
 0x1df   : > { %6872 = vmatpush1.bf16.msra.mxu0 %v11796_v6  ;;  %7528 = vmatpush1.bf16.msra.mxu1 %v11799_v7  ;;  %v11892_v6 = vld [vmem:[%s16496_s1 + $0x10ac] ss:$16 sps:$4 sm:$0xff]   ;;  %v11887_v7 = vld [vmem:[%s16496_s1 + $0x10a0] ss:$16 sps:$4 sm:$0xff]  }
 0x1e0   : > { %6873 = vmatprep.subr.bf16.mxu0 %v11804_v8  ;;  %7529 = vmatprep.subr.bf16.mxu1 %v11807_v9  ;;  %v11890_v8 = vld [vmem:[%s16496_s1 + $0x10a8] ss:$16 sps:$4 sm:$0xff]   ;;  %v11895_v9 = vld [vmem:[%s16496_s1 + $0x10c4] ss:$16 sps:$4 sm:$0xff]  }
 0x1e3   : > { %6874 = vmatpush1.bf16.msra.mxu0 %v11802_v10  ;;  %7530 = vmatpush1.bf16.msra.mxu1 %v11805_v11  ;;  %v11898_v10 = vld [vmem:[%s16496_s1 + $0x10cc] ss:$16 sps:$4 sm:$0xff]   ;;  %v11893_v11 = vld [vmem:[%s16496_s1 + $0x10c0] ss:$16 sps:$4 sm:$0xff]  }
 0x1e4   : > { %6875 = vmatprep.subr.bf16.mxu0 %v11810_v13  ;;  %7531 = vmatprep.subr.bf16.mxu1 %v11813_v14  ;;  %v11896_v13 = vld [vmem:[%s16496_s1 + $0x10c8] ss:$16 sps:$4 sm:$0xff]   ;;  %v11901_v14 = vld [vmem:[%s16496_s1 + $0x10e4] ss:$16 sps:$4 sm:$0xff]  }
 0x1e7   : > { %6876 = vmatpush1.bf16.msra.mxu0 %v11808_v15  ;;  %7532 = vmatpush1.bf16.msra.mxu1 %v11811_v16  ;;  %v11904_v15 = vld [vmem:[%s16496_s1 + $0x10ec] ss:$16 sps:$4 sm:$0xff]   ;;  %v11899_v16 = vld [vmem:[%s16496_s1 + $0x10e0] ss:$16 sps:$4 sm:$0xff]  }
 0x1e8   : > { %6877 = vmatprep.subr.bf16.mxu0 %v11816_v17  ;;  %7533 = vmatprep.subr.bf16.mxu1 %v11819_v18  ;;  %v11902_v17 = vld [vmem:[%s16496_s1 + $0x10e8] ss:$16 sps:$4 sm:$0xff]   ;;  %v11907_v18 = vld [vmem:[%s16496_s1 + $0x1104] ss:$16 sps:$4 sm:$0xff]  }
 0x1eb   : > { %6878 = vmatpush1.bf16.msra.mxu0 %v11814_v20  ;;  %7534 = vmatpush1.bf16.msra.mxu1 %v11817_v21  ;;  %v11910_v20 = vld [vmem:[%s16496_s1 + $0x110c] ss:$16 sps:$4 sm:$0xff]   ;;  %v11905_v21 = vld [vmem:[%s16496_s1 + $0x1100] ss:$16 sps:$4 sm:$0xff]  }
 0x1ec   : > { %6879 = vmatprep.subr.bf16.mxu0 %v11822_v23  ;;  %7535 = vmatprep.subr.bf16.mxu1 %v11825_v19  ;;  %v11908_v23 = vld [vmem:[%s16496_s1 + $0x1108] ss:$16 sps:$4 sm:$0xff]   ;;  %v11913_v19 = vld [vmem:[%s16496_s1 + $0x1124] ss:$16 sps:$4 sm:$0xff]  }
 0x1ef   : > { %6880 = vmatpush1.bf16.msra.mxu0 %v11820_v25  ;;  %7536 = vmatpush1.bf16.msra.mxu1 %v11823_v12  ;;  %v11916_v25 = vld [vmem:[%s16496_s1 + $0x112c] ss:$16 sps:$4 sm:$0xff]   ;;  %v11911_v12 = vld [vmem:[%s16496_s1 + $0x1120] ss:$16 sps:$4 sm:$0xff]  }
 0x1f0   : > { %6881 = vmatprep.subr.bf16.mxu0 %v11828_v27  ;;  %7537 = vmatprep.subr.bf16.mxu1 %v11831_v28  ;;  %v11914_v27 = vld [vmem:[%s16496_s1 + $0x1128] ss:$16 sps:$4 sm:$0xff]   ;;  %v11919_v28 = vld [vmem:[%s16496_s1 + $0x1144] ss:$16 sps:$4 sm:$0xff]  }
 0x1f3   : > { %6882 = vmatpush1.bf16.msra.mxu0 %v11826_v30  ;;  %7538 = vmatpush1.bf16.msra.mxu1 %v11829_v31  ;;  %v11922_v30 = vld [vmem:[%s16496_s1 + $0x114c] ss:$16 sps:$4 sm:$0xff]   ;;  %v11917_v31 = vld [vmem:[%s16496_s1 + $0x1140] ss:$16 sps:$4 sm:$0xff]  }
 0x1f4   : > { %6883 = vmatprep.subr.bf16.mxu0 %v11834_v22  ;;  %7539 = vmatprep.subr.bf16.mxu1 %v11837_v32  ;;  %v11920_v22 = vld [vmem:[%s16496_s1 + $0x1148] ss:$16 sps:$4 sm:$0xff]   ;;  %v11925_v32 = vld [vmem:[%s16496_s1 + $0x1164] ss:$16 sps:$4 sm:$0xff]  }
 0x1f7   : > { %6884 = vmatpush1.bf16.msra.mxu0 %v11832_v33  ;;  %7540 = vmatpush1.bf16.msra.mxu1 %v11835_v26  ;;  %v11928_v33 = vld [vmem:[%s16496_s1 + $0x116c] ss:$16 sps:$4 sm:$0xff]   ;;  %v11923_v26 = vld [vmem:[%s16496_s1 + $0x1160] ss:$16 sps:$4 sm:$0xff]  }
 0x1f8   : > { %6885 = vmatprep.subr.bf16.mxu0 %v11840_v36  ;;  %7541 = vmatprep.subr.bf16.mxu1 %v11843_v24  ;;  %v11926_v36 = vld [vmem:[%s16496_s1 + $0x1168] ss:$16 sps:$4 sm:$0xff]   ;;  %v11931_v24 = vld [vmem:[%s16496_s1 + $0x1184] ss:$16 sps:$4 sm:$0xff]  }
 0x1fb   : > { %6886 = vmatpush1.bf16.msra.mxu0 %v11838_v37  ;;  %7542 = vmatpush1.bf16.msra.mxu1 %v11841_v38  ;;  %v11934_v37 = vld [vmem:[%s16496_s1 + $0x118c] ss:$16 sps:$4 sm:$0xff]   ;;  %v11929_v38 = vld [vmem:[%s16496_s1 + $0x1180] ss:$16 sps:$4 sm:$0xff]  }
 0x1fc   : > { %6887 = vmatprep.subr.bf16.mxu0 %v11846_v40  ;;  %7543 = vmatprep.subr.bf16.mxu1 %v11849_v41  ;;  %v11932_v40 = vld [vmem:[%s16496_s1 + $0x1188] ss:$16 sps:$4 sm:$0xff]   ;;  %v11937_v41 = vld [vmem:[%s16496_s1 + $0x11a4] ss:$16 sps:$4 sm:$0xff]  }
 0x1ff   : > { %6888 = vmatpush1.bf16.msra.mxu0 %v11844_v29  ;;  %7544 = vmatpush1.bf16.msra.mxu1 %v11847_v43  ;;  %v11940_v29 = vld [vmem:[%s16496_s1 + $0x11ac] ss:$16 sps:$4 sm:$0xff]   ;;  %v11935_v43 = vld [vmem:[%s16496_s1 + $0x11a0] ss:$16 sps:$4 sm:$0xff]  }
 0x200   : > { %6889 = vmatprep.subr.bf16.mxu0 %v11852_v44  ;;  %7545 = vmatprep.subr.bf16.mxu1 %v11855_v35  ;;  %v11938_v44 = vld [vmem:[%s16496_s1 + $0x11a8] ss:$16 sps:$4 sm:$0xff]   ;;  %v11943_v35 = vld [vmem:[%s16496_s1 + $0x11c4] ss:$16 sps:$4 sm:$0xff]  }
 0x203   : > { %6890 = vmatpush1.bf16.msra.mxu0 %v11850_v47  ;;  %7546 = vmatpush1.bf16.msra.mxu1 %v11853_v34  ;;  %v11946_v47 = vld [vmem:[%s16496_s1 + $0x11cc] ss:$16 sps:$4 sm:$0xff]   ;;  %v11941_v34 = vld [vmem:[%s16496_s1 + $0x11c0] ss:$16 sps:$4 sm:$0xff]  }
 0x204   : > { %6900 = vmatprep.subr.bf16.mxu0 %v11859_v48  ;;  %7556 = vmatprep.subr.bf16.mxu1 %v11862_v50  ;;  %v11944_v48 = vld [vmem:[%s16496_s1 + $0x11c8] ss:$16 sps:$4 sm:$0xff]   ;;  %v11949_v50 = vld [vmem:[%s16496_s1 + $0x11e4] ss:$16 sps:$4 sm:$0xff]  }
 0x206   : > { %6892 = vmatmul.mubr.bf16.vlgmr.msra.gmra.mrb[0].mxu0 %v14240_v45  ;;  %7548 = vmatmul.mubr.bf16.vlgmr.msra.gmra.mrb[0].mxu1 %v14240_v45  ;;  %v11874_v45 = vld [vmem:[%s16496_s1 + $0x104c] ss:$16 sps:$4 sm:$0xff]  }
 0x207   : > { %6901 = vmatpush1.bf16.msra.mxu0 %v11857_v52  ;;  %7557 = vmatpush1.bf16.msra.mxu1 %v11860_v53  ;;  %v11952_v52 = vld [vmem:[%s16496_s1 + $0x11ec] ss:$16 sps:$4 sm:$0xff]   ;;  %v1352_v53 = vcombine.high %v14427_v46, %v14427_v46 }
 0x208   : > { %6902 = vmatprep.subr.bf16.mxu0 %v11865_v39  ;;  %7558 = vmatprep.subr.bf16.mxu1 %v11868_v54  ;;  %v11947_v39 = vld [vmem:[%s16496_s1 + $0x11e0] ss:$16 sps:$4 sm:$0xff]   ;;  %v11950_v54 = vld [vmem:[%s16496_s1 + $0x11e8] ss:$16 sps:$4 sm:$0xff]   ;;  %v11958_v46 = vld [vmem:[%s16496_s1 + $0x120c] ss:$16 sps:$4 sm:$0xff]  }
 0x209   : > { %6932 = vmatprep.mubr.bf16.mxu0 %v1367_v55  ;;  %7588 = vmatprep.mubr.bf16.mxu1 %v1367_v55  ;;  %v11955_v55 = vld [vmem:[%s16496_s1 + $0x1204] ss:$16 sps:$4 sm:$0xff]  }
 0x20b   : > { %6903 = vmatpush1.bf16.msra.mxu0 %v11863_v56  ;;  %7559 = vmatpush1.bf16.msra.mxu1 %v11866_v57  ;;  %v14644_v56 = vrot.slane %v1352_v53, %v12959_v49  ;;  %v11953_v57 = vld [vmem:[%s16496_s1 + $0x1200] ss:$16 sps:$4 sm:$0xff]   ;;  %v12042_v53 = vld [vmem:[%s16496_s1 + $0x13cc] ss:$16 sps:$4 sm:$0xff]  }
 0x20c   : > { %6904 = vmatprep.subr.bf16.mxu0 %v11871_v58  ;;  %7560 = vmatprep.subr.bf16.mxu1 %v11874_v45  ;;  %v11956_v58 = vld [vmem:[%s16496_s1 + $0x1208] ss:$16 sps:$4 sm:$0xff]   ;;  %v11961_v45 = vld [vmem:[%s16496_s1 + $0x1224] ss:$16 sps:$4 sm:$0xff]  }
 0x20f   : > { %6905 = vmatpush1.bf16.msra.mxu0 %v11869_v59  ;;  %7561 = vmatpush1.bf16.msra.mxu1 %v11872_v60  ;;  %v11964_v59 = vld [vmem:[%s16496_s1 + $0x122c] ss:$16 sps:$4 sm:$0xff]   ;;  %v1368_v60 = vcombine.high %v14644_v56, %v14644_v56 }
 0x210   : > { %6906 = vmatprep.subr.bf16.mxu0 %v11877_v61  ;;  %7562 = vmatprep.subr.bf16.mxu1 %v11880_v62  ;;  %v11959_v61 = vld [vmem:[%s16496_s1 + $0x1220] ss:$16 sps:$4 sm:$0xff]   ;;  %v11962_v62 = vld [vmem:[%s16496_s1 + $0x1228] ss:$16 sps:$4 sm:$0xff]  }
 0x213   : > { %6907 = vmatpush1.bf16.msra.mxu0 %v11875_v63  ;;  %7563 = vmatpush1.bf16.msra.mxu1 %v11878_v0  ;;  %v11967_v63 = vld [vmem:[%s16496_s1 + $0x1244] ss:$16 sps:$4 sm:$0xff]   ;;  %v11965_v0 = vld [vmem:[%s16496_s1 + $0x1240] ss:$16 sps:$4 sm:$0xff]  }
 0x214   : > { %6908 = vmatprep.subr.bf16.mxu0 %v11883_v1  ;;  %7564 = vmatprep.subr.bf16.mxu1 %v11886_v2  ;;  %v11968_v1 = vld [vmem:[%s16496_s1 + $0x1248] ss:$16 sps:$4 sm:$0xff]   ;;  %v11973_v2 = vld [vmem:[%s16496_s1 + $0x1264] ss:$16 sps:$4 sm:$0xff]  }
 0x217   : > { %6909 = vmatpush1.bf16.msra.mxu0 %v11881_v3  ;;  %7565 = vmatpush1.bf16.msra.mxu1 %v11884_v4  ;;  %v11976_v3 = vld [vmem:[%s16496_s1 + $0x126c] ss:$16 sps:$4 sm:$0xff]   ;;  %v11971_v4 = vld [vmem:[%s16496_s1 + $0x1260] ss:$16 sps:$4 sm:$0xff]  }
 0x218   : > { %6910 = vmatprep.subr.bf16.mxu0 %v11889_v5  ;;  %7566 = vmatprep.subr.bf16.mxu1 %v11892_v6  ;;  %v11974_v5 = vld [vmem:[%s16496_s1 + $0x1268] ss:$16 sps:$4 sm:$0xff]   ;;  %v11979_v6 = vld [vmem:[%s16496_s1 + $0x1284] ss:$16 sps:$4 sm:$0xff]  }
 0x21b   : > { %6911 = vmatpush1.bf16.msra.mxu0 %v11887_v7  ;;  %7567 = vmatpush1.bf16.msra.mxu1 %v11890_v8  ;;  %v11982_v7 = vld [vmem:[%s16496_s1 + $0x128c] ss:$16 sps:$4 sm:$0xff]   ;;  %v11977_v8 = vld [vmem:[%s16496_s1 + $0x1280] ss:$16 sps:$4 sm:$0xff]  }
 0x21c   : > { %6912 = vmatprep.subr.bf16.mxu0 %v11895_v9  ;;  %7568 = vmatprep.subr.bf16.mxu1 %v11898_v10  ;;  %v11980_v9 = vld [vmem:[%s16496_s1 + $0x1288] ss:$16 sps:$4 sm:$0xff]   ;;  %v11985_v10 = vld [vmem:[%s16496_s1 + $0x12a4] ss:$16 sps:$4 sm:$0xff]  }
 0x21f   : > { %6913 = vmatpush1.bf16.msra.mxu0 %v11893_v11  ;;  %7569 = vmatpush1.bf16.msra.mxu1 %v11896_v13  ;;  %v11988_v11 = vld [vmem:[%s16496_s1 + $0x12ac] ss:$16 sps:$4 sm:$0xff]   ;;  %v11983_v13 = vld [vmem:[%s16496_s1 + $0x12a0] ss:$16 sps:$4 sm:$0xff]  }
 0x220   : > { %6914 = vmatprep.subr.bf16.mxu0 %v11901_v14  ;;  %7570 = vmatprep.subr.bf16.mxu1 %v11904_v15  ;;  %v11986_v14 = vld [vmem:[%s16496_s1 + $0x12a8] ss:$16 sps:$4 sm:$0xff]   ;;  %v11991_v15 = vld [vmem:[%s16496_s1 + $0x12c4] ss:$16 sps:$4 sm:$0xff]  }
 0x223   : > { %6915 = vmatpush1.bf16.msra.mxu0 %v11899_v16  ;;  %7571 = vmatpush1.bf16.msra.mxu1 %v11902_v17  ;;  %v11994_v16 = vld [vmem:[%s16496_s1 + $0x12cc] ss:$16 sps:$4 sm:$0xff]   ;;  %v11989_v17 = vld [vmem:[%s16496_s1 + $0x12c0] ss:$16 sps:$4 sm:$0xff]  }
 0x224   : > { %6916 = vmatprep.subr.bf16.mxu0 %v11907_v18  ;;  %7572 = vmatprep.subr.bf16.mxu1 %v11910_v20  ;;  %v11992_v18 = vld [vmem:[%s16496_s1 + $0x12c8] ss:$16 sps:$4 sm:$0xff]   ;;  %v11997_v20 = vld [vmem:[%s16496_s1 + $0x12e4] ss:$16 sps:$4 sm:$0xff]  }
 0x227   : > { %6917 = vmatpush1.bf16.msra.mxu0 %v11905_v21  ;;  %7573 = vmatpush1.bf16.msra.mxu1 %v11908_v23  ;;  %v12000_v21 = vld [vmem:[%s16496_s1 + $0x12ec] ss:$16 sps:$4 sm:$0xff]   ;;  %v11995_v23 = vld [vmem:[%s16496_s1 + $0x12e0] ss:$16 sps:$4 sm:$0xff]  }
 0x228   : > { %6918 = vmatprep.subr.bf16.mxu0 %v11913_v19  ;;  %7574 = vmatprep.subr.bf16.mxu1 %v11916_v25  ;;  %v11998_v19 = vld [vmem:[%s16496_s1 + $0x12e8] ss:$16 sps:$4 sm:$0xff]   ;;  %v12003_v25 = vld [vmem:[%s16496_s1 + $0x1304] ss:$16 sps:$4 sm:$0xff]  }
 0x22b   : > { %6919 = vmatpush1.bf16.msra.mxu0 %v11911_v12  ;;  %7575 = vmatpush1.bf16.msra.mxu1 %v11914_v27  ;;  %v12006_v12 = vld [vmem:[%s16496_s1 + $0x130c] ss:$16 sps:$4 sm:$0xff]   ;;  %v12001_v27 = vld [vmem:[%s16496_s1 + $0x1300] ss:$16 sps:$4 sm:$0xff]  }
 0x22c   : > { %6920 = vmatprep.subr.bf16.mxu0 %v11919_v28  ;;  %7576 = vmatprep.subr.bf16.mxu1 %v11922_v30  ;;  %v12004_v28 = vld [vmem:[%s16496_s1 + $0x1308] ss:$16 sps:$4 sm:$0xff]   ;;  %v12009_v30 = vld [vmem:[%s16496_s1 + $0x1324] ss:$16 sps:$4 sm:$0xff]  }
 0x22f   : > { %6921 = vmatpush1.bf16.msra.mxu0 %v11917_v31  ;;  %7577 = vmatpush1.bf16.msra.mxu1 %v11920_v22  ;;  %v12012_v31 = vld [vmem:[%s16496_s1 + $0x132c] ss:$16 sps:$4 sm:$0xff]   ;;  %v12007_v22 = vld [vmem:[%s16496_s1 + $0x1320] ss:$16 sps:$4 sm:$0xff]  }
 0x230   : > { %6922 = vmatprep.subr.bf16.mxu0 %v11925_v32  ;;  %7578 = vmatprep.subr.bf16.mxu1 %v11928_v33  ;;  %v12010_v32 = vld [vmem:[%s16496_s1 + $0x1328] ss:$16 sps:$4 sm:$0xff]   ;;  %v12015_v33 = vld [vmem:[%s16496_s1 + $0x1344] ss:$16 sps:$4 sm:$0xff]  }
 0x233   : > { %6923 = vmatpush1.bf16.msra.mxu0 %v11923_v26  ;;  %7579 = vmatpush1.bf16.msra.mxu1 %v11926_v36  ;;  %v12018_v26 = vld [vmem:[%s16496_s1 + $0x134c] ss:$16 sps:$4 sm:$0xff]   ;;  %v12013_v36 = vld [vmem:[%s16496_s1 + $0x1340] ss:$16 sps:$4 sm:$0xff]  }
 0x234   : > { %6924 = vmatprep.subr.bf16.mxu0 %v11931_v24  ;;  %7580 = vmatprep.subr.bf16.mxu1 %v11934_v37  ;;  %v12016_v24 = vld [vmem:[%s16496_s1 + $0x1348] ss:$16 sps:$4 sm:$0xff]   ;;  %v12021_v37 = vld [vmem:[%s16496_s1 + $0x1364] ss:$16 sps:$4 sm:$0xff]  }
 0x237   : > { %6925 = vmatpush1.bf16.msra.mxu0 %v11929_v38  ;;  %7581 = vmatpush1.bf16.msra.mxu1 %v11932_v40  ;;  %v12024_v38 = vld [vmem:[%s16496_s1 + $0x136c] ss:$16 sps:$4 sm:$0xff]   ;;  %v12019_v40 = vld [vmem:[%s16496_s1 + $0x1360] ss:$16 sps:$4 sm:$0xff]  }
 0x238   : > { %6926 = vmatprep.subr.bf16.mxu0 %v11937_v41  ;;  %7582 = vmatprep.subr.bf16.mxu1 %v11940_v29  ;;  %v12022_v41 = vld [vmem:[%s16496_s1 + $0x1368] ss:$16 sps:$4 sm:$0xff]   ;;  %v12027_v29 = vld [vmem:[%s16496_s1 + $0x1384] ss:$16 sps:$4 sm:$0xff]  }
 0x23b   : > { %6927 = vmatpush1.bf16.msra.mxu0 %v11935_v43  ;;  %7583 = vmatpush1.bf16.msra.mxu1 %v11938_v44  ;;  %v12030_v43 = vld [vmem:[%s16496_s1 + $0x138c] ss:$16 sps:$4 sm:$0xff]   ;;  %v12025_v44 = vld [vmem:[%s16496_s1 + $0x1380] ss:$16 sps:$4 sm:$0xff]  }
 0x23c   : > { %6928 = vmatprep.subr.bf16.mxu0 %v11943_v35  ;;  %7584 = vmatprep.subr.bf16.mxu1 %v11946_v47  ;;  %v12028_v35 = vld [vmem:[%s16496_s1 + $0x1388] ss:$16 sps:$4 sm:$0xff]   ;;  %v12033_v47 = vld [vmem:[%s16496_s1 + $0x13a4] ss:$16 sps:$4 sm:$0xff]  }
 0x23f   : > { %6929 = vmatpush1.bf16.msra.mxu0 %v11941_v34  ;;  %7585 = vmatpush1.bf16.msra.mxu1 %v11944_v48  ;;  %v12036_v34 = vld [vmem:[%s16496_s1 + $0x13ac] ss:$16 sps:$4 sm:$0xff]   ;;  %v12031_v48 = vld [vmem:[%s16496_s1 + $0x13a0] ss:$16 sps:$4 sm:$0xff]  }
 0x240   : > { %6930 = vmatprep.subr.bf16.mxu0 %v11949_v50  ;;  %7586 = vmatprep.subr.bf16.mxu1 %v11952_v52  ;;  %v12034_v50 = vld [vmem:[%s16496_s1 + $0x13a8] ss:$16 sps:$4 sm:$0xff]   ;;  %v12039_v52 = vld [vmem:[%s16496_s1 + $0x13c4] ss:$16 sps:$4 sm:$0xff]  }
 0x243   : > { %6931 = vmatpush1.bf16.msra.mxu0 %v11947_v39  ;;  %7587 = vmatpush1.bf16.msra.mxu1 %v11950_v54  ;;  %v12037_v39 = vld [vmem:[%s16496_s1 + $0x13c0] ss:$16 sps:$4 sm:$0xff]   ;;  %v12040_v54 = vld [vmem:[%s16496_s1 + $0x13c8] ss:$16 sps:$4 sm:$0xff]  }
 0x244   : > { %6941 = vmatprep.subr.bf16.mxu0 %v11955_v55  ;;  %7597 = vmatprep.subr.bf16.mxu1 %v11958_v46  ;;  %v12045_v55 = vld [vmem:[%s16496_s1 + $0x13e4] ss:$16 sps:$4 sm:$0xff]   ;;  %v12048_v46 = vld [vmem:[%s16496_s1 + $0x13ec] ss:$16 sps:$4 sm:$0xff]  }
 0x246   : > { %6933 = vmatmul.mubr.bf16.vlgmr.msra.gmra.mrb[0].mxu0 %v14443_v51  ;;  %7589 = vmatmul.mubr.bf16.vlgmr.msra.gmra.mrb[0].mxu1 %v14443_v51  ;;  %v11970_v51 = vld [vmem:[%s16496_s1 + $0x124c] ss:$16 sps:$4 sm:$0xff]  }
 0x247   : > { %6942 = vmatpush1.bf16.msra.mxu0 %v11953_v57  ;;  %7598 = vmatpush1.bf16.msra.mxu1 %v11956_v58  ;;  %v14831_v57 = vld [vmem:[%s12956_s17 + $0x28] sm:$0xff]  ;;  %v12043_v58 = vld [vmem:[%s16496_s1 + $0x13e0] ss:$16 sps:$4 sm:$0xff]  }
 0x248   : > { %6943 = vmatprep.subr.bf16.mxu0 %v11961_v45  ;;  %7599 = vmatprep.subr.bf16.mxu1 %v11964_v59  ;;  %v12046_v45 = vld [vmem:[%s16496_s1 + $0x13e8] ss:$16 sps:$4 sm:$0xff]   ;;  %v12052_v59 = vld [vmem:[%s16496_s1 + $0x1404] ss:$16 sps:$4 sm:$0xff]  }
 0x249   : > { %6973 = vmatprep.mubr.bf16.mxu0 %v1368_v60  ;;  %7629 = vmatprep.mubr.bf16.mxu1 %v1368_v60  ;;  %v12055_v60 = vld [vmem:[%s16496_s1 + $0x140c] ss:$16 sps:$4 sm:$0xff]  }
 0x24b   : > { %6944 = vmatpush1.bf16.msra.mxu0 %v11959_v61  ;;  %7600 = vmatpush1.bf16.msra.mxu1 %v11962_v62  ;;  %v14847_v61 = vrot.slane %v14831_v57, %v12959_v49  ;;  %v12050_v62 = vld [vmem:[%s16496_s1 + $0x1400] ss:$16 sps:$4 sm:$0xff]  }
 0x24c   : > { %6945 = vmatprep.subr.bf16.mxu0 %v11967_v63  ;;  %7601 = vmatprep.subr.bf16.mxu1 %v11970_v51  ;;  %v12053_v63 = vld [vmem:[%s16496_s1 + $0x1408] ss:$16 sps:$4 sm:$0xff]   ;;  %v12058_v51 = vld [vmem:[%s16496_s1 + $0x1424] ss:$16 sps:$4 sm:$0xff]  }
 0x24f   : > { %6946 = vmatpush1.bf16.msra.mxu0 %v11965_v0  ;;  %7602 = vmatpush1.bf16.msra.mxu1 %v11968_v1  ;;  %v12061_v0 = vld [vmem:[%s16496_s1 + $0x142c] ss:$16 sps:$4 sm:$0xff]   ;;  %v1384_v1 = vcombine.high %v14847_v61, %v14847_v61 }
 0x250   : > { %6947 = vmatprep.subr.bf16.mxu0 %v11973_v2  ;;  %7603 = vmatprep.subr.bf16.mxu1 %v11976_v3  ;;  %v12056_v2 = vld [vmem:[%s16496_s1 + $0x1420] ss:$16 sps:$4 sm:$0xff]   ;;  %v12059_v3 = vld [vmem:[%s16496_s1 + $0x1428] ss:$16 sps:$4 sm:$0xff]  }
 0x253   : > { %6948 = vmatpush1.bf16.msra.mxu0 %v11971_v4  ;;  %7604 = vmatpush1.bf16.msra.mxu1 %v11974_v5  ;;  %v12064_v4 = vld [vmem:[%s16496_s1 + $0x1444] ss:$16 sps:$4 sm:$0xff]   ;;  %v12062_v5 = vld [vmem:[%s16496_s1 + $0x1440] ss:$16 sps:$4 sm:$0xff]  }
 0x254   : > { %6949 = vmatprep.subr.bf16.mxu0 %v11979_v6  ;;  %7605 = vmatprep.subr.bf16.mxu1 %v11982_v7  ;;  %v12065_v6 = vld [vmem:[%s16496_s1 + $0x1448] ss:$16 sps:$4 sm:$0xff]   ;;  %v12070_v7 = vld [vmem:[%s16496_s1 + $0x1464] ss:$16 sps:$4 sm:$0xff]  }
 0x257   : > { %6950 = vmatpush1.bf16.msra.mxu0 %v11977_v8  ;;  %7606 = vmatpush1.bf16.msra.mxu1 %v11980_v9  ;;  %v12073_v8 = vld [vmem:[%s16496_s1 + $0x146c] ss:$16 sps:$4 sm:$0xff]   ;;  %v12068_v9 = vld [vmem:[%s16496_s1 + $0x1460] ss:$16 sps:$4 sm:$0xff]  }
 0x258   : > { %6951 = vmatprep.subr.bf16.mxu0 %v11985_v10  ;;  %7607 = vmatprep.subr.bf16.mxu1 %v11988_v11  ;;  %v12071_v10 = vld [vmem:[%s16496_s1 + $0x1468] ss:$16 sps:$4 sm:$0xff]   ;;  %v12076_v11 = vld [vmem:[%s16496_s1 + $0x1484] ss:$16 sps:$4 sm:$0xff]  }
 0x25b   : > { %6952 = vmatpush1.bf16.msra.mxu0 %v11983_v13  ;;  %7608 = vmatpush1.bf16.msra.mxu1 %v11986_v14  ;;  %v12079_v13 = vld [vmem:[%s16496_s1 + $0x148c] ss:$16 sps:$4 sm:$0xff]   ;;  %v12074_v14 = vld [vmem:[%s16496_s1 + $0x1480] ss:$16 sps:$4 sm:$0xff]  }
 0x25c   : > { %6953 = vmatprep.subr.bf16.mxu0 %v11991_v15  ;;  %7609 = vmatprep.subr.bf16.mxu1 %v11994_v16  ;;  %v12077_v15 = vld [vmem:[%s16496_s1 + $0x1488] ss:$16 sps:$4 sm:$0xff]   ;;  %v12082_v16 = vld [vmem:[%s16496_s1 + $0x14a4] ss:$16 sps:$4 sm:$0xff]  }
 0x25f   : > { %6954 = vmatpush1.bf16.msra.mxu0 %v11989_v17  ;;  %7610 = vmatpush1.bf16.msra.mxu1 %v11992_v18  ;;  %v12085_v17 = vld [vmem:[%s16496_s1 + $0x14ac] ss:$16 sps:$4 sm:$0xff]   ;;  %v12080_v18 = vld [vmem:[%s16496_s1 + $0x14a0] ss:$16 sps:$4 sm:$0xff]  }
 0x260   : > { %6955 = vmatprep.subr.bf16.mxu0 %v11997_v20  ;;  %7611 = vmatprep.subr.bf16.mxu1 %v12000_v21  ;;  %v12083_v20 = vld [vmem:[%s16496_s1 + $0x14a8] ss:$16 sps:$4 sm:$0xff]   ;;  %v12088_v21 = vld [vmem:[%s16496_s1 + $0x14c4] ss:$16 sps:$4 sm:$0xff]  }
 0x263   : > { %6956 = vmatpush1.bf16.msra.mxu0 %v11995_v23  ;;  %7612 = vmatpush1.bf16.msra.mxu1 %v11998_v19  ;;  %v12091_v23 = vld [vmem:[%s16496_s1 + $0x14cc] ss:$16 sps:$4 sm:$0xff]   ;;  %v12086_v19 = vld [vmem:[%s16496_s1 + $0x14c0] ss:$16 sps:$4 sm:$0xff]  }
 0x264   : > { %6957 = vmatprep.subr.bf16.mxu0 %v12003_v25  ;;  %7613 = vmatprep.subr.bf16.mxu1 %v12006_v12  ;;  %v12089_v25 = vld [vmem:[%s16496_s1 + $0x14c8] ss:$16 sps:$4 sm:$0xff]   ;;  %v12094_v12 = vld [vmem:[%s16496_s1 + $0x14e4] ss:$16 sps:$4 sm:$0xff]  }
 0x267   : > { %6958 = vmatpush1.bf16.msra.mxu0 %v12001_v27  ;;  %7614 = vmatpush1.bf16.msra.mxu1 %v12004_v28  ;;  %v12097_v27 = vld [vmem:[%s16496_s1 + $0x14ec] ss:$16 sps:$4 sm:$0xff]   ;;  %v12092_v28 = vld [vmem:[%s16496_s1 + $0x14e0] ss:$16 sps:$4 sm:$0xff]  }
 0x268   : > { %6959 = vmatprep.subr.bf16.mxu0 %v12009_v30  ;;  %7615 = vmatprep.subr.bf16.mxu1 %v12012_v31  ;;  %v12095_v30 = vld [vmem:[%s16496_s1 + $0x14e8] ss:$16 sps:$4 sm:$0xff]   ;;  %v12100_v31 = vld [vmem:[%s16496_s1 + $0x1504] ss:$16 sps:$4 sm:$0xff]  }
 0x26b   : > { %6960 = vmatpush1.bf16.msra.mxu0 %v12007_v22  ;;  %7616 = vmatpush1.bf16.msra.mxu1 %v12010_v32  ;;  %v12103_v22 = vld [vmem:[%s16496_s1 + $0x150c] ss:$16 sps:$4 sm:$0xff]   ;;  %v12098_v32 = vld [vmem:[%s16496_s1 + $0x1500] ss:$16 sps:$4 sm:$0xff]  }
 0x26c   : > { %6961 = vmatprep.subr.bf16.mxu0 %v12015_v33  ;;  %7617 = vmatprep.subr.bf16.mxu1 %v12018_v26  ;;  %v12101_v33 = vld [vmem:[%s16496_s1 + $0x1508] ss:$16 sps:$4 sm:$0xff]   ;;  %v12106_v26 = vld [vmem:[%s16496_s1 + $0x1524] ss:$16 sps:$4 sm:$0xff]  }
 0x26f   : > { %6962 = vmatpush1.bf16.msra.mxu0 %v12013_v36  ;;  %7618 = vmatpush1.bf16.msra.mxu1 %v12016_v24  ;;  %v12109_v36 = vld [vmem:[%s16496_s1 + $0x152c] ss:$16 sps:$4 sm:$0xff]   ;;  %v12104_v24 = vld [vmem:[%s16496_s1 + $0x1520] ss:$16 sps:$4 sm:$0xff]  }
 0x270   : > { %6963 = vmatprep.subr.bf16.mxu0 %v12021_v37  ;;  %7619 = vmatprep.subr.bf16.mxu1 %v12024_v38  ;;  %v12107_v37 = vld [vmem:[%s16496_s1 + $0x1528] ss:$16 sps:$4 sm:$0xff]   ;;  %v12112_v38 = vld [vmem:[%s16496_s1 + $0x1544] ss:$16 sps:$4 sm:$0xff]  }
 0x273   : > { %6964 = vmatpush1.bf16.msra.mxu0 %v12019_v40  ;;  %7620 = vmatpush1.bf16.msra.mxu1 %v12022_v41  ;;  %v12115_v40 = vld [vmem:[%s16496_s1 + $0x154c] ss:$16 sps:$4 sm:$0xff]   ;;  %v12110_v41 = vld [vmem:[%s16496_s1 + $0x1540] ss:$16 sps:$4 sm:$0xff]  }
 0x274   : > { %6965 = vmatprep.subr.bf16.mxu0 %v12027_v29  ;;  %7621 = vmatprep.subr.bf16.mxu1 %v12030_v43  ;;  %v12113_v29 = vld [vmem:[%s16496_s1 + $0x1548] ss:$16 sps:$4 sm:$0xff]   ;;  %v12118_v43 = vld [vmem:[%s16496_s1 + $0x1564] ss:$16 sps:$4 sm:$0xff]  }
 0x277   : > { %6966 = vmatpush1.bf16.msra.mxu0 %v12025_v44  ;;  %7622 = vmatpush1.bf16.msra.mxu1 %v12028_v35  ;;  %v12121_v44 = vld [vmem:[%s16496_s1 + $0x156c] ss:$16 sps:$4 sm:$0xff]   ;;  %v12116_v35 = vld [vmem:[%s16496_s1 + $0x1560] ss:$16 sps:$4 sm:$0xff]  }
 0x278   : > { %6967 = vmatprep.subr.bf16.mxu0 %v12033_v47  ;;  %7623 = vmatprep.subr.bf16.mxu1 %v12036_v34  ;;  %v12119_v47 = vld [vmem:[%s16496_s1 + $0x1568] ss:$16 sps:$4 sm:$0xff]   ;;  %v12124_v34 = vld [vmem:[%s16496_s1 + $0x1584] ss:$16 sps:$4 sm:$0xff]  }
 0x27b   : > { %6968 = vmatpush1.bf16.msra.mxu0 %v12031_v48  ;;  %7624 = vmatpush1.bf16.msra.mxu1 %v12034_v50  ;;  %v12127_v48 = vld [vmem:[%s16496_s1 + $0x158c] ss:$16 sps:$4 sm:$0xff]   ;;  %v12122_v50 = vld [vmem:[%s16496_s1 + $0x1580] ss:$16 sps:$4 sm:$0xff]  }
 0x27c   : > { %6969 = vmatprep.subr.bf16.mxu0 %v12039_v52  ;;  %7625 = vmatprep.subr.bf16.mxu1 %v12042_v53  ;;  %v12125_v52 = vld [vmem:[%s16496_s1 + $0x1588] ss:$16 sps:$4 sm:$0xff]   ;;  %v12130_v53 = vld [vmem:[%s16496_s1 + $0x15a4] ss:$16 sps:$4 sm:$0xff]  }
 0x27f   : > { %6970 = vmatpush1.bf16.msra.mxu0 %v12037_v39  ;;  %7626 = vmatpush1.bf16.msra.mxu1 %v12040_v54  ;;  %v12133_v39 = vld [vmem:[%s16496_s1 + $0x15ac] ss:$16 sps:$4 sm:$0xff]   ;;  %v12128_v54 = vld [vmem:[%s16496_s1 + $0x15a0] ss:$16 sps:$4 sm:$0xff]  }
 0x280   : > { %6971 = vmatprep.subr.bf16.mxu0 %v12045_v55  ;;  %7627 = vmatprep.subr.bf16.mxu1 %v12048_v46  ;;  %v12131_v55 = vld [vmem:[%s16496_s1 + $0x15a8] ss:$16 sps:$4 sm:$0xff]   ;;  %v12136_v46 = vld [vmem:[%s16496_s1 + $0x15c4] ss:$16 sps:$4 sm:$0xff]  }
 0x283   : > { %6972 = vmatpush1.bf16.msra.mxu0 %v12043_v58  ;;  %7628 = vmatpush1.bf16.msra.mxu1 %v12046_v45  ;;  %v12139_v58 = vld [vmem:[%s16496_s1 + $0x15cc] ss:$16 sps:$4 sm:$0xff]   ;;  %v12134_v45 = vld [vmem:[%s16496_s1 + $0x15c0] ss:$16 sps:$4 sm:$0xff]  }
 0x284   : > { %6982 = vmatprep.subr.bf16.mxu0 %v12052_v59  ;;  %7638 = vmatprep.subr.bf16.mxu1 %v12055_v60  ;;  %v12137_v59 = vld [vmem:[%s16496_s1 + $0x15c8] ss:$16 sps:$4 sm:$0xff]   ;;  %v12142_v60 = vld [vmem:[%s16496_s1 + $0x15e4] ss:$16 sps:$4 sm:$0xff]  }
 0x286   : > { %6974 = vmatmul.mubr.bf16.vlgmr.msra.gmra.mrb[0].mxu0 %v14644_v56  ;;  %7630 = vmatmul.mubr.bf16.vlgmr.msra.gmra.mrb[0].mxu1 %v14644_v56  ;;  %v12067_v56 = vld [vmem:[%s16496_s1 + $0x144c] ss:$16 sps:$4 sm:$0xff]  }
 0x287   : > { %6983 = vmatpush1.bf16.msra.mxu0 %v12050_v62  ;;  %7639 = vmatpush1.bf16.msra.mxu1 %v12053_v63  ;;  %v12145_v62 = vld [vmem:[%s16496_s1 + $0x15ec] ss:$16 sps:$4 sm:$0xff]   ;;  %v1369_v63 = vcombine.high %v14831_v57, %v14831_v57 }
 0x288   : > { %6984 = vmatprep.subr.bf16.mxu0 %v12058_v51  ;;  %7640 = vmatprep.subr.bf16.mxu1 %v12061_v0  ;;  %v12140_v51 = vld [vmem:[%s16496_s1 + $0x15e0] ss:$16 sps:$4 sm:$0xff]   ;;  %v12143_v0 = vld [vmem:[%s16496_s1 + $0x15e8] ss:$16 sps:$4 sm:$0xff]   ;;  %v12151_v57 = vld [vmem:[%s16496_s1 + $0x160c] ss:$16 sps:$4 sm:$0xff]  }
 0x289   : > { %7014 = vmatprep.mubr.bf16.mxu0 %v1384_v1  ;;  %7670 = vmatprep.mubr.bf16.mxu1 %v1384_v1  ;;  %v12148_v1 = vld [vmem:[%s16496_s1 + $0x1604] ss:$16 sps:$4 sm:$0xff]  }
 0x28b   : > { %6985 = vmatpush1.bf16.msra.mxu0 %v12056_v2  ;;  %7641 = vmatpush1.bf16.msra.mxu1 %v12059_v3  ;;  %v15048_v2 = vrot.slane %v1369_v63, %v12959_v49  ;;  %v12146_v3 = vld [vmem:[%s16496_s1 + $0x1600] ss:$16 sps:$4 sm:$0xff]   ;;  %v12235_v63 = vld [vmem:[%s16496_s1 + $0x17cc] ss:$16 sps:$4 sm:$0xff]  }
 0x28c   : > { %6986 = vmatprep.subr.bf16.mxu0 %v12064_v4  ;;  %7642 = vmatprep.subr.bf16.mxu1 %v12067_v56  ;;  %v12149_v4 = vld [vmem:[%s16496_s1 + $0x1608] ss:$16 sps:$4 sm:$0xff]   ;;  %v12154_v56 = vld [vmem:[%s16496_s1 + $0x1624] ss:$16 sps:$4 sm:$0xff]  }
 0x28f   : > { %6987 = vmatpush1.bf16.msra.mxu0 %v12062_v5  ;;  %7643 = vmatpush1.bf16.msra.mxu1 %v12065_v6  ;;  %v12157_v5 = vld [vmem:[%s16496_s1 + $0x162c] ss:$16 sps:$4 sm:$0xff]   ;;  %v1385_v6 = vcombine.high %v15048_v2, %v15048_v2 }
 0x290   : > { %6988 = vmatprep.subr.bf16.mxu0 %v12070_v7  ;;  %7644 = vmatprep.subr.bf16.mxu1 %v12073_v8  ;;  %v12152_v7 = vld [vmem:[%s16496_s1 + $0x1620] ss:$16 sps:$4 sm:$0xff]   ;;  %v12155_v8 = vld [vmem:[%s16496_s1 + $0x1628] ss:$16 sps:$4 sm:$0xff]  }
 0x293   : > { %6989 = vmatpush1.bf16.msra.mxu0 %v12068_v9  ;;  %7645 = vmatpush1.bf16.msra.mxu1 %v12071_v10  ;;  %v12160_v9 = vld [vmem:[%s16496_s1 + $0x1644] ss:$16 sps:$4 sm:$0xff]   ;;  %v12158_v10 = vld [vmem:[%s16496_s1 + $0x1640] ss:$16 sps:$4 sm:$0xff]  }
 0x294   : > { %6990 = vmatprep.subr.bf16.mxu0 %v12076_v11  ;;  %7646 = vmatprep.subr.bf16.mxu1 %v12079_v13  ;;  %v12161_v11 = vld [vmem:[%s16496_s1 + $0x1648] ss:$16 sps:$4 sm:$0xff]   ;;  %v12166_v13 = vld [vmem:[%s16496_s1 + $0x1664] ss:$16 sps:$4 sm:$0xff]  }
 0x297   : > { %6991 = vmatpush1.bf16.msra.mxu0 %v12074_v14  ;;  %7647 = vmatpush1.bf16.msra.mxu1 %v12077_v15  ;;  %v12169_v14 = vld [vmem:[%s16496_s1 + $0x166c] ss:$16 sps:$4 sm:$0xff]   ;;  %v12164_v15 = vld [vmem:[%s16496_s1 + $0x1660] ss:$16 sps:$4 sm:$0xff]  }
 0x298   : > { %6992 = vmatprep.subr.bf16.mxu0 %v12082_v16  ;;  %7648 = vmatprep.subr.bf16.mxu1 %v12085_v17  ;;  %v12167_v16 = vld [vmem:[%s16496_s1 + $0x1668] ss:$16 sps:$4 sm:$0xff]   ;;  %v12172_v17 = vld [vmem:[%s16496_s1 + $0x1684] ss:$16 sps:$4 sm:$0xff]  }
 0x29b   : > { %6993 = vmatpush1.bf16.msra.mxu0 %v12080_v18  ;;  %7649 = vmatpush1.bf16.msra.mxu1 %v12083_v20  ;;  %v12175_v18 = vld [vmem:[%s16496_s1 + $0x168c] ss:$16 sps:$4 sm:$0xff]   ;;  %v12170_v20 = vld [vmem:[%s16496_s1 + $0x1680] ss:$16 sps:$4 sm:$0xff]  }
 0x29c   : > { %6994 = vmatprep.subr.bf16.mxu0 %v12088_v21  ;;  %7650 = vmatprep.subr.bf16.mxu1 %v12091_v23  ;;  %v12173_v21 = vld [vmem:[%s16496_s1 + $0x1688] ss:$16 sps:$4 sm:$0xff]   ;;  %v12178_v23 = vld [vmem:[%s16496_s1 + $0x16a4] ss:$16 sps:$4 sm:$0xff]  }
 0x29f   : > { %6995 = vmatpush1.bf16.msra.mxu0 %v12086_v19  ;;  %7651 = vmatpush1.bf16.msra.mxu1 %v12089_v25  ;;  %v12181_v19 = vld [vmem:[%s16496_s1 + $0x16ac] ss:$16 sps:$4 sm:$0xff]   ;;  %v12176_v25 = vld [vmem:[%s16496_s1 + $0x16a0] ss:$16 sps:$4 sm:$0xff]  }
 0x2a0   : > { %6996 = vmatprep.subr.bf16.mxu0 %v12094_v12  ;;  %7652 = vmatprep.subr.bf16.mxu1 %v12097_v27  ;;  %v12179_v12 = vld [vmem:[%s16496_s1 + $0x16a8] ss:$16 sps:$4 sm:$0xff]   ;;  %v12184_v27 = vld [vmem:[%s16496_s1 + $0x16c4] ss:$16 sps:$4 sm:$0xff]  }
 0x2a3   : > { %6997 = vmatpush1.bf16.msra.mxu0 %v12092_v28  ;;  %7653 = vmatpush1.bf16.msra.mxu1 %v12095_v30  ;;  %v12187_v28 = vld [vmem:[%s16496_s1 + $0x16cc] ss:$16 sps:$4 sm:$0xff]   ;;  %v12182_v30 = vld [vmem:[%s16496_s1 + $0x16c0] ss:$16 sps:$4 sm:$0xff]  }
 0x2a4   : > { %6998 = vmatprep.subr.bf16.mxu0 %v12100_v31  ;;  %7654 = vmatprep.subr.bf16.mxu1 %v12103_v22  ;;  %v12185_v31 = vld [vmem:[%s16496_s1 + $0x16c8] ss:$16 sps:$4 sm:$0xff]   ;;  %v12190_v22 = vld [vmem:[%s16496_s1 + $0x16e4] ss:$16 sps:$4 sm:$0xff]  }
 0x2a7   : > { %6999 = vmatpush1.bf16.msra.mxu0 %v12098_v32  ;;  %7655 = vmatpush1.bf16.msra.mxu1 %v12101_v33  ;;  %v12193_v32 = vld [vmem:[%s16496_s1 + $0x16ec] ss:$16 sps:$4 sm:$0xff]   ;;  %v12188_v33 = vld [vmem:[%s16496_s1 + $0x16e0] ss:$16 sps:$4 sm:$0xff]  }
 0x2a8   : > { %7000 = vmatprep.subr.bf16.mxu0 %v12106_v26  ;;  %7656 = vmatprep.subr.bf16.mxu1 %v12109_v36  ;;  %v12191_v26 = vld [vmem:[%s16496_s1 + $0x16e8] ss:$16 sps:$4 sm:$0xff]   ;;  %v12196_v36 = vld [vmem:[%s16496_s1 + $0x1704] ss:$16 sps:$4 sm:$0xff]  }
 0x2ab   : > { %7001 = vmatpush1.bf16.msra.mxu0 %v12104_v24  ;;  %7657 = vmatpush1.bf16.msra.mxu1 %v12107_v37  ;;  %v12199_v24 = vld [vmem:[%s16496_s1 + $0x170c] ss:$16 sps:$4 sm:$0xff]   ;;  %v12194_v37 = vld [vmem:[%s16496_s1 + $0x1700] ss:$16 sps:$4 sm:$0xff]  }
 0x2ac   : > { %7002 = vmatprep.subr.bf16.mxu0 %v12112_v38  ;;  %7658 = vmatprep.subr.bf16.mxu1 %v12115_v40  ;;  %v12197_v38 = vld [vmem:[%s16496_s1 + $0x1708] ss:$16 sps:$4 sm:$0xff]   ;;  %v12202_v40 = vld [vmem:[%s16496_s1 + $0x1724] ss:$16 sps:$4 sm:$0xff]  }
 0x2af   : > { %7003 = vmatpush1.bf16.msra.mxu0 %v12110_v41  ;;  %7659 = vmatpush1.bf16.msra.mxu1 %v12113_v29  ;;  %v12205_v41 = vld [vmem:[%s16496_s1 + $0x172c] ss:$16 sps:$4 sm:$0xff]   ;;  %v12200_v29 = vld [vmem:[%s16496_s1 + $0x1720] ss:$16 sps:$4 sm:$0xff]  }
 0x2b0   : > { %7004 = vmatprep.subr.bf16.mxu0 %v12118_v43  ;;  %7660 = vmatprep.subr.bf16.mxu1 %v12121_v44  ;;  %v12203_v43 = vld [vmem:[%s16496_s1 + $0x1728] ss:$16 sps:$4 sm:$0xff]   ;;  %v12208_v44 = vld [vmem:[%s16496_s1 + $0x1744] ss:$16 sps:$4 sm:$0xff]  }
 0x2b3   : > { %7005 = vmatpush1.bf16.msra.mxu0 %v12116_v35  ;;  %7661 = vmatpush1.bf16.msra.mxu1 %v12119_v47  ;;  %v12211_v35 = vld [vmem:[%s16496_s1 + $0x174c] ss:$16 sps:$4 sm:$0xff]   ;;  %v12206_v47 = vld [vmem:[%s16496_s1 + $0x1740] ss:$16 sps:$4 sm:$0xff]  }
 0x2b4   : > { %7006 = vmatprep.subr.bf16.mxu0 %v12124_v34  ;;  %7662 = vmatprep.subr.bf16.mxu1 %v12127_v48  ;;  %v12209_v34 = vld [vmem:[%s16496_s1 + $0x1748] ss:$16 sps:$4 sm:$0xff]   ;;  %v12214_v48 = vld [vmem:[%s16496_s1 + $0x1764] ss:$16 sps:$4 sm:$0xff]  }
 0x2b7   : > { %7007 = vmatpush1.bf16.msra.mxu0 %v12122_v50  ;;  %7663 = vmatpush1.bf16.msra.mxu1 %v12125_v52  ;;  %v12217_v50 = vld [vmem:[%s16496_s1 + $0x176c] ss:$16 sps:$4 sm:$0xff]   ;;  %v12212_v52 = vld [vmem:[%s16496_s1 + $0x1760] ss:$16 sps:$4 sm:$0xff]  }
 0x2b8   : > { %7008 = vmatprep.subr.bf16.mxu0 %v12130_v53  ;;  %7664 = vmatprep.subr.bf16.mxu1 %v12133_v39  ;;  %v12215_v53 = vld [vmem:[%s16496_s1 + $0x1768] ss:$16 sps:$4 sm:$0xff]   ;;  %v12220_v39 = vld [vmem:[%s16496_s1 + $0x1784] ss:$16 sps:$4 sm:$0xff]  }
 0x2bb   : > { %7009 = vmatpush1.bf16.msra.mxu0 %v12128_v54  ;;  %7665 = vmatpush1.bf16.msra.mxu1 %v12131_v55  ;;  %v12223_v54 = vld [vmem:[%s16496_s1 + $0x178c] ss:$16 sps:$4 sm:$0xff]   ;;  %v12218_v55 = vld [vmem:[%s16496_s1 + $0x1780] ss:$16 sps:$4 sm:$0xff]  }
 0x2bc   : > { %7010 = vmatprep.subr.bf16.mxu0 %v12136_v46  ;;  %7666 = vmatprep.subr.bf16.mxu1 %v12139_v58  ;;  %v12221_v46 = vld [vmem:[%s16496_s1 + $0x1788] ss:$16 sps:$4 sm:$0xff]   ;;  %v12226_v58 = vld [vmem:[%s16496_s1 + $0x17a4] ss:$16 sps:$4 sm:$0xff]  }
 0x2bf   : > { %7011 = vmatpush1.bf16.msra.mxu0 %v12134_v45  ;;  %7667 = vmatpush1.bf16.msra.mxu1 %v12137_v59  ;;  %v12229_v45 = vld [vmem:[%s16496_s1 + $0x17ac] ss:$16 sps:$4 sm:$0xff]   ;;  %v12224_v59 = vld [vmem:[%s16496_s1 + $0x17a0] ss:$16 sps:$4 sm:$0xff]  }
 0x2c0   : > { %7012 = vmatprep.subr.bf16.mxu0 %v12142_v60  ;;  %7668 = vmatprep.subr.bf16.mxu1 %v12145_v62  ;;  %v12227_v60 = vld [vmem:[%s16496_s1 + $0x17a8] ss:$16 sps:$4 sm:$0xff]   ;;  %v12232_v62 = vld [vmem:[%s16496_s1 + $0x17c4] ss:$16 sps:$4 sm:$0xff]  }
 0x2c3   : > { %7013 = vmatpush1.bf16.msra.mxu0 %v12140_v51  ;;  %7669 = vmatpush1.bf16.msra.mxu1 %v12143_v0  ;;  %v12230_v51 = vld [vmem:[%s16496_s1 + $0x17c0] ss:$16 sps:$4 sm:$0xff]   ;;  %v12233_v0 = vld [vmem:[%s16496_s1 + $0x17c8] ss:$16 sps:$4 sm:$0xff]  }
 0x2c4   : > { %7023 = vmatprep.subr.bf16.mxu0 %v12148_v1  ;;  %7679 = vmatprep.subr.bf16.mxu1 %v12151_v57  ;;  %v12238_v1 = vld [vmem:[%s16496_s1 + $0x17e4] ss:$16 sps:$4 sm:$0xff]   ;;  %v12241_v57 = vld [vmem:[%s16496_s1 + $0x17ec] ss:$16 sps:$4 sm:$0xff]  }
 0x2c6   : > { %7015 = vmatmul.mubr.bf16.vlgmr.msra.gmra.mrb[0].mxu0 %v14847_v61  ;;  %7671 = vmatmul.mubr.bf16.vlgmr.msra.gmra.mrb[0].mxu1 %v14847_v61  ;;  %v12163_v61 = vld [vmem:[%s16496_s1 + $0x164c] ss:$16 sps:$4 sm:$0xff]  }
 0x2c7   : > { %7024 = vmatpush1.bf16.msra.mxu0 %v12146_v3  ;;  %7680 = vmatpush1.bf16.msra.mxu1 %v12149_v4  ;;  %v15235_v3 = vld [vmem:[%s12956_s17 + $0x30] sm:$0xff] }
 0x2c8   : > { %7025 = vmatprep.subr.bf16.mxu0 %v12154_v56  ;;  %7681 = vmatprep.subr.bf16.mxu1 %v12157_v5  ;;  %v12236_v4 = vld [vmem:[%s16496_s1 + $0x17e0] ss:$16 sps:$4 sm:$0xff]   ;;  %v12239_v56 = vld [vmem:[%s16496_s1 + $0x17e8] ss:$16 sps:$4 sm:$0xff]   ;;  %v12245_v5 = vld [vmem:[%s16496_s1 + $0x1804] ss:$16 sps:$4 sm:$0xff]  }
 0x2c9   : > { %7055 = vmatprep.mubr.bf16.mxu0 %v1385_v6  ;;  %7711 = vmatprep.mubr.bf16.mxu1 %v1385_v6  ;;  %v12248_v6 = vld [vmem:[%s16496_s1 + $0x180c] ss:$16 sps:$4 sm:$0xff]  }
 0x2cb   : > { %7026 = vmatpush1.bf16.msra.mxu0 %v12152_v7  ;;  %7682 = vmatpush1.bf16.msra.mxu1 %v12155_v8  ;;  %v15251_v7 = vrot.slane %v15235_v3, %v12959_v49  ;;  %v12243_v8 = vld [vmem:[%s16496_s1 + $0x1800] ss:$16 sps:$4 sm:$0xff]  }
 0x2cc   : > { %7027 = vmatprep.subr.bf16.mxu0 %v12160_v9  ;;  %7683 = vmatprep.subr.bf16.mxu1 %v12163_v61  ;;  %v12246_v9 = vld [vmem:[%s16496_s1 + $0x1808] ss:$16 sps:$4 sm:$0xff]   ;;  %v12251_v61 = vld [vmem:[%s16496_s1 + $0x1824] ss:$16 sps:$4 sm:$0xff]  }
 0x2cf   : > { %7028 = vmatpush1.bf16.msra.mxu0 %v12158_v10  ;;  %7684 = vmatpush1.bf16.msra.mxu1 %v12161_v11  ;;  %v12254_v10 = vld [vmem:[%s16496_s1 + $0x182c] ss:$16 sps:$4 sm:$0xff]   ;;  %v1401_v11 = vcombine.high %v15251_v7, %v15251_v7 }
 0x2d0   : > { %7029 = vmatprep.subr.bf16.mxu0 %v12166_v13  ;;  %7685 = vmatprep.subr.bf16.mxu1 %v12169_v14  ;;  %v12249_v13 = vld [vmem:[%s16496_s1 + $0x1820] ss:$16 sps:$4 sm:$0xff]   ;;  %v12252_v14 = vld [vmem:[%s16496_s1 + $0x1828] ss:$16 sps:$4 sm:$0xff]  }
 0x2d3   : > { %7030 = vmatpush1.bf16.msra.mxu0 %v12164_v15  ;;  %7686 = vmatpush1.bf16.msra.mxu1 %v12167_v16  ;;  %v12257_v15 = vld [vmem:[%s16496_s1 + $0x1844] ss:$16 sps:$4 sm:$0xff]   ;;  %v12255_v16 = vld [vmem:[%s16496_s1 + $0x1840] ss:$16 sps:$4 sm:$0xff]  }
 0x2d4   : > { %7031 = vmatprep.subr.bf16.mxu0 %v12172_v17  ;;  %7687 = vmatprep.subr.bf16.mxu1 %v12175_v18  ;;  %v12258_v17 = vld [vmem:[%s16496_s1 + $0x1848] ss:$16 sps:$4 sm:$0xff]   ;;  %v12263_v18 = vld [vmem:[%s16496_s1 + $0x1864] ss:$16 sps:$4 sm:$0xff]  }
 0x2d7   : > { %7032 = vmatpush1.bf16.msra.mxu0 %v12170_v20  ;;  %7688 = vmatpush1.bf16.msra.mxu1 %v12173_v21  ;;  %v12266_v20 = vld [vmem:[%s16496_s1 + $0x186c] ss:$16 sps:$4 sm:$0xff]   ;;  %v12261_v21 = vld [vmem:[%s16496_s1 + $0x1860] ss:$16 sps:$4 sm:$0xff]  }
 0x2d8   : > { %7033 = vmatprep.subr.bf16.mxu0 %v12178_v23  ;;  %7689 = vmatprep.subr.bf16.mxu1 %v12181_v19  ;;  %v12264_v23 = vld [vmem:[%s16496_s1 + $0x1868] ss:$16 sps:$4 sm:$0xff]   ;;  %v12269_v19 = vld [vmem:[%s16496_s1 + $0x1884] ss:$16 sps:$4 sm:$0xff]  }
 0x2db   : > { %7034 = vmatpush1.bf16.msra.mxu0 %v12176_v25  ;;  %7690 = vmatpush1.bf16.msra.mxu1 %v12179_v12  ;;  %v12272_v25 = vld [vmem:[%s16496_s1 + $0x188c] ss:$16 sps:$4 sm:$0xff]   ;;  %v12267_v12 = vld [vmem:[%s16496_s1 + $0x1880] ss:$16 sps:$4 sm:$0xff]  }
 0x2dc   : > { %7035 = vmatprep.subr.bf16.mxu0 %v12184_v27  ;;  %7691 = vmatprep.subr.bf16.mxu1 %v12187_v28  ;;  %v12270_v27 = vld [vmem:[%s16496_s1 + $0x1888] ss:$16 sps:$4 sm:$0xff]   ;;  %v12275_v28 = vld [vmem:[%s16496_s1 + $0x18a4] ss:$16 sps:$4 sm:$0xff]  }
 0x2df   : > { %7036 = vmatpush1.bf16.msra.mxu0 %v12182_v30  ;;  %7692 = vmatpush1.bf16.msra.mxu1 %v12185_v31  ;;  %v12278_v30 = vld [vmem:[%s16496_s1 + $0x18ac] ss:$16 sps:$4 sm:$0xff]   ;;  %v12273_v31 = vld [vmem:[%s16496_s1 + $0x18a0] ss:$16 sps:$4 sm:$0xff]  }
 0x2e0   : > { %7037 = vmatprep.subr.bf16.mxu0 %v12190_v22  ;;  %7693 = vmatprep.subr.bf16.mxu1 %v12193_v32  ;;  %v12276_v22 = vld [vmem:[%s16496_s1 + $0x18a8] ss:$16 sps:$4 sm:$0xff]   ;;  %v12281_v32 = vld [vmem:[%s16496_s1 + $0x18c4] ss:$16 sps:$4 sm:$0xff]  }
 0x2e3   : > { %7038 = vmatpush1.bf16.msra.mxu0 %v12188_v33  ;;  %7694 = vmatpush1.bf16.msra.mxu1 %v12191_v26  ;;  %v12284_v33 = vld [vmem:[%s16496_s1 + $0x18cc] ss:$16 sps:$4 sm:$0xff]   ;;  %v12279_v26 = vld [vmem:[%s16496_s1 + $0x18c0] ss:$16 sps:$4 sm:$0xff]  }
 0x2e4   : > { %7039 = vmatprep.subr.bf16.mxu0 %v12196_v36  ;;  %7695 = vmatprep.subr.bf16.mxu1 %v12199_v24  ;;  %v12282_v36 = vld [vmem:[%s16496_s1 + $0x18c8] ss:$16 sps:$4 sm:$0xff]   ;;  %v12287_v24 = vld [vmem:[%s16496_s1 + $0x18e4] ss:$16 sps:$4 sm:$0xff]  }
 0x2e7   : > { %7040 = vmatpush1.bf16.msra.mxu0 %v12194_v37  ;;  %7696 = vmatpush1.bf16.msra.mxu1 %v12197_v38  ;;  %v12290_v37 = vld [vmem:[%s16496_s1 + $0x18ec] ss:$16 sps:$4 sm:$0xff]   ;;  %v12285_v38 = vld [vmem:[%s16496_s1 + $0x18e0] ss:$16 sps:$4 sm:$0xff]  }
 0x2e8   : > { %7041 = vmatprep.subr.bf16.mxu0 %v12202_v40  ;;  %7697 = vmatprep.subr.bf16.mxu1 %v12205_v41  ;;  %v12288_v40 = vld [vmem:[%s16496_s1 + $0x18e8] ss:$16 sps:$4 sm:$0xff]   ;;  %v12293_v41 = vld [vmem:[%s16496_s1 + $0x1904] ss:$16 sps:$4 sm:$0xff]  }
 0x2eb   : > { %7042 = vmatpush1.bf16.msra.mxu0 %v12200_v29  ;;  %7698 = vmatpush1.bf16.msra.mxu1 %v12203_v43  ;;  %v12296_v29 = vld [vmem:[%s16496_s1 + $0x190c] ss:$16 sps:$4 sm:$0xff]   ;;  %v12291_v43 = vld [vmem:[%s16496_s1 + $0x1900] ss:$16 sps:$4 sm:$0xff]  }
 0x2ec   : > { %7043 = vmatprep.subr.bf16.mxu0 %v12208_v44  ;;  %7699 = vmatprep.subr.bf16.mxu1 %v12211_v35  ;;  %v12294_v44 = vld [vmem:[%s16496_s1 + $0x1908] ss:$16 sps:$4 sm:$0xff]   ;;  %v12299_v35 = vld [vmem:[%s16496_s1 + $0x1924] ss:$16 sps:$4 sm:$0xff]  }
 0x2ef   : > { %7044 = vmatpush1.bf16.msra.mxu0 %v12206_v47  ;;  %7700 = vmatpush1.bf16.msra.mxu1 %v12209_v34  ;;  %v12302_v47 = vld [vmem:[%s16496_s1 + $0x192c] ss:$16 sps:$4 sm:$0xff]   ;;  %v12297_v34 = vld [vmem:[%s16496_s1 + $0x1920] ss:$16 sps:$4 sm:$0xff]  }
 0x2f0   : > { %7045 = vmatprep.subr.bf16.mxu0 %v12214_v48  ;;  %7701 = vmatprep.subr.bf16.mxu1 %v12217_v50  ;;  %v12300_v48 = vld [vmem:[%s16496_s1 + $0x1928] ss:$16 sps:$4 sm:$0xff]   ;;  %v12305_v50 = vld [vmem:[%s16496_s1 + $0x1944] ss:$16 sps:$4 sm:$0xff]  }
 0x2f3   : > { %7046 = vmatpush1.bf16.msra.mxu0 %v12212_v52  ;;  %7702 = vmatpush1.bf16.msra.mxu1 %v12215_v53  ;;  %v12308_v52 = vld [vmem:[%s16496_s1 + $0x194c] ss:$16 sps:$4 sm:$0xff]   ;;  %v12303_v53 = vld [vmem:[%s16496_s1 + $0x1940] ss:$16 sps:$4 sm:$0xff]  }
 0x2f4   : > { %7047 = vmatprep.subr.bf16.mxu0 %v12220_v39  ;;  %7703 = vmatprep.subr.bf16.mxu1 %v12223_v54  ;;  %v12306_v39 = vld [vmem:[%s16496_s1 + $0x1948] ss:$16 sps:$4 sm:$0xff]   ;;  %v12311_v54 = vld [vmem:[%s16496_s1 + $0x1964] ss:$16 sps:$4 sm:$0xff]  }
 0x2f7   : > { %7048 = vmatpush1.bf16.msra.mxu0 %v12218_v55  ;;  %7704 = vmatpush1.bf16.msra.mxu1 %v12221_v46  ;;  %v12314_v55 = vld [vmem:[%s16496_s1 + $0x196c] ss:$16 sps:$4 sm:$0xff]   ;;  %v12309_v46 = vld [vmem:[%s16496_s1 + $0x1960] ss:$16 sps:$4 sm:$0xff]  }
 0x2f8   : > { %7049 = vmatprep.subr.bf16.mxu0 %v12226_v58  ;;  %7705 = vmatprep.subr.bf16.mxu1 %v12229_v45  ;;  %v12312_v58 = vld [vmem:[%s16496_s1 + $0x1968] ss:$16 sps:$4 sm:$0xff]   ;;  %v12317_v45 = vld [vmem:[%s16496_s1 + $0x1984] ss:$16 sps:$4 sm:$0xff]  }
 0x2fb   : > { %7050 = vmatpush1.bf16.msra.mxu0 %v12224_v59  ;;  %7706 = vmatpush1.bf16.msra.mxu1 %v12227_v60  ;;  %v12320_v59 = vld [vmem:[%s16496_s1 + $0x198c] ss:$16 sps:$4 sm:$0xff]   ;;  %v12315_v60 = vld [vmem:[%s16496_s1 + $0x1980] ss:$16 sps:$4 sm:$0xff]  }
 0x2fc   : > { %7051 = vmatprep.subr.bf16.mxu0 %v12232_v62  ;;  %7707 = vmatprep.subr.bf16.mxu1 %v12235_v63  ;;  %v12318_v62 = vld [vmem:[%s16496_s1 + $0x1988] ss:$16 sps:$4 sm:$0xff]   ;;  %v12323_v63 = vld [vmem:[%s16496_s1 + $0x19a4] ss:$16 sps:$4 sm:$0xff]  }
 0x2ff   : > { %7052 = vmatpush1.bf16.msra.mxu0 %v12230_v51  ;;  %7708 = vmatpush1.bf16.msra.mxu1 %v12233_v0  ;;  %v12326_v51 = vld [vmem:[%s16496_s1 + $0x19ac] ss:$16 sps:$4 sm:$0xff]   ;;  %v12321_v0 = vld [vmem:[%s16496_s1 + $0x19a0] ss:$16 sps:$4 sm:$0xff]  }
 0x300   : > { %7053 = vmatprep.subr.bf16.mxu0 %v12238_v1  ;;  %7709 = vmatprep.subr.bf16.mxu1 %v12241_v57  ;;  %v12324_v1 = vld [vmem:[%s16496_s1 + $0x19a8] ss:$16 sps:$4 sm:$0xff]   ;;  %v12329_v57 = vld [vmem:[%s16496_s1 + $0x19c4] ss:$16 sps:$4 sm:$0xff]  }
 0x303   : > { %7054 = vmatpush1.bf16.msra.mxu0 %v12236_v4  ;;  %7710 = vmatpush1.bf16.msra.mxu1 %v12239_v56  ;;  %v12332_v4 = vld [vmem:[%s16496_s1 + $0x19cc] ss:$16 sps:$4 sm:$0xff]   ;;  %v12327_v56 = vld [vmem:[%s16496_s1 + $0x19c0] ss:$16 sps:$4 sm:$0xff]  }
 0x304   : > { %7064 = vmatprep.subr.bf16.mxu0 %v12245_v5  ;;  %7720 = vmatprep.subr.bf16.mxu1 %v12248_v6  ;;  %v12330_v5 = vld [vmem:[%s16496_s1 + $0x19c8] ss:$16 sps:$4 sm:$0xff]   ;;  %v12335_v6 = vld [vmem:[%s16496_s1 + $0x19e4] ss:$16 sps:$4 sm:$0xff]  }
 0x306   : > { %7056 = vmatmul.mubr.bf16.vlgmr.msra.gmra.mrb[0].mxu0 %v15048_v2  ;;  %7712 = vmatmul.mubr.bf16.vlgmr.msra.gmra.mrb[0].mxu1 %v15048_v2  ;;  %v12260_v2 = vld [vmem:[%s16496_s1 + $0x184c] ss:$16 sps:$4 sm:$0xff]  }
 0x307   : > { %7065 = vmatpush1.bf16.msra.mxu0 %v12243_v8  ;;  %7721 = vmatpush1.bf16.msra.mxu1 %v12246_v9  ;;  %v12338_v8 = vld [vmem:[%s16496_s1 + $0x19ec] ss:$16 sps:$4 sm:$0xff]   ;;  %v1386_v9 = vcombine.high %v15235_v3, %v15235_v3 }
 0x308   : > { %7066 = vmatprep.subr.bf16.mxu0 %v12251_v61  ;;  %7722 = vmatprep.subr.bf16.mxu1 %v12254_v10  ;;  %v12333_v61 = vld [vmem:[%s16496_s1 + $0x19e0] ss:$16 sps:$4 sm:$0xff]   ;;  %v12336_v10 = vld [vmem:[%s16496_s1 + $0x19e8] ss:$16 sps:$4 sm:$0xff]   ;;  %v12344_v3 = vld [vmem:[%s16496_s1 + $0x1a0c] ss:$16 sps:$4 sm:$0xff]  }
 0x309   : > { %7096 = vmatprep.mubr.bf16.mxu0 %v1401_v11  ;;  %7752 = vmatprep.mubr.bf16.mxu1 %v1401_v11  ;;  %v12341_v11 = vld [vmem:[%s16496_s1 + $0x1a04] ss:$16 sps:$4 sm:$0xff]  }
 0x30b   : > { %7067 = vmatpush1.bf16.msra.mxu0 %v12249_v13  ;;  %7723 = vmatpush1.bf16.msra.mxu1 %v12252_v14  ;;  %v15452_v13 = vrot.slane %v1386_v9, %v12959_v49  ;;  %v12339_v14 = vld [vmem:[%s16496_s1 + $0x1a00] ss:$16 sps:$4 sm:$0xff]   ;;  %v12428_v9 = vld [vmem:[%s16496_s1 + $0x1bcc] ss:$16 sps:$4 sm:$0xff]  }
 0x30c   : > { %7068 = vmatprep.subr.bf16.mxu0 %v12257_v15  ;;  %7724 = vmatprep.subr.bf16.mxu1 %v12260_v2  ;;  %v12342_v15 = vld [vmem:[%s16496_s1 + $0x1a08] ss:$16 sps:$4 sm:$0xff]   ;;  %v12347_v2 = vld [vmem:[%s16496_s1 + $0x1a24] ss:$16 sps:$4 sm:$0xff]  }
 0x30f   : > { %7069 = vmatpush1.bf16.msra.mxu0 %v12255_v16  ;;  %7725 = vmatpush1.bf16.msra.mxu1 %v12258_v17  ;;  %v12350_v16 = vld [vmem:[%s16496_s1 + $0x1a2c] ss:$16 sps:$4 sm:$0xff]   ;;  %v1402_v17 = vcombine.high %v15452_v13, %v15452_v13 }
 0x310   : > { %7070 = vmatprep.subr.bf16.mxu0 %v12263_v18  ;;  %7726 = vmatprep.subr.bf16.mxu1 %v12266_v20  ;;  %v12345_v18 = vld [vmem:[%s16496_s1 + $0x1a20] ss:$16 sps:$4 sm:$0xff]   ;;  %v12348_v20 = vld [vmem:[%s16496_s1 + $0x1a28] ss:$16 sps:$4 sm:$0xff]  }
 0x313   : > { %7071 = vmatpush1.bf16.msra.mxu0 %v12261_v21  ;;  %7727 = vmatpush1.bf16.msra.mxu1 %v12264_v23  ;;  %v12353_v21 = vld [vmem:[%s16496_s1 + $0x1a44] ss:$16 sps:$4 sm:$0xff]   ;;  %v12351_v23 = vld [vmem:[%s16496_s1 + $0x1a40] ss:$16 sps:$4 sm:$0xff]  }
 0x314   : > { %7072 = vmatprep.subr.bf16.mxu0 %v12269_v19  ;;  %7728 = vmatprep.subr.bf16.mxu1 %v12272_v25  ;;  %v12354_v19 = vld [vmem:[%s16496_s1 + $0x1a48] ss:$16 sps:$4 sm:$0xff]   ;;  %v12359_v25 = vld [vmem:[%s16496_s1 + $0x1a64] ss:$16 sps:$4 sm:$0xff]  }
 0x317   : > { %7073 = vmatpush1.bf16.msra.mxu0 %v12267_v12  ;;  %7729 = vmatpush1.bf16.msra.mxu1 %v12270_v27  ;;  %v12362_v12 = vld [vmem:[%s16496_s1 + $0x1a6c] ss:$16 sps:$4 sm:$0xff]   ;;  %v12357_v27 = vld [vmem:[%s16496_s1 + $0x1a60] ss:$16 sps:$4 sm:$0xff]  }
 0x318   : > { %7074 = vmatprep.subr.bf16.mxu0 %v12275_v28  ;;  %7730 = vmatprep.subr.bf16.mxu1 %v12278_v30  ;;  %v12360_v28 = vld [vmem:[%s16496_s1 + $0x1a68] ss:$16 sps:$4 sm:$0xff]   ;;  %v12365_v30 = vld [vmem:[%s16496_s1 + $0x1a84] ss:$16 sps:$4 sm:$0xff]  }
 0x31b   : > { %7075 = vmatpush1.bf16.msra.mxu0 %v12273_v31  ;;  %7731 = vmatpush1.bf16.msra.mxu1 %v12276_v22  ;;  %v12368_v31 = vld [vmem:[%s16496_s1 + $0x1a8c] ss:$16 sps:$4 sm:$0xff]   ;;  %v12363_v22 = vld [vmem:[%s16496_s1 + $0x1a80] ss:$16 sps:$4 sm:$0xff]  }
 0x31c   : > { %7076 = vmatprep.subr.bf16.mxu0 %v12281_v32  ;;  %7732 = vmatprep.subr.bf16.mxu1 %v12284_v33  ;;  %v12366_v32 = vld [vmem:[%s16496_s1 + $0x1a88] ss:$16 sps:$4 sm:$0xff]   ;;  %v12371_v33 = vld [vmem:[%s16496_s1 + $0x1aa4] ss:$16 sps:$4 sm:$0xff]  }
 0x31f   : > { %7077 = vmatpush1.bf16.msra.mxu0 %v12279_v26  ;;  %7733 = vmatpush1.bf16.msra.mxu1 %v12282_v36  ;;  %v12374_v26 = vld [vmem:[%s16496_s1 + $0x1aac] ss:$16 sps:$4 sm:$0xff]   ;;  %v12369_v36 = vld [vmem:[%s16496_s1 + $0x1aa0] ss:$16 sps:$4 sm:$0xff]  }
 0x320   : > { %7078 = vmatprep.subr.bf16.mxu0 %v12287_v24  ;;  %7734 = vmatprep.subr.bf16.mxu1 %v12290_v37  ;;  %v12372_v24 = vld [vmem:[%s16496_s1 + $0x1aa8] ss:$16 sps:$4 sm:$0xff]   ;;  %v12377_v37 = vld [vmem:[%s16496_s1 + $0x1ac4] ss:$16 sps:$4 sm:$0xff]  }
 0x323   : > { %7079 = vmatpush1.bf16.msra.mxu0 %v12285_v38  ;;  %7735 = vmatpush1.bf16.msra.mxu1 %v12288_v40  ;;  %v12380_v38 = vld [vmem:[%s16496_s1 + $0x1acc] ss:$16 sps:$4 sm:$0xff]   ;;  %v12375_v40 = vld [vmem:[%s16496_s1 + $0x1ac0] ss:$16 sps:$4 sm:$0xff]  }
 0x324   : > { %7080 = vmatprep.subr.bf16.mxu0 %v12293_v41  ;;  %7736 = vmatprep.subr.bf16.mxu1 %v12296_v29  ;;  %v12378_v41 = vld [vmem:[%s16496_s1 + $0x1ac8] ss:$16 sps:$4 sm:$0xff]   ;;  %v12383_v29 = vld [vmem:[%s16496_s1 + $0x1ae4] ss:$16 sps:$4 sm:$0xff]  }
 0x327   : > { %7081 = vmatpush1.bf16.msra.mxu0 %v12291_v43  ;;  %7737 = vmatpush1.bf16.msra.mxu1 %v12294_v44  ;;  %v12386_v43 = vld [vmem:[%s16496_s1 + $0x1aec] ss:$16 sps:$4 sm:$0xff]   ;;  %v12381_v44 = vld [vmem:[%s16496_s1 + $0x1ae0] ss:$16 sps:$4 sm:$0xff]  }
 0x328   : > { %7082 = vmatprep.subr.bf16.mxu0 %v12299_v35  ;;  %7738 = vmatprep.subr.bf16.mxu1 %v12302_v47  ;;  %v12384_v35 = vld [vmem:[%s16496_s1 + $0x1ae8] ss:$16 sps:$4 sm:$0xff]   ;;  %v12389_v47 = vld [vmem:[%s16496_s1 + $0x1b04] ss:$16 sps:$4 sm:$0xff]  }
 0x32b   : > { %7083 = vmatpush1.bf16.msra.mxu0 %v12297_v34  ;;  %7739 = vmatpush1.bf16.msra.mxu1 %v12300_v48  ;;  %v12392_v34 = vld [vmem:[%s16496_s1 + $0x1b0c] ss:$16 sps:$4 sm:$0xff]   ;;  %v12387_v48 = vld [vmem:[%s16496_s1 + $0x1b00] ss:$16 sps:$4 sm:$0xff]  }
 0x32c   : > { %7084 = vmatprep.subr.bf16.mxu0 %v12305_v50  ;;  %7740 = vmatprep.subr.bf16.mxu1 %v12308_v52  ;;  %v12390_v50 = vld [vmem:[%s16496_s1 + $0x1b08] ss:$16 sps:$4 sm:$0xff]   ;;  %v12395_v52 = vld [vmem:[%s16496_s1 + $0x1b24] ss:$16 sps:$4 sm:$0xff]  }
 0x32f   : > { %7085 = vmatpush1.bf16.msra.mxu0 %v12303_v53  ;;  %7741 = vmatpush1.bf16.msra.mxu1 %v12306_v39  ;;  %v12398_v53 = vld [vmem:[%s16496_s1 + $0x1b2c] ss:$16 sps:$4 sm:$0xff]   ;;  %v12393_v39 = vld [vmem:[%s16496_s1 + $0x1b20] ss:$16 sps:$4 sm:$0xff]  }
 0x330   : > { %7086 = vmatprep.subr.bf16.mxu0 %v12311_v54  ;;  %7742 = vmatprep.subr.bf16.mxu1 %v12314_v55  ;;  %v12396_v54 = vld [vmem:[%s16496_s1 + $0x1b28] ss:$16 sps:$4 sm:$0xff]   ;;  %v12401_v55 = vld [vmem:[%s16496_s1 + $0x1b44] ss:$16 sps:$4 sm:$0xff]  }
 0x333   : > { %7087 = vmatpush1.bf16.msra.mxu0 %v12309_v46  ;;  %7743 = vmatpush1.bf16.msra.mxu1 %v12312_v58  ;;  %v12404_v46 = vld [vmem:[%s16496_s1 + $0x1b4c] ss:$16 sps:$4 sm:$0xff]   ;;  %v12399_v58 = vld [vmem:[%s16496_s1 + $0x1b40] ss:$16 sps:$4 sm:$0xff]  }
 0x334   : > { %7088 = vmatprep.subr.bf16.mxu0 %v12317_v45  ;;  %7744 = vmatprep.subr.bf16.mxu1 %v12320_v59  ;;  %v12402_v45 = vld [vmem:[%s16496_s1 + $0x1b48] ss:$16 sps:$4 sm:$0xff]   ;;  %v12407_v59 = vld [vmem:[%s16496_s1 + $0x1b64] ss:$16 sps:$4 sm:$0xff]  }
 0x337   : > { %7089 = vmatpush1.bf16.msra.mxu0 %v12315_v60  ;;  %7745 = vmatpush1.bf16.msra.mxu1 %v12318_v62  ;;  %v12410_v60 = vld [vmem:[%s16496_s1 + $0x1b6c] ss:$16 sps:$4 sm:$0xff]   ;;  %v12405_v62 = vld [vmem:[%s16496_s1 + $0x1b60] ss:$16 sps:$4 sm:$0xff]  }
 0x338   : > { %7090 = vmatprep.subr.bf16.mxu0 %v12323_v63  ;;  %7746 = vmatprep.subr.bf16.mxu1 %v12326_v51  ;;  %v12408_v63 = vld [vmem:[%s16496_s1 + $0x1b68] ss:$16 sps:$4 sm:$0xff]   ;;  %v12413_v51 = vld [vmem:[%s16496_s1 + $0x1b84] ss:$16 sps:$4 sm:$0xff]  }
 0x33b   : > { %7091 = vmatpush1.bf16.msra.mxu0 %v12321_v0  ;;  %7747 = vmatpush1.bf16.msra.mxu1 %v12324_v1  ;;  %v12416_v0 = vld [vmem:[%s16496_s1 + $0x1b8c] ss:$16 sps:$4 sm:$0xff]   ;;  %v12411_v1 = vld [vmem:[%s16496_s1 + $0x1b80] ss:$16 sps:$4 sm:$0xff]  }
 0x33c   : > { %7092 = vmatprep.subr.bf16.mxu0 %v12329_v57  ;;  %7748 = vmatprep.subr.bf16.mxu1 %v12332_v4  ;;  %v12414_v57 = vld [vmem:[%s16496_s1 + $0x1b88] ss:$16 sps:$4 sm:$0xff]   ;;  %v12419_v4 = vld [vmem:[%s16496_s1 + $0x1ba4] ss:$16 sps:$4 sm:$0xff]  }
 0x33f   : > { %7093 = vmatpush1.bf16.msra.mxu0 %v12327_v56  ;;  %7749 = vmatpush1.bf16.msra.mxu1 %v12330_v5  ;;  %v12422_v56 = vld [vmem:[%s16496_s1 + $0x1bac] ss:$16 sps:$4 sm:$0xff]   ;;  %v12417_v5 = vld [vmem:[%s16496_s1 + $0x1ba0] ss:$16 sps:$4 sm:$0xff]  }
 0x340   : > { %7094 = vmatprep.subr.bf16.mxu0 %v12335_v6  ;;  %7750 = vmatprep.subr.bf16.mxu1 %v12338_v8  ;;  %v12420_v6 = vld [vmem:[%s16496_s1 + $0x1ba8] ss:$16 sps:$4 sm:$0xff]   ;;  %v12425_v8 = vld [vmem:[%s16496_s1 + $0x1bc4] ss:$16 sps:$4 sm:$0xff]  }
 0x343   : > { %7095 = vmatpush1.bf16.msra.mxu0 %v12333_v61  ;;  %7751 = vmatpush1.bf16.msra.mxu1 %v12336_v10  ;;  %v12423_v61 = vld [vmem:[%s16496_s1 + $0x1bc0] ss:$16 sps:$4 sm:$0xff]   ;;  %v12426_v10 = vld [vmem:[%s16496_s1 + $0x1bc8] ss:$16 sps:$4 sm:$0xff]  }
 0x344   : > { %7105 = vmatprep.subr.bf16.mxu0 %v12341_v11  ;;  %7761 = vmatprep.subr.bf16.mxu1 %v12344_v3  ;;  %v12431_v11 = vld [vmem:[%s16496_s1 + $0x1be4] ss:$16 sps:$4 sm:$0xff]   ;;  %v12434_v3 = vld [vmem:[%s16496_s1 + $0x1bec] ss:$16 sps:$4 sm:$0xff]  }
 0x346   : > { %7097 = vmatmul.mubr.bf16.vlgmr.msra.gmra.mrb[0].mxu0 %v15251_v7  ;;  %7753 = vmatmul.mubr.bf16.vlgmr.msra.gmra.mrb[0].mxu1 %v15251_v7  ;;  %v12356_v7 = vld [vmem:[%s16496_s1 + $0x1a4c] ss:$16 sps:$4 sm:$0xff]  }
 0x347   : > { %7106 = vmatpush1.bf16.msra.mxu0 %v12339_v14  ;;  %7762 = vmatpush1.bf16.msra.mxu1 %v12342_v15  ;;  %v15639_v14 = vld [vmem:[%s12956_s17 + $0x38] sm:$0xff]  ;;  %v12429_v15 = vld [vmem:[%s16496_s1 + $0x1be0] ss:$16 sps:$4 sm:$0xff]  }
 0x348   : > { %7107 = vmatprep.subr.bf16.mxu0 %v12347_v2  ;;  %7763 = vmatprep.subr.bf16.mxu1 %v12350_v16  ;;  %v12432_v2 = vld [vmem:[%s16496_s1 + $0x1be8] ss:$16 sps:$4 sm:$0xff]   ;;  %v12438_v16 = vld [vmem:[%s16496_s1 + $0x1c04] ss:$16 sps:$4 sm:$0xff]  }
 0x349   : > { %7137 = vmatprep.mubr.bf16.mxu0 %v1402_v17  ;;  %7793 = vmatprep.mubr.bf16.mxu1 %v1402_v17  ;;  %v12441_v17 = vld [vmem:[%s16496_s1 + $0x1c0c] ss:$16 sps:$4 sm:$0xff]  }
 0x34b   : > { %7108 = vmatpush1.bf16.msra.mxu0 %v12345_v18  ;;  %7764 = vmatpush1.bf16.msra.mxu1 %v12348_v20  ;;  %v15655_v18 = vrot.slane %v15639_v14, %v12959_v49  ;;  %v12436_v20 = vld [vmem:[%s16496_s1 + $0x1c00] ss:$16 sps:$4 sm:$0xff]  }
 0x34c   : > { %7109 = vmatprep.subr.bf16.mxu0 %v12353_v21  ;;  %7765 = vmatprep.subr.bf16.mxu1 %v12356_v7  ;;  %v12439_v21 = vld [vmem:[%s16496_s1 + $0x1c08] ss:$16 sps:$4 sm:$0xff]   ;;  %v12444_v7 = vld [vmem:[%s16496_s1 + $0x1c24] ss:$16 sps:$4 sm:$0xff]  }
 0x34f   : > { %7110 = vmatpush1.bf16.msra.mxu0 %v12351_v23  ;;  %7766 = vmatpush1.bf16.msra.mxu1 %v12354_v19  ;;  %v12447_v23 = vld [vmem:[%s16496_s1 + $0x1c2c] ss:$16 sps:$4 sm:$0xff]   ;;  %v1418_v19 = vcombine.high %v15655_v18, %v15655_v18 }
 0x350   : > { %7111 = vmatprep.subr.bf16.mxu0 %v12359_v25  ;;  %7767 = vmatprep.subr.bf16.mxu1 %v12362_v12  ;;  %v12442_v25 = vld [vmem:[%s16496_s1 + $0x1c20] ss:$16 sps:$4 sm:$0xff]   ;;  %v12445_v12 = vld [vmem:[%s16496_s1 + $0x1c28] ss:$16 sps:$4 sm:$0xff]  }
 0x353   : > { %7112 = vmatpush1.bf16.msra.mxu0 %v12357_v27  ;;  %7768 = vmatpush1.bf16.msra.mxu1 %v12360_v28  ;;  %v12450_v27 = vld [vmem:[%s16496_s1 + $0x1c44] ss:$16 sps:$4 sm:$0xff]   ;;  %v12448_v28 = vld [vmem:[%s16496_s1 + $0x1c40] ss:$16 sps:$4 sm:$0xff]  }
 0x354   : > { %7113 = vmatprep.subr.bf16.mxu0 %v12365_v30  ;;  %7769 = vmatprep.subr.bf16.mxu1 %v12368_v31  ;;  %v12451_v30 = vld [vmem:[%s16496_s1 + $0x1c48] ss:$16 sps:$4 sm:$0xff]   ;;  %v12456_v31 = vld [vmem:[%s16496_s1 + $0x1c64] ss:$16 sps:$4 sm:$0xff]  }
 0x357   : > { %7114 = vmatpush1.bf16.msra.mxu0 %v12363_v22  ;;  %7770 = vmatpush1.bf16.msra.mxu1 %v12366_v32  ;;  %v12459_v22 = vld [vmem:[%s16496_s1 + $0x1c6c] ss:$16 sps:$4 sm:$0xff]   ;;  %v12454_v32 = vld [vmem:[%s16496_s1 + $0x1c60] ss:$16 sps:$4 sm:$0xff]  }
 0x358   : > { %7115 = vmatprep.subr.bf16.mxu0 %v12371_v33  ;;  %7771 = vmatprep.subr.bf16.mxu1 %v12374_v26  ;;  %v12457_v33 = vld [vmem:[%s16496_s1 + $0x1c68] ss:$16 sps:$4 sm:$0xff]   ;;  %v12462_v26 = vld [vmem:[%s16496_s1 + $0x1c84] ss:$16 sps:$4 sm:$0xff]  }
 0x35b   : > { %7116 = vmatpush1.bf16.msra.mxu0 %v12369_v36  ;;  %7772 = vmatpush1.bf16.msra.mxu1 %v12372_v24  ;;  %v12465_v36 = vld [vmem:[%s16496_s1 + $0x1c8c] ss:$16 sps:$4 sm:$0xff]   ;;  %v12460_v24 = vld [vmem:[%s16496_s1 + $0x1c80] ss:$16 sps:$4 sm:$0xff]  }
 0x35c   : > { %7117 = vmatprep.subr.bf16.mxu0 %v12377_v37  ;;  %7773 = vmatprep.subr.bf16.mxu1 %v12380_v38  ;;  %v12463_v37 = vld [vmem:[%s16496_s1 + $0x1c88] ss:$16 sps:$4 sm:$0xff]   ;;  %v12468_v38 = vld [vmem:[%s16496_s1 + $0x1ca4] ss:$16 sps:$4 sm:$0xff]  }
 0x35f   : > { %7118 = vmatpush1.bf16.msra.mxu0 %v12375_v40  ;;  %7774 = vmatpush1.bf16.msra.mxu1 %v12378_v41  ;;  %v12471_v40 = vld [vmem:[%s16496_s1 + $0x1cac] ss:$16 sps:$4 sm:$0xff]   ;;  %v12466_v41 = vld [vmem:[%s16496_s1 + $0x1ca0] ss:$16 sps:$4 sm:$0xff]  }
 0x360   : > { %7119 = vmatprep.subr.bf16.mxu0 %v12383_v29  ;;  %7775 = vmatprep.subr.bf16.mxu1 %v12386_v43  ;;  %v12469_v29 = vld [vmem:[%s16496_s1 + $0x1ca8] ss:$16 sps:$4 sm:$0xff]   ;;  %v12474_v43 = vld [vmem:[%s16496_s1 + $0x1cc4] ss:$16 sps:$4 sm:$0xff]  }
 0x363   : > { %7120 = vmatpush1.bf16.msra.mxu0 %v12381_v44  ;;  %7776 = vmatpush1.bf16.msra.mxu1 %v12384_v35  ;;  %v12477_v44 = vld [vmem:[%s16496_s1 + $0x1ccc] ss:$16 sps:$4 sm:$0xff]   ;;  %v12472_v35 = vld [vmem:[%s16496_s1 + $0x1cc0] ss:$16 sps:$4 sm:$0xff]  }
 0x364   : > { %7121 = vmatprep.subr.bf16.mxu0 %v12389_v47  ;;  %7777 = vmatprep.subr.bf16.mxu1 %v12392_v34  ;;  %v12475_v47 = vld [vmem:[%s16496_s1 + $0x1cc8] ss:$16 sps:$4 sm:$0xff]   ;;  %v12480_v34 = vld [vmem:[%s16496_s1 + $0x1ce4] ss:$16 sps:$4 sm:$0xff]  }
 0x367   : > { %7122 = vmatpush1.bf16.msra.mxu0 %v12387_v48  ;;  %7778 = vmatpush1.bf16.msra.mxu1 %v12390_v50  ;;  %v12483_v48 = vld [vmem:[%s16496_s1 + $0x1cec] ss:$16 sps:$4 sm:$0xff]   ;;  %v12478_v50 = vld [vmem:[%s16496_s1 + $0x1ce0] ss:$16 sps:$4 sm:$0xff]  }
 0x368   : > { %7123 = vmatprep.subr.bf16.mxu0 %v12395_v52  ;;  %7779 = vmatprep.subr.bf16.mxu1 %v12398_v53  ;;  %v12481_v52 = vld [vmem:[%s16496_s1 + $0x1ce8] ss:$16 sps:$4 sm:$0xff]   ;;  %v12486_v53 = vld [vmem:[%s16496_s1 + $0x1d04] ss:$16 sps:$4 sm:$0xff]  }
 0x36b   : > { %7124 = vmatpush1.bf16.msra.mxu0 %v12393_v39  ;;  %7780 = vmatpush1.bf16.msra.mxu1 %v12396_v54  ;;  %v12489_v39 = vld [vmem:[%s16496_s1 + $0x1d0c] ss:$16 sps:$4 sm:$0xff]   ;;  %v12484_v54 = vld [vmem:[%s16496_s1 + $0x1d00] ss:$16 sps:$4 sm:$0xff]  }
 0x36c   : > { %7125 = vmatprep.subr.bf16.mxu0 %v12401_v55  ;;  %7781 = vmatprep.subr.bf16.mxu1 %v12404_v46  ;;  %v12487_v55 = vld [vmem:[%s16496_s1 + $0x1d08] ss:$16 sps:$4 sm:$0xff]   ;;  %v12492_v46 = vld [vmem:[%s16496_s1 + $0x1d24] ss:$16 sps:$4 sm:$0xff]  }
 0x36f   : > { %7126 = vmatpush1.bf16.msra.mxu0 %v12399_v58  ;;  %7782 = vmatpush1.bf16.msra.mxu1 %v12402_v45  ;;  %v12495_v58 = vld [vmem:[%s16496_s1 + $0x1d2c] ss:$16 sps:$4 sm:$0xff]   ;;  %v12490_v45 = vld [vmem:[%s16496_s1 + $0x1d20] ss:$16 sps:$4 sm:$0xff]  }
 0x370   : > { %7127 = vmatprep.subr.bf16.mxu0 %v12407_v59  ;;  %7783 = vmatprep.subr.bf16.mxu1 %v12410_v60  ;;  %v12493_v59 = vld [vmem:[%s16496_s1 + $0x1d28] ss:$16 sps:$4 sm:$0xff]   ;;  %v12498_v60 = vld [vmem:[%s16496_s1 + $0x1d44] ss:$16 sps:$4 sm:$0xff]  }
 0x373   : > { %7128 = vmatpush1.bf16.msra.mxu0 %v12405_v62  ;;  %7784 = vmatpush1.bf16.msra.mxu1 %v12408_v63  ;;  %v12501_v62 = vld [vmem:[%s16496_s1 + $0x1d4c] ss:$16 sps:$4 sm:$0xff]   ;;  %v12496_v63 = vld [vmem:[%s16496_s1 + $0x1d40] ss:$16 sps:$4 sm:$0xff]  }
 0x374   : > { %7129 = vmatprep.subr.bf16.mxu0 %v12413_v51  ;;  %7785 = vmatprep.subr.bf16.mxu1 %v12416_v0  ;;  %v12499_v51 = vld [vmem:[%s16496_s1 + $0x1d48] ss:$16 sps:$4 sm:$0xff]   ;;  %v12504_v0 = vld [vmem:[%s16496_s1 + $0x1d64] ss:$16 sps:$4 sm:$0xff]  }
 0x377   : > { %7130 = vmatpush1.bf16.msra.mxu0 %v12411_v1  ;;  %7786 = vmatpush1.bf16.msra.mxu1 %v12414_v57  ;;  %v12507_v1 = vld [vmem:[%s16496_s1 + $0x1d6c] ss:$16 sps:$4 sm:$0xff]   ;;  %v12502_v57 = vld [vmem:[%s16496_s1 + $0x1d60] ss:$16 sps:$4 sm:$0xff]  }
 0x378   : > { %7131 = vmatprep.subr.bf16.mxu0 %v12419_v4  ;;  %7787 = vmatprep.subr.bf16.mxu1 %v12422_v56  ;;  %v12505_v4 = vld [vmem:[%s16496_s1 + $0x1d68] ss:$16 sps:$4 sm:$0xff]   ;;  %v12510_v56 = vld [vmem:[%s16496_s1 + $0x1d84] ss:$16 sps:$4 sm:$0xff]  }
 0x37b   : > { %7132 = vmatpush1.bf16.msra.mxu0 %v12417_v5  ;;  %7788 = vmatpush1.bf16.msra.mxu1 %v12420_v6  ;;  %v12513_v5 = vld [vmem:[%s16496_s1 + $0x1d8c] ss:$16 sps:$4 sm:$0xff]   ;;  %v12508_v6 = vld [vmem:[%s16496_s1 + $0x1d80] ss:$16 sps:$4 sm:$0xff]  }
 0x37c   : > { %7133 = vmatprep.subr.bf16.mxu0 %v12425_v8  ;;  %7789 = vmatprep.subr.bf16.mxu1 %v12428_v9  ;;  %v12511_v8 = vld [vmem:[%s16496_s1 + $0x1d88] ss:$16 sps:$4 sm:$0xff]   ;;  %v12516_v9 = vld [vmem:[%s16496_s1 + $0x1da4] ss:$16 sps:$4 sm:$0xff]  }
 0x37f   : > { %7134 = vmatpush1.bf16.msra.mxu0 %v12423_v61  ;;  %7790 = vmatpush1.bf16.msra.mxu1 %v12426_v10  ;;  %v12519_v61 = vld [vmem:[%s16496_s1 + $0x1dac] ss:$16 sps:$4 sm:$0xff]   ;;  %v12514_v10 = vld [vmem:[%s16496_s1 + $0x1da0] ss:$16 sps:$4 sm:$0xff]  }
 0x380   : > { %7135 = vmatprep.subr.bf16.mxu0 %v12431_v11  ;;  %7791 = vmatprep.subr.bf16.mxu1 %v12434_v3  ;;  %v12517_v11 = vld [vmem:[%s16496_s1 + $0x1da8] ss:$16 sps:$4 sm:$0xff]   ;;  %v12522_v3 = vld [vmem:[%s16496_s1 + $0x1dc4] ss:$16 sps:$4 sm:$0xff]  }
 0x383   : > { %7136 = vmatpush1.bf16.msra.mxu0 %v12429_v15  ;;  %7792 = vmatpush1.bf16.msra.mxu1 %v12432_v2  ;;  %v12525_v15 = vld [vmem:[%s16496_s1 + $0x1dcc] ss:$16 sps:$4 sm:$0xff]   ;;  %v12520_v2 = vld [vmem:[%s16496_s1 + $0x1dc0] ss:$16 sps:$4 sm:$0xff]  }
 0x384   : > { %7146 = vmatprep.subr.bf16.mxu0 %v12438_v16  ;;  %7802 = vmatprep.subr.bf16.mxu1 %v12441_v17  ;;  %v12523_v16 = vld [vmem:[%s16496_s1 + $0x1dc8] ss:$16 sps:$4 sm:$0xff]   ;;  %v12528_v17 = vld [vmem:[%s16496_s1 + $0x1de4] ss:$16 sps:$4 sm:$0xff]  }
 0x386   : > { %7138 = vmatmul.mubr.bf16.vlgmr.msra.gmra.mrb[0].mxu0 %v15452_v13  ;;  %7794 = vmatmul.mubr.bf16.vlgmr.msra.gmra.mrb[0].mxu1 %v15452_v13  ;;  %v12453_v13 = vld [vmem:[%s16496_s1 + $0x1c4c] ss:$16 sps:$4 sm:$0xff]  }
 0x387   : > { %7147 = vmatpush1.bf16.msra.mxu0 %v12436_v20  ;;  %7803 = vmatpush1.bf16.msra.mxu1 %v12439_v21  ;;  %v12531_v20 = vld [vmem:[%s16496_s1 + $0x1dec] ss:$16 sps:$4 sm:$0xff]   ;;  %v1403_v21 = vcombine.high %v15639_v14, %v15639_v14 }
 0x388   : > { %7148 = vmatprep.subr.bf16.mxu0 %v12444_v7  ;;  %7804 = vmatprep.subr.bf16.mxu1 %v12447_v23  ;;  %v12526_v7 = vld [vmem:[%s16496_s1 + $0x1de0] ss:$16 sps:$4 sm:$0xff]   ;;  %v12529_v23 = vld [vmem:[%s16496_s1 + $0x1de8] ss:$16 sps:$4 sm:$0xff]   ;;  %v12537_v14 = vld [vmem:[%s16496_s1 + $0x1e0c] ss:$16 sps:$4 sm:$0xff]  }
 0x389   : > { %7178 = vmatprep.mubr.bf16.mxu0 %v1418_v19  ;;  %7834 = vmatprep.mubr.bf16.mxu1 %v1418_v19  ;;  %v12534_v19 = vld [vmem:[%s16496_s1 + $0x1e04] ss:$16 sps:$4 sm:$0xff]  }
 0x38b   : > { %7149 = vmatpush1.bf16.msra.mxu0 %v12442_v25  ;;  %7805 = vmatpush1.bf16.msra.mxu1 %v12445_v12  ;;  %v15856_v25 = vrot.slane %v1403_v21, %v12959_v49  ;;  %v12532_v12 = vld [vmem:[%s16496_s1 + $0x1e00] ss:$16 sps:$4 sm:$0xff]   ;;  %v12543_v49 = vld [vmem:[%s16496_s1 + $0x1e2c] ss:$16 sps:$4 sm:$0xff]  }
 0x38c   : > { %7150 = vmatprep.subr.bf16.mxu0 %v12450_v27  ;;  %7806 = vmatprep.subr.bf16.mxu1 %v12453_v13  ;;  %v12535_v27 = vld [vmem:[%s16496_s1 + $0x1e08] ss:$16 sps:$4 sm:$0xff]   ;;  %v12540_v13 = vld [vmem:[%s16496_s1 + $0x1e24] ss:$16 sps:$4 sm:$0xff]   ;;  %v12616_v21 = vld [vmem:[%s16496_s1 + $0x1fc0] ss:$16 sps:$4 sm:$0xff]  }
 0x38f   : > { %7151 = vmatpush1.bf16.msra.mxu0 %v12448_v28  ;;  %7807 = vmatpush1.bf16.msra.mxu1 %v12451_v30  ;;  %v1419_v28 = vcombine.high %v15856_v25, %v15856_v25  ;;  %v12538_v30 = vld [vmem:[%s16496_s1 + $0x1e20] ss:$16 sps:$4 sm:$0xff]  }
 0x390   : > { %7152 = vmatprep.subr.bf16.mxu0 %v12456_v31  ;;  %7808 = vmatprep.subr.bf16.mxu1 %v12459_v22  ;;  %v12541_v31 = vld [vmem:[%s16496_s1 + $0x1e28] ss:$16 sps:$4 sm:$0xff]   ;;  %v12546_v22 = vld [vmem:[%s16496_s1 + $0x1e44] ss:$16 sps:$4 sm:$0xff]  }
 0x393   : > { %7153 = vmatpush1.bf16.msra.mxu0 %v12454_v32  ;;  %7809 = vmatpush1.bf16.msra.mxu1 %v12457_v33  ;;  %v12544_v32 = vld [vmem:[%s16496_s1 + $0x1e40] ss:$16 sps:$4 sm:$0xff]   ;;  %v12547_v33 = vld [vmem:[%s16496_s1 + $0x1e48] ss:$16 sps:$4 sm:$0xff]  }
 0x394   : > { %7154 = vmatprep.subr.bf16.mxu0 %v12462_v26  ;;  %7810 = vmatprep.subr.bf16.mxu1 %v12465_v36  ;;  %v12552_v26 = vld [vmem:[%s16496_s1 + $0x1e64] ss:$16 sps:$4 sm:$0xff]   ;;  %v12555_v36 = vld [vmem:[%s16496_s1 + $0x1e6c] ss:$16 sps:$4 sm:$0xff]  }
 0x397   : > { %7155 = vmatpush1.bf16.msra.mxu0 %v12460_v24  ;;  %7811 = vmatpush1.bf16.msra.mxu1 %v12463_v37  ;;  %v12550_v24 = vld [vmem:[%s16496_s1 + $0x1e60] ss:$16 sps:$4 sm:$0xff]   ;;  %v12553_v37 = vld [vmem:[%s16496_s1 + $0x1e68] ss:$16 sps:$4 sm:$0xff]  }
 0x398   : > { %7156 = vmatprep.subr.bf16.mxu0 %v12468_v38  ;;  %7812 = vmatprep.subr.bf16.mxu1 %v12471_v40  ;;  %v12558_v38 = vld [vmem:[%s16496_s1 + $0x1e84] ss:$16 sps:$4 sm:$0xff]   ;;  %v12561_v40 = vld [vmem:[%s16496_s1 + $0x1e8c] ss:$16 sps:$4 sm:$0xff]  }
 0x39b   : > { %7157 = vmatpush1.bf16.msra.mxu0 %v12466_v41  ;;  %7813 = vmatpush1.bf16.msra.mxu1 %v12469_v29  ;;  %v12556_v41 = vld [vmem:[%s16496_s1 + $0x1e80] ss:$16 sps:$4 sm:$0xff]   ;;  %v12559_v29 = vld [vmem:[%s16496_s1 + $0x1e88] ss:$16 sps:$4 sm:$0xff]  }
 0x39c   : > { %7158 = vmatprep.subr.bf16.mxu0 %v12474_v43  ;;  %7814 = vmatprep.subr.bf16.mxu1 %v12477_v44  ;;  %v12564_v43 = vld [vmem:[%s16496_s1 + $0x1ea4] ss:$16 sps:$4 sm:$0xff]   ;;  %v12567_v44 = vld [vmem:[%s16496_s1 + $0x1eac] ss:$16 sps:$4 sm:$0xff]  }
 0x39f   : > { %7159 = vmatpush1.bf16.msra.mxu0 %v12472_v35  ;;  %7815 = vmatpush1.bf16.msra.mxu1 %v12475_v47  ;;  %v12562_v35 = vld [vmem:[%s16496_s1 + $0x1ea0] ss:$16 sps:$4 sm:$0xff]   ;;  %v12565_v47 = vld [vmem:[%s16496_s1 + $0x1ea8] ss:$16 sps:$4 sm:$0xff]  }
 0x3a0   : > { %7160 = vmatprep.subr.bf16.mxu0 %v12480_v34  ;;  %7816 = vmatprep.subr.bf16.mxu1 %v12483_v48  ;;  %v12570_v34 = vld [vmem:[%s16496_s1 + $0x1ec4] ss:$16 sps:$4 sm:$0xff]   ;;  %v12573_v48 = vld [vmem:[%s16496_s1 + $0x1ecc] ss:$16 sps:$4 sm:$0xff]  }
 0x3a3   : > { %7161 = vmatpush1.bf16.msra.mxu0 %v12478_v50  ;;  %7817 = vmatpush1.bf16.msra.mxu1 %v12481_v52  ;;  %v12568_v50 = vld [vmem:[%s16496_s1 + $0x1ec0] ss:$16 sps:$4 sm:$0xff]   ;;  %v12571_v52 = vld [vmem:[%s16496_s1 + $0x1ec8] ss:$16 sps:$4 sm:$0xff]  }
 0x3a4   : > { %7162 = vmatprep.subr.bf16.mxu0 %v12486_v53  ;;  %7818 = vmatprep.subr.bf16.mxu1 %v12489_v39  ;;  %v12576_v53 = vld [vmem:[%s16496_s1 + $0x1ee4] ss:$16 sps:$4 sm:$0xff]   ;;  %v12579_v39 = vld [vmem:[%s16496_s1 + $0x1eec] ss:$16 sps:$4 sm:$0xff]  }
 0x3a7   : > { %7163 = vmatpush1.bf16.msra.mxu0 %v12484_v54  ;;  %7819 = vmatpush1.bf16.msra.mxu1 %v12487_v55  ;;  %v12574_v54 = vld [vmem:[%s16496_s1 + $0x1ee0] ss:$16 sps:$4 sm:$0xff]   ;;  %v12577_v55 = vld [vmem:[%s16496_s1 + $0x1ee8] ss:$16 sps:$4 sm:$0xff]  }
 0x3a8   : > { %7164 = vmatprep.subr.bf16.mxu0 %v12492_v46  ;;  %7820 = vmatprep.subr.bf16.mxu1 %v12495_v58  ;;  %v12582_v46 = vld [vmem:[%s16496_s1 + $0x1f04] ss:$16 sps:$4 sm:$0xff]   ;;  %v12585_v58 = vld [vmem:[%s16496_s1 + $0x1f0c] ss:$16 sps:$4 sm:$0xff]  }
 0x3ab   : > { %7165 = vmatpush1.bf16.msra.mxu0 %v12490_v45  ;;  %7821 = vmatpush1.bf16.msra.mxu1 %v12493_v59  ;;  %v12580_v45 = vld [vmem:[%s16496_s1 + $0x1f00] ss:$16 sps:$4 sm:$0xff]   ;;  %v12583_v59 = vld [vmem:[%s16496_s1 + $0x1f08] ss:$16 sps:$4 sm:$0xff]  }
 0x3ac   : > { %7166 = vmatprep.subr.bf16.mxu0 %v12498_v60  ;;  %7822 = vmatprep.subr.bf16.mxu1 %v12501_v62  ;;  %v12588_v60 = vld [vmem:[%s16496_s1 + $0x1f24] ss:$16 sps:$4 sm:$0xff]   ;;  %v12591_v62 = vld [vmem:[%s16496_s1 + $0x1f2c] ss:$16 sps:$4 sm:$0xff]  }
 0x3af   : > { %7167 = vmatpush1.bf16.msra.mxu0 %v12496_v63  ;;  %7823 = vmatpush1.bf16.msra.mxu1 %v12499_v51  ;;  %v12586_v63 = vld [vmem:[%s16496_s1 + $0x1f20] ss:$16 sps:$4 sm:$0xff]   ;;  %v12589_v51 = vld [vmem:[%s16496_s1 + $0x1f28] ss:$16 sps:$4 sm:$0xff]  }
 0x3b0   : > { %7168 = vmatprep.subr.bf16.mxu0 %v12504_v0  ;;  %7824 = vmatprep.subr.bf16.mxu1 %v12507_v1  ;;  %v12594_v0 = vld [vmem:[%s16496_s1 + $0x1f44] ss:$16 sps:$4 sm:$0xff]   ;;  %v12597_v1 = vld [vmem:[%s16496_s1 + $0x1f4c] ss:$16 sps:$4 sm:$0xff]  }
 0x3b3   : > { %7169 = vmatpush1.bf16.msra.mxu0 %v12502_v57  ;;  %7825 = vmatpush1.bf16.msra.mxu1 %v12505_v4  ;;  %v12592_v57 = vld [vmem:[%s16496_s1 + $0x1f40] ss:$16 sps:$4 sm:$0xff]   ;;  %v12595_v4 = vld [vmem:[%s16496_s1 + $0x1f48] ss:$16 sps:$4 sm:$0xff]  }
 0x3b4   : > { %7170 = vmatprep.subr.bf16.mxu0 %v12510_v56  ;;  %7826 = vmatprep.subr.bf16.mxu1 %v12513_v5  ;;  %v12600_v56 = vld [vmem:[%s16496_s1 + $0x1f64] ss:$16 sps:$4 sm:$0xff]   ;;  %v12603_v5 = vld [vmem:[%s16496_s1 + $0x1f6c] ss:$16 sps:$4 sm:$0xff]  }
 0x3b7   : > { %7171 = vmatpush1.bf16.msra.mxu0 %v12508_v6  ;;  %7827 = vmatpush1.bf16.msra.mxu1 %v12511_v8  ;;  %v12598_v6 = vld [vmem:[%s16496_s1 + $0x1f60] ss:$16 sps:$4 sm:$0xff]   ;;  %v12601_v8 = vld [vmem:[%s16496_s1 + $0x1f68] ss:$16 sps:$4 sm:$0xff]  }
 0x3b8   : > { %7172 = vmatprep.subr.bf16.mxu0 %v12516_v9  ;;  %7828 = vmatprep.subr.bf16.mxu1 %v12519_v61  ;;  %v12606_v9 = vld [vmem:[%s16496_s1 + $0x1f84] ss:$16 sps:$4 sm:$0xff]   ;;  %v12609_v61 = vld [vmem:[%s16496_s1 + $0x1f8c] ss:$16 sps:$4 sm:$0xff]  }
 0x3bb   : > { %7173 = vmatpush1.bf16.msra.mxu0 %v12514_v10  ;;  %7829 = vmatpush1.bf16.msra.mxu1 %v12517_v11  ;;  %v12604_v10 = vld [vmem:[%s16496_s1 + $0x1f80] ss:$16 sps:$4 sm:$0xff]   ;;  %v12607_v11 = vld [vmem:[%s16496_s1 + $0x1f88] ss:$16 sps:$4 sm:$0xff]  }
 0x3bc   : > { %7174 = vmatprep.subr.bf16.mxu0 %v12522_v3  ;;  %7830 = vmatprep.subr.bf16.mxu1 %v12525_v15  ;;  %v12612_v3 = vld [vmem:[%s16496_s1 + $0x1fa4] ss:$16 sps:$4 sm:$0xff]   ;;  %v12615_v15 = vld [vmem:[%s16496_s1 + $0x1fac] ss:$16 sps:$4 sm:$0xff]  }
 0x3bf   : > { %7175 = vmatpush1.bf16.msra.mxu0 %v12520_v2  ;;  %7831 = vmatpush1.bf16.msra.mxu1 %v12523_v16  ;;  %v12610_v2 = vld [vmem:[%s16496_s1 + $0x1fa0] ss:$16 sps:$4 sm:$0xff]   ;;  %v12613_v16 = vld [vmem:[%s16496_s1 + $0x1fa8] ss:$16 sps:$4 sm:$0xff]  }
 0x3c0   : > { %7176 = vmatprep.subr.bf16.mxu0 %v12528_v17  ;;  %7832 = vmatprep.subr.bf16.mxu1 %v12531_v20  ;;  %v12618_v17 = vld [vmem:[%s16496_s1 + $0x1fc4] ss:$16 sps:$4 sm:$0xff]   ;;  %v12621_v20 = vld [vmem:[%s16496_s1 + $0x1fcc] ss:$16 sps:$4 sm:$0xff]  }
 0x3c3   : > { %7177 = vmatpush1.bf16.msra.mxu0 %v12526_v7  ;;  %7833 = vmatpush1.bf16.msra.mxu1 %v12529_v23  ;;  %v12619_v7 = vld [vmem:[%s16496_s1 + $0x1fc8] ss:$16 sps:$4 sm:$0xff]   ;;  %v12624_v23 = vld [vmem:[%s16496_s1 + $0x1fe4] ss:$16 sps:$4 sm:$0xff]  }
 0x3c4   : > { %7187 = vmatprep.subr.bf16.mxu0 %v12534_v19  ;;  %7843 = vmatprep.subr.bf16.mxu1 %v12537_v14  ;;  %v12627_v19 = vld [vmem:[%s16496_s1 + $0x1fec] ss:$16 sps:$4 sm:$0xff]   ;;  %v12622_v14 = vld [vmem:[%s16496_s1 + $0x1fe0] ss:$16 sps:$4 sm:$0xff]  }
 0x3c6   : > { %7179 = vmatmul.mubr.bf16.vlgmr.msra.gmra.mrb[0].mxu0 %v15655_v18  ;;  %7835 = vmatmul.mubr.bf16.vlgmr.msra.gmra.mrb[0].mxu1 %v15655_v18  ;;  %v12549_v18 = vld [vmem:[%s16496_s1 + $0x1e4c] ss:$16 sps:$4 sm:$0xff]  }
 0x3c7   : > { %7188 = vmatpush1.bf16.msra.mxu0 %v12532_v12  ;;  %7844 = vmatpush1.bf16.msra.mxu1 %v12535_v27  ;;  %v12625_v12 = vld [vmem:[%s16496_s1 + $0x1fe8] ss:$16 sps:$4 sm:$0xff]   ;;  %v12629_v27 = vld [vmem:[%s16498_s3 + $0x40] sm:$0xff]  }
 0x3c8   : > { %7189 = vmatprep.subr.bf16.mxu0 %v12540_v13  ;;  %7845 = vmatprep.subr.bf16.mxu1 %v12543_v49  ;;  %v12630_v13 = vld [vmem:[%s16498_s3 + $0xc0] sm:$0xff]  }
 0x3c9   : > { %7219 = vmatprep.mubr.bf16.mxu0 %v1419_v28  ;;  %7875 = vmatprep.mubr.bf16.mxu1 %v1419_v28  ;;  %v12631_v49 = vld [vmem:[%s16498_s3] sm:$0xff]  }
 0x3ca   : > { %v12632_v28 = vld [vmem:[%s16498_s3 + $0x80] sm:$0xff]  }
 0x3cb   : > { %7190 = vmatpush1.bf16.msra.mxu0 %v12538_v30  ;;  %7846 = vmatpush1.bf16.msra.mxu1 %v12541_v31  ;;  %v12634_v30 = vld [vmem:[%s16498_s3 + $0xc8] sm:$0xff]  }
 0x3cc   : > { %7191 = vmatprep.subr.bf16.mxu0 %v12546_v22  ;;  %7847 = vmatprep.subr.bf16.mxu1 %v12549_v18  ;;  %v12635_v31 = vld [vmem:[%s16498_s3 + $0x8] sm:$0xff]   ;;  %v12637_v18 = vld [vmem:[%s16498_s3 + $0x50] sm:$0xff]  }
 0x3cd   : > { %v12636_v22 = vld [vmem:[%s16498_s3 + $0x88] sm:$0xff]  }
 0x3cf   : > { %7192 = vmatpush1.bf16.msra.mxu0 %v12544_v32  ;;  %7848 = vmatpush1.bf16.msra.mxu1 %v12547_v33  ;;  %v12638_v32 = vld [vmem:[%s16498_s3 + $0xd0] sm:$0xff]  }
 0x3d0   : > { %7193 = vmatprep.subr.bf16.mxu0 %v12552_v26  ;;  %7849 = vmatprep.subr.bf16.mxu1 %v12555_v36  ;;  %v12639_v33 = vld [vmem:[%s16498_s3 + $0x10] sm:$0xff]   ;;  %v12641_v36 = vld [vmem:[%s16498_s3 + $0x58] sm:$0xff]  }
 0x3d1   : > { %v12640_v26 = vld [vmem:[%s16498_s3 + $0x90] sm:$0xff]  }
 0x3d3   : > { %7194 = vmatpush1.bf16.msra.mxu0 %v12550_v24  ;;  %7850 = vmatpush1.bf16.msra.mxu1 %v12553_v37  ;;  %v12642_v24 = vld [vmem:[%s16498_s3 + $0xd8] sm:$0xff]  }
 0x3d4   : > { %7195 = vmatprep.subr.bf16.mxu0 %v12558_v38  ;;  %7851 = vmatprep.subr.bf16.mxu1 %v12561_v40  ;;  %v12643_v37 = vld [vmem:[%s16498_s3 + $0x18] sm:$0xff]   ;;  %v12645_v40 = vld [vmem:[%s16498_s3 + $0x60] sm:$0xff]  }
 0x3d5   : > { %v12644_v38 = vld [vmem:[%s16498_s3 + $0x98] sm:$0xff]  }
 0x3d7   : > { %7196 = vmatpush1.bf16.msra.mxu0 %v12556_v41  ;;  %7852 = vmatpush1.bf16.msra.mxu1 %v12559_v29  ;;  %v12646_v41 = vld [vmem:[%s16498_s3 + $0xe0] sm:$0xff]  }
 0x3d8   : > { %7197 = vmatprep.subr.bf16.mxu0 %v12564_v43  ;;  %7853 = vmatprep.subr.bf16.mxu1 %v12567_v44  ;;  %v12647_v29 = vld [vmem:[%s16498_s3 + $0x20] sm:$0xff]   ;;  %v12649_v44 = vld [vmem:[%s16498_s3 + $0x68] sm:$0xff]  }
 0x3d9   : > { %v12648_v43 = vld [vmem:[%s16498_s3 + $0xa0] sm:$0xff]  }
 0x3db   : > { %7198 = vmatpush1.bf16.msra.mxu0 %v12562_v35  ;;  %7854 = vmatpush1.bf16.msra.mxu1 %v12565_v47  ;;  %v12650_v35 = vld [vmem:[%s16498_s3 + $0xe8] sm:$0xff]  }
 0x3dc   : > { %7199 = vmatprep.subr.bf16.mxu0 %v12570_v34  ;;  %7855 = vmatprep.subr.bf16.mxu1 %v12573_v48  ;;  %v12651_v47 = vld [vmem:[%s16498_s3 + $0x28] sm:$0xff]   ;;  %v12653_v48 = vld [vmem:[%s16498_s3 + $0x70] sm:$0xff]  }
 0x3dd   : > { %v12652_v34 = vld [vmem:[%s16498_s3 + $0xa8] sm:$0xff]  }
 0x3df   : > { %7200 = vmatpush1.bf16.msra.mxu0 %v12568_v50  ;;  %7856 = vmatpush1.bf16.msra.mxu1 %v12571_v52  ;;  %v12654_v50 = vld [vmem:[%s16498_s3 + $0xf0] sm:$0xff]  }
 0x3e0   : > { %7201 = vmatprep.subr.bf16.mxu0 %v12576_v53  ;;  %7857 = vmatprep.subr.bf16.mxu1 %v12579_v39  ;;  %v12655_v52 = vld [vmem:[%s16498_s3 + $0x30] sm:$0xff]   ;;  %v12657_v39 = vld [vmem:[%s16498_s3 + $0x78] sm:$0xff]  }
 0x3e1   : > { %v12656_v53 = vld [vmem:[%s16498_s3 + $0xb0] sm:$0xff]  }
 0x3e3   : > { %7202 = vmatpush1.bf16.msra.mxu0 %v12574_v54  ;;  %7858 = vmatpush1.bf16.msra.mxu1 %v12577_v55  ;;  %v12658_v54 = vld [vmem:[%s16498_s3 + $0xf8] sm:$0xff]  }
 0x3e4   : > { %7203 = vmatprep.subr.bf16.mxu0 %v12582_v46  ;;  %7859 = vmatprep.subr.bf16.mxu1 %v12585_v58  ;;  %v12659_v55 = vld [vmem:[%s16498_s3 + $0x38] sm:$0xff]   ;;  %v12661_v58 = vld [vmem:[%s16498_s3 + $0x140] sm:$0xff]  }
 0x3e5   : > { %v12660_v46 = vld [vmem:[%s16498_s3 + $0xb8] sm:$0xff]  }
 0x3e7   : > { %7204 = vmatpush1.bf16.msra.mxu0 %v12580_v45  ;;  %7860 = vmatpush1.bf16.msra.mxu1 %v12583_v59  ;;  %v12662_v45 = vld [vmem:[%s16498_s3 + $0x1c0] sm:$0xff]   ;;  %v1258_v59 = vsub.s32 0, %v12935_v42 }
 0x3e8   : > { %7205 = vmatprep.subr.bf16.mxu0 %v12588_v60  ;;  %7861 = vmatprep.subr.bf16.mxu1 %v12591_v62  ;;  %v1266_v60 = vsub.s32 2, %v12935_v42  ;;  %v1254_v62 = vld [vmem:[%s16497_s2] sm:$0xf] }
 0x3eb   : > { %7206 = vmatpush1.bf16.msra.mxu0 %v12586_v63  ;;  %7862 = vmatpush1.bf16.msra.mxu1 %v12589_v51  ;;  %v1262_v63 = vsub.s32 1, %v12935_v42  ;;  %v1270_v51 = vsub.s32 3, %v12935_v42 }
 0x3ec   : > { %7207 = vmatprep.subr.bf16.mxu0 %v12594_v0  ;;  %7863 = vmatprep.subr.bf16.mxu1 %v12597_v1  ;;  %v1259_v0 = vrot.slane %v1254_v62, %v1258_v59  ;;  %v1267_v1 = vrot.slane %v1254_v62, %v1266_v60 }
 0x3ef   : > { %7208 = vmatpush1.bf16.msra.mxu0 %v12592_v57  ;;  %7864 = vmatpush1.bf16.msra.mxu1 %v12595_v4  ;;  %v1263_v57 = vrot.slane %v1254_v62, %v1262_v63  ;;  %v1271_v4 = vrot.slane %v1254_v62, %v1270_v51 }
 0x3f0   : > { %7209 = vmatprep.subr.bf16.mxu0 %v12600_v56  ;;  %7865 = vmatprep.subr.bf16.mxu1 %v12603_v5 }
 0x3f3   : > { %7210 = vmatpush1.bf16.msra.mxu0 %v12598_v6  ;;  %7866 = vmatpush1.bf16.msra.mxu1 %v12601_v8 }
 0x3f4   : > { %7211 = vmatprep.subr.bf16.mxu0 %v12606_v9  ;;  %7867 = vmatprep.subr.bf16.mxu1 %v12609_v61 }
 0x3f7   : > { %7212 = vmatpush1.bf16.msra.mxu0 %v12604_v10  ;;  %7868 = vmatpush1.bf16.msra.mxu1 %v12607_v11 }
 0x3f8   : > { %7213 = vmatprep.subr.bf16.mxu0 %v12612_v3  ;;  %7869 = vmatprep.subr.bf16.mxu1 %v12615_v15 }
 0x3fb   : > { %7214 = vmatpush1.bf16.msra.mxu0 %v12610_v2  ;;  %7870 = vmatpush1.bf16.msra.mxu1 %v12613_v16 }
 0x3fc   : > { %7215 = vmatprep.subr.bf16.mxu0 %v12618_v17  ;;  %7871 = vmatprep.subr.bf16.mxu1 %v12621_v20 }
 0x3ff   : > { %7216 = vmatpush1.bf16.msra.mxu0 %v12616_v21  ;;  %7872 = vmatpush1.bf16.msra.mxu1 %v12619_v7 }
 0x400   : > { %7217 = vmatprep.subr.bf16.mxu0 %v12624_v23  ;;  %7873 = vmatprep.subr.bf16.mxu1 %v12627_v19 }
 0x403   : > { %7218 = vmatpush1.bf16.msra.mxu0 %v12622_v14  ;;  %7874 = vmatpush1.bf16.msra.mxu1 %v12625_v12 }
 0x404   : > { %10776 = vmatprep.subr.bf16.mxu0 %v12629_v27  ;;  %10798 = vmatprep.subr.bf16.mxu1 %v12630_v13 }
 0x406   : > { %7220 = vmatmul.mubr.bf16.vlgmr.msra.gmra.mrb[0].mxu0 %v15856_v25  ;;  %7876 = vmatmul.mubr.bf16.vlgmr.msra.gmra.mrb[0].mxu1 %v15856_v25  ;;  %v12633_v25 = vld [vmem:[%s16498_s3 + $0x48] sm:$0xff]  }
 0x407   : > { %10777 = vmatpush3.bf16.msra.mxu0 %v12631_v49  ;;  %10799 = vmatpush3.bf16.msra.mxu1 %v12632_v28 }
 0x408   : > { %10778 = vmatprep.subr.bf16.mxu0 %v12633_v25  ;;  %10800 = vmatprep.subr.bf16.mxu1 %v12634_v30 }
 0x40b   : > { %10779 = vmatpush3.bf16.msra.mxu0 %v12635_v31  ;;  %10801 = vmatpush3.bf16.msra.mxu1 %v12636_v22 }
 0x40c   : > { %10780 = vmatprep.subr.bf16.mxu0 %v12637_v18  ;;  %10802 = vmatprep.subr.bf16.mxu1 %v12638_v32 }
 0x40f   : > { %10781 = vmatpush3.bf16.msra.mxu0 %v12639_v33  ;;  %10803 = vmatpush3.bf16.msra.mxu1 %v12640_v26 }
 0x410   : > { %10782 = vmatprep.subr.bf16.mxu0 %v12641_v36  ;;  %10804 = vmatprep.subr.bf16.mxu1 %v12642_v24 }
 0x413   : > { %10783 = vmatpush3.bf16.msra.mxu0 %v12643_v37  ;;  %10805 = vmatpush3.bf16.msra.mxu1 %v12644_v38 }
 0x414   : > { %10784 = vmatprep.subr.bf16.mxu0 %v12645_v40  ;;  %10806 = vmatprep.subr.bf16.mxu1 %v12646_v41 }
 0x417   : > { %10785 = vmatpush3.bf16.msra.mxu0 %v12647_v29  ;;  %10807 = vmatpush3.bf16.msra.mxu1 %v12648_v43 }
 0x418   : > { %10786 = vmatprep.subr.bf16.mxu0 %v12649_v44  ;;  %10808 = vmatprep.subr.bf16.mxu1 %v12650_v35 }
 0x41b   : > { %10787 = vmatpush3.bf16.msra.mxu0 %v12651_v47  ;;  %10809 = vmatpush3.bf16.msra.mxu1 %v12652_v34 }
 0x41c   : > { %10788 = vmatprep.subr.bf16.mxu0 %v12653_v48  ;;  %10810 = vmatprep.subr.bf16.mxu1 %v12654_v50 }
 0x41f   : > { %10789 = vmatpush3.bf16.msra.mxu0 %v12655_v52  ;;  %10811 = vmatpush3.bf16.msra.mxu1 %v12656_v53 }
 0x420   : > { %10790 = vmatprep.subr.bf16.mxu0 %v12657_v39  ;;  %10812 = vmatprep.subr.bf16.mxu1 %v12658_v54 }
 0x423   : > { %10791 = vmatpush3.bf16.msra.mxu0 %v12659_v55  ;;  %10813 = vmatpush3.bf16.msra.mxu1 %v12660_v46 }
 0x424   : > { %10820 = vmatprep.subr.bf16.mxu0 %v12661_v58  ;;  %10842 = vmatprep.subr.bf16.mxu1 %v12662_v45 }
 0x4d9   : > { %v7221_v56 = vpop.f32.mrb[0].mxu0  ;;  %v7877_v5 = vpop.f32.mrb[0].mxu1 }
 0x4da   : > { %v10952_v6 = vadd.f32 %v7221_v56, %v1259_v0  ;;  %v10954_v8 = vadd.f32 %v7877_v5, %v1267_v1  ;;  %v7223_v9 = vpop.f32.mrb[1].mxu0  ;;  %v7879_v61 = vpop.f32.mrb[1].mxu1 }
 0x4db   : > { %v10953_v10 = vadd.f32 %v7223_v9, %v1263_v57  ;;  %v10955_v11 = vadd.f32 %v7879_v61, %v1271_v4  ;;  %v7225_v3 = vpop.f32.mrb[2].mxu0  ;;  %v7881_v15 = vpop.f32.mrb[2].mxu1 }
 0x4dc   : > { %v7885_v2 = vsel %vm7884_vm0, %v10952_v6, 0.0  ;;  %v7899_v16 = vsel %vm7884_vm0, %v10954_v8, 0.0  ;;  %v7226_v42 = vpop.f32.mrb[3].mxu0  ;;  %v7882_v17 = vpop.f32.mrb[3].mxu1 }
 0x4dd   : > { %v7886_v20 = vrot.slane %v7885_v2, 4  ;;  %v7900_v21 = vrot.slane %v7899_v16, 4  ;;  %v7892_v7 = vsel %vm7884_vm0, %v10953_v10, 0.0  ;;  %v7906_v23 = vsel %vm7884_vm0, %v10955_v11, 0.0 }
 0x4de   : > { %v7893_v19 = vrot.slane %v7892_v7, 4  ;;  %v7907_v14 = vrot.slane %v7906_v23, 4 }
 0x4df   : > { %v7887_v12 = vadd.f32 %v7886_v20, %v7885_v2  ;;  %v7901_v27 = vadd.f32 %v7900_v21, %v7899_v16 }
 0x4e0   : > { %v7894_v13 = vadd.f32 %v7893_v19, %v7892_v7  ;;  %v7908_v49 = vadd.f32 %v7907_v14, %v7906_v23 }
 0x4e1   : > { %v7888_v28 = vrot.slane %v7887_v12, 2  ;;  %v7902_v25 = vrot.slane %v7901_v27, 2 }
 0x4e2   : > { %v7895_v30 = vrot.slane %v7894_v13, 2  ;;  %v7909_v31 = vrot.slane %v7908_v49, 2 }
 0x4e3   : > { %v7889_v22 = vadd.f32 %v7888_v28, %v7887_v12  ;;  %v7903_v18 = vadd.f32 %v7902_v25, %v7901_v27 }
 0x4e4   : > { %v7896_v32 = vadd.f32 %v7895_v30, %v7894_v13  ;;  %v7910_v33 = vadd.f32 %v7909_v31, %v7908_v49 }
 0x4e5   : > { %v7890_v26 = vrot.slane %v7889_v22, 1  ;;  %v7904_v36 = vrot.slane %v7903_v18, 1 }
 0x4e6   : > { %v7897_v24 = vrot.slane %v7896_v32, 1  ;;  %v7911_v37 = vrot.slane %v7910_v33, 1 }
 0x4e7   : > { %v7891_v38 = vadd.f32 %v7890_v26, %v7889_v22  ;;  %v7905_v40 = vadd.f32 %v7904_v36, %v7903_v18 }
 0x4e8   : > { %v7898_v41 = vadd.f32 %v7897_v24, %v7896_v32  ;;  %v7912_v29 = vadd.f32 %v7911_v37, %v7910_v33 }
 0x4e9   : > { %v7914_v43 = vmul.f32 0.25, %v7891_v38  ;;  %v7916_v44 = vmul.f32 0.25, %v7905_v40 }
 0x4ea   : > { %v7915_v35 = vmul.f32 0.25, %v7898_v41  ;;  %v7917_v47 = vmul.f32 0.25, %v7912_v29 }
 0x4eb   : > { %v7918_v34 = vsub.f32 %v10952_v6, %v7914_v43  ;;  %v7920_v48 = vsub.f32 %v10954_v8, %v7916_v44  ;;  %v12663_v44 = vld [vmem:[%s16498_s3 + $0x100] sm:$0xff]  }
 0x4ec   : > { %v7919_v50 = vsub.f32 %v10953_v10, %v7915_v35  ;;  %v7921_v52 = vsub.f32 %v10955_v11, %v7917_v47 }
 0x4ed   : > { %v7922_v53 = vmul.f32 %v7918_v34, %v7918_v34  ;;  %v7924_v39 = vmul.f32 %v7920_v48, %v7920_v48 }
 0x4ee   : > { %v7923_v54 = vmul.f32 %v7919_v50, %v7919_v50  ;;  %v7925_v55 = vmul.f32 %v7921_v52, %v7921_v52 }
 0x4ef   : > { %v7926_v46 = vsel %vm7884_vm0, %v7922_v53, 0.0  ;;  %v7940_v58 = vsel %vm7884_vm0, %v7924_v39, 0.0  ;;  %v12666_v39 = vld [vmem:[%s16498_s3 + $0x1c8] sm:$0xff]  }
 0x4f0   : > { %v7927_v45 = vrot.slane %v7926_v46, 4  ;;  %v7941_v59 = vrot.slane %v7940_v58, 4  ;;  %v7933_v60 = vsel %vm7884_vm0, %v7923_v54, 0.0  ;;  %v7947_v62 = vsel %vm7884_vm0, %v7925_v55, 0.0  ;;  %v12667_v54 = vld [vmem:[%s16498_s3 + $0x108] sm:$0xff]  }
 0x4f1   : > { %v7934_v63 = vrot.slane %v7933_v60, 4  ;;  %v7948_v51 = vrot.slane %v7947_v62, 4  ;;  %v12668_v55 = vld [vmem:[%s16498_s3 + $0x188] sm:$0xff]  }
 0x4f2   : > { %v7928_v0 = vadd.f32 %v7927_v45, %v7926_v46  ;;  %v7942_v1 = vadd.f32 %v7941_v59, %v7940_v58  ;;  %v12669_v46 = vld [vmem:[%s16498_s3 + $0x150] sm:$0xff]  }
 0x4f3   : > { %v7935_v57 = vadd.f32 %v7934_v63, %v7933_v60  ;;  %v7949_v4 = vadd.f32 %v7948_v51, %v7947_v62  ;;  %v12670_v58 = vld [vmem:[%s16498_s3 + $0x1d0] sm:$0xff]   ;;  %v12673_v60 = vld [vmem:[%s16498_s3 + $0x158] sm:$0xff]  }
 0x4f4   : > { %v7929_v56 = vrot.slane %v7928_v0, 2  ;;  %v7943_v5 = vrot.slane %v7942_v1, 2  ;;  %v12671_v45 = vld [vmem:[%s16498_s3 + $0x110] sm:$0xff]   ;;  %v12674_v62 = vld [vmem:[%s16498_s3 + $0x1d8] sm:$0xff]  }
 0x4f5   : > { %v7936_v6 = vrot.slane %v7935_v57, 2  ;;  %v7950_v8 = vrot.slane %v7949_v4, 2  ;;  %v12672_v59 = vld [vmem:[%s16498_s3 + $0x190] sm:$0xff]   ;;  %v12675_v63 = vld [vmem:[%s16498_s3 + $0x118] sm:$0xff]  }
 0x4f6   : > { %v7930_v9 = vadd.f32 %v7929_v56, %v7928_v0  ;;  %v7944_v61 = vadd.f32 %v7943_v5, %v7942_v1  ;;  %v12676_v51 = vld [vmem:[%s16498_s3 + $0x198] sm:$0xff]   ;;  %v12677_v0 = vld [vmem:[%s16498_s3 + $0x160] sm:$0xff]   ;;  %v12681_v56 = vld [vmem:[%s16498_s3 + $0x168] sm:$0xff]  }
 0x4f7   : > { %v7937_v10 = vadd.f32 %v7936_v6, %v7935_v57  ;;  %v7951_v11 = vadd.f32 %v7950_v8, %v7949_v4  ;;  %v12678_v1 = vld [vmem:[%s16498_s3 + $0x1e0] sm:$0xff]   ;;  %v12682_v5 = vld [vmem:[%s16498_s3 + $0x1e8] sm:$0xff]  }
 0x4f8   : > { %v7931_v3 = vrot.slane %v7930_v9, 1  ;;  %v7945_v15 = vrot.slane %v7944_v61, 1  ;;  %v12679_v57 = vld [vmem:[%s16498_s3 + $0x120] sm:$0xff]   ;;  %v12683_v6 = vld [vmem:[%s16498_s3 + $0x128] sm:$0xff]  }
 0x4f9   : > { %v7938_v2 = vrot.slane %v7937_v10, 1  ;;  %v7952_v16 = vrot.slane %v7951_v11, 1  ;;  %v12680_v4 = vld [vmem:[%s16498_s3 + $0x1a0] sm:$0xff]   ;;  %v12684_v8 = vld [vmem:[%s16498_s3 + $0x1a8] sm:$0xff]  }
 0x4fa   : > { %v7932_v42 = vadd.f32 %v7931_v3, %v7930_v9  ;;  %v7946_v17 = vadd.f32 %v7945_v15, %v7944_v61  ;;  %v12685_v9 = vld [vmem:[%s16498_s3 + $0x170] sm:$0xff]   ;;  %v12689_v3 = vld [vmem:[%s16498_s3 + $0x178] sm:$0xff]  }
 0x4fb   : > { %v7939_v20 = vadd.f32 %v7938_v2, %v7937_v10  ;;  %v7953_v21 = vadd.f32 %v7952_v16, %v7951_v11  ;;  %v12686_v61 = vld [vmem:[%s16498_s3 + $0x1f0] sm:$0xff]   ;;  %v12690_v15 = vld [vmem:[%s16498_s3 + $0x1f8] sm:$0xff]  }
 0x4fc   : > { %v7954_v7 = vmul.f32 0.25, %v7932_v42  ;;  %v7956_v23 = vmul.f32 0.25, %v7946_v17  ;;  %v12687_v10 = vld [vmem:[%s16498_s3 + $0x130] sm:$0xff]   ;;  %v12691_v2 = vld [vmem:[%s16498_s3 + $0x138] sm:$0xff]   ;;  %v12693_v42 = vld [vmem:[%s16498_s3 + $0x240] sm:$0xff]  }
 0x4fd   : > { %v7955_v19 = vmul.f32 0.25, %v7939_v20  ;;  %v7957_v14 = vmul.f32 0.25, %v7953_v21  ;;  %v12688_v11 = vld [vmem:[%s16498_s3 + $0x1b0] sm:$0xff]   ;;  %v12692_v16 = vld [vmem:[%s16498_s3 + $0x1b8] sm:$0xff]   ;;  %v12694_v17 = vld [vmem:[%s16498_s3 + $0x2c0] sm:$0xff]  }
 0x4fe   : > { %v7958_v12 = vadd.f32 1e-05, %v7954_v7  ;;  %v7960_v27 = vadd.f32 1e-05, %v7956_v23  ;;  %v12695_v20 = vld [vmem:[%s16498_s3 + $0x200] sm:$0xff]  }
 0x4ff   : > { %v7959_v13 = vadd.f32 1e-05, %v7955_v19  ;;  %v7961_v49 = vadd.f32 1e-05, %v7957_v14  ;;  %v12696_v7 = vld [vmem:[%s16498_s3 + $0x280] sm:$0xff]   ;;  %v12697_v19 = vld [vmem:[%s16498_s3 + $0x248] sm:$0xff]  }
 0x500   : > { %12757 = vrsqrt.f32 %v7958_v12  ;;  %v12698_v12 = vld [vmem:[%s16498_s3 + $0x2c8] sm:$0xff]  }
 0x501   : > { %12759 = vrsqrt.f32 %v7960_v27 }
 0x502   : > { %12761 = vrsqrt.f32 %v7959_v13  ;;  %v12699_v13 = vld [vmem:[%s16498_s3 + $0x208] sm:$0xff]  }
 0x503   : > { %12763 = vrsqrt.f32 %v7961_v49  ;;  %v12700_v49 = vld [vmem:[%s16498_s3 + $0x288] sm:$0xff]  }
 0x50a   : > { %v12758_v28 = vpop.eup %12757 }
 0x50b   : > { %v12760_v25 = vpop.eup %12759  ;;  %v7966_v30 = vmul.f32 %v12758_v28, %v7918_v34  ;;  %v12664_v34 = vld [vmem:[%s16498_s3 + $0x180] sm:$0xff]   ;;  %v12701_v28 = vld [vmem:[%s16498_s3 + $0x250] sm:$0xff]  }
 0x50c   : > { %v12762_v31 = vpop.eup %12761  ;;  %v7968_v22 = vmul.f32 %v12760_v25, %v7920_v48  ;;  %v12702_v25 = vld [vmem:[%s16498_s3 + $0x2d0] sm:$0xff]  }
 0x50d   : > { %v12764_v18 = vpop.eup %12763  ;;  %vm7970_vm1 = vcmp.gt.f32.partialorder %v7966_v30, 0.0  ;;  %v7974_v32 = vmul.f32 0.2, %v7966_v30  ;;  %v7967_v33 = vmul.f32 %v12762_v31, %v7919_v50  ;;  %v12704_v31 = vld [vmem:[%s16498_s3 + $0x290] sm:$0xff]  }
 0x50e   : > { %vm7972_vm2 = vcmp.gt.f32.partialorder %v7968_v22, 0.0  ;;  %v7976_v26 = vmul.f32 0.2, %v7968_v22  ;;  %v7969_v36 = vmul.f32 %v12764_v18, %v7921_v52  ;;  %v12665_v52 = vld [vmem:[%s16498_s3 + $0x148] sm:$0xff]   ;;  %v12706_v18 = vld [vmem:[%s16498_s3 + $0x2d8] sm:$0xff]  }
 0x50f   : > { %vm7971_vm3 = vcmp.gt.f32.partialorder %v7967_v33, 0.0  ;;  %v7975_v24 = vmul.f32 0.2, %v7967_v33  ;;  %v7978_v38 = vsel %vm7970_vm1, %v7966_v30, %v7974_v32  ;;  %v12703_v30 = vld [vmem:[%s16498_s3 + $0x210] sm:$0xff]   ;;  %v12707_v32 = vld [vmem:[%s16498_s3 + $0x218] sm:$0xff]  }
 0x510   : > { %vm7973_vm4 = vcmp.gt.f32.partialorder %v7969_v36, 0.0  ;;  %v7977_v37 = vmul.f32 0.2, %v7969_v36  ;;  %v7980_v41 = vsel %vm7972_vm2, %v7968_v22, %v7976_v26  ;;  %v16174_v47 = vpack.c.bf16 %v7978_v38, %v7978_v38  ;;  %v12705_v22 = vld [vmem:[%s16498_s3 + $0x258] sm:$0xff]   ;;  %v12709_v26 = vld [vmem:[%s16498_s3 + $0x260] sm:$0xff]   ;;  %v12713_v38 = vld [vmem:[%s16498_s3 + $0x268] sm:$0xff]  }
 0x511   : > { %v7979_v40 = vsel %vm7971_vm3, %v7967_v33, %v7975_v24  ;;  %v16180_v48 = vpack.c.bf16 %v7980_v41, %v7980_v41  ;;  %v12708_v33 = vld [vmem:[%s16498_s3 + $0x298] sm:$0xff]   ;;  %v12711_v24 = vld [vmem:[%s16498_s3 + $0x220] sm:$0xff]   ;;  %v12715_v41 = vld [vmem:[%s16498_s3 + $0x228] sm:$0xff]  }
 0x512   : > { %v16167_v29 = vpack.c.bf16 %v7979_v40, %v7979_v40  ;;  %v7981_v43 = vsel %vm7973_vm4, %v7969_v36, %v7977_v37  ;;  %v8390_v21 = vshrl.u32 %v16174_v47, 16  ;;  %v12710_v36 = vld [vmem:[%s16498_s3 + $0x2e0] sm:$0xff]   ;;  %v12714_v40 = vld [vmem:[%s16498_s3 + $0x2e8] sm:$0xff]  }
 0x513   : > { %v16172_v35 = vpack.c.bf16 %v7981_v43, %v7981_v43  ;;  %v8396_v23 = vshrl.u32 %v16180_v48, 16  ;;  %v12712_v37 = vld [vmem:[%s16498_s3 + $0x2a0] sm:$0xff]   ;;  %v12716_v43 = vld [vmem:[%s16498_s3 + $0x2a8] sm:$0xff]  }
 0x514   : > { %8275 = vmatprep.mubr.bf16.mxu0 %v16167_v29  ;;  %v8393_v50 = vshrl.u32 %v16167_v29, 16  ;;  %v8748_v14 = vrot.slane %v16167_v29, 1  ;;  %v12732_v29 = vld [vmem:[%s16498_s3 + $0x388] sm:$0xff]  }
 0x515   : > { %8315 = vmatprep.mubr.bf16.mxu1 %v16172_v35  ;;  %8276 = vmatmul.mubr.bf16.vlgmr.msra.gmra.mrb[4].mxu0 %v16174_v47  ;;  %v8399_v53 = vshrl.u32 %v16172_v35, 16  ;;  %v8750_v27 = vrot.slane %v16172_v35, 1  ;;  %v12734_v35 = vld [vmem:[%s16498_s3 + $0x3d0] sm:$0xff]  }
 0x516   : > { %8316 = vmatmul.mubr.bf16.vlgmr.msra.gmra.mrb[4].mxu1 %v16180_v48  ;;  %10821 = vmatpush3.bf16.msra.mxu0 %v12663_v44  ;;  %v12717_v44 = vld [vmem:[%s16498_s3 + $0x270] sm:$0xff]  }
 0x517   : > { %10843 = vmatpush3.bf16.msra.mxu1 %v12664_v34  ;;  %8629 = vmatprep.mubr.bf16.mxu0 %v8393_v50  ;;  %v12718_v34 = vld [vmem:[%s16498_s3 + $0x2f0] sm:$0xff]  }
 0x518   : > { %8669 = vmatprep.mubr.bf16.mxu1 %v8399_v53  ;;  %10822 = vmatprep.subr.bf16.mxu0 %v12665_v52  ;;  %v12719_v52 = vld [vmem:[%s16498_s3 + $0x230] sm:$0xff]  }
 0x519   : > { %10844 = vmatprep.subr.bf16.mxu1 %v12666_v39  ;;  %v12720_v39 = vld [vmem:[%s16498_s3 + $0x2b0] sm:$0xff]  }
 0x51a   : > { %10823 = vmatpush3.bf16.msra.mxu0 %v12667_v54  ;;  %v12721_v54 = vld [vmem:[%s16498_s3 + $0x278] sm:$0xff]  }
 0x51b   : > { %10845 = vmatpush3.bf16.msra.mxu1 %v12668_v55  ;;  %10824 = vmatprep.subr.bf16.mxu0 %v12669_v46  ;;  %v12722_v55 = vld [vmem:[%s16498_s3 + $0x2f8] sm:$0xff]  }
 0x51c   : > { %10846 = vmatprep.subr.bf16.mxu1 %v12670_v58  ;;  %v12723_v46 = vld [vmem:[%s16498_s3 + $0x238] sm:$0xff]  }
 0x51d   : > { %v12724_v58 = vld [vmem:[%s16498_s3 + $0x2b8] sm:$0xff]  }
 0x51e   : > { %10825 = vmatpush3.bf16.msra.mxu0 %v12671_v45  ;;  %v12725_v45 = vld [vmem:[%s16498_s3 + $0x340] sm:$0xff]  }
 0x51f   : > { %10847 = vmatpush3.bf16.msra.mxu1 %v12672_v59  ;;  %10826 = vmatprep.subr.bf16.mxu0 %v12673_v60  ;;  %v12726_v59 = vld [vmem:[%s16498_s3 + $0x3c0] sm:$0xff]  }
 0x520   : > { %10848 = vmatprep.subr.bf16.mxu1 %v12674_v62  ;;  %v12727_v60 = vld [vmem:[%s16498_s3 + $0x300] sm:$0xff]   ;;  %v8747_v62 = vrot.slane %v16174_v47, 1 }
 0x522   : > { %10827 = vmatpush3.bf16.msra.mxu0 %v12675_v63  ;;  %v12728_v63 = vld [vmem:[%s16498_s3 + $0x380] sm:$0xff]  }
 0x523   : > { %10849 = vmatpush3.bf16.msra.mxu1 %v12676_v51  ;;  %10828 = vmatprep.subr.bf16.mxu0 %v12677_v0  ;;  %v8749_v51 = vrot.slane %v16180_v48, 1  ;;  %v12729_v0 = vld [vmem:[%s16498_s3 + $0x348] sm:$0xff]   ;;  %v7986_v48 = vld [vmem:[%s16499_s4] sm:$0x1] }
 0x524   : > { %10850 = vmatprep.subr.bf16.mxu1 %v12678_v1  ;;  %v9094_v1 = vrot.slane %v8393_v50, 1  ;;  %v12733_v50 = vld [vmem:[%s16498_s3 + $0x350] sm:$0xff]  }
 0x526   : > { %10829 = vmatpush3.bf16.msra.mxu0 %v12679_v57  ;;  %v12730_v57 = vld [vmem:[%s16498_s3 + $0x3c8] sm:$0xff]  }
 0x527   : > { %10851 = vmatpush3.bf16.msra.mxu1 %v12680_v4  ;;  %10830 = vmatprep.subr.bf16.mxu0 %v12681_v56  ;;  %v9096_v4 = vrot.slane %v8399_v53, 1  ;;  %v12731_v56 = vld [vmem:[%s16498_s3 + $0x308] sm:$0xff]   ;;  %v12735_v53 = vld [vmem:[%s16498_s3 + $0x310] sm:$0xff]  }
 0x528   : > { %10852 = vmatprep.subr.bf16.mxu1 %v12682_v5  ;;  %v12736_v5 = vld [vmem:[%s16498_s3 + $0x390] sm:$0xff]  }
 0x52a   : > { %10831 = vmatpush3.bf16.msra.mxu0 %v12683_v6  ;;  %v12737_v6 = vld [vmem:[%s16498_s3 + $0x358] sm:$0xff]  }
 0x52b   : > { %10853 = vmatpush3.bf16.msra.mxu1 %v12684_v8  ;;  %10832 = vmatprep.subr.bf16.mxu0 %v12685_v9  ;;  %v12738_v8 = vld [vmem:[%s16498_s3 + $0x3d8] sm:$0xff]  }
 0x52c   : > { %10854 = vmatprep.subr.bf16.mxu1 %v12686_v61  ;;  %v12739_v9 = vld [vmem:[%s16498_s3 + $0x318] sm:$0xff]  }
 0x52d   : > { %v12740_v61 = vld [vmem:[%s16498_s3 + $0x398] sm:$0xff]  }
 0x52e   : > { %10833 = vmatpush3.bf16.msra.mxu0 %v12687_v10  ;;  %v12741_v10 = vld [vmem:[%s16498_s3 + $0x360] sm:$0xff]  }
 0x52f   : > { %10855 = vmatpush3.bf16.msra.mxu1 %v12688_v11  ;;  %10834 = vmatprep.subr.bf16.mxu0 %v12689_v3  ;;  %v12742_v11 = vld [vmem:[%s16498_s3 + $0x3e0] sm:$0xff]  }
 0x530   : > { %10856 = vmatprep.subr.bf16.mxu1 %v12690_v15  ;;  %v12743_v3 = vld [vmem:[%s16498_s3 + $0x320] sm:$0xff]  }
 0x531   : > { %v12744_v15 = vld [vmem:[%s16498_s3 + $0x3a0] sm:$0xff]  }
 0x532   : > { %10835 = vmatpush3.bf16.msra.mxu0 %v12691_v2  ;;  %v12745_v2 = vld [vmem:[%s16498_s3 + $0x368] sm:$0xff]  }
 0x533   : > { %10857 = vmatpush3.bf16.msra.mxu1 %v12692_v16  ;;  %10864 = vmatprep.subr.bf16.mxu0 %v12693_v42  ;;  %v12746_v16 = vld [vmem:[%s16498_s3 + $0x3e8] sm:$0xff]  }
 0x534   : > { %10886 = vmatprep.subr.bf16.mxu1 %v12694_v17  ;;  %v12747_v42 = vld [vmem:[%s16498_s3 + $0x328] sm:$0xff]  }
 0x535   : > { %8630 = vmatmul.mubr.bf16.vlgmr.msra.gmra.mrb[8].mxu0 %v8390_v21  ;;  %v12748_v17 = vld [vmem:[%s16498_s3 + $0x3a8] sm:$0xff]  }
 0x536   : > { %8670 = vmatmul.mubr.bf16.vlgmr.msra.gmra.mrb[8].mxu1 %v8396_v23  ;;  %10865 = vmatpush3.bf16.msra.mxu0 %v12695_v20  ;;  %v12749_v20 = vld [vmem:[%s16498_s3 + $0x370] sm:$0xff]  }
 0x537   : > { %8979 = vmatprep.mubr.bf16.mxu0 %v8748_v14  ;;  %10887 = vmatpush3.bf16.msra.mxu1 %v12696_v7  ;;  %v12750_v7 = vld [vmem:[%s16498_s3 + $0x3f0] sm:$0xff]  }
 0x538   : > { %9019 = vmatprep.mubr.bf16.mxu1 %v8750_v27  ;;  %10866 = vmatprep.subr.bf16.mxu0 %v12697_v19  ;;  %v12751_v19 = vld [vmem:[%s16498_s3 + $0x330] sm:$0xff]   ;;  %v12754_v27 = vld [vmem:[%s16498_s3 + $0x3f8] sm:$0xff]  }
 0x539   : > { %10888 = vmatprep.subr.bf16.mxu1 %v12698_v12  ;;  %v12752_v14 = vld [vmem:[%s16498_s3 + $0x3b0] sm:$0xff]   ;;  %v12753_v12 = vld [vmem:[%s16498_s3 + $0x378] sm:$0xff]  }
 0x53a   : > { %10867 = vmatpush3.bf16.msra.mxu0 %v12699_v13  ;;  %v12755_v13 = vld [vmem:[%s16498_s3 + $0x338] sm:$0xff]  }
 0x53b   : > { %10889 = vmatpush3.bf16.msra.mxu1 %v12700_v49  ;;  %10868 = vmatprep.subr.bf16.mxu0 %v12701_v28  ;;  %v12756_v49 = vld [vmem:[%s16498_s3 + $0x3b8] sm:$0xff]   ;;  %v9093_v28 = vrot.slane %v8390_v21, 1 }
 0x53c   : > { %10890 = vmatprep.subr.bf16.mxu1 %v12702_v25  ;;  %v9095_v25 = vrot.slane %v8396_v23, 1 }
 0x53e   : > { %10869 = vmatpush3.bf16.msra.mxu0 %v12703_v30 }
 0x53f   : > { %10891 = vmatpush3.bf16.msra.mxu1 %v12704_v31  ;;  %10870 = vmatprep.subr.bf16.mxu0 %v12705_v22 }
 0x540   : > { %10892 = vmatprep.subr.bf16.mxu1 %v12706_v18 }
 0x542   : > { %10871 = vmatpush3.bf16.msra.mxu0 %v12707_v32 }
 0x543   : > { %10893 = vmatpush3.bf16.msra.mxu1 %v12708_v33  ;;  %10872 = vmatprep.subr.bf16.mxu0 %v12709_v26 }
 0x544   : > { %10894 = vmatprep.subr.bf16.mxu1 %v12710_v36 }
 0x546   : > { %10873 = vmatpush3.bf16.msra.mxu0 %v12711_v24 }
 0x547   : > { %10895 = vmatpush3.bf16.msra.mxu1 %v12712_v37  ;;  %10874 = vmatprep.subr.bf16.mxu0 %v12713_v38 }
 0x548   : > { %10896 = vmatprep.subr.bf16.mxu1 %v12714_v40 }
 0x54a   : > { %10875 = vmatpush3.bf16.msra.mxu0 %v12715_v41 }
 0x54b   : > { %10897 = vmatpush3.bf16.msra.mxu1 %v12716_v43  ;;  %10876 = vmatprep.subr.bf16.mxu0 %v12717_v44 }
 0x54c   : > { %10898 = vmatprep.subr.bf16.mxu1 %v12718_v34 }
 0x54e   : > { %10877 = vmatpush3.bf16.msra.mxu0 %v12719_v52 }
 0x54f   : > { %10899 = vmatpush3.bf16.msra.mxu1 %v12720_v39  ;;  %10878 = vmatprep.subr.bf16.mxu0 %v12721_v54 }
 0x550   : > { %10900 = vmatprep.subr.bf16.mxu1 %v12722_v55 }
 0x552   : > { %10879 = vmatpush3.bf16.msra.mxu0 %v12723_v46 }
 0x553   : > { %10901 = vmatpush3.bf16.msra.mxu1 %v12724_v58  ;;  %10908 = vmatprep.subr.bf16.mxu0 %v12725_v45 }
 0x554   : > { %10930 = vmatprep.subr.bf16.mxu1 %v12726_v59 }
 0x555   : > { %8980 = vmatmul.mubr.bf16.vlgmr.msra.gmra.mrb[12].mxu0 %v8747_v62 }
 0x556   : > { %9020 = vmatmul.mubr.bf16.vlgmr.msra.gmra.mrb[12].mxu1 %v8749_v51  ;;  %10909 = vmatpush3.bf16.msra.mxu0 %v12727_v60 }
 0x557   : > { %9325 = vmatprep.mubr.bf16.mxu0 %v9094_v1  ;;  %10931 = vmatpush3.bf16.msra.mxu1 %v12728_v63 }
 0x558   : > { %9365 = vmatprep.mubr.bf16.mxu1 %v9096_v4  ;;  %10910 = vmatprep.subr.bf16.mxu0 %v12729_v0 }
 0x559   : > { %10932 = vmatprep.subr.bf16.mxu1 %v12730_v57 }
 0x55a   : > { %10911 = vmatpush3.bf16.msra.mxu0 %v12731_v56 }
 0x55b   : > { %10933 = vmatpush3.bf16.msra.mxu1 %v12732_v29  ;;  %10912 = vmatprep.subr.bf16.mxu0 %v12733_v50 }
 0x55c   : > { %10934 = vmatprep.subr.bf16.mxu1 %v12734_v35 }
 0x55e   : > { %10913 = vmatpush3.bf16.msra.mxu0 %v12735_v53 }
 0x55f   : > { %10935 = vmatpush3.bf16.msra.mxu1 %v12736_v5  ;;  %10914 = vmatprep.subr.bf16.mxu0 %v12737_v6 }
 0x560   : > { %10936 = vmatprep.subr.bf16.mxu1 %v12738_v8 }
 0x562   : > { %10915 = vmatpush3.bf16.msra.mxu0 %v12739_v9 }
 0x563   : > { %10937 = vmatpush3.bf16.msra.mxu1 %v12740_v61  ;;  %10916 = vmatprep.subr.bf16.mxu0 %v12741_v10 }
 0x564   : > { %10938 = vmatprep.subr.bf16.mxu1 %v12742_v11 }
 0x566   : > { %10917 = vmatpush3.bf16.msra.mxu0 %v12743_v3 }
 0x567   : > { %10939 = vmatpush3.bf16.msra.mxu1 %v12744_v15  ;;  %10918 = vmatprep.subr.bf16.mxu0 %v12745_v2 }
 0x568   : > { %10940 = vmatprep.subr.bf16.mxu1 %v12746_v16 }
 0x56a   : > { %10919 = vmatpush3.bf16.msra.mxu0 %v12747_v42 }
 0x56b   : > { %10941 = vmatpush3.bf16.msra.mxu1 %v12748_v17  ;;  %10920 = vmatprep.subr.bf16.mxu0 %v12749_v20 }
 0x56c   : > { %10942 = vmatprep.subr.bf16.mxu1 %v12750_v7 }
 0x56e   : > { %10921 = vmatpush3.bf16.msra.mxu0 %v12751_v19 }
 0x56f   : > { %10943 = vmatpush3.bf16.msra.mxu1 %v12752_v14  ;;  %10922 = vmatprep.subr.bf16.mxu0 %v12753_v12 }
 0x570   : > { %10944 = vmatprep.subr.bf16.mxu1 %v12754_v27 }
 0x572   : > { %10923 = vmatpush3.bf16.msra.mxu0 %v12755_v13 }
 0x573   : > { %10945 = vmatpush3.bf16.msra.mxu1 %v12756_v49 }
 0x575   : > { %9326 = vmatmul.mubr.bf16.vlgmr.msra.gmra.mrb[16].mxu0 %v9093_v28 }
 0x576   : > { %9366 = vmatmul.mubr.bf16.vlgmr.msra.gmra.mrb[16].mxu1 %v9095_v25 }
 0x5e8   : > { %v10792_v30 = vpop.f32.mrb[4].mxu0 }
 0x5e9   : > { %v10814_v31 = vpop.f32.mrb[4].mxu1  ;;  %v10793_v22 = vpop.f32.mrb[5].mxu0 }
 0x5ea   : > { %v10794_v18 = vadd.f32 %v10793_v22, %v10792_v30  ;;  %v10815_v32 = vpop.f32.mrb[5].mxu1  ;;  %v10795_v33 = vpop.f32.mrb[6].mxu0 }
 0x5eb   : > { %v10816_v26 = vadd.f32 %v10815_v32, %v10814_v31  ;;  %v10817_v36 = vpop.f32.mrb[6].mxu1  ;;  %v10796_v24 = vpop.f32.mrb[7].mxu0 }
 0x5ec   : > { %v10818_v37 = vpop.f32.mrb[7].mxu1 }
 0x5ed   : > { %v8318_v38 = vadd.f32 %v10816_v26, %v10794_v18 }
 0x5ef   : > { %v8323_v54 = vadd.f32 %v8318_v38, %v7986_v48 }
 0x608   : > { %v10836_v40 = vpop.f32.mrb[8].mxu0 }
 0x609   : > { %v10858_v41 = vpop.f32.mrb[8].mxu1  ;;  %v10837_v47 = vpop.f32.mrb[9].mxu0 }
 0x60a   : > { %v10838_v21 = vadd.f32 %v10837_v47, %v10836_v40  ;;  %v10859_v23 = vpop.f32.mrb[9].mxu1  ;;  %v10839_v43 = vpop.f32.mrb[10].mxu0 }
 0x60b   : > { %v10860_v44 = vadd.f32 %v10859_v23, %v10858_v41  ;;  %v10861_v34 = vpop.f32.mrb[10].mxu1  ;;  %v10840_v52 = vpop.f32.mrb[11].mxu0 }
 0x60c   : > { %v10862_v39 = vpop.f32.mrb[11].mxu1 }
 0x60d   : > { %v8672_v55 = vadd.f32 %v10860_v44, %v10838_v21 }
 0x60f   : > { %v8677_v46 = vadd.f32 %v8672_v55, %v8323_v54 }
 0x628   : > { %v10880_v58 = vpop.f32.mrb[12].mxu0 }
 0x629   : > { %v10902_v45 = vpop.f32.mrb[12].mxu1  ;;  %v10881_v59 = vpop.f32.mrb[13].mxu0 }
 0x62a   : > { %v10882_v60 = vadd.f32 %v10881_v59, %v10880_v58  ;;  %v10903_v62 = vpop.f32.mrb[13].mxu1  ;;  %v10883_v63 = vpop.f32.mrb[14].mxu0 }
 0x62b   : > { %v10904_v51 = vadd.f32 %v10903_v62, %v10902_v45  ;;  %v10905_v0 = vpop.f32.mrb[14].mxu1  ;;  %v10884_v1 = vpop.f32.mrb[15].mxu0 }
 0x62c   : > { %v10906_v57 = vpop.f32.mrb[15].mxu1 }
 0x62d   : > { %v9022_v4 = vadd.f32 %v10904_v51, %v10882_v60 }
 0x62f   : > { %v9027_v56 = vadd.f32 %v9022_v4, %v8677_v46 }
 0x648   : > { %v10924_v29 = vpop.f32.mrb[16].mxu0 }
 0x649   : > { %v10946_v50 = vpop.f32.mrb[16].mxu1  ;;  %v10925_v35 = vpop.f32.mrb[17].mxu0 }
 0x64a   : > { %v10926_v53 = vadd.f32 %v10925_v35, %v10924_v29  ;;  %v10947_v5 = vpop.f32.mrb[17].mxu1  ;;  %v10927_v6 = vpop.f32.mrb[18].mxu0 }
 0x64b   : > { %v10948_v8 = vadd.f32 %v10947_v5, %v10946_v50  ;;  %v10949_v9 = vpop.f32.mrb[18].mxu1  ;;  %v10928_v61 = vpop.f32.mrb[19].mxu0 }
 0x64c   : > { %v10950_v10 = vpop.f32.mrb[19].mxu1 }
 0x64d   : > { %v9368_v11 = vadd.f32 %v10948_v8, %v10926_v53 }
 0x64f   : > { %v9373_v3 = vadd.f32 %v9368_v11, %v9027_v56 }
 0x651   : > { %9374 = vst [vmem:[%s220_s16] sm:$0x1] %v9373_v3 }
 0x652 PF: > { %s15_s18 = sadd.s32 1, %s12771_s18  }
 0x653   : > { %p12_p4 = scmp.ge.s32.totalorder %s15_s18, 4  }
 0x655   :  { %14 = sbr.rel (!%p12_p4) target bundleno = 1 (0x1), region = 73 }

</bundles_post_ra>
